<compile_context>
chip_gen: v5e
topology: v5e:2x2
jax: 0.10.0
libtpu: 0.0.40
codegen_flags: <defaults>
</compile_context>

<pallas_src>
import functools
import math

import jax
import jax.numpy as jnp
from jax.experimental import pallas as pl
from jax.experimental.pallas import tpu as pltpu

BETA = 0.5
THRESHOLD = 1.0
LANE = 128


def _round_up(x, m):
    return ((x + m - 1) // m) * m


def _snn_kernel(x_ref, w1t_ref, b1_ref, w2t_ref, b2_ref, out_ref,
                m1_c, m2_c, spk1_scr, *, tb, b, ni, nhp, nop):
    blk = pl.program_id(0)
    rows = tb * b

    # Reset membrane potentials at the first time block (lif.reset_mem()).
    @pl.when(blk == 0)
    def _():
        m1_c[...] = jnp.zeros_like(m1_c)
        m2_c[...] = jnp.zeros_like(m2_c)

    # --- layer-1 synaptic currents for the whole block (time-independent).
    x = x_ref[...]                                              # (rows, ni)
    if ni <= 4:
        # Tiny K: VPU broadcast-FMAs instead of a degenerate (rows, 2)@(2, NH)
        # MXU matmul (avoids MXU push/pop latency; matters most on v5e).
        syn1_all = x[:, 0:1] * w1t_ref[0:1, :] + b1_ref[...]    # (rows, nhp)
        for k in range(1, ni):
            syn1_all = syn1_all + x[:, k:k + 1] * w1t_ref[k:k + 1, :]
    else:
        syn1_all = (jnp.dot(x, w1t_ref[...], preferred_element_type=jnp.float32)
                    + b1_ref[...])

    # --- sequential LIF layer 1 (pure VPU).  Spikes staged in VMEM scratch so
    # the layer-2 matmul never reads back an output block; mem1 goes straight
    # into its lane-dense, 128-aligned output column slab.
    m1 = m1_c[...]                                              # (b, nhp)
    for s in range(tb):
        lo = s * b
        syn1 = syn1_all[lo:lo + b, :]
        r1 = (m1 > THRESHOLD).astype(jnp.float32)
        m1 = BETA * m1 + syn1 - r1 * THRESHOLD
        s1 = (m1 > THRESHOLD).astype(jnp.float32)
        spk1_scr[lo:lo + b, :] = s1
        out_ref[lo:lo + b, nhp:2 * nhp] = m1
    m1_c[...] = m1

    # Single slab store of layer-1 spikes; same value feeds the layer-2 matmul.
    spk1_all = spk1_scr[...]
    out_ref[:, 0:nhp] = spk1_all

    # --- layer-2 synaptic currents: one MXU matmul over the block of spikes.
    syn2_all = (jnp.dot(spk1_all, w2t_ref[...], preferred_element_type=jnp.float32)
                + b2_ref[...])                                  # (rows, nop)

    # --- sequential LIF layer 2.
    c0 = 2 * nhp
    m2 = m2_c[...]                                              # (b, nop)
    for s in range(tb):
        lo = s * b
        syn2 = syn2_all[lo:lo + b, :]
        r2 = (m2 > THRESHOLD).astype(jnp.float32)
        m2 = BETA * m2 + syn2 - r2 * THRESHOLD
        s2 = (m2 > THRESHOLD).astype(jnp.float32)
        out_ref[lo:lo + b, c0:c0 + nop] = s2
        out_ref[lo:lo + b, c0 + nop:c0 + 2 * nop] = m2
    m2_c[...] = m2


def _block_vmem_bytes(tb, b, ni, nhp, nop, w_out):
    rows = tb * b
    return 4 * (2 * rows * ni            # x block (double-buffered)
                + 2 * rows * w_out       # packed output block (double-buffered)
                + rows * nhp             # layer-1 spike staging scratch
                + b * (nhp + nop)        # membrane carries
                + 2 * (ni * nhp + nhp + nhp * nop + nop))   # weights + biases


@functools.partial(jax.jit, static_argnames=("max_time_block",))
def snn_forward(x, w1, b1, w2, b2, max_time_block=256):
    """x: (T, B, num_inputs); w1: (num_hidden, num_inputs); w2: (num_outputs, num_hidden)."""
    T, B, NI = x.shape
    NH = w1.shape[0]
    NO = w2.shape[0]
    NHP = _round_up(NH, LANE)
    NOP = _round_up(NO, LANE)
    W = 2 * NHP + 2 * NOP

    # Largest time block under a conservative VMEM budget (fits the default
    # scoped limit on v5e/v6e and v7x's 64 MiB physical VMEM), capped so the
    # in-kernel unrolled scan stays a reasonable size.
    VMEM_LIMIT = 32 * 1024 * 1024
    budget = 24 * 1024 * 1024
    TB = min(T, int(max_time_block))
    while TB > 1 and _block_vmem_bytes(TB, B, NI, NHP, NOP, W) > budget:
        TB -= 1
    if TB < T:
        step = 8 // math.gcd(B, 8)       # keep (TB*B) % 8 == 0 when tiling
        TB = max(step, (TB // step) * step)
    n_blocks = -(-T // TB)
    TP = n_blocks * TB
    assert TB == T or (TB * B) % 8 == 0

    # Pad the time axis with trailing zeros; padded steps only affect rows that
    # are sliced off (the recurrence runs forward, so they never feed real steps).
    if TP != T:
        x = jnp.concatenate([x, jnp.zeros((TP - T, B, NI), x.dtype)], axis=0)

    x2 = x.reshape(TP * B, NI).astype(jnp.float32)    # time-major flatten (contiguous)

    # Lane-padded weights/biases (padded features stay exactly zero end-to-end).
    w1t = jnp.zeros((NI, NHP), jnp.float32).at[:, :NH].set(w1.T.astype(jnp.float32))
    b1p = jnp.zeros((1, NHP), jnp.float32).at[0, :NH].set(b1.astype(jnp.float32))
    w2t = jnp.zeros((NHP, NOP), jnp.float32).at[:NH, :NO].set(w2.T.astype(jnp.float32))
    b2p = jnp.zeros((1, NOP), jnp.float32).at[0, :NO].set(b2.astype(jnp.float32))

    grid_spec = pltpu.PrefetchScalarGridSpec(
        num_scalar_prefetch=0,
        grid=(n_blocks,),
        in_specs=[
            pl.BlockSpec((TB * B, NI), lambda t: (t, 0)),   # x time-block
            pl.BlockSpec((NI, NHP), lambda t: (0, 0)),      # w1^T (resident)
            pl.BlockSpec((1, NHP), lambda t: (0, 0)),       # b1
            pl.BlockSpec((NHP, NOP), lambda t: (0, 0)),     # w2^T (resident)
            pl.BlockSpec((1, NOP), lambda t: (0, 0)),       # b2
        ],
        out_specs=pl.BlockSpec((TB * B, W), lambda t: (t, 0)),  # packed outputs
        scratch_shapes=[
            pltpu.VMEM((B, NHP), jnp.float32),        # mem1 carry across blocks
            pltpu.VMEM((B, NOP), jnp.float32),        # mem2 carry across blocks
            pltpu.VMEM((TB * B, NHP), jnp.float32),   # layer-1 spike staging
        ],
    )

    flops = 2 * TP * B * (NI * NHP + NHP * NOP)
    bytes_accessed = 4 * (TP * B * NI + TP * B * W
                          + NI * NHP + NHP + NHP * NOP + NOP)

    out = pl.pallas_call(
        functools.partial(_snn_kernel, tb=TB, b=B, ni=NI, nhp=NHP, nop=NOP),
        out_shape=jax.ShapeDtypeStruct((TP * B, W), jnp.float32),
        grid_spec=grid_spec,
        compiler_params=pltpu.CompilerParams(
            dimension_semantics=("arbitrary",),       # carried time scan
            vmem_limit_bytes=VMEM_LIMIT,
        ),
        cost_estimate=pl.CostEstimate(flops=flops, transcendentals=0,
                                      bytes_accessed=bytes_accessed),
    )(x2, w1t, b1p, w2t, b2p)

    out = out.reshape(TP, B, W)[:T]
    spk1 = out[..., 0:NH]
    mem1 = out[..., NHP:NHP + NH]
    spk2 = out[..., 2 * NHP:2 * NHP + NO]
    mem2 = out[..., 2 * NHP + NOP:2 * NHP + NOP + NO]
    return spk1, mem1, spk2, mem2


def snn_forward_ref(x, w1, b1, w2, b2):
    """Pure-JAX reference (lax.scan) mirroring the PyTorch/snntorch forward."""
    B = x.shape[1]
    NH, NO = w1.shape[0], w2.shape[0]

    def step(carry, x_t):
        m1, m2 = carry
        syn1 = x_t @ w1.T + b1
        r1 = (m1 > THRESHOLD).astype(jnp.float32)
        m1n = BETA * m1 + syn1 - r1 * THRESHOLD
        s1 = (m1n > THRESHOLD).astype(jnp.float32)
        syn2 = s1 @ w2.T + b2
        r2 = (m2 > THRESHOLD).astype(jnp.float32)
        m2n = BETA * m2 + syn2 - r2 * THRESHOLD
        s2 = (m2n > THRESHOLD).astype(jnp.float32)
        return (m1n, m2n), (s1, m1n, s2, m2n)

    init = (jnp.zeros((B, NH), jnp.float32), jnp.zeros((B, NO), jnp.float32))
    _, (s1, m1, s2, m2) = jax.lax.scan(step, init, x)
    return s1, m1, s2, m2


if __name__ == "__main__":
    # Small shapes consistent with the module defaults (num_inputs=2, num_hidden=10,
    # num_outputs=4); T=64 time steps, batch=2.
    T, B, NI, NH, NO = 64, 2, 2, 10, 4

    key = jax.random.PRNGKey(0)
    kx, kw1, kb1, kw2, kb2 = jax.random.split(key, 5)

    # Deterministic parameter init mimicking nn.Linear (uniform +/- 1/sqrt(fan_in)).
    x = jax.random.normal(kx, (T, B, NI), dtype=jnp.float32) * 2.0
    lim1 = 1.0 / (NI ** 0.5)
    w1 = jax.random.uniform(kw1, (NH, NI), jnp.float32, -lim1, lim1)
    b1 = jax.random.uniform(kb1, (NH,), jnp.float32, -lim1, lim1)
    lim2 = 1.0 / (NH ** 0.5)
    w2 = jax.random.uniform(kw2, (NO, NH), jnp.float32, -lim2, lim2)
    b2 = jax.random.uniform(kb2, (NO,), jnp.float32, -lim2, lim2)

    spk1, mem1, spk2, mem2 = jax.block_until_ready(snn_forward(x, w1, b1, w2, b2))

    # Correctness check vs. pure-JAX reference.
    r_spk1, r_mem1, r_spk2, r_mem2 = snn_forward_ref(x, w1, b1, w2, b2)
    assert spk1.shape == (T, B, NH) and spk2.shape == (T, B, NO)
    assert jnp.allclose(mem1, r_mem1, atol=1e-4)
    assert jnp.allclose(mem2, r_mem2, atol=1e-4)
    assert jnp.allclose(spk1, r_spk1, atol=1e-5)
    assert jnp.allclose(spk2, r_spk2, atol=1e-5)

    # Side-effect flag from the PyTorch forward (self.rescale) — computed host-side.
    rescale = bool(spk2.sum() == 0)
    del rescale

    print("KERNEL_OK")
</pallas_src>

<mosaic_0001>
module attributes {stable_mosaic.version = 11 : i64} {
  func.func @_snn_kernel(%arg0: i32, %arg1: memref<128x2xf32, #tpu.memory_space<vmem>>, %arg2: memref<2x128xf32, #tpu.memory_space<vmem>>, %arg3: memref<1x128xf32, #tpu.memory_space<vmem>>, %arg4: memref<128x128xf32, #tpu.memory_space<vmem>>, %arg5: memref<1x128xf32, #tpu.memory_space<vmem>>, %arg6: memref<128x512xf32, #tpu.memory_space<vmem>>, %arg7: memref<2x128xf32, #tpu.memory_space<vmem>>, %arg8: memref<2x128xf32, #tpu.memory_space<vmem>>, %arg9: memref<128x128xf32, #tpu.memory_space<vmem>>) attributes {dimension_semantics = [#tpu.dimension_semantics<arbitrary>], iteration_bounds = array<i64: 1>, scalar_prefetch = 0 : i64, scratch_operands = 3 : i64, tpu.core_type = #tpu.core_type<tc>, window_params = [{transform_indices = @transform_0, window_bounds = array<i64: 128, 2>}, {pipeline_mode = #tpu.pipeline_mode<synchronous>, transform_indices = @transform_1, window_bounds = array<i64: 2, 128>}, {pipeline_mode = #tpu.pipeline_mode<synchronous>, transform_indices = @transform_2, window_bounds = array<i64: 1, 128>}, {pipeline_mode = #tpu.pipeline_mode<synchronous>, transform_indices = @transform_3, window_bounds = array<i64: 128, 128>}, {pipeline_mode = #tpu.pipeline_mode<synchronous>, transform_indices = @transform_4, window_bounds = array<i64: 1, 128>}, {transform_indices = @transform_5, window_bounds = array<i64: 128, 512>}]} {
    %c0_i32 = arith.constant 0 : i32
    %0 = arith.cmpi eq, %arg0, %c0_i32 : i32
    %1 = arith.extui %0 : i1 to i32
    %c0_i32_0 = arith.constant 0 : i32
    %2 = arith.cmpi ne, %1, %c0_i32_0 : i32
    scf.if %2 {
      %cst_981 = arith.constant 0.000000e+00 : f32
      %2205 = vector.broadcast %cst_981 : f32 to vector<2x128xf32>
      %c0_982 = arith.constant 0 : index
      %c0_983 = arith.constant 0 : index
      %2206 = vector.load %arg7[%c0_982, %c0_983] : memref<2x128xf32, #tpu.memory_space<vmem>>, vector<2x128xf32>
      tpu.vector_store %arg7[%c0_982, %c0_983], %2205 {strides = array<i32>} : memref<2x128xf32, #tpu.memory_space<vmem>>, vector<2x128xf32>,
      %cst_984 = arith.constant 0.000000e+00 : f32
      %2207 = vector.broadcast %cst_984 : f32 to vector<2x128xf32>
      %c0_985 = arith.constant 0 : index
      %c0_986 = arith.constant 0 : index
      %2208 = vector.load %arg8[%c0_985, %c0_986] : memref<2x128xf32, #tpu.memory_space<vmem>>, vector<2x128xf32>
      tpu.vector_store %arg8[%c0_985, %c0_986], %2207 {strides = array<i32>} : memref<2x128xf32, #tpu.memory_space<vmem>>, vector<2x128xf32>,
    } else {
    }
    %c0 = arith.constant 0 : index
    %c0_1 = arith.constant 0 : index
    %3 = vector.load %arg1[%c0, %c0_1] : memref<128x2xf32, #tpu.memory_space<vmem>>, vector<128x2xf32>
    %4 = vector.extract_strided_slice %3 {offsets = [0, 0], sizes = [128, 1], strides = [1, 1]} : vector<128x2xf32> to vector<128x1xf32>
    %c0_2 = arith.constant 0 : index
    %c0_3 = arith.constant 0 : index
    %5 = vector.load %arg2[%c0_2, %c0_3] : memref<2x128xf32, #tpu.memory_space<vmem>>, vector<1x128xf32>
    %6 = vector.broadcast %4 : vector<128x1xf32> to vector<128x128xf32>
    %7 = vector.broadcast %5 : vector<1x128xf32> to vector<128x128xf32>
    %8 = arith.mulf %6, %7 : vector<128x128xf32>
    %c0_4 = arith.constant 0 : index
    %c0_5 = arith.constant 0 : index
    %9 = vector.load %arg3[%c0_4, %c0_5] : memref<1x128xf32, #tpu.memory_space<vmem>>, vector<1x128xf32>
    %10 = vector.broadcast %9 : vector<1x128xf32> to vector<128x128xf32>
    %11 = arith.addf %8, %10 : vector<128x128xf32>
    %12 = vector.extract_strided_slice %3 {offsets = [0, 1], sizes = [128, 1], strides = [1, 1]} : vector<128x2xf32> to vector<128x1xf32>
    %c1 = arith.constant 1 : index
    %c0_6 = arith.constant 0 : index
    %13 = vector.load %arg2[%c1, %c0_6] : memref<2x128xf32, #tpu.memory_space<vmem>>, vector<1x128xf32>
    %14 = vector.broadcast %12 : vector<128x1xf32> to vector<128x128xf32>
    %15 = vector.broadcast %13 : vector<1x128xf32> to vector<128x128xf32>
    %16 = arith.mulf %14, %15 : vector<128x128xf32>
    %17 = arith.addf %11, %16 : vector<128x128xf32>
    %c0_7 = arith.constant 0 : index
    %c0_8 = arith.constant 0 : index
    %18 = vector.load %arg7[%c0_7, %c0_8] : memref<2x128xf32, #tpu.memory_space<vmem>>, vector<2x128xf32>
    %19 = vector.extract_strided_slice %17 {offsets = [0, 0], sizes = [2, 128], strides = [1, 1]} : vector<128x128xf32> to vector<2x128xf32>
    %cst = arith.constant 1.000000e+00 : f32
    %20 = vector.broadcast %cst : f32 to vector<2x128xf32>
    %21 = arith.cmpf ogt, %18, %20 : vector<2x128xf32>
    %22 = arith.extui %21 : vector<2x128xi1> to vector<2x128xi32>
    %23 = arith.sitofp %22 : vector<2x128xi32> to vector<2x128xf32>
    %cst_9 = arith.constant 5.000000e-01 : f32
    %24 = vector.broadcast %cst_9 : f32 to vector<2x128xf32>
    %25 = arith.mulf %24, %18 : vector<2x128xf32>
    %26 = arith.addf %25, %19 : vector<2x128xf32>
    %cst_10 = arith.constant 1.000000e+00 : f32
    %27 = vector.broadcast %cst_10 : f32 to vector<2x128xf32>
    %28 = arith.mulf %23, %27 : vector<2x128xf32>
    %29 = arith.subf %26, %28 : vector<2x128xf32>
    %cst_11 = arith.constant 1.000000e+00 : f32
    %30 = vector.broadcast %cst_11 : f32 to vector<2x128xf32>
    %31 = arith.cmpf ogt, %29, %30 : vector<2x128xf32>
    %32 = arith.extui %31 : vector<2x128xi1> to vector<2x128xi32>
    %33 = arith.sitofp %32 : vector<2x128xi32> to vector<2x128xf32>
    %c0_12 = arith.constant 0 : index
    %c0_13 = arith.constant 0 : index
    %34 = vector.load %arg9[%c0_12, %c0_13] : memref<128x128xf32, #tpu.memory_space<vmem>>, vector<2x128xf32>
    tpu.vector_store %arg9[%c0_12, %c0_13], %33 {strides = array<i32>} : memref<128x128xf32, #tpu.memory_space<vmem>>, vector<2x128xf32>,
    %c0_14 = arith.constant 0 : index
    %c128 = arith.constant 128 : index
    %35 = vector.load %arg6[%c0_14, %c128] : memref<128x512xf32, #tpu.memory_space<vmem>>, vector<2x128xf32>
    tpu.vector_store %arg6[%c0_14, %c128], %29 {strides = array<i32>} : memref<128x512xf32, #tpu.memory_space<vmem>>, vector<2x128xf32>,
    %36 = vector.extract_strided_slice %17 {offsets = [2, 0], sizes = [2, 128], strides = [1, 1]} : vector<128x128xf32> to vector<2x128xf32>
    %cst_15 = arith.constant 1.000000e+00 : f32
    %37 = vector.broadcast %cst_15 : f32 to vector<2x128xf32>
    %38 = arith.cmpf ogt, %29, %37 : vector<2x128xf32>
    %39 = arith.extui %38 : vector<2x128xi1> to vector<2x128xi32>
    %40 = arith.sitofp %39 : vector<2x128xi32> to vector<2x128xf32>
    %cst_16 = arith.constant 5.000000e-01 : f32
    %41 = vector.broadcast %cst_16 : f32 to vector<2x128xf32>
    %42 = arith.mulf %41, %29 : vector<2x128xf32>
    %43 = arith.addf %42, %36 : vector<2x128xf32>
    %cst_17 = arith.constant 1.000000e+00 : f32
    %44 = vector.broadcast %cst_17 : f32 to vector<2x128xf32>
    %45 = arith.mulf %40, %44 : vector<2x128xf32>
    %46 = arith.subf %43, %45 : vector<2x128xf32>
    %cst_18 = arith.constant 1.000000e+00 : f32
    %47 = vector.broadcast %cst_18 : f32 to vector<2x128xf32>
    %48 = arith.cmpf ogt, %46, %47 : vector<2x128xf32>
    %49 = arith.extui %48 : vector<2x128xi1> to vector<2x128xi32>
    %50 = arith.sitofp %49 : vector<2x128xi32> to vector<2x128xf32>
    %c2 = arith.constant 2 : index
    %c0_19 = arith.constant 0 : index
    %51 = vector.load %arg9[%c2, %c0_19] : memref<128x128xf32, #tpu.memory_space<vmem>>, vector<2x128xf32>
    tpu.vector_store %arg9[%c2, %c0_19], %50 {strides = array<i32>} : memref<128x128xf32, #tpu.memory_space<vmem>>, vector<2x128xf32>,
    %c2_20 = arith.constant 2 : index
    %c128_21 = arith.constant 128 : index
    %52 = vector.load %arg6[%c2_20, %c128_21] : memref<128x512xf32, #tpu.memory_space<vmem>>, vector<2x128xf32>
    tpu.vector_store %arg6[%c2_20, %c128_21], %46 {strides = array<i32>} : memref<128x512xf32, #tpu.memory_space<vmem>>, vector<2x128xf32>,
    %53 = vector.extract_strided_slice %17 {offsets = [4, 0], sizes = [2, 128], strides = [1, 1]} : vector<128x128xf32> to vector<2x128xf32>
    %cst_22 = arith.constant 1.000000e+00 : f32
    %54 = vector.broadcast %cst_22 : f32 to vector<2x128xf32>
    %55 = arith.cmpf ogt, %46, %54 : vector<2x128xf32>
    %56 = arith.extui %55 : vector<2x128xi1> to vector<2x128xi32>
    %57 = arith.sitofp %56 : vector<2x128xi32> to vector<2x128xf32>
    %cst_23 = arith.constant 5.000000e-01 : f32
    %58 = vector.broadcast %cst_23 : f32 to vector<2x128xf32>
    %59 = arith.mulf %58, %46 : vector<2x128xf32>
    %60 = arith.addf %59, %53 : vector<2x128xf32>
    %cst_24 = arith.constant 1.000000e+00 : f32
    %61 = vector.broadcast %cst_24 : f32 to vector<2x128xf32>
    %62 = arith.mulf %57, %61 : vector<2x128xf32>
    %63 = arith.subf %60, %62 : vector<2x128xf32>
    %cst_25 = arith.constant 1.000000e+00 : f32
    %64 = vector.broadcast %cst_25 : f32 to vector<2x128xf32>
    %65 = arith.cmpf ogt, %63, %64 : vector<2x128xf32>
    %66 = arith.extui %65 : vector<2x128xi1> to vector<2x128xi32>
    %67 = arith.sitofp %66 : vector<2x128xi32> to vector<2x128xf32>
    %c4 = arith.constant 4 : index
    %c0_26 = arith.constant 0 : index
    %68 = vector.load %arg9[%c4, %c0_26] : memref<128x128xf32, #tpu.memory_space<vmem>>, vector<2x128xf32>
    tpu.vector_store %arg9[%c4, %c0_26], %67 {strides = array<i32>} : memref<128x128xf32, #tpu.memory_space<vmem>>, vector<2x128xf32>,
    %c4_27 = arith.constant 4 : index
    %c128_28 = arith.constant 128 : index
    %69 = vector.load %arg6[%c4_27, %c128_28] : memref<128x512xf32, #tpu.memory_space<vmem>>, vector<2x128xf32>
    tpu.vector_store %arg6[%c4_27, %c128_28], %63 {strides = array<i32>} : memref<128x512xf32, #tpu.memory_space<vmem>>, vector<2x128xf32>,
    %70 = vector.extract_strided_slice %17 {offsets = [6, 0], sizes = [2, 128], strides = [1, 1]} : vector<128x128xf32> to vector<2x128xf32>
    %cst_29 = arith.constant 1.000000e+00 : f32
    %71 = vector.broadcast %cst_29 : f32 to vector<2x128xf32>
    %72 = arith.cmpf ogt, %63, %71 : vector<2x128xf32>
    %73 = arith.extui %72 : vector<2x128xi1> to vector<2x128xi32>
    %74 = arith.sitofp %73 : vector<2x128xi32> to vector<2x128xf32>
    %cst_30 = arith.constant 5.000000e-01 : f32
    %75 = vector.broadcast %cst_30 : f32 to vector<2x128xf32>
    %76 = arith.mulf %75, %63 : vector<2x128xf32>
    %77 = arith.addf %76, %70 : vector<2x128xf32>
    %cst_31 = arith.constant 1.000000e+00 : f32
    %78 = vector.broadcast %cst_31 : f32 to vector<2x128xf32>
    %79 = arith.mulf %74, %78 : vector<2x128xf32>
    %80 = arith.subf %77, %79 : vector<2x128xf32>
    %cst_32 = arith.constant 1.000000e+00 : f32
    %81 = vector.broadcast %cst_32 : f32 to vector<2x128xf32>
    %82 = arith.cmpf ogt, %80, %81 : vector<2x128xf32>
    %83 = arith.extui %82 : vector<2x128xi1> to vector<2x128xi32>
    %84 = arith.sitofp %83 : vector<2x128xi32> to vector<2x128xf32>
    %c6 = arith.constant 6 : index
    %c0_33 = arith.constant 0 : index
    %85 = vector.load %arg9[%c6, %c0_33] : memref<128x128xf32, #tpu.memory_space<vmem>>, vector<2x128xf32>
    tpu.vector_store %arg9[%c6, %c0_33], %84 {strides = array<i32>} : memref<128x128xf32, #tpu.memory_space<vmem>>, vector<2x128xf32>,
    %c6_34 = arith.constant 6 : index
    %c128_35 = arith.constant 128 : index
    %86 = vector.load %arg6[%c6_34, %c128_35] : memref<128x512xf32, #tpu.memory_space<vmem>>, vector<2x128xf32>
    tpu.vector_store %arg6[%c6_34, %c128_35], %80 {strides = array<i32>} : memref<128x512xf32, #tpu.memory_space<vmem>>, vector<2x128xf32>,
    %87 = vector.extract_strided_slice %17 {offsets = [8, 0], sizes = [2, 128], strides = [1, 1]} : vector<128x128xf32> to vector<2x128xf32>
    %cst_36 = arith.constant 1.000000e+00 : f32
    %88 = vector.broadcast %cst_36 : f32 to vector<2x128xf32>
    %89 = arith.cmpf ogt, %80, %88 : vector<2x128xf32>
    %90 = arith.extui %89 : vector<2x128xi1> to vector<2x128xi32>
    %91 = arith.sitofp %90 : vector<2x128xi32> to vector<2x128xf32>
    %cst_37 = arith.constant 5.000000e-01 : f32
    %92 = vector.broadcast %cst_37 : f32 to vector<2x128xf32>
    %93 = arith.mulf %92, %80 : vector<2x128xf32>
    %94 = arith.addf %93, %87 : vector<2x128xf32>
    %cst_38 = arith.constant 1.000000e+00 : f32
    %95 = vector.broadcast %cst_38 : f32 to vector<2x128xf32>
    %96 = arith.mulf %91, %95 : vector<2x128xf32>
    %97 = arith.subf %94, %96 : vector<2x128xf32>
    %cst_39 = arith.constant 1.000000e+00 : f32
    %98 = vector.broadcast %cst_39 : f32 to vector<2x128xf32>
    %99 = arith.cmpf ogt, %97, %98 : vector<2x128xf32>
    %100 = arith.extui %99 : vector<2x128xi1> to vector<2x128xi32>
    %101 = arith.sitofp %100 : vector<2x128xi32> to vector<2x128xf32>
    %c8 = arith.constant 8 : index
    %c0_40 = arith.constant 0 : index
    %102 = vector.load %arg9[%c8, %c0_40] : memref<128x128xf32, #tpu.memory_space<vmem>>, vector<2x128xf32>
    tpu.vector_store %arg9[%c8, %c0_40], %101 {strides = array<i32>} : memref<128x128xf32, #tpu.memory_space<vmem>>, vector<2x128xf32>,
    %c8_41 = arith.constant 8 : index
    %c128_42 = arith.constant 128 : index
    %103 = vector.load %arg6[%c8_41, %c128_42] : memref<128x512xf32, #tpu.memory_space<vmem>>, vector<2x128xf32>
    tpu.vector_store %arg6[%c8_41, %c128_42], %97 {strides = array<i32>} : memref<128x512xf32, #tpu.memory_space<vmem>>, vector<2x128xf32>,
    %104 = vector.extract_strided_slice %17 {offsets = [10, 0], sizes = [2, 128], strides = [1, 1]} : vector<128x128xf32> to vector<2x128xf32>
    %cst_43 = arith.constant 1.000000e+00 : f32
    %105 = vector.broadcast %cst_43 : f32 to vector<2x128xf32>
    %106 = arith.cmpf ogt, %97, %105 : vector<2x128xf32>
    %107 = arith.extui %106 : vector<2x128xi1> to vector<2x128xi32>
    %108 = arith.sitofp %107 : vector<2x128xi32> to vector<2x128xf32>
    %cst_44 = arith.constant 5.000000e-01 : f32
    %109 = vector.broadcast %cst_44 : f32 to vector<2x128xf32>
    %110 = arith.mulf %109, %97 : vector<2x128xf32>
    %111 = arith.addf %110, %104 : vector<2x128xf32>
    %cst_45 = arith.constant 1.000000e+00 : f32
    %112 = vector.broadcast %cst_45 : f32 to vector<2x128xf32>
    %113 = arith.mulf %108, %112 : vector<2x128xf32>
    %114 = arith.subf %111, %113 : vector<2x128xf32>
    %cst_46 = arith.constant 1.000000e+00 : f32
    %115 = vector.broadcast %cst_46 : f32 to vector<2x128xf32>
    %116 = arith.cmpf ogt, %114, %115 : vector<2x128xf32>
    %117 = arith.extui %116 : vector<2x128xi1> to vector<2x128xi32>
    %118 = arith.sitofp %117 : vector<2x128xi32> to vector<2x128xf32>
    %c10 = arith.constant 10 : index
    %c0_47 = arith.constant 0 : index
    %119 = vector.load %arg9[%c10, %c0_47] : memref<128x128xf32, #tpu.memory_space<vmem>>, vector<2x128xf32>
    tpu.vector_store %arg9[%c10, %c0_47], %118 {strides = array<i32>} : memref<128x128xf32, #tpu.memory_space<vmem>>, vector<2x128xf32>,
    %c10_48 = arith.constant 10 : index
    %c128_49 = arith.constant 128 : index
    %120 = vector.load %arg6[%c10_48, %c128_49] : memref<128x512xf32, #tpu.memory_space<vmem>>, vector<2x128xf32>
    tpu.vector_store %arg6[%c10_48, %c128_49], %114 {strides = array<i32>} : memref<128x512xf32, #tpu.memory_space<vmem>>, vector<2x128xf32>,
    %121 = vector.extract_strided_slice %17 {offsets = [12, 0], sizes = [2, 128], strides = [1, 1]} : vector<128x128xf32> to vector<2x128xf32>
    %cst_50 = arith.constant 1.000000e+00 : f32
    %122 = vector.broadcast %cst_50 : f32 to vector<2x128xf32>
    %123 = arith.cmpf ogt, %114, %122 : vector<2x128xf32>
    %124 = arith.extui %123 : vector<2x128xi1> to vector<2x128xi32>
    %125 = arith.sitofp %124 : vector<2x128xi32> to vector<2x128xf32>
    %cst_51 = arith.constant 5.000000e-01 : f32
    %126 = vector.broadcast %cst_51 : f32 to vector<2x128xf32>
    %127 = arith.mulf %126, %114 : vector<2x128xf32>
    %128 = arith.addf %127, %121 : vector<2x128xf32>
    %cst_52 = arith.constant 1.000000e+00 : f32
    %129 = vector.broadcast %cst_52 : f32 to vector<2x128xf32>
    %130 = arith.mulf %125, %129 : vector<2x128xf32>
    %131 = arith.subf %128, %130 : vector<2x128xf32>
    %cst_53 = arith.constant 1.000000e+00 : f32
    %132 = vector.broadcast %cst_53 : f32 to vector<2x128xf32>
    %133 = arith.cmpf ogt, %131, %132 : vector<2x128xf32>
    %134 = arith.extui %133 : vector<2x128xi1> to vector<2x128xi32>
    %135 = arith.sitofp %134 : vector<2x128xi32> to vector<2x128xf32>
    %c12 = arith.constant 12 : index
    %c0_54 = arith.constant 0 : index
    %136 = vector.load %arg9[%c12, %c0_54] : memref<128x128xf32, #tpu.memory_space<vmem>>, vector<2x128xf32>
    tpu.vector_store %arg9[%c12, %c0_54], %135 {strides = array<i32>} : memref<128x128xf32, #tpu.memory_space<vmem>>, vector<2x128xf32>,
    %c12_55 = arith.constant 12 : index
    %c128_56 = arith.constant 128 : index
    %137 = vector.load %arg6[%c12_55, %c128_56] : memref<128x512xf32, #tpu.memory_space<vmem>>, vector<2x128xf32>
    tpu.vector_store %arg6[%c12_55, %c128_56], %131 {strides = array<i32>} : memref<128x512xf32, #tpu.memory_space<vmem>>, vector<2x128xf32>,
    %138 = vector.extract_strided_slice %17 {offsets = [14, 0], sizes = [2, 128], strides = [1, 1]} : vector<128x128xf32> to vector<2x128xf32>
    %cst_57 = arith.constant 1.000000e+00 : f32
    %139 = vector.broadcast %cst_57 : f32 to vector<2x128xf32>
    %140 = arith.cmpf ogt, %131, %139 : vector<2x128xf32>
    %141 = arith.extui %140 : vector<2x128xi1> to vector<2x128xi32>
    %142 = arith.sitofp %141 : vector<2x128xi32> to vector<2x128xf32>
    %cst_58 = arith.constant 5.000000e-01 : f32
    %143 = vector.broadcast %cst_58 : f32 to vector<2x128xf32>
    %144 = arith.mulf %143, %131 : vector<2x128xf32>
    %145 = arith.addf %144, %138 : vector<2x128xf32>
    %cst_59 = arith.constant 1.000000e+00 : f32
    %146 = vector.broadcast %cst_59 : f32 to vector<2x128xf32>
    %147 = arith.mulf %142, %146 : vector<2x128xf32>
    %148 = arith.subf %145, %147 : vector<2x128xf32>
    %cst_60 = arith.constant 1.000000e+00 : f32
    %149 = vector.broadcast %cst_60 : f32 to vector<2x128xf32>
    %150 = arith.cmpf ogt, %148, %149 : vector<2x128xf32>
    %151 = arith.extui %150 : vector<2x128xi1> to vector<2x128xi32>
    %152 = arith.sitofp %151 : vector<2x128xi32> to vector<2x128xf32>
    %c14 = arith.constant 14 : index
    %c0_61 = arith.constant 0 : index
    %153 = vector.load %arg9[%c14, %c0_61] : memref<128x128xf32, #tpu.memory_space<vmem>>, vector<2x128xf32>
    tpu.vector_store %arg9[%c14, %c0_61], %152 {strides = array<i32>} : memref<128x128xf32, #tpu.memory_space<vmem>>, vector<2x128xf32>,
    %c14_62 = arith.constant 14 : index
    %c128_63 = arith.constant 128 : index
    %154 = vector.load %arg6[%c14_62, %c128_63] : memref<128x512xf32, #tpu.memory_space<vmem>>, vector<2x128xf32>
    tpu.vector_store %arg6[%c14_62, %c128_63], %148 {strides = array<i32>} : memref<128x512xf32, #tpu.memory_space<vmem>>, vector<2x128xf32>,
    %155 = vector.extract_strided_slice %17 {offsets = [16, 0], sizes = [2, 128], strides = [1, 1]} : vector<128x128xf32> to vector<2x128xf32>
    %cst_64 = arith.constant 1.000000e+00 : f32
    %156 = vector.broadcast %cst_64 : f32 to vector<2x128xf32>
    %157 = arith.cmpf ogt, %148, %156 : vector<2x128xf32>
    %158 = arith.extui %157 : vector<2x128xi1> to vector<2x128xi32>
    %159 = arith.sitofp %158 : vector<2x128xi32> to vector<2x128xf32>
    %cst_65 = arith.constant 5.000000e-01 : f32
    %160 = vector.broadcast %cst_65 : f32 to vector<2x128xf32>
    %161 = arith.mulf %160, %148 : vector<2x128xf32>
    %162 = arith.addf %161, %155 : vector<2x128xf32>
    %cst_66 = arith.constant 1.000000e+00 : f32
    %163 = vector.broadcast %cst_66 : f32 to vector<2x128xf32>
    %164 = arith.mulf %159, %163 : vector<2x128xf32>
    %165 = arith.subf %162, %164 : vector<2x128xf32>
    %cst_67 = arith.constant 1.000000e+00 : f32
    %166 = vector.broadcast %cst_67 : f32 to vector<2x128xf32>
    %167 = arith.cmpf ogt, %165, %166 : vector<2x128xf32>
    %168 = arith.extui %167 : vector<2x128xi1> to vector<2x128xi32>
    %169 = arith.sitofp %168 : vector<2x128xi32> to vector<2x128xf32>
    %c16 = arith.constant 16 : index
    %c0_68 = arith.constant 0 : index
    %170 = vector.load %arg9[%c16, %c0_68] : memref<128x128xf32, #tpu.memory_space<vmem>>, vector<2x128xf32>
    tpu.vector_store %arg9[%c16, %c0_68], %169 {strides = array<i32>} : memref<128x128xf32, #tpu.memory_space<vmem>>, vector<2x128xf32>,
    %c16_69 = arith.constant 16 : index
    %c128_70 = arith.constant 128 : index
    %171 = vector.load %arg6[%c16_69, %c128_70] : memref<128x512xf32, #tpu.memory_space<vmem>>, vector<2x128xf32>
    tpu.vector_store %arg6[%c16_69, %c128_70], %165 {strides = array<i32>} : memref<128x512xf32, #tpu.memory_space<vmem>>, vector<2x128xf32>,
    %172 = vector.extract_strided_slice %17 {offsets = [18, 0], sizes = [2, 128], strides = [1, 1]} : vector<128x128xf32> to vector<2x128xf32>
    %cst_71 = arith.constant 1.000000e+00 : f32
    %173 = vector.broadcast %cst_71 : f32 to vector<2x128xf32>
    %174 = arith.cmpf ogt, %165, %173 : vector<2x128xf32>
    %175 = arith.extui %174 : vector<2x128xi1> to vector<2x128xi32>
    %176 = arith.sitofp %175 : vector<2x128xi32> to vector<2x128xf32>
    %cst_72 = arith.constant 5.000000e-01 : f32
    %177 = vector.broadcast %cst_72 : f32 to vector<2x128xf32>
    %178 = arith.mulf %177, %165 : vector<2x128xf32>
    %179 = arith.addf %178, %172 : vector<2x128xf32>
    %cst_73 = arith.constant 1.000000e+00 : f32
    %180 = vector.broadcast %cst_73 : f32 to vector<2x128xf32>
    %181 = arith.mulf %176, %180 : vector<2x128xf32>
    %182 = arith.subf %179, %181 : vector<2x128xf32>
    %cst_74 = arith.constant 1.000000e+00 : f32
    %183 = vector.broadcast %cst_74 : f32 to vector<2x128xf32>
    %184 = arith.cmpf ogt, %182, %183 : vector<2x128xf32>
    %185 = arith.extui %184 : vector<2x128xi1> to vector<2x128xi32>
    %186 = arith.sitofp %185 : vector<2x128xi32> to vector<2x128xf32>
    %c18 = arith.constant 18 : index
    %c0_75 = arith.constant 0 : index
    %187 = vector.load %arg9[%c18, %c0_75] : memref<128x128xf32, #tpu.memory_space<vmem>>, vector<2x128xf32>
    tpu.vector_store %arg9[%c18, %c0_75], %186 {strides = array<i32>} : memref<128x128xf32, #tpu.memory_space<vmem>>, vector<2x128xf32>,
    %c18_76 = arith.constant 18 : index
    %c128_77 = arith.constant 128 : index
    %188 = vector.load %arg6[%c18_76, %c128_77] : memref<128x512xf32, #tpu.memory_space<vmem>>, vector<2x128xf32>
    tpu.vector_store %arg6[%c18_76, %c128_77], %182 {strides = array<i32>} : memref<128x512xf32, #tpu.memory_space<vmem>>, vector<2x128xf32>,
    %189 = vector.extract_strided_slice %17 {offsets = [20, 0], sizes = [2, 128], strides = [1, 1]} : vector<128x128xf32> to vector<2x128xf32>
    %cst_78 = arith.constant 1.000000e+00 : f32
    %190 = vector.broadcast %cst_78 : f32 to vector<2x128xf32>
    %191 = arith.cmpf ogt, %182, %190 : vector<2x128xf32>
    %192 = arith.extui %191 : vector<2x128xi1> to vector<2x128xi32>
    %193 = arith.sitofp %192 : vector<2x128xi32> to vector<2x128xf32>
    %cst_79 = arith.constant 5.000000e-01 : f32
    %194 = vector.broadcast %cst_79 : f32 to vector<2x128xf32>
    %195 = arith.mulf %194, %182 : vector<2x128xf32>
    %196 = arith.addf %195, %189 : vector<2x128xf32>
    %cst_80 = arith.constant 1.000000e+00 : f32
    %197 = vector.broadcast %cst_80 : f32 to vector<2x128xf32>
    %198 = arith.mulf %193, %197 : vector<2x128xf32>
    %199 = arith.subf %196, %198 : vector<2x128xf32>
    %cst_81 = arith.constant 1.000000e+00 : f32
    %200 = vector.broadcast %cst_81 : f32 to vector<2x128xf32>
    %201 = arith.cmpf ogt, %199, %200 : vector<2x128xf32>
    %202 = arith.extui %201 : vector<2x128xi1> to vector<2x128xi32>
    %203 = arith.sitofp %202 : vector<2x128xi32> to vector<2x128xf32>
    %c20 = arith.constant 20 : index
    %c0_82 = arith.constant 0 : index
    %204 = vector.load %arg9[%c20, %c0_82] : memref<128x128xf32, #tpu.memory_space<vmem>>, vector<2x128xf32>
    tpu.vector_store %arg9[%c20, %c0_82], %203 {strides = array<i32>} : memref<128x128xf32, #tpu.memory_space<vmem>>, vector<2x128xf32>,
    %c20_83 = arith.constant 20 : index
    %c128_84 = arith.constant 128 : index
    %205 = vector.load %arg6[%c20_83, %c128_84] : memref<128x512xf32, #tpu.memory_space<vmem>>, vector<2x128xf32>
    tpu.vector_store %arg6[%c20_83, %c128_84], %199 {strides = array<i32>} : memref<128x512xf32, #tpu.memory_space<vmem>>, vector<2x128xf32>,
    %206 = vector.extract_strided_slice %17 {offsets = [22, 0], sizes = [2, 128], strides = [1, 1]} : vector<128x128xf32> to vector<2x128xf32>
    %cst_85 = arith.constant 1.000000e+00 : f32
    %207 = vector.broadcast %cst_85 : f32 to vector<2x128xf32>
    %208 = arith.cmpf ogt, %199, %207 : vector<2x128xf32>
    %209 = arith.extui %208 : vector<2x128xi1> to vector<2x128xi32>
    %210 = arith.sitofp %209 : vector<2x128xi32> to vector<2x128xf32>
    %cst_86 = arith.constant 5.000000e-01 : f32
    %211 = vector.broadcast %cst_86 : f32 to vector<2x128xf32>
    %212 = arith.mulf %211, %199 : vector<2x128xf32>
    %213 = arith.addf %212, %206 : vector<2x128xf32>
    %cst_87 = arith.constant 1.000000e+00 : f32
    %214 = vector.broadcast %cst_87 : f32 to vector<2x128xf32>
    %215 = arith.mulf %210, %214 : vector<2x128xf32>
    %216 = arith.subf %213, %215 : vector<2x128xf32>
    %cst_88 = arith.constant 1.000000e+00 : f32
    %217 = vector.broadcast %cst_88 : f32 to vector<2x128xf32>
    %218 = arith.cmpf ogt, %216, %217 : vector<2x128xf32>
    %219 = arith.extui %218 : vector<2x128xi1> to vector<2x128xi32>
    %220 = arith.sitofp %219 : vector<2x128xi32> to vector<2x128xf32>
    %c22 = arith.constant 22 : index
    %c0_89 = arith.constant 0 : index
    %221 = vector.load %arg9[%c22, %c0_89] : memref<128x128xf32, #tpu.memory_space<vmem>>, vector<2x128xf32>
    tpu.vector_store %arg9[%c22, %c0_89], %220 {strides = array<i32>} : memref<128x128xf32, #tpu.memory_space<vmem>>, vector<2x128xf32>,
    %c22_90 = arith.constant 22 : index
    %c128_91 = arith.constant 128 : index
    %222 = vector.load %arg6[%c22_90, %c128_91] : memref<128x512xf32, #tpu.memory_space<vmem>>, vector<2x128xf32>
    tpu.vector_store %arg6[%c22_90, %c128_91], %216 {strides = array<i32>} : memref<128x512xf32, #tpu.memory_space<vmem>>, vector<2x128xf32>,
    %223 = vector.extract_strided_slice %17 {offsets = [24, 0], sizes = [2, 128], strides = [1, 1]} : vector<128x128xf32> to vector<2x128xf32>
    %cst_92 = arith.constant 1.000000e+00 : f32
    %224 = vector.broadcast %cst_92 : f32 to vector<2x128xf32>
    %225 = arith.cmpf ogt, %216, %224 : vector<2x128xf32>
    %226 = arith.extui %225 : vector<2x128xi1> to vector<2x128xi32>
    %227 = arith.sitofp %226 : vector<2x128xi32> to vector<2x128xf32>
    %cst_93 = arith.constant 5.000000e-01 : f32
    %228 = vector.broadcast %cst_93 : f32 to vector<2x128xf32>
    %229 = arith.mulf %228, %216 : vector<2x128xf32>
    %230 = arith.addf %229, %223 : vector<2x128xf32>
    %cst_94 = arith.constant 1.000000e+00 : f32
    %231 = vector.broadcast %cst_94 : f32 to vector<2x128xf32>
    %232 = arith.mulf %227, %231 : vector<2x128xf32>
    %233 = arith.subf %230, %232 : vector<2x128xf32>
    %cst_95 = arith.constant 1.000000e+00 : f32
    %234 = vector.broadcast %cst_95 : f32 to vector<2x128xf32>
    %235 = arith.cmpf ogt, %233, %234 : vector<2x128xf32>
    %236 = arith.extui %235 : vector<2x128xi1> to vector<2x128xi32>
    %237 = arith.sitofp %236 : vector<2x128xi32> to vector<2x128xf32>
    %c24 = arith.constant 24 : index
    %c0_96 = arith.constant 0 : index
    %238 = vector.load %arg9[%c24, %c0_96] : memref<128x128xf32, #tpu.memory_space<vmem>>, vector<2x128xf32>
    tpu.vector_store %arg9[%c24, %c0_96], %237 {strides = array<i32>} : memref<128x128xf32, #tpu.memory_space<vmem>>, vector<2x128xf32>,
    %c24_97 = arith.constant 24 : index
    %c128_98 = arith.constant 128 : index
    %239 = vector.load %arg6[%c24_97, %c128_98] : memref<128x512xf32, #tpu.memory_space<vmem>>, vector<2x128xf32>
    tpu.vector_store %arg6[%c24_97, %c128_98], %233 {strides = array<i32>} : memref<128x512xf32, #tpu.memory_space<vmem>>, vector<2x128xf32>,
    %240 = vector.extract_strided_slice %17 {offsets = [26, 0], sizes = [2, 128], strides = [1, 1]} : vector<128x128xf32> to vector<2x128xf32>
    %cst_99 = arith.constant 1.000000e+00 : f32
    %241 = vector.broadcast %cst_99 : f32 to vector<2x128xf32>
    %242 = arith.cmpf ogt, %233, %241 : vector<2x128xf32>
    %243 = arith.extui %242 : vector<2x128xi1> to vector<2x128xi32>
    %244 = arith.sitofp %243 : vector<2x128xi32> to vector<2x128xf32>
    %cst_100 = arith.constant 5.000000e-01 : f32
    %245 = vector.broadcast %cst_100 : f32 to vector<2x128xf32>
    %246 = arith.mulf %245, %233 : vector<2x128xf32>
    %247 = arith.addf %246, %240 : vector<2x128xf32>
    %cst_101 = arith.constant 1.000000e+00 : f32
    %248 = vector.broadcast %cst_101 : f32 to vector<2x128xf32>
    %249 = arith.mulf %244, %248 : vector<2x128xf32>
    %250 = arith.subf %247, %249 : vector<2x128xf32>
    %cst_102 = arith.constant 1.000000e+00 : f32
    %251 = vector.broadcast %cst_102 : f32 to vector<2x128xf32>
    %252 = arith.cmpf ogt, %250, %251 : vector<2x128xf32>
    %253 = arith.extui %252 : vector<2x128xi1> to vector<2x128xi32>
    %254 = arith.sitofp %253 : vector<2x128xi32> to vector<2x128xf32>
    %c26 = arith.constant 26 : index
    %c0_103 = arith.constant 0 : index
    %255 = vector.load %arg9[%c26, %c0_103] : memref<128x128xf32, #tpu.memory_space<vmem>>, vector<2x128xf32>
    tpu.vector_store %arg9[%c26, %c0_103], %254 {strides = array<i32>} : memref<128x128xf32, #tpu.memory_space<vmem>>, vector<2x128xf32>,
    %c26_104 = arith.constant 26 : index
    %c128_105 = arith.constant 128 : index
    %256 = vector.load %arg6[%c26_104, %c128_105] : memref<128x512xf32, #tpu.memory_space<vmem>>, vector<2x128xf32>
    tpu.vector_store %arg6[%c26_104, %c128_105], %250 {strides = array<i32>} : memref<128x512xf32, #tpu.memory_space<vmem>>, vector<2x128xf32>,
    %257 = vector.extract_strided_slice %17 {offsets = [28, 0], sizes = [2, 128], strides = [1, 1]} : vector<128x128xf32> to vector<2x128xf32>
    %cst_106 = arith.constant 1.000000e+00 : f32
    %258 = vector.broadcast %cst_106 : f32 to vector<2x128xf32>
    %259 = arith.cmpf ogt, %250, %258 : vector<2x128xf32>
    %260 = arith.extui %259 : vector<2x128xi1> to vector<2x128xi32>
    %261 = arith.sitofp %260 : vector<2x128xi32> to vector<2x128xf32>
    %cst_107 = arith.constant 5.000000e-01 : f32
    %262 = vector.broadcast %cst_107 : f32 to vector<2x128xf32>
    %263 = arith.mulf %262, %250 : vector<2x128xf32>
    %264 = arith.addf %263, %257 : vector<2x128xf32>
    %cst_108 = arith.constant 1.000000e+00 : f32
    %265 = vector.broadcast %cst_108 : f32 to vector<2x128xf32>
    %266 = arith.mulf %261, %265 : vector<2x128xf32>
    %267 = arith.subf %264, %266 : vector<2x128xf32>
    %cst_109 = arith.constant 1.000000e+00 : f32
    %268 = vector.broadcast %cst_109 : f32 to vector<2x128xf32>
    %269 = arith.cmpf ogt, %267, %268 : vector<2x128xf32>
    %270 = arith.extui %269 : vector<2x128xi1> to vector<2x128xi32>
    %271 = arith.sitofp %270 : vector<2x128xi32> to vector<2x128xf32>
    %c28 = arith.constant 28 : index
    %c0_110 = arith.constant 0 : index
    %272 = vector.load %arg9[%c28, %c0_110] : memref<128x128xf32, #tpu.memory_space<vmem>>, vector<2x128xf32>
    tpu.vector_store %arg9[%c28, %c0_110], %271 {strides = array<i32>} : memref<128x128xf32, #tpu.memory_space<vmem>>, vector<2x128xf32>,
    %c28_111 = arith.constant 28 : index
    %c128_112 = arith.constant 128 : index
    %273 = vector.load %arg6[%c28_111, %c128_112] : memref<128x512xf32, #tpu.memory_space<vmem>>, vector<2x128xf32>
    tpu.vector_store %arg6[%c28_111, %c128_112], %267 {strides = array<i32>} : memref<128x512xf32, #tpu.memory_space<vmem>>, vector<2x128xf32>,
    %274 = vector.extract_strided_slice %17 {offsets = [30, 0], sizes = [2, 128], strides = [1, 1]} : vector<128x128xf32> to vector<2x128xf32>
    %cst_113 = arith.constant 1.000000e+00 : f32
    %275 = vector.broadcast %cst_113 : f32 to vector<2x128xf32>
    %276 = arith.cmpf ogt, %267, %275 : vector<2x128xf32>
    %277 = arith.extui %276 : vector<2x128xi1> to vector<2x128xi32>
    %278 = arith.sitofp %277 : vector<2x128xi32> to vector<2x128xf32>
    %cst_114 = arith.constant 5.000000e-01 : f32
    %279 = vector.broadcast %cst_114 : f32 to vector<2x128xf32>
    %280 = arith.mulf %279, %267 : vector<2x128xf32>
    %281 = arith.addf %280, %274 : vector<2x128xf32>
    %cst_115 = arith.constant 1.000000e+00 : f32
    %282 = vector.broadcast %cst_115 : f32 to vector<2x128xf32>
    %283 = arith.mulf %278, %282 : vector<2x128xf32>
    %284 = arith.subf %281, %283 : vector<2x128xf32>
    %cst_116 = arith.constant 1.000000e+00 : f32
    %285 = vector.broadcast %cst_116 : f32 to vector<2x128xf32>
    %286 = arith.cmpf ogt, %284, %285 : vector<2x128xf32>
    %287 = arith.extui %286 : vector<2x128xi1> to vector<2x128xi32>
    %288 = arith.sitofp %287 : vector<2x128xi32> to vector<2x128xf32>
    %c30 = arith.constant 30 : index
    %c0_117 = arith.constant 0 : index
    %289 = vector.load %arg9[%c30, %c0_117] : memref<128x128xf32, #tpu.memory_space<vmem>>, vector<2x128xf32>
    tpu.vector_store %arg9[%c30, %c0_117], %288 {strides = array<i32>} : memref<128x128xf32, #tpu.memory_space<vmem>>, vector<2x128xf32>,
    %c30_118 = arith.constant 30 : index
    %c128_119 = arith.constant 128 : index
    %290 = vector.load %arg6[%c30_118, %c128_119] : memref<128x512xf32, #tpu.memory_space<vmem>>, vector<2x128xf32>
    tpu.vector_store %arg6[%c30_118, %c128_119], %284 {strides = array<i32>} : memref<128x512xf32, #tpu.memory_space<vmem>>, vector<2x128xf32>,
    %291 = vector.extract_strided_slice %17 {offsets = [32, 0], sizes = [2, 128], strides = [1, 1]} : vector<128x128xf32> to vector<2x128xf32>
    %cst_120 = arith.constant 1.000000e+00 : f32
    %292 = vector.broadcast %cst_120 : f32 to vector<2x128xf32>
    %293 = arith.cmpf ogt, %284, %292 : vector<2x128xf32>
    %294 = arith.extui %293 : vector<2x128xi1> to vector<2x128xi32>
    %295 = arith.sitofp %294 : vector<2x128xi32> to vector<2x128xf32>
    %cst_121 = arith.constant 5.000000e-01 : f32
    %296 = vector.broadcast %cst_121 : f32 to vector<2x128xf32>
    %297 = arith.mulf %296, %284 : vector<2x128xf32>
    %298 = arith.addf %297, %291 : vector<2x128xf32>
    %cst_122 = arith.constant 1.000000e+00 : f32
    %299 = vector.broadcast %cst_122 : f32 to vector<2x128xf32>
    %300 = arith.mulf %295, %299 : vector<2x128xf32>
    %301 = arith.subf %298, %300 : vector<2x128xf32>
    %cst_123 = arith.constant 1.000000e+00 : f32
    %302 = vector.broadcast %cst_123 : f32 to vector<2x128xf32>
    %303 = arith.cmpf ogt, %301, %302 : vector<2x128xf32>
    %304 = arith.extui %303 : vector<2x128xi1> to vector<2x128xi32>
    %305 = arith.sitofp %304 : vector<2x128xi32> to vector<2x128xf32>
    %c32 = arith.constant 32 : index
    %c0_124 = arith.constant 0 : index
    %306 = vector.load %arg9[%c32, %c0_124] : memref<128x128xf32, #tpu.memory_space<vmem>>, vector<2x128xf32>
    tpu.vector_store %arg9[%c32, %c0_124], %305 {strides = array<i32>} : memref<128x128xf32, #tpu.memory_space<vmem>>, vector<2x128xf32>,
    %c32_125 = arith.constant 32 : index
    %c128_126 = arith.constant 128 : index
    %307 = vector.load %arg6[%c32_125, %c128_126] : memref<128x512xf32, #tpu.memory_space<vmem>>, vector<2x128xf32>
    tpu.vector_store %arg6[%c32_125, %c128_126], %301 {strides = array<i32>} : memref<128x512xf32, #tpu.memory_space<vmem>>, vector<2x128xf32>,
    %308 = vector.extract_strided_slice %17 {offsets = [34, 0], sizes = [2, 128], strides = [1, 1]} : vector<128x128xf32> to vector<2x128xf32>
    %cst_127 = arith.constant 1.000000e+00 : f32
    %309 = vector.broadcast %cst_127 : f32 to vector<2x128xf32>
    %310 = arith.cmpf ogt, %301, %309 : vector<2x128xf32>
    %311 = arith.extui %310 : vector<2x128xi1> to vector<2x128xi32>
    %312 = arith.sitofp %311 : vector<2x128xi32> to vector<2x128xf32>
    %cst_128 = arith.constant 5.000000e-01 : f32
    %313 = vector.broadcast %cst_128 : f32 to vector<2x128xf32>
    %314 = arith.mulf %313, %301 : vector<2x128xf32>
    %315 = arith.addf %314, %308 : vector<2x128xf32>
    %cst_129 = arith.constant 1.000000e+00 : f32
    %316 = vector.broadcast %cst_129 : f32 to vector<2x128xf32>
    %317 = arith.mulf %312, %316 : vector<2x128xf32>
    %318 = arith.subf %315, %317 : vector<2x128xf32>
    %cst_130 = arith.constant 1.000000e+00 : f32
    %319 = vector.broadcast %cst_130 : f32 to vector<2x128xf32>
    %320 = arith.cmpf ogt, %318, %319 : vector<2x128xf32>
    %321 = arith.extui %320 : vector<2x128xi1> to vector<2x128xi32>
    %322 = arith.sitofp %321 : vector<2x128xi32> to vector<2x128xf32>
    %c34 = arith.constant 34 : index
    %c0_131 = arith.constant 0 : index
    %323 = vector.load %arg9[%c34, %c0_131] : memref<128x128xf32, #tpu.memory_space<vmem>>, vector<2x128xf32>
    tpu.vector_store %arg9[%c34, %c0_131], %322 {strides = array<i32>} : memref<128x128xf32, #tpu.memory_space<vmem>>, vector<2x128xf32>,
    %c34_132 = arith.constant 34 : index
    %c128_133 = arith.constant 128 : index
    %324 = vector.load %arg6[%c34_132, %c128_133] : memref<128x512xf32, #tpu.memory_space<vmem>>, vector<2x128xf32>
    tpu.vector_store %arg6[%c34_132, %c128_133], %318 {strides = array<i32>} : memref<128x512xf32, #tpu.memory_space<vmem>>, vector<2x128xf32>,
    %325 = vector.extract_strided_slice %17 {offsets = [36, 0], sizes = [2, 128], strides = [1, 1]} : vector<128x128xf32> to vector<2x128xf32>
    %cst_134 = arith.constant 1.000000e+00 : f32
    %326 = vector.broadcast %cst_134 : f32 to vector<2x128xf32>
    %327 = arith.cmpf ogt, %318, %326 : vector<2x128xf32>
    %328 = arith.extui %327 : vector<2x128xi1> to vector<2x128xi32>
    %329 = arith.sitofp %328 : vector<2x128xi32> to vector<2x128xf32>
    %cst_135 = arith.constant 5.000000e-01 : f32
    %330 = vector.broadcast %cst_135 : f32 to vector<2x128xf32>
    %331 = arith.mulf %330, %318 : vector<2x128xf32>
    %332 = arith.addf %331, %325 : vector<2x128xf32>
    %cst_136 = arith.constant 1.000000e+00 : f32
    %333 = vector.broadcast %cst_136 : f32 to vector<2x128xf32>
    %334 = arith.mulf %329, %333 : vector<2x128xf32>
    %335 = arith.subf %332, %334 : vector<2x128xf32>
    %cst_137 = arith.constant 1.000000e+00 : f32
    %336 = vector.broadcast %cst_137 : f32 to vector<2x128xf32>
    %337 = arith.cmpf ogt, %335, %336 : vector<2x128xf32>
    %338 = arith.extui %337 : vector<2x128xi1> to vector<2x128xi32>
    %339 = arith.sitofp %338 : vector<2x128xi32> to vector<2x128xf32>
    %c36 = arith.constant 36 : index
    %c0_138 = arith.constant 0 : index
    %340 = vector.load %arg9[%c36, %c0_138] : memref<128x128xf32, #tpu.memory_space<vmem>>, vector<2x128xf32>
    tpu.vector_store %arg9[%c36, %c0_138], %339 {strides = array<i32>} : memref<128x128xf32, #tpu.memory_space<vmem>>, vector<2x128xf32>,
    %c36_139 = arith.constant 36 : index
    %c128_140 = arith.constant 128 : index
    %341 = vector.load %arg6[%c36_139, %c128_140] : memref<128x512xf32, #tpu.memory_space<vmem>>, vector<2x128xf32>
    tpu.vector_store %arg6[%c36_139, %c128_140], %335 {strides = array<i32>} : memref<128x512xf32, #tpu.memory_space<vmem>>, vector<2x128xf32>,
    %342 = vector.extract_strided_slice %17 {offsets = [38, 0], sizes = [2, 128], strides = [1, 1]} : vector<128x128xf32> to vector<2x128xf32>
    %cst_141 = arith.constant 1.000000e+00 : f32
    %343 = vector.broadcast %cst_141 : f32 to vector<2x128xf32>
    %344 = arith.cmpf ogt, %335, %343 : vector<2x128xf32>
    %345 = arith.extui %344 : vector<2x128xi1> to vector<2x128xi32>
    %346 = arith.sitofp %345 : vector<2x128xi32> to vector<2x128xf32>
    %cst_142 = arith.constant 5.000000e-01 : f32
    %347 = vector.broadcast %cst_142 : f32 to vector<2x128xf32>
    %348 = arith.mulf %347, %335 : vector<2x128xf32>
    %349 = arith.addf %348, %342 : vector<2x128xf32>
    %cst_143 = arith.constant 1.000000e+00 : f32
    %350 = vector.broadcast %cst_143 : f32 to vector<2x128xf32>
    %351 = arith.mulf %346, %350 : vector<2x128xf32>
    %352 = arith.subf %349, %351 : vector<2x128xf32>
    %cst_144 = arith.constant 1.000000e+00 : f32
    %353 = vector.broadcast %cst_144 : f32 to vector<2x128xf32>
    %354 = arith.cmpf ogt, %352, %353 : vector<2x128xf32>
    %355 = arith.extui %354 : vector<2x128xi1> to vector<2x128xi32>
    %356 = arith.sitofp %355 : vector<2x128xi32> to vector<2x128xf32>
    %c38 = arith.constant 38 : index
    %c0_145 = arith.constant 0 : index
    %357 = vector.load %arg9[%c38, %c0_145] : memref<128x128xf32, #tpu.memory_space<vmem>>, vector<2x128xf32>
    tpu.vector_store %arg9[%c38, %c0_145], %356 {strides = array<i32>} : memref<128x128xf32, #tpu.memory_space<vmem>>, vector<2x128xf32>,
    %c38_146 = arith.constant 38 : index
    %c128_147 = arith.constant 128 : index
    %358 = vector.load %arg6[%c38_146, %c128_147] : memref<128x512xf32, #tpu.memory_space<vmem>>, vector<2x128xf32>
    tpu.vector_store %arg6[%c38_146, %c128_147], %352 {strides = array<i32>} : memref<128x512xf32, #tpu.memory_space<vmem>>, vector<2x128xf32>,
    %359 = vector.extract_strided_slice %17 {offsets = [40, 0], sizes = [2, 128], strides = [1, 1]} : vector<128x128xf32> to vector<2x128xf32>
    %cst_148 = arith.constant 1.000000e+00 : f32
    %360 = vector.broadcast %cst_148 : f32 to vector<2x128xf32>
    %361 = arith.cmpf ogt, %352, %360 : vector<2x128xf32>
    %362 = arith.extui %361 : vector<2x128xi1> to vector<2x128xi32>
    %363 = arith.sitofp %362 : vector<2x128xi32> to vector<2x128xf32>
    %cst_149 = arith.constant 5.000000e-01 : f32
    %364 = vector.broadcast %cst_149 : f32 to vector<2x128xf32>
    %365 = arith.mulf %364, %352 : vector<2x128xf32>
    %366 = arith.addf %365, %359 : vector<2x128xf32>
    %cst_150 = arith.constant 1.000000e+00 : f32
    %367 = vector.broadcast %cst_150 : f32 to vector<2x128xf32>
    %368 = arith.mulf %363, %367 : vector<2x128xf32>
    %369 = arith.subf %366, %368 : vector<2x128xf32>
    %cst_151 = arith.constant 1.000000e+00 : f32
    %370 = vector.broadcast %cst_151 : f32 to vector<2x128xf32>
    %371 = arith.cmpf ogt, %369, %370 : vector<2x128xf32>
    %372 = arith.extui %371 : vector<2x128xi1> to vector<2x128xi32>
    %373 = arith.sitofp %372 : vector<2x128xi32> to vector<2x128xf32>
    %c40 = arith.constant 40 : index
    %c0_152 = arith.constant 0 : index
    %374 = vector.load %arg9[%c40, %c0_152] : memref<128x128xf32, #tpu.memory_space<vmem>>, vector<2x128xf32>
    tpu.vector_store %arg9[%c40, %c0_152], %373 {strides = array<i32>} : memref<128x128xf32, #tpu.memory_space<vmem>>, vector<2x128xf32>,
    %c40_153 = arith.constant 40 : index
    %c128_154 = arith.constant 128 : index
    %375 = vector.load %arg6[%c40_153, %c128_154] : memref<128x512xf32, #tpu.memory_space<vmem>>, vector<2x128xf32>
    tpu.vector_store %arg6[%c40_153, %c128_154], %369 {strides = array<i32>} : memref<128x512xf32, #tpu.memory_space<vmem>>, vector<2x128xf32>,
    %376 = vector.extract_strided_slice %17 {offsets = [42, 0], sizes = [2, 128], strides = [1, 1]} : vector<128x128xf32> to vector<2x128xf32>
    %cst_155 = arith.constant 1.000000e+00 : f32
    %377 = vector.broadcast %cst_155 : f32 to vector<2x128xf32>
    %378 = arith.cmpf ogt, %369, %377 : vector<2x128xf32>
    %379 = arith.extui %378 : vector<2x128xi1> to vector<2x128xi32>
    %380 = arith.sitofp %379 : vector<2x128xi32> to vector<2x128xf32>
    %cst_156 = arith.constant 5.000000e-01 : f32
    %381 = vector.broadcast %cst_156 : f32 to vector<2x128xf32>
    %382 = arith.mulf %381, %369 : vector<2x128xf32>
    %383 = arith.addf %382, %376 : vector<2x128xf32>
    %cst_157 = arith.constant 1.000000e+00 : f32
    %384 = vector.broadcast %cst_157 : f32 to vector<2x128xf32>
    %385 = arith.mulf %380, %384 : vector<2x128xf32>
    %386 = arith.subf %383, %385 : vector<2x128xf32>
    %cst_158 = arith.constant 1.000000e+00 : f32
    %387 = vector.broadcast %cst_158 : f32 to vector<2x128xf32>
    %388 = arith.cmpf ogt, %386, %387 : vector<2x128xf32>
    %389 = arith.extui %388 : vector<2x128xi1> to vector<2x128xi32>
    %390 = arith.sitofp %389 : vector<2x128xi32> to vector<2x128xf32>
    %c42 = arith.constant 42 : index
    %c0_159 = arith.constant 0 : index
    %391 = vector.load %arg9[%c42, %c0_159] : memref<128x128xf32, #tpu.memory_space<vmem>>, vector<2x128xf32>
    tpu.vector_store %arg9[%c42, %c0_159], %390 {strides = array<i32>} : memref<128x128xf32, #tpu.memory_space<vmem>>, vector<2x128xf32>,
    %c42_160 = arith.constant 42 : index
    %c128_161 = arith.constant 128 : index
    %392 = vector.load %arg6[%c42_160, %c128_161] : memref<128x512xf32, #tpu.memory_space<vmem>>, vector<2x128xf32>
    tpu.vector_store %arg6[%c42_160, %c128_161], %386 {strides = array<i32>} : memref<128x512xf32, #tpu.memory_space<vmem>>, vector<2x128xf32>,
    %393 = vector.extract_strided_slice %17 {offsets = [44, 0], sizes = [2, 128], strides = [1, 1]} : vector<128x128xf32> to vector<2x128xf32>
    %cst_162 = arith.constant 1.000000e+00 : f32
    %394 = vector.broadcast %cst_162 : f32 to vector<2x128xf32>
    %395 = arith.cmpf ogt, %386, %394 : vector<2x128xf32>
    %396 = arith.extui %395 : vector<2x128xi1> to vector<2x128xi32>
    %397 = arith.sitofp %396 : vector<2x128xi32> to vector<2x128xf32>
    %cst_163 = arith.constant 5.000000e-01 : f32
    %398 = vector.broadcast %cst_163 : f32 to vector<2x128xf32>
    %399 = arith.mulf %398, %386 : vector<2x128xf32>
    %400 = arith.addf %399, %393 : vector<2x128xf32>
    %cst_164 = arith.constant 1.000000e+00 : f32
    %401 = vector.broadcast %cst_164 : f32 to vector<2x128xf32>
    %402 = arith.mulf %397, %401 : vector<2x128xf32>
    %403 = arith.subf %400, %402 : vector<2x128xf32>
    %cst_165 = arith.constant 1.000000e+00 : f32
    %404 = vector.broadcast %cst_165 : f32 to vector<2x128xf32>
    %405 = arith.cmpf ogt, %403, %404 : vector<2x128xf32>
    %406 = arith.extui %405 : vector<2x128xi1> to vector<2x128xi32>
    %407 = arith.sitofp %406 : vector<2x128xi32> to vector<2x128xf32>
    %c44 = arith.constant 44 : index
    %c0_166 = arith.constant 0 : index
    %408 = vector.load %arg9[%c44, %c0_166] : memref<128x128xf32, #tpu.memory_space<vmem>>, vector<2x128xf32>
    tpu.vector_store %arg9[%c44, %c0_166], %407 {strides = array<i32>} : memref<128x128xf32, #tpu.memory_space<vmem>>, vector<2x128xf32>,
    %c44_167 = arith.constant 44 : index
    %c128_168 = arith.constant 128 : index
    %409 = vector.load %arg6[%c44_167, %c128_168] : memref<128x512xf32, #tpu.memory_space<vmem>>, vector<2x128xf32>
    tpu.vector_store %arg6[%c44_167, %c128_168], %403 {strides = array<i32>} : memref<128x512xf32, #tpu.memory_space<vmem>>, vector<2x128xf32>,
    %410 = vector.extract_strided_slice %17 {offsets = [46, 0], sizes = [2, 128], strides = [1, 1]} : vector<128x128xf32> to vector<2x128xf32>
    %cst_169 = arith.constant 1.000000e+00 : f32
    %411 = vector.broadcast %cst_169 : f32 to vector<2x128xf32>
    %412 = arith.cmpf ogt, %403, %411 : vector<2x128xf32>
    %413 = arith.extui %412 : vector<2x128xi1> to vector<2x128xi32>
    %414 = arith.sitofp %413 : vector<2x128xi32> to vector<2x128xf32>
    %cst_170 = arith.constant 5.000000e-01 : f32
    %415 = vector.broadcast %cst_170 : f32 to vector<2x128xf32>
    %416 = arith.mulf %415, %403 : vector<2x128xf32>
    %417 = arith.addf %416, %410 : vector<2x128xf32>
    %cst_171 = arith.constant 1.000000e+00 : f32
    %418 = vector.broadcast %cst_171 : f32 to vector<2x128xf32>
    %419 = arith.mulf %414, %418 : vector<2x128xf32>
    %420 = arith.subf %417, %419 : vector<2x128xf32>
    %cst_172 = arith.constant 1.000000e+00 : f32
    %421 = vector.broadcast %cst_172 : f32 to vector<2x128xf32>
    %422 = arith.cmpf ogt, %420, %421 : vector<2x128xf32>
    %423 = arith.extui %422 : vector<2x128xi1> to vector<2x128xi32>
    %424 = arith.sitofp %423 : vector<2x128xi32> to vector<2x128xf32>
    %c46 = arith.constant 46 : index
    %c0_173 = arith.constant 0 : index
    %425 = vector.load %arg9[%c46, %c0_173] : memref<128x128xf32, #tpu.memory_space<vmem>>, vector<2x128xf32>
    tpu.vector_store %arg9[%c46, %c0_173], %424 {strides = array<i32>} : memref<128x128xf32, #tpu.memory_space<vmem>>, vector<2x128xf32>,
    %c46_174 = arith.constant 46 : index
    %c128_175 = arith.constant 128 : index
    %426 = vector.load %arg6[%c46_174, %c128_175] : memref<128x512xf32, #tpu.memory_space<vmem>>, vector<2x128xf32>
    tpu.vector_store %arg6[%c46_174, %c128_175], %420 {strides = array<i32>} : memref<128x512xf32, #tpu.memory_space<vmem>>, vector<2x128xf32>,
    %427 = vector.extract_strided_slice %17 {offsets = [48, 0], sizes = [2, 128], strides = [1, 1]} : vector<128x128xf32> to vector<2x128xf32>
    %cst_176 = arith.constant 1.000000e+00 : f32
    %428 = vector.broadcast %cst_176 : f32 to vector<2x128xf32>
    %429 = arith.cmpf ogt, %420, %428 : vector<2x128xf32>
    %430 = arith.extui %429 : vector<2x128xi1> to vector<2x128xi32>
    %431 = arith.sitofp %430 : vector<2x128xi32> to vector<2x128xf32>
    %cst_177 = arith.constant 5.000000e-01 : f32
    %432 = vector.broadcast %cst_177 : f32 to vector<2x128xf32>
    %433 = arith.mulf %432, %420 : vector<2x128xf32>
    %434 = arith.addf %433, %427 : vector<2x128xf32>
    %cst_178 = arith.constant 1.000000e+00 : f32
    %435 = vector.broadcast %cst_178 : f32 to vector<2x128xf32>
    %436 = arith.mulf %431, %435 : vector<2x128xf32>
    %437 = arith.subf %434, %436 : vector<2x128xf32>
    %cst_179 = arith.constant 1.000000e+00 : f32
    %438 = vector.broadcast %cst_179 : f32 to vector<2x128xf32>
    %439 = arith.cmpf ogt, %437, %438 : vector<2x128xf32>
    %440 = arith.extui %439 : vector<2x128xi1> to vector<2x128xi32>
    %441 = arith.sitofp %440 : vector<2x128xi32> to vector<2x128xf32>
    %c48 = arith.constant 48 : index
    %c0_180 = arith.constant 0 : index
    %442 = vector.load %arg9[%c48, %c0_180] : memref<128x128xf32, #tpu.memory_space<vmem>>, vector<2x128xf32>
    tpu.vector_store %arg9[%c48, %c0_180], %441 {strides = array<i32>} : memref<128x128xf32, #tpu.memory_space<vmem>>, vector<2x128xf32>,
    %c48_181 = arith.constant 48 : index
    %c128_182 = arith.constant 128 : index
    %443 = vector.load %arg6[%c48_181, %c128_182] : memref<128x512xf32, #tpu.memory_space<vmem>>, vector<2x128xf32>
    tpu.vector_store %arg6[%c48_181, %c128_182], %437 {strides = array<i32>} : memref<128x512xf32, #tpu.memory_space<vmem>>, vector<2x128xf32>,
    %444 = vector.extract_strided_slice %17 {offsets = [50, 0], sizes = [2, 128], strides = [1, 1]} : vector<128x128xf32> to vector<2x128xf32>
    %cst_183 = arith.constant 1.000000e+00 : f32
    %445 = vector.broadcast %cst_183 : f32 to vector<2x128xf32>
    %446 = arith.cmpf ogt, %437, %445 : vector<2x128xf32>
    %447 = arith.extui %446 : vector<2x128xi1> to vector<2x128xi32>
    %448 = arith.sitofp %447 : vector<2x128xi32> to vector<2x128xf32>
    %cst_184 = arith.constant 5.000000e-01 : f32
    %449 = vector.broadcast %cst_184 : f32 to vector<2x128xf32>
    %450 = arith.mulf %449, %437 : vector<2x128xf32>
    %451 = arith.addf %450, %444 : vector<2x128xf32>
    %cst_185 = arith.constant 1.000000e+00 : f32
    %452 = vector.broadcast %cst_185 : f32 to vector<2x128xf32>
    %453 = arith.mulf %448, %452 : vector<2x128xf32>
    %454 = arith.subf %451, %453 : vector<2x128xf32>
    %cst_186 = arith.constant 1.000000e+00 : f32
    %455 = vector.broadcast %cst_186 : f32 to vector<2x128xf32>
    %456 = arith.cmpf ogt, %454, %455 : vector<2x128xf32>
    %457 = arith.extui %456 : vector<2x128xi1> to vector<2x128xi32>
    %458 = arith.sitofp %457 : vector<2x128xi32> to vector<2x128xf32>
    %c50 = arith.constant 50 : index
    %c0_187 = arith.constant 0 : index
    %459 = vector.load %arg9[%c50, %c0_187] : memref<128x128xf32, #tpu.memory_space<vmem>>, vector<2x128xf32>
    tpu.vector_store %arg9[%c50, %c0_187], %458 {strides = array<i32>} : memref<128x128xf32, #tpu.memory_space<vmem>>, vector<2x128xf32>,
    %c50_188 = arith.constant 50 : index
    %c128_189 = arith.constant 128 : index
    %460 = vector.load %arg6[%c50_188, %c128_189] : memref<128x512xf32, #tpu.memory_space<vmem>>, vector<2x128xf32>
    tpu.vector_store %arg6[%c50_188, %c128_189], %454 {strides = array<i32>} : memref<128x512xf32, #tpu.memory_space<vmem>>, vector<2x128xf32>,
    %461 = vector.extract_strided_slice %17 {offsets = [52, 0], sizes = [2, 128], strides = [1, 1]} : vector<128x128xf32> to vector<2x128xf32>
    %cst_190 = arith.constant 1.000000e+00 : f32
    %462 = vector.broadcast %cst_190 : f32 to vector<2x128xf32>
    %463 = arith.cmpf ogt, %454, %462 : vector<2x128xf32>
    %464 = arith.extui %463 : vector<2x128xi1> to vector<2x128xi32>
    %465 = arith.sitofp %464 : vector<2x128xi32> to vector<2x128xf32>
    %cst_191 = arith.constant 5.000000e-01 : f32
    %466 = vector.broadcast %cst_191 : f32 to vector<2x128xf32>
    %467 = arith.mulf %466, %454 : vector<2x128xf32>
    %468 = arith.addf %467, %461 : vector<2x128xf32>
    %cst_192 = arith.constant 1.000000e+00 : f32
    %469 = vector.broadcast %cst_192 : f32 to vector<2x128xf32>
    %470 = arith.mulf %465, %469 : vector<2x128xf32>
    %471 = arith.subf %468, %470 : vector<2x128xf32>
    %cst_193 = arith.constant 1.000000e+00 : f32
    %472 = vector.broadcast %cst_193 : f32 to vector<2x128xf32>
    %473 = arith.cmpf ogt, %471, %472 : vector<2x128xf32>
    %474 = arith.extui %473 : vector<2x128xi1> to vector<2x128xi32>
    %475 = arith.sitofp %474 : vector<2x128xi32> to vector<2x128xf32>
    %c52 = arith.constant 52 : index
    %c0_194 = arith.constant 0 : index
    %476 = vector.load %arg9[%c52, %c0_194] : memref<128x128xf32, #tpu.memory_space<vmem>>, vector<2x128xf32>
    tpu.vector_store %arg9[%c52, %c0_194], %475 {strides = array<i32>} : memref<128x128xf32, #tpu.memory_space<vmem>>, vector<2x128xf32>,
    %c52_195 = arith.constant 52 : index
    %c128_196 = arith.constant 128 : index
    %477 = vector.load %arg6[%c52_195, %c128_196] : memref<128x512xf32, #tpu.memory_space<vmem>>, vector<2x128xf32>
    tpu.vector_store %arg6[%c52_195, %c128_196], %471 {strides = array<i32>} : memref<128x512xf32, #tpu.memory_space<vmem>>, vector<2x128xf32>,
    %478 = vector.extract_strided_slice %17 {offsets = [54, 0], sizes = [2, 128], strides = [1, 1]} : vector<128x128xf32> to vector<2x128xf32>
    %cst_197 = arith.constant 1.000000e+00 : f32
    %479 = vector.broadcast %cst_197 : f32 to vector<2x128xf32>
    %480 = arith.cmpf ogt, %471, %479 : vector<2x128xf32>
    %481 = arith.extui %480 : vector<2x128xi1> to vector<2x128xi32>
    %482 = arith.sitofp %481 : vector<2x128xi32> to vector<2x128xf32>
    %cst_198 = arith.constant 5.000000e-01 : f32
    %483 = vector.broadcast %cst_198 : f32 to vector<2x128xf32>
    %484 = arith.mulf %483, %471 : vector<2x128xf32>
    %485 = arith.addf %484, %478 : vector<2x128xf32>
    %cst_199 = arith.constant 1.000000e+00 : f32
    %486 = vector.broadcast %cst_199 : f32 to vector<2x128xf32>
    %487 = arith.mulf %482, %486 : vector<2x128xf32>
    %488 = arith.subf %485, %487 : vector<2x128xf32>
    %cst_200 = arith.constant 1.000000e+00 : f32
    %489 = vector.broadcast %cst_200 : f32 to vector<2x128xf32>
    %490 = arith.cmpf ogt, %488, %489 : vector<2x128xf32>
    %491 = arith.extui %490 : vector<2x128xi1> to vector<2x128xi32>
    %492 = arith.sitofp %491 : vector<2x128xi32> to vector<2x128xf32>
    %c54 = arith.constant 54 : index
    %c0_201 = arith.constant 0 : index
    %493 = vector.load %arg9[%c54, %c0_201] : memref<128x128xf32, #tpu.memory_space<vmem>>, vector<2x128xf32>
    tpu.vector_store %arg9[%c54, %c0_201], %492 {strides = array<i32>} : memref<128x128xf32, #tpu.memory_space<vmem>>, vector<2x128xf32>,
    %c54_202 = arith.constant 54 : index
    %c128_203 = arith.constant 128 : index
    %494 = vector.load %arg6[%c54_202, %c128_203] : memref<128x512xf32, #tpu.memory_space<vmem>>, vector<2x128xf32>
    tpu.vector_store %arg6[%c54_202, %c128_203], %488 {strides = array<i32>} : memref<128x512xf32, #tpu.memory_space<vmem>>, vector<2x128xf32>,
    %495 = vector.extract_strided_slice %17 {offsets = [56, 0], sizes = [2, 128], strides = [1, 1]} : vector<128x128xf32> to vector<2x128xf32>
    %cst_204 = arith.constant 1.000000e+00 : f32
    %496 = vector.broadcast %cst_204 : f32 to vector<2x128xf32>
    %497 = arith.cmpf ogt, %488, %496 : vector<2x128xf32>
    %498 = arith.extui %497 : vector<2x128xi1> to vector<2x128xi32>
    %499 = arith.sitofp %498 : vector<2x128xi32> to vector<2x128xf32>
    %cst_205 = arith.constant 5.000000e-01 : f32
    %500 = vector.broadcast %cst_205 : f32 to vector<2x128xf32>
    %501 = arith.mulf %500, %488 : vector<2x128xf32>
    %502 = arith.addf %501, %495 : vector<2x128xf32>
    %cst_206 = arith.constant 1.000000e+00 : f32
    %503 = vector.broadcast %cst_206 : f32 to vector<2x128xf32>
    %504 = arith.mulf %499, %503 : vector<2x128xf32>
    %505 = arith.subf %502, %504 : vector<2x128xf32>
    %cst_207 = arith.constant 1.000000e+00 : f32
    %506 = vector.broadcast %cst_207 : f32 to vector<2x128xf32>
    %507 = arith.cmpf ogt, %505, %506 : vector<2x128xf32>
    %508 = arith.extui %507 : vector<2x128xi1> to vector<2x128xi32>
    %509 = arith.sitofp %508 : vector<2x128xi32> to vector<2x128xf32>
    %c56 = arith.constant 56 : index
    %c0_208 = arith.constant 0 : index
    %510 = vector.load %arg9[%c56, %c0_208] : memref<128x128xf32, #tpu.memory_space<vmem>>, vector<2x128xf32>
    tpu.vector_store %arg9[%c56, %c0_208], %509 {strides = array<i32>} : memref<128x128xf32, #tpu.memory_space<vmem>>, vector<2x128xf32>,
    %c56_209 = arith.constant 56 : index
    %c128_210 = arith.constant 128 : index
    %511 = vector.load %arg6[%c56_209, %c128_210] : memref<128x512xf32, #tpu.memory_space<vmem>>, vector<2x128xf32>
    tpu.vector_store %arg6[%c56_209, %c128_210], %505 {strides = array<i32>} : memref<128x512xf32, #tpu.memory_space<vmem>>, vector<2x128xf32>,
    %512 = vector.extract_strided_slice %17 {offsets = [58, 0], sizes = [2, 128], strides = [1, 1]} : vector<128x128xf32> to vector<2x128xf32>
    %cst_211 = arith.constant 1.000000e+00 : f32
    %513 = vector.broadcast %cst_211 : f32 to vector<2x128xf32>
    %514 = arith.cmpf ogt, %505, %513 : vector<2x128xf32>
    %515 = arith.extui %514 : vector<2x128xi1> to vector<2x128xi32>
    %516 = arith.sitofp %515 : vector<2x128xi32> to vector<2x128xf32>
    %cst_212 = arith.constant 5.000000e-01 : f32
    %517 = vector.broadcast %cst_212 : f32 to vector<2x128xf32>
    %518 = arith.mulf %517, %505 : vector<2x128xf32>
    %519 = arith.addf %518, %512 : vector<2x128xf32>
    %cst_213 = arith.constant 1.000000e+00 : f32
    %520 = vector.broadcast %cst_213 : f32 to vector<2x128xf32>
    %521 = arith.mulf %516, %520 : vector<2x128xf32>
    %522 = arith.subf %519, %521 : vector<2x128xf32>
    %cst_214 = arith.constant 1.000000e+00 : f32
    %523 = vector.broadcast %cst_214 : f32 to vector<2x128xf32>
    %524 = arith.cmpf ogt, %522, %523 : vector<2x128xf32>
    %525 = arith.extui %524 : vector<2x128xi1> to vector<2x128xi32>
    %526 = arith.sitofp %525 : vector<2x128xi32> to vector<2x128xf32>
    %c58 = arith.constant 58 : index
    %c0_215 = arith.constant 0 : index
    %527 = vector.load %arg9[%c58, %c0_215] : memref<128x128xf32, #tpu.memory_space<vmem>>, vector<2x128xf32>
    tpu.vector_store %arg9[%c58, %c0_215], %526 {strides = array<i32>} : memref<128x128xf32, #tpu.memory_space<vmem>>, vector<2x128xf32>,
    %c58_216 = arith.constant 58 : index
    %c128_217 = arith.constant 128 : index
    %528 = vector.load %arg6[%c58_216, %c128_217] : memref<128x512xf32, #tpu.memory_space<vmem>>, vector<2x128xf32>
    tpu.vector_store %arg6[%c58_216, %c128_217], %522 {strides = array<i32>} : memref<128x512xf32, #tpu.memory_space<vmem>>, vector<2x128xf32>,
    %529 = vector.extract_strided_slice %17 {offsets = [60, 0], sizes = [2, 128], strides = [1, 1]} : vector<128x128xf32> to vector<2x128xf32>
    %cst_218 = arith.constant 1.000000e+00 : f32
    %530 = vector.broadcast %cst_218 : f32 to vector<2x128xf32>
    %531 = arith.cmpf ogt, %522, %530 : vector<2x128xf32>
    %532 = arith.extui %531 : vector<2x128xi1> to vector<2x128xi32>
    %533 = arith.sitofp %532 : vector<2x128xi32> to vector<2x128xf32>
    %cst_219 = arith.constant 5.000000e-01 : f32
    %534 = vector.broadcast %cst_219 : f32 to vector<2x128xf32>
    %535 = arith.mulf %534, %522 : vector<2x128xf32>
    %536 = arith.addf %535, %529 : vector<2x128xf32>
    %cst_220 = arith.constant 1.000000e+00 : f32
    %537 = vector.broadcast %cst_220 : f32 to vector<2x128xf32>
    %538 = arith.mulf %533, %537 : vector<2x128xf32>
    %539 = arith.subf %536, %538 : vector<2x128xf32>
    %cst_221 = arith.constant 1.000000e+00 : f32
    %540 = vector.broadcast %cst_221 : f32 to vector<2x128xf32>
    %541 = arith.cmpf ogt, %539, %540 : vector<2x128xf32>
    %542 = arith.extui %541 : vector<2x128xi1> to vector<2x128xi32>
    %543 = arith.sitofp %542 : vector<2x128xi32> to vector<2x128xf32>
    %c60 = arith.constant 60 : index
    %c0_222 = arith.constant 0 : index
    %544 = vector.load %arg9[%c60, %c0_222] : memref<128x128xf32, #tpu.memory_space<vmem>>, vector<2x128xf32>
    tpu.vector_store %arg9[%c60, %c0_222], %543 {strides = array<i32>} : memref<128x128xf32, #tpu.memory_space<vmem>>, vector<2x128xf32>,
    %c60_223 = arith.constant 60 : index
    %c128_224 = arith.constant 128 : index
    %545 = vector.load %arg6[%c60_223, %c128_224] : memref<128x512xf32, #tpu.memory_space<vmem>>, vector<2x128xf32>
    tpu.vector_store %arg6[%c60_223, %c128_224], %539 {strides = array<i32>} : memref<128x512xf32, #tpu.memory_space<vmem>>, vector<2x128xf32>,
    %546 = vector.extract_strided_slice %17 {offsets = [62, 0], sizes = [2, 128], strides = [1, 1]} : vector<128x128xf32> to vector<2x128xf32>
    %cst_225 = arith.constant 1.000000e+00 : f32
    %547 = vector.broadcast %cst_225 : f32 to vector<2x128xf32>
    %548 = arith.cmpf ogt, %539, %547 : vector<2x128xf32>
    %549 = arith.extui %548 : vector<2x128xi1> to vector<2x128xi32>
    %550 = arith.sitofp %549 : vector<2x128xi32> to vector<2x128xf32>
    %cst_226 = arith.constant 5.000000e-01 : f32
    %551 = vector.broadcast %cst_226 : f32 to vector<2x128xf32>
    %552 = arith.mulf %551, %539 : vector<2x128xf32>
    %553 = arith.addf %552, %546 : vector<2x128xf32>
    %cst_227 = arith.constant 1.000000e+00 : f32
    %554 = vector.broadcast %cst_227 : f32 to vector<2x128xf32>
    %555 = arith.mulf %550, %554 : vector<2x128xf32>
    %556 = arith.subf %553, %555 : vector<2x128xf32>
    %cst_228 = arith.constant 1.000000e+00 : f32
    %557 = vector.broadcast %cst_228 : f32 to vector<2x128xf32>
    %558 = arith.cmpf ogt, %556, %557 : vector<2x128xf32>
    %559 = arith.extui %558 : vector<2x128xi1> to vector<2x128xi32>
    %560 = arith.sitofp %559 : vector<2x128xi32> to vector<2x128xf32>
    %c62 = arith.constant 62 : index
    %c0_229 = arith.constant 0 : index
    %561 = vector.load %arg9[%c62, %c0_229] : memref<128x128xf32, #tpu.memory_space<vmem>>, vector<2x128xf32>
    tpu.vector_store %arg9[%c62, %c0_229], %560 {strides = array<i32>} : memref<128x128xf32, #tpu.memory_space<vmem>>, vector<2x128xf32>,
    %c62_230 = arith.constant 62 : index
    %c128_231 = arith.constant 128 : index
    %562 = vector.load %arg6[%c62_230, %c128_231] : memref<128x512xf32, #tpu.memory_space<vmem>>, vector<2x128xf32>
    tpu.vector_store %arg6[%c62_230, %c128_231], %556 {strides = array<i32>} : memref<128x512xf32, #tpu.memory_space<vmem>>, vector<2x128xf32>,
    %563 = vector.extract_strided_slice %17 {offsets = [64, 0], sizes = [2, 128], strides = [1, 1]} : vector<128x128xf32> to vector<2x128xf32>
    %cst_232 = arith.constant 1.000000e+00 : f32
    %564 = vector.broadcast %cst_232 : f32 to vector<2x128xf32>
    %565 = arith.cmpf ogt, %556, %564 : vector<2x128xf32>
    %566 = arith.extui %565 : vector<2x128xi1> to vector<2x128xi32>
    %567 = arith.sitofp %566 : vector<2x128xi32> to vector<2x128xf32>
    %cst_233 = arith.constant 5.000000e-01 : f32
    %568 = vector.broadcast %cst_233 : f32 to vector<2x128xf32>
    %569 = arith.mulf %568, %556 : vector<2x128xf32>
    %570 = arith.addf %569, %563 : vector<2x128xf32>
    %cst_234 = arith.constant 1.000000e+00 : f32
    %571 = vector.broadcast %cst_234 : f32 to vector<2x128xf32>
    %572 = arith.mulf %567, %571 : vector<2x128xf32>
    %573 = arith.subf %570, %572 : vector<2x128xf32>
    %cst_235 = arith.constant 1.000000e+00 : f32
    %574 = vector.broadcast %cst_235 : f32 to vector<2x128xf32>
    %575 = arith.cmpf ogt, %573, %574 : vector<2x128xf32>
    %576 = arith.extui %575 : vector<2x128xi1> to vector<2x128xi32>
    %577 = arith.sitofp %576 : vector<2x128xi32> to vector<2x128xf32>
    %c64 = arith.constant 64 : index
    %c0_236 = arith.constant 0 : index
    %578 = vector.load %arg9[%c64, %c0_236] : memref<128x128xf32, #tpu.memory_space<vmem>>, vector<2x128xf32>
    tpu.vector_store %arg9[%c64, %c0_236], %577 {strides = array<i32>} : memref<128x128xf32, #tpu.memory_space<vmem>>, vector<2x128xf32>,
    %c64_237 = arith.constant 64 : index
    %c128_238 = arith.constant 128 : index
    %579 = vector.load %arg6[%c64_237, %c128_238] : memref<128x512xf32, #tpu.memory_space<vmem>>, vector<2x128xf32>
    tpu.vector_store %arg6[%c64_237, %c128_238], %573 {strides = array<i32>} : memref<128x512xf32, #tpu.memory_space<vmem>>, vector<2x128xf32>,
    %580 = vector.extract_strided_slice %17 {offsets = [66, 0], sizes = [2, 128], strides = [1, 1]} : vector<128x128xf32> to vector<2x128xf32>
    %cst_239 = arith.constant 1.000000e+00 : f32
    %581 = vector.broadcast %cst_239 : f32 to vector<2x128xf32>
    %582 = arith.cmpf ogt, %573, %581 : vector<2x128xf32>
    %583 = arith.extui %582 : vector<2x128xi1> to vector<2x128xi32>
    %584 = arith.sitofp %583 : vector<2x128xi32> to vector<2x128xf32>
    %cst_240 = arith.constant 5.000000e-01 : f32
    %585 = vector.broadcast %cst_240 : f32 to vector<2x128xf32>
    %586 = arith.mulf %585, %573 : vector<2x128xf32>
    %587 = arith.addf %586, %580 : vector<2x128xf32>
    %cst_241 = arith.constant 1.000000e+00 : f32
    %588 = vector.broadcast %cst_241 : f32 to vector<2x128xf32>
    %589 = arith.mulf %584, %588 : vector<2x128xf32>
    %590 = arith.subf %587, %589 : vector<2x128xf32>
    %cst_242 = arith.constant 1.000000e+00 : f32
    %591 = vector.broadcast %cst_242 : f32 to vector<2x128xf32>
    %592 = arith.cmpf ogt, %590, %591 : vector<2x128xf32>
    %593 = arith.extui %592 : vector<2x128xi1> to vector<2x128xi32>
    %594 = arith.sitofp %593 : vector<2x128xi32> to vector<2x128xf32>
    %c66 = arith.constant 66 : index
    %c0_243 = arith.constant 0 : index
    %595 = vector.load %arg9[%c66, %c0_243] : memref<128x128xf32, #tpu.memory_space<vmem>>, vector<2x128xf32>
    tpu.vector_store %arg9[%c66, %c0_243], %594 {strides = array<i32>} : memref<128x128xf32, #tpu.memory_space<vmem>>, vector<2x128xf32>,
    %c66_244 = arith.constant 66 : index
    %c128_245 = arith.constant 128 : index
    %596 = vector.load %arg6[%c66_244, %c128_245] : memref<128x512xf32, #tpu.memory_space<vmem>>, vector<2x128xf32>
    tpu.vector_store %arg6[%c66_244, %c128_245], %590 {strides = array<i32>} : memref<128x512xf32, #tpu.memory_space<vmem>>, vector<2x128xf32>,
    %597 = vector.extract_strided_slice %17 {offsets = [68, 0], sizes = [2, 128], strides = [1, 1]} : vector<128x128xf32> to vector<2x128xf32>
    %cst_246 = arith.constant 1.000000e+00 : f32
    %598 = vector.broadcast %cst_246 : f32 to vector<2x128xf32>
    %599 = arith.cmpf ogt, %590, %598 : vector<2x128xf32>
    %600 = arith.extui %599 : vector<2x128xi1> to vector<2x128xi32>
    %601 = arith.sitofp %600 : vector<2x128xi32> to vector<2x128xf32>
    %cst_247 = arith.constant 5.000000e-01 : f32
    %602 = vector.broadcast %cst_247 : f32 to vector<2x128xf32>
    %603 = arith.mulf %602, %590 : vector<2x128xf32>
    %604 = arith.addf %603, %597 : vector<2x128xf32>
    %cst_248 = arith.constant 1.000000e+00 : f32
    %605 = vector.broadcast %cst_248 : f32 to vector<2x128xf32>
    %606 = arith.mulf %601, %605 : vector<2x128xf32>
    %607 = arith.subf %604, %606 : vector<2x128xf32>
    %cst_249 = arith.constant 1.000000e+00 : f32
    %608 = vector.broadcast %cst_249 : f32 to vector<2x128xf32>
    %609 = arith.cmpf ogt, %607, %608 : vector<2x128xf32>
    %610 = arith.extui %609 : vector<2x128xi1> to vector<2x128xi32>
    %611 = arith.sitofp %610 : vector<2x128xi32> to vector<2x128xf32>
    %c68 = arith.constant 68 : index
    %c0_250 = arith.constant 0 : index
    %612 = vector.load %arg9[%c68, %c0_250] : memref<128x128xf32, #tpu.memory_space<vmem>>, vector<2x128xf32>
    tpu.vector_store %arg9[%c68, %c0_250], %611 {strides = array<i32>} : memref<128x128xf32, #tpu.memory_space<vmem>>, vector<2x128xf32>,
    %c68_251 = arith.constant 68 : index
    %c128_252 = arith.constant 128 : index
    %613 = vector.load %arg6[%c68_251, %c128_252] : memref<128x512xf32, #tpu.memory_space<vmem>>, vector<2x128xf32>
    tpu.vector_store %arg6[%c68_251, %c128_252], %607 {strides = array<i32>} : memref<128x512xf32, #tpu.memory_space<vmem>>, vector<2x128xf32>,
    %614 = vector.extract_strided_slice %17 {offsets = [70, 0], sizes = [2, 128], strides = [1, 1]} : vector<128x128xf32> to vector<2x128xf32>
    %cst_253 = arith.constant 1.000000e+00 : f32
    %615 = vector.broadcast %cst_253 : f32 to vector<2x128xf32>
    %616 = arith.cmpf ogt, %607, %615 : vector<2x128xf32>
    %617 = arith.extui %616 : vector<2x128xi1> to vector<2x128xi32>
    %618 = arith.sitofp %617 : vector<2x128xi32> to vector<2x128xf32>
    %cst_254 = arith.constant 5.000000e-01 : f32
    %619 = vector.broadcast %cst_254 : f32 to vector<2x128xf32>
    %620 = arith.mulf %619, %607 : vector<2x128xf32>
    %621 = arith.addf %620, %614 : vector<2x128xf32>
    %cst_255 = arith.constant 1.000000e+00 : f32
    %622 = vector.broadcast %cst_255 : f32 to vector<2x128xf32>
    %623 = arith.mulf %618, %622 : vector<2x128xf32>
    %624 = arith.subf %621, %623 : vector<2x128xf32>
    %cst_256 = arith.constant 1.000000e+00 : f32
    %625 = vector.broadcast %cst_256 : f32 to vector<2x128xf32>
    %626 = arith.cmpf ogt, %624, %625 : vector<2x128xf32>
    %627 = arith.extui %626 : vector<2x128xi1> to vector<2x128xi32>
    %628 = arith.sitofp %627 : vector<2x128xi32> to vector<2x128xf32>
    %c70 = arith.constant 70 : index
    %c0_257 = arith.constant 0 : index
    %629 = vector.load %arg9[%c70, %c0_257] : memref<128x128xf32, #tpu.memory_space<vmem>>, vector<2x128xf32>
    tpu.vector_store %arg9[%c70, %c0_257], %628 {strides = array<i32>} : memref<128x128xf32, #tpu.memory_space<vmem>>, vector<2x128xf32>,
    %c70_258 = arith.constant 70 : index
    %c128_259 = arith.constant 128 : index
    %630 = vector.load %arg6[%c70_258, %c128_259] : memref<128x512xf32, #tpu.memory_space<vmem>>, vector<2x128xf32>
    tpu.vector_store %arg6[%c70_258, %c128_259], %624 {strides = array<i32>} : memref<128x512xf32, #tpu.memory_space<vmem>>, vector<2x128xf32>,
    %631 = vector.extract_strided_slice %17 {offsets = [72, 0], sizes = [2, 128], strides = [1, 1]} : vector<128x128xf32> to vector<2x128xf32>
    %cst_260 = arith.constant 1.000000e+00 : f32
    %632 = vector.broadcast %cst_260 : f32 to vector<2x128xf32>
    %633 = arith.cmpf ogt, %624, %632 : vector<2x128xf32>
    %634 = arith.extui %633 : vector<2x128xi1> to vector<2x128xi32>
    %635 = arith.sitofp %634 : vector<2x128xi32> to vector<2x128xf32>
    %cst_261 = arith.constant 5.000000e-01 : f32
    %636 = vector.broadcast %cst_261 : f32 to vector<2x128xf32>
    %637 = arith.mulf %636, %624 : vector<2x128xf32>
    %638 = arith.addf %637, %631 : vector<2x128xf32>
    %cst_262 = arith.constant 1.000000e+00 : f32
    %639 = vector.broadcast %cst_262 : f32 to vector<2x128xf32>
    %640 = arith.mulf %635, %639 : vector<2x128xf32>
    %641 = arith.subf %638, %640 : vector<2x128xf32>
    %cst_263 = arith.constant 1.000000e+00 : f32
    %642 = vector.broadcast %cst_263 : f32 to vector<2x128xf32>
    %643 = arith.cmpf ogt, %641, %642 : vector<2x128xf32>
    %644 = arith.extui %643 : vector<2x128xi1> to vector<2x128xi32>
    %645 = arith.sitofp %644 : vector<2x128xi32> to vector<2x128xf32>
    %c72 = arith.constant 72 : index
    %c0_264 = arith.constant 0 : index
    %646 = vector.load %arg9[%c72, %c0_264] : memref<128x128xf32, #tpu.memory_space<vmem>>, vector<2x128xf32>
    tpu.vector_store %arg9[%c72, %c0_264], %645 {strides = array<i32>} : memref<128x128xf32, #tpu.memory_space<vmem>>, vector<2x128xf32>,
    %c72_265 = arith.constant 72 : index
    %c128_266 = arith.constant 128 : index
    %647 = vector.load %arg6[%c72_265, %c128_266] : memref<128x512xf32, #tpu.memory_space<vmem>>, vector<2x128xf32>
    tpu.vector_store %arg6[%c72_265, %c128_266], %641 {strides = array<i32>} : memref<128x512xf32, #tpu.memory_space<vmem>>, vector<2x128xf32>,
    %648 = vector.extract_strided_slice %17 {offsets = [74, 0], sizes = [2, 128], strides = [1, 1]} : vector<128x128xf32> to vector<2x128xf32>
    %cst_267 = arith.constant 1.000000e+00 : f32
    %649 = vector.broadcast %cst_267 : f32 to vector<2x128xf32>
    %650 = arith.cmpf ogt, %641, %649 : vector<2x128xf32>
    %651 = arith.extui %650 : vector<2x128xi1> to vector<2x128xi32>
    %652 = arith.sitofp %651 : vector<2x128xi32> to vector<2x128xf32>
    %cst_268 = arith.constant 5.000000e-01 : f32
    %653 = vector.broadcast %cst_268 : f32 to vector<2x128xf32>
    %654 = arith.mulf %653, %641 : vector<2x128xf32>
    %655 = arith.addf %654, %648 : vector<2x128xf32>
    %cst_269 = arith.constant 1.000000e+00 : f32
    %656 = vector.broadcast %cst_269 : f32 to vector<2x128xf32>
    %657 = arith.mulf %652, %656 : vector<2x128xf32>
    %658 = arith.subf %655, %657 : vector<2x128xf32>
    %cst_270 = arith.constant 1.000000e+00 : f32
    %659 = vector.broadcast %cst_270 : f32 to vector<2x128xf32>
    %660 = arith.cmpf ogt, %658, %659 : vector<2x128xf32>
    %661 = arith.extui %660 : vector<2x128xi1> to vector<2x128xi32>
    %662 = arith.sitofp %661 : vector<2x128xi32> to vector<2x128xf32>
    %c74 = arith.constant 74 : index
    %c0_271 = arith.constant 0 : index
    %663 = vector.load %arg9[%c74, %c0_271] : memref<128x128xf32, #tpu.memory_space<vmem>>, vector<2x128xf32>
    tpu.vector_store %arg9[%c74, %c0_271], %662 {strides = array<i32>} : memref<128x128xf32, #tpu.memory_space<vmem>>, vector<2x128xf32>,
    %c74_272 = arith.constant 74 : index
    %c128_273 = arith.constant 128 : index
    %664 = vector.load %arg6[%c74_272, %c128_273] : memref<128x512xf32, #tpu.memory_space<vmem>>, vector<2x128xf32>
    tpu.vector_store %arg6[%c74_272, %c128_273], %658 {strides = array<i32>} : memref<128x512xf32, #tpu.memory_space<vmem>>, vector<2x128xf32>,
    %665 = vector.extract_strided_slice %17 {offsets = [76, 0], sizes = [2, 128], strides = [1, 1]} : vector<128x128xf32> to vector<2x128xf32>
    %cst_274 = arith.constant 1.000000e+00 : f32
    %666 = vector.broadcast %cst_274 : f32 to vector<2x128xf32>
    %667 = arith.cmpf ogt, %658, %666 : vector<2x128xf32>
    %668 = arith.extui %667 : vector<2x128xi1> to vector<2x128xi32>
    %669 = arith.sitofp %668 : vector<2x128xi32> to vector<2x128xf32>
    %cst_275 = arith.constant 5.000000e-01 : f32
    %670 = vector.broadcast %cst_275 : f32 to vector<2x128xf32>
    %671 = arith.mulf %670, %658 : vector<2x128xf32>
    %672 = arith.addf %671, %665 : vector<2x128xf32>
    %cst_276 = arith.constant 1.000000e+00 : f32
    %673 = vector.broadcast %cst_276 : f32 to vector<2x128xf32>
    %674 = arith.mulf %669, %673 : vector<2x128xf32>
    %675 = arith.subf %672, %674 : vector<2x128xf32>
    %cst_277 = arith.constant 1.000000e+00 : f32
    %676 = vector.broadcast %cst_277 : f32 to vector<2x128xf32>
    %677 = arith.cmpf ogt, %675, %676 : vector<2x128xf32>
    %678 = arith.extui %677 : vector<2x128xi1> to vector<2x128xi32>
    %679 = arith.sitofp %678 : vector<2x128xi32> to vector<2x128xf32>
    %c76 = arith.constant 76 : index
    %c0_278 = arith.constant 0 : index
    %680 = vector.load %arg9[%c76, %c0_278] : memref<128x128xf32, #tpu.memory_space<vmem>>, vector<2x128xf32>
    tpu.vector_store %arg9[%c76, %c0_278], %679 {strides = array<i32>} : memref<128x128xf32, #tpu.memory_space<vmem>>, vector<2x128xf32>,
    %c76_279 = arith.constant 76 : index
    %c128_280 = arith.constant 128 : index
    %681 = vector.load %arg6[%c76_279, %c128_280] : memref<128x512xf32, #tpu.memory_space<vmem>>, vector<2x128xf32>
    tpu.vector_store %arg6[%c76_279, %c128_280], %675 {strides = array<i32>} : memref<128x512xf32, #tpu.memory_space<vmem>>, vector<2x128xf32>,
    %682 = vector.extract_strided_slice %17 {offsets = [78, 0], sizes = [2, 128], strides = [1, 1]} : vector<128x128xf32> to vector<2x128xf32>
    %cst_281 = arith.constant 1.000000e+00 : f32
    %683 = vector.broadcast %cst_281 : f32 to vector<2x128xf32>
    %684 = arith.cmpf ogt, %675, %683 : vector<2x128xf32>
    %685 = arith.extui %684 : vector<2x128xi1> to vector<2x128xi32>
    %686 = arith.sitofp %685 : vector<2x128xi32> to vector<2x128xf32>
    %cst_282 = arith.constant 5.000000e-01 : f32
    %687 = vector.broadcast %cst_282 : f32 to vector<2x128xf32>
    %688 = arith.mulf %687, %675 : vector<2x128xf32>
    %689 = arith.addf %688, %682 : vector<2x128xf32>
    %cst_283 = arith.constant 1.000000e+00 : f32
    %690 = vector.broadcast %cst_283 : f32 to vector<2x128xf32>
    %691 = arith.mulf %686, %690 : vector<2x128xf32>
    %692 = arith.subf %689, %691 : vector<2x128xf32>
    %cst_284 = arith.constant 1.000000e+00 : f32
    %693 = vector.broadcast %cst_284 : f32 to vector<2x128xf32>
    %694 = arith.cmpf ogt, %692, %693 : vector<2x128xf32>
    %695 = arith.extui %694 : vector<2x128xi1> to vector<2x128xi32>
    %696 = arith.sitofp %695 : vector<2x128xi32> to vector<2x128xf32>
    %c78 = arith.constant 78 : index
    %c0_285 = arith.constant 0 : index
    %697 = vector.load %arg9[%c78, %c0_285] : memref<128x128xf32, #tpu.memory_space<vmem>>, vector<2x128xf32>
    tpu.vector_store %arg9[%c78, %c0_285], %696 {strides = array<i32>} : memref<128x128xf32, #tpu.memory_space<vmem>>, vector<2x128xf32>,
    %c78_286 = arith.constant 78 : index
    %c128_287 = arith.constant 128 : index
    %698 = vector.load %arg6[%c78_286, %c128_287] : memref<128x512xf32, #tpu.memory_space<vmem>>, vector<2x128xf32>
    tpu.vector_store %arg6[%c78_286, %c128_287], %692 {strides = array<i32>} : memref<128x512xf32, #tpu.memory_space<vmem>>, vector<2x128xf32>,
    %699 = vector.extract_strided_slice %17 {offsets = [80, 0], sizes = [2, 128], strides = [1, 1]} : vector<128x128xf32> to vector<2x128xf32>
    %cst_288 = arith.constant 1.000000e+00 : f32
    %700 = vector.broadcast %cst_288 : f32 to vector<2x128xf32>
    %701 = arith.cmpf ogt, %692, %700 : vector<2x128xf32>
    %702 = arith.extui %701 : vector<2x128xi1> to vector<2x128xi32>
    %703 = arith.sitofp %702 : vector<2x128xi32> to vector<2x128xf32>
    %cst_289 = arith.constant 5.000000e-01 : f32
    %704 = vector.broadcast %cst_289 : f32 to vector<2x128xf32>
    %705 = arith.mulf %704, %692 : vector<2x128xf32>
    %706 = arith.addf %705, %699 : vector<2x128xf32>
    %cst_290 = arith.constant 1.000000e+00 : f32
    %707 = vector.broadcast %cst_290 : f32 to vector<2x128xf32>
    %708 = arith.mulf %703, %707 : vector<2x128xf32>
    %709 = arith.subf %706, %708 : vector<2x128xf32>
    %cst_291 = arith.constant 1.000000e+00 : f32
    %710 = vector.broadcast %cst_291 : f32 to vector<2x128xf32>
    %711 = arith.cmpf ogt, %709, %710 : vector<2x128xf32>
    %712 = arith.extui %711 : vector<2x128xi1> to vector<2x128xi32>
    %713 = arith.sitofp %712 : vector<2x128xi32> to vector<2x128xf32>
    %c80 = arith.constant 80 : index
    %c0_292 = arith.constant 0 : index
    %714 = vector.load %arg9[%c80, %c0_292] : memref<128x128xf32, #tpu.memory_space<vmem>>, vector<2x128xf32>
    tpu.vector_store %arg9[%c80, %c0_292], %713 {strides = array<i32>} : memref<128x128xf32, #tpu.memory_space<vmem>>, vector<2x128xf32>,
    %c80_293 = arith.constant 80 : index
    %c128_294 = arith.constant 128 : index
    %715 = vector.load %arg6[%c80_293, %c128_294] : memref<128x512xf32, #tpu.memory_space<vmem>>, vector<2x128xf32>
    tpu.vector_store %arg6[%c80_293, %c128_294], %709 {strides = array<i32>} : memref<128x512xf32, #tpu.memory_space<vmem>>, vector<2x128xf32>,
    %716 = vector.extract_strided_slice %17 {offsets = [82, 0], sizes = [2, 128], strides = [1, 1]} : vector<128x128xf32> to vector<2x128xf32>
    %cst_295 = arith.constant 1.000000e+00 : f32
    %717 = vector.broadcast %cst_295 : f32 to vector<2x128xf32>
    %718 = arith.cmpf ogt, %709, %717 : vector<2x128xf32>
    %719 = arith.extui %718 : vector<2x128xi1> to vector<2x128xi32>
    %720 = arith.sitofp %719 : vector<2x128xi32> to vector<2x128xf32>
    %cst_296 = arith.constant 5.000000e-01 : f32
    %721 = vector.broadcast %cst_296 : f32 to vector<2x128xf32>
    %722 = arith.mulf %721, %709 : vector<2x128xf32>
    %723 = arith.addf %722, %716 : vector<2x128xf32>
    %cst_297 = arith.constant 1.000000e+00 : f32
    %724 = vector.broadcast %cst_297 : f32 to vector<2x128xf32>
    %725 = arith.mulf %720, %724 : vector<2x128xf32>
    %726 = arith.subf %723, %725 : vector<2x128xf32>
    %cst_298 = arith.constant 1.000000e+00 : f32
    %727 = vector.broadcast %cst_298 : f32 to vector<2x128xf32>
    %728 = arith.cmpf ogt, %726, %727 : vector<2x128xf32>
    %729 = arith.extui %728 : vector<2x128xi1> to vector<2x128xi32>
    %730 = arith.sitofp %729 : vector<2x128xi32> to vector<2x128xf32>
    %c82 = arith.constant 82 : index
    %c0_299 = arith.constant 0 : index
    %731 = vector.load %arg9[%c82, %c0_299] : memref<128x128xf32, #tpu.memory_space<vmem>>, vector<2x128xf32>
    tpu.vector_store %arg9[%c82, %c0_299], %730 {strides = array<i32>} : memref<128x128xf32, #tpu.memory_space<vmem>>, vector<2x128xf32>,
    %c82_300 = arith.constant 82 : index
    %c128_301 = arith.constant 128 : index
    %732 = vector.load %arg6[%c82_300, %c128_301] : memref<128x512xf32, #tpu.memory_space<vmem>>, vector<2x128xf32>
    tpu.vector_store %arg6[%c82_300, %c128_301], %726 {strides = array<i32>} : memref<128x512xf32, #tpu.memory_space<vmem>>, vector<2x128xf32>,
    %733 = vector.extract_strided_slice %17 {offsets = [84, 0], sizes = [2, 128], strides = [1, 1]} : vector<128x128xf32> to vector<2x128xf32>
    %cst_302 = arith.constant 1.000000e+00 : f32
    %734 = vector.broadcast %cst_302 : f32 to vector<2x128xf32>
    %735 = arith.cmpf ogt, %726, %734 : vector<2x128xf32>
    %736 = arith.extui %735 : vector<2x128xi1> to vector<2x128xi32>
    %737 = arith.sitofp %736 : vector<2x128xi32> to vector<2x128xf32>
    %cst_303 = arith.constant 5.000000e-01 : f32
    %738 = vector.broadcast %cst_303 : f32 to vector<2x128xf32>
    %739 = arith.mulf %738, %726 : vector<2x128xf32>
    %740 = arith.addf %739, %733 : vector<2x128xf32>
    %cst_304 = arith.constant 1.000000e+00 : f32
    %741 = vector.broadcast %cst_304 : f32 to vector<2x128xf32>
    %742 = arith.mulf %737, %741 : vector<2x128xf32>
    %743 = arith.subf %740, %742 : vector<2x128xf32>
    %cst_305 = arith.constant 1.000000e+00 : f32
    %744 = vector.broadcast %cst_305 : f32 to vector<2x128xf32>
    %745 = arith.cmpf ogt, %743, %744 : vector<2x128xf32>
    %746 = arith.extui %745 : vector<2x128xi1> to vector<2x128xi32>
    %747 = arith.sitofp %746 : vector<2x128xi32> to vector<2x128xf32>
    %c84 = arith.constant 84 : index
    %c0_306 = arith.constant 0 : index
    %748 = vector.load %arg9[%c84, %c0_306] : memref<128x128xf32, #tpu.memory_space<vmem>>, vector<2x128xf32>
    tpu.vector_store %arg9[%c84, %c0_306], %747 {strides = array<i32>} : memref<128x128xf32, #tpu.memory_space<vmem>>, vector<2x128xf32>,
    %c84_307 = arith.constant 84 : index
    %c128_308 = arith.constant 128 : index
    %749 = vector.load %arg6[%c84_307, %c128_308] : memref<128x512xf32, #tpu.memory_space<vmem>>, vector<2x128xf32>
    tpu.vector_store %arg6[%c84_307, %c128_308], %743 {strides = array<i32>} : memref<128x512xf32, #tpu.memory_space<vmem>>, vector<2x128xf32>,
    %750 = vector.extract_strided_slice %17 {offsets = [86, 0], sizes = [2, 128], strides = [1, 1]} : vector<128x128xf32> to vector<2x128xf32>
    %cst_309 = arith.constant 1.000000e+00 : f32
    %751 = vector.broadcast %cst_309 : f32 to vector<2x128xf32>
    %752 = arith.cmpf ogt, %743, %751 : vector<2x128xf32>
    %753 = arith.extui %752 : vector<2x128xi1> to vector<2x128xi32>
    %754 = arith.sitofp %753 : vector<2x128xi32> to vector<2x128xf32>
    %cst_310 = arith.constant 5.000000e-01 : f32
    %755 = vector.broadcast %cst_310 : f32 to vector<2x128xf32>
    %756 = arith.mulf %755, %743 : vector<2x128xf32>
    %757 = arith.addf %756, %750 : vector<2x128xf32>
    %cst_311 = arith.constant 1.000000e+00 : f32
    %758 = vector.broadcast %cst_311 : f32 to vector<2x128xf32>
    %759 = arith.mulf %754, %758 : vector<2x128xf32>
    %760 = arith.subf %757, %759 : vector<2x128xf32>
    %cst_312 = arith.constant 1.000000e+00 : f32
    %761 = vector.broadcast %cst_312 : f32 to vector<2x128xf32>
    %762 = arith.cmpf ogt, %760, %761 : vector<2x128xf32>
    %763 = arith.extui %762 : vector<2x128xi1> to vector<2x128xi32>
    %764 = arith.sitofp %763 : vector<2x128xi32> to vector<2x128xf32>
    %c86 = arith.constant 86 : index
    %c0_313 = arith.constant 0 : index
    %765 = vector.load %arg9[%c86, %c0_313] : memref<128x128xf32, #tpu.memory_space<vmem>>, vector<2x128xf32>
    tpu.vector_store %arg9[%c86, %c0_313], %764 {strides = array<i32>} : memref<128x128xf32, #tpu.memory_space<vmem>>, vector<2x128xf32>,
    %c86_314 = arith.constant 86 : index
    %c128_315 = arith.constant 128 : index
    %766 = vector.load %arg6[%c86_314, %c128_315] : memref<128x512xf32, #tpu.memory_space<vmem>>, vector<2x128xf32>
    tpu.vector_store %arg6[%c86_314, %c128_315], %760 {strides = array<i32>} : memref<128x512xf32, #tpu.memory_space<vmem>>, vector<2x128xf32>,
    %767 = vector.extract_strided_slice %17 {offsets = [88, 0], sizes = [2, 128], strides = [1, 1]} : vector<128x128xf32> to vector<2x128xf32>
    %cst_316 = arith.constant 1.000000e+00 : f32
    %768 = vector.broadcast %cst_316 : f32 to vector<2x128xf32>
    %769 = arith.cmpf ogt, %760, %768 : vector<2x128xf32>
    %770 = arith.extui %769 : vector<2x128xi1> to vector<2x128xi32>
    %771 = arith.sitofp %770 : vector<2x128xi32> to vector<2x128xf32>
    %cst_317 = arith.constant 5.000000e-01 : f32
    %772 = vector.broadcast %cst_317 : f32 to vector<2x128xf32>
    %773 = arith.mulf %772, %760 : vector<2x128xf32>
    %774 = arith.addf %773, %767 : vector<2x128xf32>
    %cst_318 = arith.constant 1.000000e+00 : f32
    %775 = vector.broadcast %cst_318 : f32 to vector<2x128xf32>
    %776 = arith.mulf %771, %775 : vector<2x128xf32>
    %777 = arith.subf %774, %776 : vector<2x128xf32>
    %cst_319 = arith.constant 1.000000e+00 : f32
    %778 = vector.broadcast %cst_319 : f32 to vector<2x128xf32>
    %779 = arith.cmpf ogt, %777, %778 : vector<2x128xf32>
    %780 = arith.extui %779 : vector<2x128xi1> to vector<2x128xi32>
    %781 = arith.sitofp %780 : vector<2x128xi32> to vector<2x128xf32>
    %c88 = arith.constant 88 : index
    %c0_320 = arith.constant 0 : index
    %782 = vector.load %arg9[%c88, %c0_320] : memref<128x128xf32, #tpu.memory_space<vmem>>, vector<2x128xf32>
    tpu.vector_store %arg9[%c88, %c0_320], %781 {strides = array<i32>} : memref<128x128xf32, #tpu.memory_space<vmem>>, vector<2x128xf32>,
    %c88_321 = arith.constant 88 : index
    %c128_322 = arith.constant 128 : index
    %783 = vector.load %arg6[%c88_321, %c128_322] : memref<128x512xf32, #tpu.memory_space<vmem>>, vector<2x128xf32>
    tpu.vector_store %arg6[%c88_321, %c128_322], %777 {strides = array<i32>} : memref<128x512xf32, #tpu.memory_space<vmem>>, vector<2x128xf32>,
    %784 = vector.extract_strided_slice %17 {offsets = [90, 0], sizes = [2, 128], strides = [1, 1]} : vector<128x128xf32> to vector<2x128xf32>
    %cst_323 = arith.constant 1.000000e+00 : f32
    %785 = vector.broadcast %cst_323 : f32 to vector<2x128xf32>
    %786 = arith.cmpf ogt, %777, %785 : vector<2x128xf32>
    %787 = arith.extui %786 : vector<2x128xi1> to vector<2x128xi32>
    %788 = arith.sitofp %787 : vector<2x128xi32> to vector<2x128xf32>
    %cst_324 = arith.constant 5.000000e-01 : f32
    %789 = vector.broadcast %cst_324 : f32 to vector<2x128xf32>
    %790 = arith.mulf %789, %777 : vector<2x128xf32>
    %791 = arith.addf %790, %784 : vector<2x128xf32>
    %cst_325 = arith.constant 1.000000e+00 : f32
    %792 = vector.broadcast %cst_325 : f32 to vector<2x128xf32>
    %793 = arith.mulf %788, %792 : vector<2x128xf32>
    %794 = arith.subf %791, %793 : vector<2x128xf32>
    %cst_326 = arith.constant 1.000000e+00 : f32
    %795 = vector.broadcast %cst_326 : f32 to vector<2x128xf32>
    %796 = arith.cmpf ogt, %794, %795 : vector<2x128xf32>
    %797 = arith.extui %796 : vector<2x128xi1> to vector<2x128xi32>
    %798 = arith.sitofp %797 : vector<2x128xi32> to vector<2x128xf32>
    %c90 = arith.constant 90 : index
    %c0_327 = arith.constant 0 : index
    %799 = vector.load %arg9[%c90, %c0_327] : memref<128x128xf32, #tpu.memory_space<vmem>>, vector<2x128xf32>
    tpu.vector_store %arg9[%c90, %c0_327], %798 {strides = array<i32>} : memref<128x128xf32, #tpu.memory_space<vmem>>, vector<2x128xf32>,
    %c90_328 = arith.constant 90 : index
    %c128_329 = arith.constant 128 : index
    %800 = vector.load %arg6[%c90_328, %c128_329] : memref<128x512xf32, #tpu.memory_space<vmem>>, vector<2x128xf32>
    tpu.vector_store %arg6[%c90_328, %c128_329], %794 {strides = array<i32>} : memref<128x512xf32, #tpu.memory_space<vmem>>, vector<2x128xf32>,
    %801 = vector.extract_strided_slice %17 {offsets = [92, 0], sizes = [2, 128], strides = [1, 1]} : vector<128x128xf32> to vector<2x128xf32>
    %cst_330 = arith.constant 1.000000e+00 : f32
    %802 = vector.broadcast %cst_330 : f32 to vector<2x128xf32>
    %803 = arith.cmpf ogt, %794, %802 : vector<2x128xf32>
    %804 = arith.extui %803 : vector<2x128xi1> to vector<2x128xi32>
    %805 = arith.sitofp %804 : vector<2x128xi32> to vector<2x128xf32>
    %cst_331 = arith.constant 5.000000e-01 : f32
    %806 = vector.broadcast %cst_331 : f32 to vector<2x128xf32>
    %807 = arith.mulf %806, %794 : vector<2x128xf32>
    %808 = arith.addf %807, %801 : vector<2x128xf32>
    %cst_332 = arith.constant 1.000000e+00 : f32
    %809 = vector.broadcast %cst_332 : f32 to vector<2x128xf32>
    %810 = arith.mulf %805, %809 : vector<2x128xf32>
    %811 = arith.subf %808, %810 : vector<2x128xf32>
    %cst_333 = arith.constant 1.000000e+00 : f32
    %812 = vector.broadcast %cst_333 : f32 to vector<2x128xf32>
    %813 = arith.cmpf ogt, %811, %812 : vector<2x128xf32>
    %814 = arith.extui %813 : vector<2x128xi1> to vector<2x128xi32>
    %815 = arith.sitofp %814 : vector<2x128xi32> to vector<2x128xf32>
    %c92 = arith.constant 92 : index
    %c0_334 = arith.constant 0 : index
    %816 = vector.load %arg9[%c92, %c0_334] : memref<128x128xf32, #tpu.memory_space<vmem>>, vector<2x128xf32>
    tpu.vector_store %arg9[%c92, %c0_334], %815 {strides = array<i32>} : memref<128x128xf32, #tpu.memory_space<vmem>>, vector<2x128xf32>,
    %c92_335 = arith.constant 92 : index
    %c128_336 = arith.constant 128 : index
    %817 = vector.load %arg6[%c92_335, %c128_336] : memref<128x512xf32, #tpu.memory_space<vmem>>, vector<2x128xf32>
    tpu.vector_store %arg6[%c92_335, %c128_336], %811 {strides = array<i32>} : memref<128x512xf32, #tpu.memory_space<vmem>>, vector<2x128xf32>,
    %818 = vector.extract_strided_slice %17 {offsets = [94, 0], sizes = [2, 128], strides = [1, 1]} : vector<128x128xf32> to vector<2x128xf32>
    %cst_337 = arith.constant 1.000000e+00 : f32
    %819 = vector.broadcast %cst_337 : f32 to vector<2x128xf32>
    %820 = arith.cmpf ogt, %811, %819 : vector<2x128xf32>
    %821 = arith.extui %820 : vector<2x128xi1> to vector<2x128xi32>
    %822 = arith.sitofp %821 : vector<2x128xi32> to vector<2x128xf32>
    %cst_338 = arith.constant 5.000000e-01 : f32
    %823 = vector.broadcast %cst_338 : f32 to vector<2x128xf32>
    %824 = arith.mulf %823, %811 : vector<2x128xf32>
    %825 = arith.addf %824, %818 : vector<2x128xf32>
    %cst_339 = arith.constant 1.000000e+00 : f32
    %826 = vector.broadcast %cst_339 : f32 to vector<2x128xf32>
    %827 = arith.mulf %822, %826 : vector<2x128xf32>
    %828 = arith.subf %825, %827 : vector<2x128xf32>
    %cst_340 = arith.constant 1.000000e+00 : f32
    %829 = vector.broadcast %cst_340 : f32 to vector<2x128xf32>
    %830 = arith.cmpf ogt, %828, %829 : vector<2x128xf32>
    %831 = arith.extui %830 : vector<2x128xi1> to vector<2x128xi32>
    %832 = arith.sitofp %831 : vector<2x128xi32> to vector<2x128xf32>
    %c94 = arith.constant 94 : index
    %c0_341 = arith.constant 0 : index
    %833 = vector.load %arg9[%c94, %c0_341] : memref<128x128xf32, #tpu.memory_space<vmem>>, vector<2x128xf32>
    tpu.vector_store %arg9[%c94, %c0_341], %832 {strides = array<i32>} : memref<128x128xf32, #tpu.memory_space<vmem>>, vector<2x128xf32>,
    %c94_342 = arith.constant 94 : index
    %c128_343 = arith.constant 128 : index
    %834 = vector.load %arg6[%c94_342, %c128_343] : memref<128x512xf32, #tpu.memory_space<vmem>>, vector<2x128xf32>
    tpu.vector_store %arg6[%c94_342, %c128_343], %828 {strides = array<i32>} : memref<128x512xf32, #tpu.memory_space<vmem>>, vector<2x128xf32>,
    %835 = vector.extract_strided_slice %17 {offsets = [96, 0], sizes = [2, 128], strides = [1, 1]} : vector<128x128xf32> to vector<2x128xf32>
    %cst_344 = arith.constant 1.000000e+00 : f32
    %836 = vector.broadcast %cst_344 : f32 to vector<2x128xf32>
    %837 = arith.cmpf ogt, %828, %836 : vector<2x128xf32>
    %838 = arith.extui %837 : vector<2x128xi1> to vector<2x128xi32>
    %839 = arith.sitofp %838 : vector<2x128xi32> to vector<2x128xf32>
    %cst_345 = arith.constant 5.000000e-01 : f32
    %840 = vector.broadcast %cst_345 : f32 to vector<2x128xf32>
    %841 = arith.mulf %840, %828 : vector<2x128xf32>
    %842 = arith.addf %841, %835 : vector<2x128xf32>
    %cst_346 = arith.constant 1.000000e+00 : f32
    %843 = vector.broadcast %cst_346 : f32 to vector<2x128xf32>
    %844 = arith.mulf %839, %843 : vector<2x128xf32>
    %845 = arith.subf %842, %844 : vector<2x128xf32>
    %cst_347 = arith.constant 1.000000e+00 : f32
    %846 = vector.broadcast %cst_347 : f32 to vector<2x128xf32>
    %847 = arith.cmpf ogt, %845, %846 : vector<2x128xf32>
    %848 = arith.extui %847 : vector<2x128xi1> to vector<2x128xi32>
    %849 = arith.sitofp %848 : vector<2x128xi32> to vector<2x128xf32>
    %c96 = arith.constant 96 : index
    %c0_348 = arith.constant 0 : index
    %850 = vector.load %arg9[%c96, %c0_348] : memref<128x128xf32, #tpu.memory_space<vmem>>, vector<2x128xf32>
    tpu.vector_store %arg9[%c96, %c0_348], %849 {strides = array<i32>} : memref<128x128xf32, #tpu.memory_space<vmem>>, vector<2x128xf32>,
    %c96_349 = arith.constant 96 : index
    %c128_350 = arith.constant 128 : index
    %851 = vector.load %arg6[%c96_349, %c128_350] : memref<128x512xf32, #tpu.memory_space<vmem>>, vector<2x128xf32>
    tpu.vector_store %arg6[%c96_349, %c128_350], %845 {strides = array<i32>} : memref<128x512xf32, #tpu.memory_space<vmem>>, vector<2x128xf32>,
    %852 = vector.extract_strided_slice %17 {offsets = [98, 0], sizes = [2, 128], strides = [1, 1]} : vector<128x128xf32> to vector<2x128xf32>
    %cst_351 = arith.constant 1.000000e+00 : f32
    %853 = vector.broadcast %cst_351 : f32 to vector<2x128xf32>
    %854 = arith.cmpf ogt, %845, %853 : vector<2x128xf32>
    %855 = arith.extui %854 : vector<2x128xi1> to vector<2x128xi32>
    %856 = arith.sitofp %855 : vector<2x128xi32> to vector<2x128xf32>
    %cst_352 = arith.constant 5.000000e-01 : f32
    %857 = vector.broadcast %cst_352 : f32 to vector<2x128xf32>
    %858 = arith.mulf %857, %845 : vector<2x128xf32>
    %859 = arith.addf %858, %852 : vector<2x128xf32>
    %cst_353 = arith.constant 1.000000e+00 : f32
    %860 = vector.broadcast %cst_353 : f32 to vector<2x128xf32>
    %861 = arith.mulf %856, %860 : vector<2x128xf32>
    %862 = arith.subf %859, %861 : vector<2x128xf32>
    %cst_354 = arith.constant 1.000000e+00 : f32
    %863 = vector.broadcast %cst_354 : f32 to vector<2x128xf32>
    %864 = arith.cmpf ogt, %862, %863 : vector<2x128xf32>
    %865 = arith.extui %864 : vector<2x128xi1> to vector<2x128xi32>
    %866 = arith.sitofp %865 : vector<2x128xi32> to vector<2x128xf32>
    %c98 = arith.constant 98 : index
    %c0_355 = arith.constant 0 : index
    %867 = vector.load %arg9[%c98, %c0_355] : memref<128x128xf32, #tpu.memory_space<vmem>>, vector<2x128xf32>
    tpu.vector_store %arg9[%c98, %c0_355], %866 {strides = array<i32>} : memref<128x128xf32, #tpu.memory_space<vmem>>, vector<2x128xf32>,
    %c98_356 = arith.constant 98 : index
    %c128_357 = arith.constant 128 : index
    %868 = vector.load %arg6[%c98_356, %c128_357] : memref<128x512xf32, #tpu.memory_space<vmem>>, vector<2x128xf32>
    tpu.vector_store %arg6[%c98_356, %c128_357], %862 {strides = array<i32>} : memref<128x512xf32, #tpu.memory_space<vmem>>, vector<2x128xf32>,
    %869 = vector.extract_strided_slice %17 {offsets = [100, 0], sizes = [2, 128], strides = [1, 1]} : vector<128x128xf32> to vector<2x128xf32>
    %cst_358 = arith.constant 1.000000e+00 : f32
    %870 = vector.broadcast %cst_358 : f32 to vector<2x128xf32>
    %871 = arith.cmpf ogt, %862, %870 : vector<2x128xf32>
    %872 = arith.extui %871 : vector<2x128xi1> to vector<2x128xi32>
    %873 = arith.sitofp %872 : vector<2x128xi32> to vector<2x128xf32>
    %cst_359 = arith.constant 5.000000e-01 : f32
    %874 = vector.broadcast %cst_359 : f32 to vector<2x128xf32>
    %875 = arith.mulf %874, %862 : vector<2x128xf32>
    %876 = arith.addf %875, %869 : vector<2x128xf32>
    %cst_360 = arith.constant 1.000000e+00 : f32
    %877 = vector.broadcast %cst_360 : f32 to vector<2x128xf32>
    %878 = arith.mulf %873, %877 : vector<2x128xf32>
    %879 = arith.subf %876, %878 : vector<2x128xf32>
    %cst_361 = arith.constant 1.000000e+00 : f32
    %880 = vector.broadcast %cst_361 : f32 to vector<2x128xf32>
    %881 = arith.cmpf ogt, %879, %880 : vector<2x128xf32>
    %882 = arith.extui %881 : vector<2x128xi1> to vector<2x128xi32>
    %883 = arith.sitofp %882 : vector<2x128xi32> to vector<2x128xf32>
    %c100 = arith.constant 100 : index
    %c0_362 = arith.constant 0 : index
    %884 = vector.load %arg9[%c100, %c0_362] : memref<128x128xf32, #tpu.memory_space<vmem>>, vector<2x128xf32>
    tpu.vector_store %arg9[%c100, %c0_362], %883 {strides = array<i32>} : memref<128x128xf32, #tpu.memory_space<vmem>>, vector<2x128xf32>,
    %c100_363 = arith.constant 100 : index
    %c128_364 = arith.constant 128 : index
    %885 = vector.load %arg6[%c100_363, %c128_364] : memref<128x512xf32, #tpu.memory_space<vmem>>, vector<2x128xf32>
    tpu.vector_store %arg6[%c100_363, %c128_364], %879 {strides = array<i32>} : memref<128x512xf32, #tpu.memory_space<vmem>>, vector<2x128xf32>,
    %886 = vector.extract_strided_slice %17 {offsets = [102, 0], sizes = [2, 128], strides = [1, 1]} : vector<128x128xf32> to vector<2x128xf32>
    %cst_365 = arith.constant 1.000000e+00 : f32
    %887 = vector.broadcast %cst_365 : f32 to vector<2x128xf32>
    %888 = arith.cmpf ogt, %879, %887 : vector<2x128xf32>
    %889 = arith.extui %888 : vector<2x128xi1> to vector<2x128xi32>
    %890 = arith.sitofp %889 : vector<2x128xi32> to vector<2x128xf32>
    %cst_366 = arith.constant 5.000000e-01 : f32
    %891 = vector.broadcast %cst_366 : f32 to vector<2x128xf32>
    %892 = arith.mulf %891, %879 : vector<2x128xf32>
    %893 = arith.addf %892, %886 : vector<2x128xf32>
    %cst_367 = arith.constant 1.000000e+00 : f32
    %894 = vector.broadcast %cst_367 : f32 to vector<2x128xf32>
    %895 = arith.mulf %890, %894 : vector<2x128xf32>
    %896 = arith.subf %893, %895 : vector<2x128xf32>
    %cst_368 = arith.constant 1.000000e+00 : f32
    %897 = vector.broadcast %cst_368 : f32 to vector<2x128xf32>
    %898 = arith.cmpf ogt, %896, %897 : vector<2x128xf32>
    %899 = arith.extui %898 : vector<2x128xi1> to vector<2x128xi32>
    %900 = arith.sitofp %899 : vector<2x128xi32> to vector<2x128xf32>
    %c102 = arith.constant 102 : index
    %c0_369 = arith.constant 0 : index
    %901 = vector.load %arg9[%c102, %c0_369] : memref<128x128xf32, #tpu.memory_space<vmem>>, vector<2x128xf32>
    tpu.vector_store %arg9[%c102, %c0_369], %900 {strides = array<i32>} : memref<128x128xf32, #tpu.memory_space<vmem>>, vector<2x128xf32>,
    %c102_370 = arith.constant 102 : index
    %c128_371 = arith.constant 128 : index
    %902 = vector.load %arg6[%c102_370, %c128_371] : memref<128x512xf32, #tpu.memory_space<vmem>>, vector<2x128xf32>
    tpu.vector_store %arg6[%c102_370, %c128_371], %896 {strides = array<i32>} : memref<128x512xf32, #tpu.memory_space<vmem>>, vector<2x128xf32>,
    %903 = vector.extract_strided_slice %17 {offsets = [104, 0], sizes = [2, 128], strides = [1, 1]} : vector<128x128xf32> to vector<2x128xf32>
    %cst_372 = arith.constant 1.000000e+00 : f32
    %904 = vector.broadcast %cst_372 : f32 to vector<2x128xf32>
    %905 = arith.cmpf ogt, %896, %904 : vector<2x128xf32>
    %906 = arith.extui %905 : vector<2x128xi1> to vector<2x128xi32>
    %907 = arith.sitofp %906 : vector<2x128xi32> to vector<2x128xf32>
    %cst_373 = arith.constant 5.000000e-01 : f32
    %908 = vector.broadcast %cst_373 : f32 to vector<2x128xf32>
    %909 = arith.mulf %908, %896 : vector<2x128xf32>
    %910 = arith.addf %909, %903 : vector<2x128xf32>
    %cst_374 = arith.constant 1.000000e+00 : f32
    %911 = vector.broadcast %cst_374 : f32 to vector<2x128xf32>
    %912 = arith.mulf %907, %911 : vector<2x128xf32>
    %913 = arith.subf %910, %912 : vector<2x128xf32>
    %cst_375 = arith.constant 1.000000e+00 : f32
    %914 = vector.broadcast %cst_375 : f32 to vector<2x128xf32>
    %915 = arith.cmpf ogt, %913, %914 : vector<2x128xf32>
    %916 = arith.extui %915 : vector<2x128xi1> to vector<2x128xi32>
    %917 = arith.sitofp %916 : vector<2x128xi32> to vector<2x128xf32>
    %c104 = arith.constant 104 : index
    %c0_376 = arith.constant 0 : index
    %918 = vector.load %arg9[%c104, %c0_376] : memref<128x128xf32, #tpu.memory_space<vmem>>, vector<2x128xf32>
    tpu.vector_store %arg9[%c104, %c0_376], %917 {strides = array<i32>} : memref<128x128xf32, #tpu.memory_space<vmem>>, vector<2x128xf32>,
    %c104_377 = arith.constant 104 : index
    %c128_378 = arith.constant 128 : index
    %919 = vector.load %arg6[%c104_377, %c128_378] : memref<128x512xf32, #tpu.memory_space<vmem>>, vector<2x128xf32>
    tpu.vector_store %arg6[%c104_377, %c128_378], %913 {strides = array<i32>} : memref<128x512xf32, #tpu.memory_space<vmem>>, vector<2x128xf32>,
    %920 = vector.extract_strided_slice %17 {offsets = [106, 0], sizes = [2, 128], strides = [1, 1]} : vector<128x128xf32> to vector<2x128xf32>
    %cst_379 = arith.constant 1.000000e+00 : f32
    %921 = vector.broadcast %cst_379 : f32 to vector<2x128xf32>
    %922 = arith.cmpf ogt, %913, %921 : vector<2x128xf32>
    %923 = arith.extui %922 : vector<2x128xi1> to vector<2x128xi32>
    %924 = arith.sitofp %923 : vector<2x128xi32> to vector<2x128xf32>
    %cst_380 = arith.constant 5.000000e-01 : f32
    %925 = vector.broadcast %cst_380 : f32 to vector<2x128xf32>
    %926 = arith.mulf %925, %913 : vector<2x128xf32>
    %927 = arith.addf %926, %920 : vector<2x128xf32>
    %cst_381 = arith.constant 1.000000e+00 : f32
    %928 = vector.broadcast %cst_381 : f32 to vector<2x128xf32>
    %929 = arith.mulf %924, %928 : vector<2x128xf32>
    %930 = arith.subf %927, %929 : vector<2x128xf32>
    %cst_382 = arith.constant 1.000000e+00 : f32
    %931 = vector.broadcast %cst_382 : f32 to vector<2x128xf32>
    %932 = arith.cmpf ogt, %930, %931 : vector<2x128xf32>
    %933 = arith.extui %932 : vector<2x128xi1> to vector<2x128xi32>
    %934 = arith.sitofp %933 : vector<2x128xi32> to vector<2x128xf32>
    %c106 = arith.constant 106 : index
    %c0_383 = arith.constant 0 : index
    %935 = vector.load %arg9[%c106, %c0_383] : memref<128x128xf32, #tpu.memory_space<vmem>>, vector<2x128xf32>
    tpu.vector_store %arg9[%c106, %c0_383], %934 {strides = array<i32>} : memref<128x128xf32, #tpu.memory_space<vmem>>, vector<2x128xf32>,
    %c106_384 = arith.constant 106 : index
    %c128_385 = arith.constant 128 : index
    %936 = vector.load %arg6[%c106_384, %c128_385] : memref<128x512xf32, #tpu.memory_space<vmem>>, vector<2x128xf32>
    tpu.vector_store %arg6[%c106_384, %c128_385], %930 {strides = array<i32>} : memref<128x512xf32, #tpu.memory_space<vmem>>, vector<2x128xf32>,
    %937 = vector.extract_strided_slice %17 {offsets = [108, 0], sizes = [2, 128], strides = [1, 1]} : vector<128x128xf32> to vector<2x128xf32>
    %cst_386 = arith.constant 1.000000e+00 : f32
    %938 = vector.broadcast %cst_386 : f32 to vector<2x128xf32>
    %939 = arith.cmpf ogt, %930, %938 : vector<2x128xf32>
    %940 = arith.extui %939 : vector<2x128xi1> to vector<2x128xi32>
    %941 = arith.sitofp %940 : vector<2x128xi32> to vector<2x128xf32>
    %cst_387 = arith.constant 5.000000e-01 : f32
    %942 = vector.broadcast %cst_387 : f32 to vector<2x128xf32>
    %943 = arith.mulf %942, %930 : vector<2x128xf32>
    %944 = arith.addf %943, %937 : vector<2x128xf32>
    %cst_388 = arith.constant 1.000000e+00 : f32
    %945 = vector.broadcast %cst_388 : f32 to vector<2x128xf32>
    %946 = arith.mulf %941, %945 : vector<2x128xf32>
    %947 = arith.subf %944, %946 : vector<2x128xf32>
    %cst_389 = arith.constant 1.000000e+00 : f32
    %948 = vector.broadcast %cst_389 : f32 to vector<2x128xf32>
    %949 = arith.cmpf ogt, %947, %948 : vector<2x128xf32>
    %950 = arith.extui %949 : vector<2x128xi1> to vector<2x128xi32>
    %951 = arith.sitofp %950 : vector<2x128xi32> to vector<2x128xf32>
    %c108 = arith.constant 108 : index
    %c0_390 = arith.constant 0 : index
    %952 = vector.load %arg9[%c108, %c0_390] : memref<128x128xf32, #tpu.memory_space<vmem>>, vector<2x128xf32>
    tpu.vector_store %arg9[%c108, %c0_390], %951 {strides = array<i32>} : memref<128x128xf32, #tpu.memory_space<vmem>>, vector<2x128xf32>,
    %c108_391 = arith.constant 108 : index
    %c128_392 = arith.constant 128 : index
    %953 = vector.load %arg6[%c108_391, %c128_392] : memref<128x512xf32, #tpu.memory_space<vmem>>, vector<2x128xf32>
    tpu.vector_store %arg6[%c108_391, %c128_392], %947 {strides = array<i32>} : memref<128x512xf32, #tpu.memory_space<vmem>>, vector<2x128xf32>,
    %954 = vector.extract_strided_slice %17 {offsets = [110, 0], sizes = [2, 128], strides = [1, 1]} : vector<128x128xf32> to vector<2x128xf32>
    %cst_393 = arith.constant 1.000000e+00 : f32
    %955 = vector.broadcast %cst_393 : f32 to vector<2x128xf32>
    %956 = arith.cmpf ogt, %947, %955 : vector<2x128xf32>
    %957 = arith.extui %956 : vector<2x128xi1> to vector<2x128xi32>
    %958 = arith.sitofp %957 : vector<2x128xi32> to vector<2x128xf32>
    %cst_394 = arith.constant 5.000000e-01 : f32
    %959 = vector.broadcast %cst_394 : f32 to vector<2x128xf32>
    %960 = arith.mulf %959, %947 : vector<2x128xf32>
    %961 = arith.addf %960, %954 : vector<2x128xf32>
    %cst_395 = arith.constant 1.000000e+00 : f32
    %962 = vector.broadcast %cst_395 : f32 to vector<2x128xf32>
    %963 = arith.mulf %958, %962 : vector<2x128xf32>
    %964 = arith.subf %961, %963 : vector<2x128xf32>
    %cst_396 = arith.constant 1.000000e+00 : f32
    %965 = vector.broadcast %cst_396 : f32 to vector<2x128xf32>
    %966 = arith.cmpf ogt, %964, %965 : vector<2x128xf32>
    %967 = arith.extui %966 : vector<2x128xi1> to vector<2x128xi32>
    %968 = arith.sitofp %967 : vector<2x128xi32> to vector<2x128xf32>
    %c110 = arith.constant 110 : index
    %c0_397 = arith.constant 0 : index
    %969 = vector.load %arg9[%c110, %c0_397] : memref<128x128xf32, #tpu.memory_space<vmem>>, vector<2x128xf32>
    tpu.vector_store %arg9[%c110, %c0_397], %968 {strides = array<i32>} : memref<128x128xf32, #tpu.memory_space<vmem>>, vector<2x128xf32>,
    %c110_398 = arith.constant 110 : index
    %c128_399 = arith.constant 128 : index
    %970 = vector.load %arg6[%c110_398, %c128_399] : memref<128x512xf32, #tpu.memory_space<vmem>>, vector<2x128xf32>
    tpu.vector_store %arg6[%c110_398, %c128_399], %964 {strides = array<i32>} : memref<128x512xf32, #tpu.memory_space<vmem>>, vector<2x128xf32>,
    %971 = vector.extract_strided_slice %17 {offsets = [112, 0], sizes = [2, 128], strides = [1, 1]} : vector<128x128xf32> to vector<2x128xf32>
    %cst_400 = arith.constant 1.000000e+00 : f32
    %972 = vector.broadcast %cst_400 : f32 to vector<2x128xf32>
    %973 = arith.cmpf ogt, %964, %972 : vector<2x128xf32>
    %974 = arith.extui %973 : vector<2x128xi1> to vector<2x128xi32>
    %975 = arith.sitofp %974 : vector<2x128xi32> to vector<2x128xf32>
    %cst_401 = arith.constant 5.000000e-01 : f32
    %976 = vector.broadcast %cst_401 : f32 to vector<2x128xf32>
    %977 = arith.mulf %976, %964 : vector<2x128xf32>
    %978 = arith.addf %977, %971 : vector<2x128xf32>
    %cst_402 = arith.constant 1.000000e+00 : f32
    %979 = vector.broadcast %cst_402 : f32 to vector<2x128xf32>
    %980 = arith.mulf %975, %979 : vector<2x128xf32>
    %981 = arith.subf %978, %980 : vector<2x128xf32>
    %cst_403 = arith.constant 1.000000e+00 : f32
    %982 = vector.broadcast %cst_403 : f32 to vector<2x128xf32>
    %983 = arith.cmpf ogt, %981, %982 : vector<2x128xf32>
    %984 = arith.extui %983 : vector<2x128xi1> to vector<2x128xi32>
    %985 = arith.sitofp %984 : vector<2x128xi32> to vector<2x128xf32>
    %c112 = arith.constant 112 : index
    %c0_404 = arith.constant 0 : index
    %986 = vector.load %arg9[%c112, %c0_404] : memref<128x128xf32, #tpu.memory_space<vmem>>, vector<2x128xf32>
    tpu.vector_store %arg9[%c112, %c0_404], %985 {strides = array<i32>} : memref<128x128xf32, #tpu.memory_space<vmem>>, vector<2x128xf32>,
    %c112_405 = arith.constant 112 : index
    %c128_406 = arith.constant 128 : index
    %987 = vector.load %arg6[%c112_405, %c128_406] : memref<128x512xf32, #tpu.memory_space<vmem>>, vector<2x128xf32>
    tpu.vector_store %arg6[%c112_405, %c128_406], %981 {strides = array<i32>} : memref<128x512xf32, #tpu.memory_space<vmem>>, vector<2x128xf32>,
    %988 = vector.extract_strided_slice %17 {offsets = [114, 0], sizes = [2, 128], strides = [1, 1]} : vector<128x128xf32> to vector<2x128xf32>
    %cst_407 = arith.constant 1.000000e+00 : f32
    %989 = vector.broadcast %cst_407 : f32 to vector<2x128xf32>
    %990 = arith.cmpf ogt, %981, %989 : vector<2x128xf32>
    %991 = arith.extui %990 : vector<2x128xi1> to vector<2x128xi32>
    %992 = arith.sitofp %991 : vector<2x128xi32> to vector<2x128xf32>
    %cst_408 = arith.constant 5.000000e-01 : f32
    %993 = vector.broadcast %cst_408 : f32 to vector<2x128xf32>
    %994 = arith.mulf %993, %981 : vector<2x128xf32>
    %995 = arith.addf %994, %988 : vector<2x128xf32>
    %cst_409 = arith.constant 1.000000e+00 : f32
    %996 = vector.broadcast %cst_409 : f32 to vector<2x128xf32>
    %997 = arith.mulf %992, %996 : vector<2x128xf32>
    %998 = arith.subf %995, %997 : vector<2x128xf32>
    %cst_410 = arith.constant 1.000000e+00 : f32
    %999 = vector.broadcast %cst_410 : f32 to vector<2x128xf32>
    %1000 = arith.cmpf ogt, %998, %999 : vector<2x128xf32>
    %1001 = arith.extui %1000 : vector<2x128xi1> to vector<2x128xi32>
    %1002 = arith.sitofp %1001 : vector<2x128xi32> to vector<2x128xf32>
    %c114 = arith.constant 114 : index
    %c0_411 = arith.constant 0 : index
    %1003 = vector.load %arg9[%c114, %c0_411] : memref<128x128xf32, #tpu.memory_space<vmem>>, vector<2x128xf32>
    tpu.vector_store %arg9[%c114, %c0_411], %1002 {strides = array<i32>} : memref<128x128xf32, #tpu.memory_space<vmem>>, vector<2x128xf32>,
    %c114_412 = arith.constant 114 : index
    %c128_413 = arith.constant 128 : index
    %1004 = vector.load %arg6[%c114_412, %c128_413] : memref<128x512xf32, #tpu.memory_space<vmem>>, vector<2x128xf32>
    tpu.vector_store %arg6[%c114_412, %c128_413], %998 {strides = array<i32>} : memref<128x512xf32, #tpu.memory_space<vmem>>, vector<2x128xf32>,
    %1005 = vector.extract_strided_slice %17 {offsets = [116, 0], sizes = [2, 128], strides = [1, 1]} : vector<128x128xf32> to vector<2x128xf32>
    %cst_414 = arith.constant 1.000000e+00 : f32
    %1006 = vector.broadcast %cst_414 : f32 to vector<2x128xf32>
    %1007 = arith.cmpf ogt, %998, %1006 : vector<2x128xf32>
    %1008 = arith.extui %1007 : vector<2x128xi1> to vector<2x128xi32>
    %1009 = arith.sitofp %1008 : vector<2x128xi32> to vector<2x128xf32>
    %cst_415 = arith.constant 5.000000e-01 : f32
    %1010 = vector.broadcast %cst_415 : f32 to vector<2x128xf32>
    %1011 = arith.mulf %1010, %998 : vector<2x128xf32>
    %1012 = arith.addf %1011, %1005 : vector<2x128xf32>
    %cst_416 = arith.constant 1.000000e+00 : f32
    %1013 = vector.broadcast %cst_416 : f32 to vector<2x128xf32>
    %1014 = arith.mulf %1009, %1013 : vector<2x128xf32>
    %1015 = arith.subf %1012, %1014 : vector<2x128xf32>
    %cst_417 = arith.constant 1.000000e+00 : f32
    %1016 = vector.broadcast %cst_417 : f32 to vector<2x128xf32>
    %1017 = arith.cmpf ogt, %1015, %1016 : vector<2x128xf32>
    %1018 = arith.extui %1017 : vector<2x128xi1> to vector<2x128xi32>
    %1019 = arith.sitofp %1018 : vector<2x128xi32> to vector<2x128xf32>
    %c116 = arith.constant 116 : index
    %c0_418 = arith.constant 0 : index
    %1020 = vector.load %arg9[%c116, %c0_418] : memref<128x128xf32, #tpu.memory_space<vmem>>, vector<2x128xf32>
    tpu.vector_store %arg9[%c116, %c0_418], %1019 {strides = array<i32>} : memref<128x128xf32, #tpu.memory_space<vmem>>, vector<2x128xf32>,
    %c116_419 = arith.constant 116 : index
    %c128_420 = arith.constant 128 : index
    %1021 = vector.load %arg6[%c116_419, %c128_420] : memref<128x512xf32, #tpu.memory_space<vmem>>, vector<2x128xf32>
    tpu.vector_store %arg6[%c116_419, %c128_420], %1015 {strides = array<i32>} : memref<128x512xf32, #tpu.memory_space<vmem>>, vector<2x128xf32>,
    %1022 = vector.extract_strided_slice %17 {offsets = [118, 0], sizes = [2, 128], strides = [1, 1]} : vector<128x128xf32> to vector<2x128xf32>
    %cst_421 = arith.constant 1.000000e+00 : f32
    %1023 = vector.broadcast %cst_421 : f32 to vector<2x128xf32>
    %1024 = arith.cmpf ogt, %1015, %1023 : vector<2x128xf32>
    %1025 = arith.extui %1024 : vector<2x128xi1> to vector<2x128xi32>
    %1026 = arith.sitofp %1025 : vector<2x128xi32> to vector<2x128xf32>
    %cst_422 = arith.constant 5.000000e-01 : f32
    %1027 = vector.broadcast %cst_422 : f32 to vector<2x128xf32>
    %1028 = arith.mulf %1027, %1015 : vector<2x128xf32>
    %1029 = arith.addf %1028, %1022 : vector<2x128xf32>
    %cst_423 = arith.constant 1.000000e+00 : f32
    %1030 = vector.broadcast %cst_423 : f32 to vector<2x128xf32>
    %1031 = arith.mulf %1026, %1030 : vector<2x128xf32>
    %1032 = arith.subf %1029, %1031 : vector<2x128xf32>
    %cst_424 = arith.constant 1.000000e+00 : f32
    %1033 = vector.broadcast %cst_424 : f32 to vector<2x128xf32>
    %1034 = arith.cmpf ogt, %1032, %1033 : vector<2x128xf32>
    %1035 = arith.extui %1034 : vector<2x128xi1> to vector<2x128xi32>
    %1036 = arith.sitofp %1035 : vector<2x128xi32> to vector<2x128xf32>
    %c118 = arith.constant 118 : index
    %c0_425 = arith.constant 0 : index
    %1037 = vector.load %arg9[%c118, %c0_425] : memref<128x128xf32, #tpu.memory_space<vmem>>, vector<2x128xf32>
    tpu.vector_store %arg9[%c118, %c0_425], %1036 {strides = array<i32>} : memref<128x128xf32, #tpu.memory_space<vmem>>, vector<2x128xf32>,
    %c118_426 = arith.constant 118 : index
    %c128_427 = arith.constant 128 : index
    %1038 = vector.load %arg6[%c118_426, %c128_427] : memref<128x512xf32, #tpu.memory_space<vmem>>, vector<2x128xf32>
    tpu.vector_store %arg6[%c118_426, %c128_427], %1032 {strides = array<i32>} : memref<128x512xf32, #tpu.memory_space<vmem>>, vector<2x128xf32>,
    %1039 = vector.extract_strided_slice %17 {offsets = [120, 0], sizes = [2, 128], strides = [1, 1]} : vector<128x128xf32> to vector<2x128xf32>
    %cst_428 = arith.constant 1.000000e+00 : f32
    %1040 = vector.broadcast %cst_428 : f32 to vector<2x128xf32>
    %1041 = arith.cmpf ogt, %1032, %1040 : vector<2x128xf32>
    %1042 = arith.extui %1041 : vector<2x128xi1> to vector<2x128xi32>
    %1043 = arith.sitofp %1042 : vector<2x128xi32> to vector<2x128xf32>
    %cst_429 = arith.constant 5.000000e-01 : f32
    %1044 = vector.broadcast %cst_429 : f32 to vector<2x128xf32>
    %1045 = arith.mulf %1044, %1032 : vector<2x128xf32>
    %1046 = arith.addf %1045, %1039 : vector<2x128xf32>
    %cst_430 = arith.constant 1.000000e+00 : f32
    %1047 = vector.broadcast %cst_430 : f32 to vector<2x128xf32>
    %1048 = arith.mulf %1043, %1047 : vector<2x128xf32>
    %1049 = arith.subf %1046, %1048 : vector<2x128xf32>
    %cst_431 = arith.constant 1.000000e+00 : f32
    %1050 = vector.broadcast %cst_431 : f32 to vector<2x128xf32>
    %1051 = arith.cmpf ogt, %1049, %1050 : vector<2x128xf32>
    %1052 = arith.extui %1051 : vector<2x128xi1> to vector<2x128xi32>
    %1053 = arith.sitofp %1052 : vector<2x128xi32> to vector<2x128xf32>
    %c120 = arith.constant 120 : index
    %c0_432 = arith.constant 0 : index
    %1054 = vector.load %arg9[%c120, %c0_432] : memref<128x128xf32, #tpu.memory_space<vmem>>, vector<2x128xf32>
    tpu.vector_store %arg9[%c120, %c0_432], %1053 {strides = array<i32>} : memref<128x128xf32, #tpu.memory_space<vmem>>, vector<2x128xf32>,
    %c120_433 = arith.constant 120 : index
    %c128_434 = arith.constant 128 : index
    %1055 = vector.load %arg6[%c120_433, %c128_434] : memref<128x512xf32, #tpu.memory_space<vmem>>, vector<2x128xf32>
    tpu.vector_store %arg6[%c120_433, %c128_434], %1049 {strides = array<i32>} : memref<128x512xf32, #tpu.memory_space<vmem>>, vector<2x128xf32>,
    %1056 = vector.extract_strided_slice %17 {offsets = [122, 0], sizes = [2, 128], strides = [1, 1]} : vector<128x128xf32> to vector<2x128xf32>
    %cst_435 = arith.constant 1.000000e+00 : f32
    %1057 = vector.broadcast %cst_435 : f32 to vector<2x128xf32>
    %1058 = arith.cmpf ogt, %1049, %1057 : vector<2x128xf32>
    %1059 = arith.extui %1058 : vector<2x128xi1> to vector<2x128xi32>
    %1060 = arith.sitofp %1059 : vector<2x128xi32> to vector<2x128xf32>
    %cst_436 = arith.constant 5.000000e-01 : f32
    %1061 = vector.broadcast %cst_436 : f32 to vector<2x128xf32>
    %1062 = arith.mulf %1061, %1049 : vector<2x128xf32>
    %1063 = arith.addf %1062, %1056 : vector<2x128xf32>
    %cst_437 = arith.constant 1.000000e+00 : f32
    %1064 = vector.broadcast %cst_437 : f32 to vector<2x128xf32>
    %1065 = arith.mulf %1060, %1064 : vector<2x128xf32>
    %1066 = arith.subf %1063, %1065 : vector<2x128xf32>
    %cst_438 = arith.constant 1.000000e+00 : f32
    %1067 = vector.broadcast %cst_438 : f32 to vector<2x128xf32>
    %1068 = arith.cmpf ogt, %1066, %1067 : vector<2x128xf32>
    %1069 = arith.extui %1068 : vector<2x128xi1> to vector<2x128xi32>
    %1070 = arith.sitofp %1069 : vector<2x128xi32> to vector<2x128xf32>
    %c122 = arith.constant 122 : index
    %c0_439 = arith.constant 0 : index
    %1071 = vector.load %arg9[%c122, %c0_439] : memref<128x128xf32, #tpu.memory_space<vmem>>, vector<2x128xf32>
    tpu.vector_store %arg9[%c122, %c0_439], %1070 {strides = array<i32>} : memref<128x128xf32, #tpu.memory_space<vmem>>, vector<2x128xf32>,
    %c122_440 = arith.constant 122 : index
    %c128_441 = arith.constant 128 : index
    %1072 = vector.load %arg6[%c122_440, %c128_441] : memref<128x512xf32, #tpu.memory_space<vmem>>, vector<2x128xf32>
    tpu.vector_store %arg6[%c122_440, %c128_441], %1066 {strides = array<i32>} : memref<128x512xf32, #tpu.memory_space<vmem>>, vector<2x128xf32>,
    %1073 = vector.extract_strided_slice %17 {offsets = [124, 0], sizes = [2, 128], strides = [1, 1]} : vector<128x128xf32> to vector<2x128xf32>
    %cst_442 = arith.constant 1.000000e+00 : f32
    %1074 = vector.broadcast %cst_442 : f32 to vector<2x128xf32>
    %1075 = arith.cmpf ogt, %1066, %1074 : vector<2x128xf32>
    %1076 = arith.extui %1075 : vector<2x128xi1> to vector<2x128xi32>
    %1077 = arith.sitofp %1076 : vector<2x128xi32> to vector<2x128xf32>
    %cst_443 = arith.constant 5.000000e-01 : f32
    %1078 = vector.broadcast %cst_443 : f32 to vector<2x128xf32>
    %1079 = arith.mulf %1078, %1066 : vector<2x128xf32>
    %1080 = arith.addf %1079, %1073 : vector<2x128xf32>
    %cst_444 = arith.constant 1.000000e+00 : f32
    %1081 = vector.broadcast %cst_444 : f32 to vector<2x128xf32>
    %1082 = arith.mulf %1077, %1081 : vector<2x128xf32>
    %1083 = arith.subf %1080, %1082 : vector<2x128xf32>
    %cst_445 = arith.constant 1.000000e+00 : f32
    %1084 = vector.broadcast %cst_445 : f32 to vector<2x128xf32>
    %1085 = arith.cmpf ogt, %1083, %1084 : vector<2x128xf32>
    %1086 = arith.extui %1085 : vector<2x128xi1> to vector<2x128xi32>
    %1087 = arith.sitofp %1086 : vector<2x128xi32> to vector<2x128xf32>
    %c124 = arith.constant 124 : index
    %c0_446 = arith.constant 0 : index
    %1088 = vector.load %arg9[%c124, %c0_446] : memref<128x128xf32, #tpu.memory_space<vmem>>, vector<2x128xf32>
    tpu.vector_store %arg9[%c124, %c0_446], %1087 {strides = array<i32>} : memref<128x128xf32, #tpu.memory_space<vmem>>, vector<2x128xf32>,
    %c124_447 = arith.constant 124 : index
    %c128_448 = arith.constant 128 : index
    %1089 = vector.load %arg6[%c124_447, %c128_448] : memref<128x512xf32, #tpu.memory_space<vmem>>, vector<2x128xf32>
    tpu.vector_store %arg6[%c124_447, %c128_448], %1083 {strides = array<i32>} : memref<128x512xf32, #tpu.memory_space<vmem>>, vector<2x128xf32>,
    %1090 = vector.extract_strided_slice %17 {offsets = [126, 0], sizes = [2, 128], strides = [1, 1]} : vector<128x128xf32> to vector<2x128xf32>
    %cst_449 = arith.constant 1.000000e+00 : f32
    %1091 = vector.broadcast %cst_449 : f32 to vector<2x128xf32>
    %1092 = arith.cmpf ogt, %1083, %1091 : vector<2x128xf32>
    %1093 = arith.extui %1092 : vector<2x128xi1> to vector<2x128xi32>
    %1094 = arith.sitofp %1093 : vector<2x128xi32> to vector<2x128xf32>
    %cst_450 = arith.constant 5.000000e-01 : f32
    %1095 = vector.broadcast %cst_450 : f32 to vector<2x128xf32>
    %1096 = arith.mulf %1095, %1083 : vector<2x128xf32>
    %1097 = arith.addf %1096, %1090 : vector<2x128xf32>
    %cst_451 = arith.constant 1.000000e+00 : f32
    %1098 = vector.broadcast %cst_451 : f32 to vector<2x128xf32>
    %1099 = arith.mulf %1094, %1098 : vector<2x128xf32>
    %1100 = arith.subf %1097, %1099 : vector<2x128xf32>
    %cst_452 = arith.constant 1.000000e+00 : f32
    %1101 = vector.broadcast %cst_452 : f32 to vector<2x128xf32>
    %1102 = arith.cmpf ogt, %1100, %1101 : vector<2x128xf32>
    %1103 = arith.extui %1102 : vector<2x128xi1> to vector<2x128xi32>
    %1104 = arith.sitofp %1103 : vector<2x128xi32> to vector<2x128xf32>
    %c126 = arith.constant 126 : index
    %c0_453 = arith.constant 0 : index
    %1105 = vector.load %arg9[%c126, %c0_453] : memref<128x128xf32, #tpu.memory_space<vmem>>, vector<2x128xf32>
    tpu.vector_store %arg9[%c126, %c0_453], %1104 {strides = array<i32>} : memref<128x128xf32, #tpu.memory_space<vmem>>, vector<2x128xf32>,
    %c126_454 = arith.constant 126 : index
    %c128_455 = arith.constant 128 : index
    %1106 = vector.load %arg6[%c126_454, %c128_455] : memref<128x512xf32, #tpu.memory_space<vmem>>, vector<2x128xf32>
    tpu.vector_store %arg6[%c126_454, %c128_455], %1100 {strides = array<i32>} : memref<128x512xf32, #tpu.memory_space<vmem>>, vector<2x128xf32>,
    %c0_456 = arith.constant 0 : index
    %c0_457 = arith.constant 0 : index
    %1107 = vector.load %arg7[%c0_456, %c0_457] : memref<2x128xf32, #tpu.memory_space<vmem>>, vector<2x128xf32>
    tpu.vector_store %arg7[%c0_456, %c0_457], %1100 {strides = array<i32>} : memref<2x128xf32, #tpu.memory_space<vmem>>, vector<2x128xf32>,
    %c0_458 = arith.constant 0 : index
    %c0_459 = arith.constant 0 : index
    %1108 = vector.load %arg9[%c0_458, %c0_459] : memref<128x128xf32, #tpu.memory_space<vmem>>, vector<128x128xf32>
    %c0_460 = arith.constant 0 : index
    %c0_461 = arith.constant 0 : index
    %1109 = vector.load %arg6[%c0_460, %c0_461] : memref<128x512xf32, #tpu.memory_space<vmem>>, vector<128x128xf32>
    tpu.vector_store %arg6[%c0_460, %c0_461], %1108 {strides = array<i32>} : memref<128x512xf32, #tpu.memory_space<vmem>>, vector<128x128xf32>,
    %c0_462 = arith.constant 0 : index
    %c0_463 = arith.constant 0 : index
    %1110 = vector.load %arg4[%c0_462, %c0_463] : memref<128x128xf32, #tpu.memory_space<vmem>>, vector<128x128xf32>
    %cst_464 = arith.constant dense<0.000000e+00> : vector<128x128xf32>
    %1111 = tpu.matmul %1108, %1110, %cst_464 {dimension_numbers = #tpu.dot_dimension_numbers<[1], [0], [0], [1], [0, 0, 1, 1], [], []>} : vector<128x128xf32>, vector<128x128xf32>, vector<128x128xf32> -> vector<128x128xf32>
    %c0_465 = arith.constant 0 : index
    %c0_466 = arith.constant 0 : index
    %1112 = vector.load %arg5[%c0_465, %c0_466] : memref<1x128xf32, #tpu.memory_space<vmem>>, vector<1x128xf32>
    %1113 = vector.broadcast %1112 : vector<1x128xf32> to vector<128x128xf32>
    %1114 = arith.addf %1111, %1113 : vector<128x128xf32>
    %c0_467 = arith.constant 0 : index
    %c0_468 = arith.constant 0 : index
    %1115 = vector.load %arg8[%c0_467, %c0_468] : memref<2x128xf32, #tpu.memory_space<vmem>>, vector<2x128xf32>
    %1116 = vector.extract_strided_slice %1114 {offsets = [0, 0], sizes = [2, 128], strides = [1, 1]} : vector<128x128xf32> to vector<2x128xf32>
    %cst_469 = arith.constant 1.000000e+00 : f32
    %1117 = vector.broadcast %cst_469 : f32 to vector<2x128xf32>
    %1118 = arith.cmpf ogt, %1115, %1117 : vector<2x128xf32>
    %1119 = arith.extui %1118 : vector<2x128xi1> to vector<2x128xi32>
    %1120 = arith.sitofp %1119 : vector<2x128xi32> to vector<2x128xf32>
    %cst_470 = arith.constant 5.000000e-01 : f32
    %1121 = vector.broadcast %cst_470 : f32 to vector<2x128xf32>
    %1122 = arith.mulf %1121, %1115 : vector<2x128xf32>
    %1123 = arith.addf %1122, %1116 : vector<2x128xf32>
    %cst_471 = arith.constant 1.000000e+00 : f32
    %1124 = vector.broadcast %cst_471 : f32 to vector<2x128xf32>
    %1125 = arith.mulf %1120, %1124 : vector<2x128xf32>
    %1126 = arith.subf %1123, %1125 : vector<2x128xf32>
    %cst_472 = arith.constant 1.000000e+00 : f32
    %1127 = vector.broadcast %cst_472 : f32 to vector<2x128xf32>
    %1128 = arith.cmpf ogt, %1126, %1127 : vector<2x128xf32>
    %1129 = arith.extui %1128 : vector<2x128xi1> to vector<2x128xi32>
    %1130 = arith.sitofp %1129 : vector<2x128xi32> to vector<2x128xf32>
    %c0_473 = arith.constant 0 : index
    %c256 = arith.constant 256 : index
    %1131 = vector.load %arg6[%c0_473, %c256] : memref<128x512xf32, #tpu.memory_space<vmem>>, vector<2x128xf32>
    tpu.vector_store %arg6[%c0_473, %c256], %1130 {strides = array<i32>} : memref<128x512xf32, #tpu.memory_space<vmem>>, vector<2x128xf32>,
    %c0_474 = arith.constant 0 : index
    %c384 = arith.constant 384 : index
    %1132 = vector.load %arg6[%c0_474, %c384] : memref<128x512xf32, #tpu.memory_space<vmem>>, vector<2x128xf32>
    tpu.vector_store %arg6[%c0_474, %c384], %1126 {strides = array<i32>} : memref<128x512xf32, #tpu.memory_space<vmem>>, vector<2x128xf32>,
    %1133 = vector.extract_strided_slice %1114 {offsets = [2, 0], sizes = [2, 128], strides = [1, 1]} : vector<128x128xf32> to vector<2x128xf32>
    %cst_475 = arith.constant 1.000000e+00 : f32
    %1134 = vector.broadcast %cst_475 : f32 to vector<2x128xf32>
    %1135 = arith.cmpf ogt, %1126, %1134 : vector<2x128xf32>
    %1136 = arith.extui %1135 : vector<2x128xi1> to vector<2x128xi32>
    %1137 = arith.sitofp %1136 : vector<2x128xi32> to vector<2x128xf32>
    %cst_476 = arith.constant 5.000000e-01 : f32
    %1138 = vector.broadcast %cst_476 : f32 to vector<2x128xf32>
    %1139 = arith.mulf %1138, %1126 : vector<2x128xf32>
    %1140 = arith.addf %1139, %1133 : vector<2x128xf32>
    %cst_477 = arith.constant 1.000000e+00 : f32
    %1141 = vector.broadcast %cst_477 : f32 to vector<2x128xf32>
    %1142 = arith.mulf %1137, %1141 : vector<2x128xf32>
    %1143 = arith.subf %1140, %1142 : vector<2x128xf32>
    %cst_478 = arith.constant 1.000000e+00 : f32
    %1144 = vector.broadcast %cst_478 : f32 to vector<2x128xf32>
    %1145 = arith.cmpf ogt, %1143, %1144 : vector<2x128xf32>
    %1146 = arith.extui %1145 : vector<2x128xi1> to vector<2x128xi32>
    %1147 = arith.sitofp %1146 : vector<2x128xi32> to vector<2x128xf32>
    %c2_479 = arith.constant 2 : index
    %c256_480 = arith.constant 256 : index
    %1148 = vector.load %arg6[%c2_479, %c256_480] : memref<128x512xf32, #tpu.memory_space<vmem>>, vector<2x128xf32>
    tpu.vector_store %arg6[%c2_479, %c256_480], %1147 {strides = array<i32>} : memref<128x512xf32, #tpu.memory_space<vmem>>, vector<2x128xf32>,
    %c2_481 = arith.constant 2 : index
    %c384_482 = arith.constant 384 : index
    %1149 = vector.load %arg6[%c2_481, %c384_482] : memref<128x512xf32, #tpu.memory_space<vmem>>, vector<2x128xf32>
    tpu.vector_store %arg6[%c2_481, %c384_482], %1143 {strides = array<i32>} : memref<128x512xf32, #tpu.memory_space<vmem>>, vector<2x128xf32>,
    %1150 = vector.extract_strided_slice %1114 {offsets = [4, 0], sizes = [2, 128], strides = [1, 1]} : vector<128x128xf32> to vector<2x128xf32>
    %cst_483 = arith.constant 1.000000e+00 : f32
    %1151 = vector.broadcast %cst_483 : f32 to vector<2x128xf32>
    %1152 = arith.cmpf ogt, %1143, %1151 : vector<2x128xf32>
    %1153 = arith.extui %1152 : vector<2x128xi1> to vector<2x128xi32>
    %1154 = arith.sitofp %1153 : vector<2x128xi32> to vector<2x128xf32>
    %cst_484 = arith.constant 5.000000e-01 : f32
    %1155 = vector.broadcast %cst_484 : f32 to vector<2x128xf32>
    %1156 = arith.mulf %1155, %1143 : vector<2x128xf32>
    %1157 = arith.addf %1156, %1150 : vector<2x128xf32>
    %cst_485 = arith.constant 1.000000e+00 : f32
    %1158 = vector.broadcast %cst_485 : f32 to vector<2x128xf32>
    %1159 = arith.mulf %1154, %1158 : vector<2x128xf32>
    %1160 = arith.subf %1157, %1159 : vector<2x128xf32>
    %cst_486 = arith.constant 1.000000e+00 : f32
    %1161 = vector.broadcast %cst_486 : f32 to vector<2x128xf32>
    %1162 = arith.cmpf ogt, %1160, %1161 : vector<2x128xf32>
    %1163 = arith.extui %1162 : vector<2x128xi1> to vector<2x128xi32>
    %1164 = arith.sitofp %1163 : vector<2x128xi32> to vector<2x128xf32>
    %c4_487 = arith.constant 4 : index
    %c256_488 = arith.constant 256 : index
    %1165 = vector.load %arg6[%c4_487, %c256_488] : memref<128x512xf32, #tpu.memory_space<vmem>>, vector<2x128xf32>
    tpu.vector_store %arg6[%c4_487, %c256_488], %1164 {strides = array<i32>} : memref<128x512xf32, #tpu.memory_space<vmem>>, vector<2x128xf32>,
    %c4_489 = arith.constant 4 : index
    %c384_490 = arith.constant 384 : index
    %1166 = vector.load %arg6[%c4_489, %c384_490] : memref<128x512xf32, #tpu.memory_space<vmem>>, vector<2x128xf32>
    tpu.vector_store %arg6[%c4_489, %c384_490], %1160 {strides = array<i32>} : memref<128x512xf32, #tpu.memory_space<vmem>>, vector<2x128xf32>,
    %1167 = vector.extract_strided_slice %1114 {offsets = [6, 0], sizes = [2, 128], strides = [1, 1]} : vector<128x128xf32> to vector<2x128xf32>
    %cst_491 = arith.constant 1.000000e+00 : f32
    %1168 = vector.broadcast %cst_491 : f32 to vector<2x128xf32>
    %1169 = arith.cmpf ogt, %1160, %1168 : vector<2x128xf32>
    %1170 = arith.extui %1169 : vector<2x128xi1> to vector<2x128xi32>
    %1171 = arith.sitofp %1170 : vector<2x128xi32> to vector<2x128xf32>
    %cst_492 = arith.constant 5.000000e-01 : f32
    %1172 = vector.broadcast %cst_492 : f32 to vector<2x128xf32>
    %1173 = arith.mulf %1172, %1160 : vector<2x128xf32>
    %1174 = arith.addf %1173, %1167 : vector<2x128xf32>
    %cst_493 = arith.constant 1.000000e+00 : f32
    %1175 = vector.broadcast %cst_493 : f32 to vector<2x128xf32>
    %1176 = arith.mulf %1171, %1175 : vector<2x128xf32>
    %1177 = arith.subf %1174, %1176 : vector<2x128xf32>
    %cst_494 = arith.constant 1.000000e+00 : f32
    %1178 = vector.broadcast %cst_494 : f32 to vector<2x128xf32>
    %1179 = arith.cmpf ogt, %1177, %1178 : vector<2x128xf32>
    %1180 = arith.extui %1179 : vector<2x128xi1> to vector<2x128xi32>
    %1181 = arith.sitofp %1180 : vector<2x128xi32> to vector<2x128xf32>
    %c6_495 = arith.constant 6 : index
    %c256_496 = arith.constant 256 : index
    %1182 = vector.load %arg6[%c6_495, %c256_496] : memref<128x512xf32, #tpu.memory_space<vmem>>, vector<2x128xf32>
    tpu.vector_store %arg6[%c6_495, %c256_496], %1181 {strides = array<i32>} : memref<128x512xf32, #tpu.memory_space<vmem>>, vector<2x128xf32>,
    %c6_497 = arith.constant 6 : index
    %c384_498 = arith.constant 384 : index
    %1183 = vector.load %arg6[%c6_497, %c384_498] : memref<128x512xf32, #tpu.memory_space<vmem>>, vector<2x128xf32>
    tpu.vector_store %arg6[%c6_497, %c384_498], %1177 {strides = array<i32>} : memref<128x512xf32, #tpu.memory_space<vmem>>, vector<2x128xf32>,
    %1184 = vector.extract_strided_slice %1114 {offsets = [8, 0], sizes = [2, 128], strides = [1, 1]} : vector<128x128xf32> to vector<2x128xf32>
    %cst_499 = arith.constant 1.000000e+00 : f32
    %1185 = vector.broadcast %cst_499 : f32 to vector<2x128xf32>
    %1186 = arith.cmpf ogt, %1177, %1185 : vector<2x128xf32>
    %1187 = arith.extui %1186 : vector<2x128xi1> to vector<2x128xi32>
    %1188 = arith.sitofp %1187 : vector<2x128xi32> to vector<2x128xf32>
    %cst_500 = arith.constant 5.000000e-01 : f32
    %1189 = vector.broadcast %cst_500 : f32 to vector<2x128xf32>
    %1190 = arith.mulf %1189, %1177 : vector<2x128xf32>
    %1191 = arith.addf %1190, %1184 : vector<2x128xf32>
    %cst_501 = arith.constant 1.000000e+00 : f32
    %1192 = vector.broadcast %cst_501 : f32 to vector<2x128xf32>
    %1193 = arith.mulf %1188, %1192 : vector<2x128xf32>
    %1194 = arith.subf %1191, %1193 : vector<2x128xf32>
    %cst_502 = arith.constant 1.000000e+00 : f32
    %1195 = vector.broadcast %cst_502 : f32 to vector<2x128xf32>
    %1196 = arith.cmpf ogt, %1194, %1195 : vector<2x128xf32>
    %1197 = arith.extui %1196 : vector<2x128xi1> to vector<2x128xi32>
    %1198 = arith.sitofp %1197 : vector<2x128xi32> to vector<2x128xf32>
    %c8_503 = arith.constant 8 : index
    %c256_504 = arith.constant 256 : index
    %1199 = vector.load %arg6[%c8_503, %c256_504] : memref<128x512xf32, #tpu.memory_space<vmem>>, vector<2x128xf32>
    tpu.vector_store %arg6[%c8_503, %c256_504], %1198 {strides = array<i32>} : memref<128x512xf32, #tpu.memory_space<vmem>>, vector<2x128xf32>,
    %c8_505 = arith.constant 8 : index
    %c384_506 = arith.constant 384 : index
    %1200 = vector.load %arg6[%c8_505, %c384_506] : memref<128x512xf32, #tpu.memory_space<vmem>>, vector<2x128xf32>
    tpu.vector_store %arg6[%c8_505, %c384_506], %1194 {strides = array<i32>} : memref<128x512xf32, #tpu.memory_space<vmem>>, vector<2x128xf32>,
    %1201 = vector.extract_strided_slice %1114 {offsets = [10, 0], sizes = [2, 128], strides = [1, 1]} : vector<128x128xf32> to vector<2x128xf32>
    %cst_507 = arith.constant 1.000000e+00 : f32
    %1202 = vector.broadcast %cst_507 : f32 to vector<2x128xf32>
    %1203 = arith.cmpf ogt, %1194, %1202 : vector<2x128xf32>
    %1204 = arith.extui %1203 : vector<2x128xi1> to vector<2x128xi32>
    %1205 = arith.sitofp %1204 : vector<2x128xi32> to vector<2x128xf32>
    %cst_508 = arith.constant 5.000000e-01 : f32
    %1206 = vector.broadcast %cst_508 : f32 to vector<2x128xf32>
    %1207 = arith.mulf %1206, %1194 : vector<2x128xf32>
    %1208 = arith.addf %1207, %1201 : vector<2x128xf32>
    %cst_509 = arith.constant 1.000000e+00 : f32
    %1209 = vector.broadcast %cst_509 : f32 to vector<2x128xf32>
    %1210 = arith.mulf %1205, %1209 : vector<2x128xf32>
    %1211 = arith.subf %1208, %1210 : vector<2x128xf32>
    %cst_510 = arith.constant 1.000000e+00 : f32
    %1212 = vector.broadcast %cst_510 : f32 to vector<2x128xf32>
    %1213 = arith.cmpf ogt, %1211, %1212 : vector<2x128xf32>
    %1214 = arith.extui %1213 : vector<2x128xi1> to vector<2x128xi32>
    %1215 = arith.sitofp %1214 : vector<2x128xi32> to vector<2x128xf32>
    %c10_511 = arith.constant 10 : index
    %c256_512 = arith.constant 256 : index
    %1216 = vector.load %arg6[%c10_511, %c256_512] : memref<128x512xf32, #tpu.memory_space<vmem>>, vector<2x128xf32>
    tpu.vector_store %arg6[%c10_511, %c256_512], %1215 {strides = array<i32>} : memref<128x512xf32, #tpu.memory_space<vmem>>, vector<2x128xf32>,
    %c10_513 = arith.constant 10 : index
    %c384_514 = arith.constant 384 : index
    %1217 = vector.load %arg6[%c10_513, %c384_514] : memref<128x512xf32, #tpu.memory_space<vmem>>, vector<2x128xf32>
    tpu.vector_store %arg6[%c10_513, %c384_514], %1211 {strides = array<i32>} : memref<128x512xf32, #tpu.memory_space<vmem>>, vector<2x128xf32>,
    %1218 = vector.extract_strided_slice %1114 {offsets = [12, 0], sizes = [2, 128], strides = [1, 1]} : vector<128x128xf32> to vector<2x128xf32>
    %cst_515 = arith.constant 1.000000e+00 : f32
    %1219 = vector.broadcast %cst_515 : f32 to vector<2x128xf32>
    %1220 = arith.cmpf ogt, %1211, %1219 : vector<2x128xf32>
    %1221 = arith.extui %1220 : vector<2x128xi1> to vector<2x128xi32>
    %1222 = arith.sitofp %1221 : vector<2x128xi32> to vector<2x128xf32>
    %cst_516 = arith.constant 5.000000e-01 : f32
    %1223 = vector.broadcast %cst_516 : f32 to vector<2x128xf32>
    %1224 = arith.mulf %1223, %1211 : vector<2x128xf32>
    %1225 = arith.addf %1224, %1218 : vector<2x128xf32>
    %cst_517 = arith.constant 1.000000e+00 : f32
    %1226 = vector.broadcast %cst_517 : f32 to vector<2x128xf32>
    %1227 = arith.mulf %1222, %1226 : vector<2x128xf32>
    %1228 = arith.subf %1225, %1227 : vector<2x128xf32>
    %cst_518 = arith.constant 1.000000e+00 : f32
    %1229 = vector.broadcast %cst_518 : f32 to vector<2x128xf32>
    %1230 = arith.cmpf ogt, %1228, %1229 : vector<2x128xf32>
    %1231 = arith.extui %1230 : vector<2x128xi1> to vector<2x128xi32>
    %1232 = arith.sitofp %1231 : vector<2x128xi32> to vector<2x128xf32>
    %c12_519 = arith.constant 12 : index
    %c256_520 = arith.constant 256 : index
    %1233 = vector.load %arg6[%c12_519, %c256_520] : memref<128x512xf32, #tpu.memory_space<vmem>>, vector<2x128xf32>
    tpu.vector_store %arg6[%c12_519, %c256_520], %1232 {strides = array<i32>} : memref<128x512xf32, #tpu.memory_space<vmem>>, vector<2x128xf32>,
    %c12_521 = arith.constant 12 : index
    %c384_522 = arith.constant 384 : index
    %1234 = vector.load %arg6[%c12_521, %c384_522] : memref<128x512xf32, #tpu.memory_space<vmem>>, vector<2x128xf32>
    tpu.vector_store %arg6[%c12_521, %c384_522], %1228 {strides = array<i32>} : memref<128x512xf32, #tpu.memory_space<vmem>>, vector<2x128xf32>,
    %1235 = vector.extract_strided_slice %1114 {offsets = [14, 0], sizes = [2, 128], strides = [1, 1]} : vector<128x128xf32> to vector<2x128xf32>
    %cst_523 = arith.constant 1.000000e+00 : f32
    %1236 = vector.broadcast %cst_523 : f32 to vector<2x128xf32>
    %1237 = arith.cmpf ogt, %1228, %1236 : vector<2x128xf32>
    %1238 = arith.extui %1237 : vector<2x128xi1> to vector<2x128xi32>
    %1239 = arith.sitofp %1238 : vector<2x128xi32> to vector<2x128xf32>
    %cst_524 = arith.constant 5.000000e-01 : f32
    %1240 = vector.broadcast %cst_524 : f32 to vector<2x128xf32>
    %1241 = arith.mulf %1240, %1228 : vector<2x128xf32>
    %1242 = arith.addf %1241, %1235 : vector<2x128xf32>
    %cst_525 = arith.constant 1.000000e+00 : f32
    %1243 = vector.broadcast %cst_525 : f32 to vector<2x128xf32>
    %1244 = arith.mulf %1239, %1243 : vector<2x128xf32>
    %1245 = arith.subf %1242, %1244 : vector<2x128xf32>
    %cst_526 = arith.constant 1.000000e+00 : f32
    %1246 = vector.broadcast %cst_526 : f32 to vector<2x128xf32>
    %1247 = arith.cmpf ogt, %1245, %1246 : vector<2x128xf32>
    %1248 = arith.extui %1247 : vector<2x128xi1> to vector<2x128xi32>
    %1249 = arith.sitofp %1248 : vector<2x128xi32> to vector<2x128xf32>
    %c14_527 = arith.constant 14 : index
    %c256_528 = arith.constant 256 : index
    %1250 = vector.load %arg6[%c14_527, %c256_528] : memref<128x512xf32, #tpu.memory_space<vmem>>, vector<2x128xf32>
    tpu.vector_store %arg6[%c14_527, %c256_528], %1249 {strides = array<i32>} : memref<128x512xf32, #tpu.memory_space<vmem>>, vector<2x128xf32>,
    %c14_529 = arith.constant 14 : index
    %c384_530 = arith.constant 384 : index
    %1251 = vector.load %arg6[%c14_529, %c384_530] : memref<128x512xf32, #tpu.memory_space<vmem>>, vector<2x128xf32>
    tpu.vector_store %arg6[%c14_529, %c384_530], %1245 {strides = array<i32>} : memref<128x512xf32, #tpu.memory_space<vmem>>, vector<2x128xf32>,
    %1252 = vector.extract_strided_slice %1114 {offsets = [16, 0], sizes = [2, 128], strides = [1, 1]} : vector<128x128xf32> to vector<2x128xf32>
    %cst_531 = arith.constant 1.000000e+00 : f32
    %1253 = vector.broadcast %cst_531 : f32 to vector<2x128xf32>
    %1254 = arith.cmpf ogt, %1245, %1253 : vector<2x128xf32>
    %1255 = arith.extui %1254 : vector<2x128xi1> to vector<2x128xi32>
    %1256 = arith.sitofp %1255 : vector<2x128xi32> to vector<2x128xf32>
    %cst_532 = arith.constant 5.000000e-01 : f32
    %1257 = vector.broadcast %cst_532 : f32 to vector<2x128xf32>
    %1258 = arith.mulf %1257, %1245 : vector<2x128xf32>
    %1259 = arith.addf %1258, %1252 : vector<2x128xf32>
    %cst_533 = arith.constant 1.000000e+00 : f32
    %1260 = vector.broadcast %cst_533 : f32 to vector<2x128xf32>
    %1261 = arith.mulf %1256, %1260 : vector<2x128xf32>
    %1262 = arith.subf %1259, %1261 : vector<2x128xf32>
    %cst_534 = arith.constant 1.000000e+00 : f32
    %1263 = vector.broadcast %cst_534 : f32 to vector<2x128xf32>
    %1264 = arith.cmpf ogt, %1262, %1263 : vector<2x128xf32>
    %1265 = arith.extui %1264 : vector<2x128xi1> to vector<2x128xi32>
    %1266 = arith.sitofp %1265 : vector<2x128xi32> to vector<2x128xf32>
    %c16_535 = arith.constant 16 : index
    %c256_536 = arith.constant 256 : index
    %1267 = vector.load %arg6[%c16_535, %c256_536] : memref<128x512xf32, #tpu.memory_space<vmem>>, vector<2x128xf32>
    tpu.vector_store %arg6[%c16_535, %c256_536], %1266 {strides = array<i32>} : memref<128x512xf32, #tpu.memory_space<vmem>>, vector<2x128xf32>,
    %c16_537 = arith.constant 16 : index
    %c384_538 = arith.constant 384 : index
    %1268 = vector.load %arg6[%c16_537, %c384_538] : memref<128x512xf32, #tpu.memory_space<vmem>>, vector<2x128xf32>
    tpu.vector_store %arg6[%c16_537, %c384_538], %1262 {strides = array<i32>} : memref<128x512xf32, #tpu.memory_space<vmem>>, vector<2x128xf32>,
    %1269 = vector.extract_strided_slice %1114 {offsets = [18, 0], sizes = [2, 128], strides = [1, 1]} : vector<128x128xf32> to vector<2x128xf32>
    %cst_539 = arith.constant 1.000000e+00 : f32
    %1270 = vector.broadcast %cst_539 : f32 to vector<2x128xf32>
    %1271 = arith.cmpf ogt, %1262, %1270 : vector<2x128xf32>
    %1272 = arith.extui %1271 : vector<2x128xi1> to vector<2x128xi32>
    %1273 = arith.sitofp %1272 : vector<2x128xi32> to vector<2x128xf32>
    %cst_540 = arith.constant 5.000000e-01 : f32
    %1274 = vector.broadcast %cst_540 : f32 to vector<2x128xf32>
    %1275 = arith.mulf %1274, %1262 : vector<2x128xf32>
    %1276 = arith.addf %1275, %1269 : vector<2x128xf32>
    %cst_541 = arith.constant 1.000000e+00 : f32
    %1277 = vector.broadcast %cst_541 : f32 to vector<2x128xf32>
    %1278 = arith.mulf %1273, %1277 : vector<2x128xf32>
    %1279 = arith.subf %1276, %1278 : vector<2x128xf32>
    %cst_542 = arith.constant 1.000000e+00 : f32
    %1280 = vector.broadcast %cst_542 : f32 to vector<2x128xf32>
    %1281 = arith.cmpf ogt, %1279, %1280 : vector<2x128xf32>
    %1282 = arith.extui %1281 : vector<2x128xi1> to vector<2x128xi32>
    %1283 = arith.sitofp %1282 : vector<2x128xi32> to vector<2x128xf32>
    %c18_543 = arith.constant 18 : index
    %c256_544 = arith.constant 256 : index
    %1284 = vector.load %arg6[%c18_543, %c256_544] : memref<128x512xf32, #tpu.memory_space<vmem>>, vector<2x128xf32>
    tpu.vector_store %arg6[%c18_543, %c256_544], %1283 {strides = array<i32>} : memref<128x512xf32, #tpu.memory_space<vmem>>, vector<2x128xf32>,
    %c18_545 = arith.constant 18 : index
    %c384_546 = arith.constant 384 : index
    %1285 = vector.load %arg6[%c18_545, %c384_546] : memref<128x512xf32, #tpu.memory_space<vmem>>, vector<2x128xf32>
    tpu.vector_store %arg6[%c18_545, %c384_546], %1279 {strides = array<i32>} : memref<128x512xf32, #tpu.memory_space<vmem>>, vector<2x128xf32>,
    %1286 = vector.extract_strided_slice %1114 {offsets = [20, 0], sizes = [2, 128], strides = [1, 1]} : vector<128x128xf32> to vector<2x128xf32>
    %cst_547 = arith.constant 1.000000e+00 : f32
    %1287 = vector.broadcast %cst_547 : f32 to vector<2x128xf32>
    %1288 = arith.cmpf ogt, %1279, %1287 : vector<2x128xf32>
    %1289 = arith.extui %1288 : vector<2x128xi1> to vector<2x128xi32>
    %1290 = arith.sitofp %1289 : vector<2x128xi32> to vector<2x128xf32>
    %cst_548 = arith.constant 5.000000e-01 : f32
    %1291 = vector.broadcast %cst_548 : f32 to vector<2x128xf32>
    %1292 = arith.mulf %1291, %1279 : vector<2x128xf32>
    %1293 = arith.addf %1292, %1286 : vector<2x128xf32>
    %cst_549 = arith.constant 1.000000e+00 : f32
    %1294 = vector.broadcast %cst_549 : f32 to vector<2x128xf32>
    %1295 = arith.mulf %1290, %1294 : vector<2x128xf32>
    %1296 = arith.subf %1293, %1295 : vector<2x128xf32>
    %cst_550 = arith.constant 1.000000e+00 : f32
    %1297 = vector.broadcast %cst_550 : f32 to vector<2x128xf32>
    %1298 = arith.cmpf ogt, %1296, %1297 : vector<2x128xf32>
    %1299 = arith.extui %1298 : vector<2x128xi1> to vector<2x128xi32>
    %1300 = arith.sitofp %1299 : vector<2x128xi32> to vector<2x128xf32>
    %c20_551 = arith.constant 20 : index
    %c256_552 = arith.constant 256 : index
    %1301 = vector.load %arg6[%c20_551, %c256_552] : memref<128x512xf32, #tpu.memory_space<vmem>>, vector<2x128xf32>
    tpu.vector_store %arg6[%c20_551, %c256_552], %1300 {strides = array<i32>} : memref<128x512xf32, #tpu.memory_space<vmem>>, vector<2x128xf32>,
    %c20_553 = arith.constant 20 : index
    %c384_554 = arith.constant 384 : index
    %1302 = vector.load %arg6[%c20_553, %c384_554] : memref<128x512xf32, #tpu.memory_space<vmem>>, vector<2x128xf32>
    tpu.vector_store %arg6[%c20_553, %c384_554], %1296 {strides = array<i32>} : memref<128x512xf32, #tpu.memory_space<vmem>>, vector<2x128xf32>,
    %1303 = vector.extract_strided_slice %1114 {offsets = [22, 0], sizes = [2, 128], strides = [1, 1]} : vector<128x128xf32> to vector<2x128xf32>
    %cst_555 = arith.constant 1.000000e+00 : f32
    %1304 = vector.broadcast %cst_555 : f32 to vector<2x128xf32>
    %1305 = arith.cmpf ogt, %1296, %1304 : vector<2x128xf32>
    %1306 = arith.extui %1305 : vector<2x128xi1> to vector<2x128xi32>
    %1307 = arith.sitofp %1306 : vector<2x128xi32> to vector<2x128xf32>
    %cst_556 = arith.constant 5.000000e-01 : f32
    %1308 = vector.broadcast %cst_556 : f32 to vector<2x128xf32>
    %1309 = arith.mulf %1308, %1296 : vector<2x128xf32>
    %1310 = arith.addf %1309, %1303 : vector<2x128xf32>
    %cst_557 = arith.constant 1.000000e+00 : f32
    %1311 = vector.broadcast %cst_557 : f32 to vector<2x128xf32>
    %1312 = arith.mulf %1307, %1311 : vector<2x128xf32>
    %1313 = arith.subf %1310, %1312 : vector<2x128xf32>
    %cst_558 = arith.constant 1.000000e+00 : f32
    %1314 = vector.broadcast %cst_558 : f32 to vector<2x128xf32>
    %1315 = arith.cmpf ogt, %1313, %1314 : vector<2x128xf32>
    %1316 = arith.extui %1315 : vector<2x128xi1> to vector<2x128xi32>
    %1317 = arith.sitofp %1316 : vector<2x128xi32> to vector<2x128xf32>
    %c22_559 = arith.constant 22 : index
    %c256_560 = arith.constant 256 : index
    %1318 = vector.load %arg6[%c22_559, %c256_560] : memref<128x512xf32, #tpu.memory_space<vmem>>, vector<2x128xf32>
    tpu.vector_store %arg6[%c22_559, %c256_560], %1317 {strides = array<i32>} : memref<128x512xf32, #tpu.memory_space<vmem>>, vector<2x128xf32>,
    %c22_561 = arith.constant 22 : index
    %c384_562 = arith.constant 384 : index
    %1319 = vector.load %arg6[%c22_561, %c384_562] : memref<128x512xf32, #tpu.memory_space<vmem>>, vector<2x128xf32>
    tpu.vector_store %arg6[%c22_561, %c384_562], %1313 {strides = array<i32>} : memref<128x512xf32, #tpu.memory_space<vmem>>, vector<2x128xf32>,
    %1320 = vector.extract_strided_slice %1114 {offsets = [24, 0], sizes = [2, 128], strides = [1, 1]} : vector<128x128xf32> to vector<2x128xf32>
    %cst_563 = arith.constant 1.000000e+00 : f32
    %1321 = vector.broadcast %cst_563 : f32 to vector<2x128xf32>
    %1322 = arith.cmpf ogt, %1313, %1321 : vector<2x128xf32>
    %1323 = arith.extui %1322 : vector<2x128xi1> to vector<2x128xi32>
    %1324 = arith.sitofp %1323 : vector<2x128xi32> to vector<2x128xf32>
    %cst_564 = arith.constant 5.000000e-01 : f32
    %1325 = vector.broadcast %cst_564 : f32 to vector<2x128xf32>
    %1326 = arith.mulf %1325, %1313 : vector<2x128xf32>
    %1327 = arith.addf %1326, %1320 : vector<2x128xf32>
    %cst_565 = arith.constant 1.000000e+00 : f32
    %1328 = vector.broadcast %cst_565 : f32 to vector<2x128xf32>
    %1329 = arith.mulf %1324, %1328 : vector<2x128xf32>
    %1330 = arith.subf %1327, %1329 : vector<2x128xf32>
    %cst_566 = arith.constant 1.000000e+00 : f32
    %1331 = vector.broadcast %cst_566 : f32 to vector<2x128xf32>
    %1332 = arith.cmpf ogt, %1330, %1331 : vector<2x128xf32>
    %1333 = arith.extui %1332 : vector<2x128xi1> to vector<2x128xi32>
    %1334 = arith.sitofp %1333 : vector<2x128xi32> to vector<2x128xf32>
    %c24_567 = arith.constant 24 : index
    %c256_568 = arith.constant 256 : index
    %1335 = vector.load %arg6[%c24_567, %c256_568] : memref<128x512xf32, #tpu.memory_space<vmem>>, vector<2x128xf32>
    tpu.vector_store %arg6[%c24_567, %c256_568], %1334 {strides = array<i32>} : memref<128x512xf32, #tpu.memory_space<vmem>>, vector<2x128xf32>,
    %c24_569 = arith.constant 24 : index
    %c384_570 = arith.constant 384 : index
    %1336 = vector.load %arg6[%c24_569, %c384_570] : memref<128x512xf32, #tpu.memory_space<vmem>>, vector<2x128xf32>
    tpu.vector_store %arg6[%c24_569, %c384_570], %1330 {strides = array<i32>} : memref<128x512xf32, #tpu.memory_space<vmem>>, vector<2x128xf32>,
    %1337 = vector.extract_strided_slice %1114 {offsets = [26, 0], sizes = [2, 128], strides = [1, 1]} : vector<128x128xf32> to vector<2x128xf32>
    %cst_571 = arith.constant 1.000000e+00 : f32
    %1338 = vector.broadcast %cst_571 : f32 to vector<2x128xf32>
    %1339 = arith.cmpf ogt, %1330, %1338 : vector<2x128xf32>
    %1340 = arith.extui %1339 : vector<2x128xi1> to vector<2x128xi32>
    %1341 = arith.sitofp %1340 : vector<2x128xi32> to vector<2x128xf32>
    %cst_572 = arith.constant 5.000000e-01 : f32
    %1342 = vector.broadcast %cst_572 : f32 to vector<2x128xf32>
    %1343 = arith.mulf %1342, %1330 : vector<2x128xf32>
    %1344 = arith.addf %1343, %1337 : vector<2x128xf32>
    %cst_573 = arith.constant 1.000000e+00 : f32
    %1345 = vector.broadcast %cst_573 : f32 to vector<2x128xf32>
    %1346 = arith.mulf %1341, %1345 : vector<2x128xf32>
    %1347 = arith.subf %1344, %1346 : vector<2x128xf32>
    %cst_574 = arith.constant 1.000000e+00 : f32
    %1348 = vector.broadcast %cst_574 : f32 to vector<2x128xf32>
    %1349 = arith.cmpf ogt, %1347, %1348 : vector<2x128xf32>
    %1350 = arith.extui %1349 : vector<2x128xi1> to vector<2x128xi32>
    %1351 = arith.sitofp %1350 : vector<2x128xi32> to vector<2x128xf32>
    %c26_575 = arith.constant 26 : index
    %c256_576 = arith.constant 256 : index
    %1352 = vector.load %arg6[%c26_575, %c256_576] : memref<128x512xf32, #tpu.memory_space<vmem>>, vector<2x128xf32>
    tpu.vector_store %arg6[%c26_575, %c256_576], %1351 {strides = array<i32>} : memref<128x512xf32, #tpu.memory_space<vmem>>, vector<2x128xf32>,
    %c26_577 = arith.constant 26 : index
    %c384_578 = arith.constant 384 : index
    %1353 = vector.load %arg6[%c26_577, %c384_578] : memref<128x512xf32, #tpu.memory_space<vmem>>, vector<2x128xf32>
    tpu.vector_store %arg6[%c26_577, %c384_578], %1347 {strides = array<i32>} : memref<128x512xf32, #tpu.memory_space<vmem>>, vector<2x128xf32>,
    %1354 = vector.extract_strided_slice %1114 {offsets = [28, 0], sizes = [2, 128], strides = [1, 1]} : vector<128x128xf32> to vector<2x128xf32>
    %cst_579 = arith.constant 1.000000e+00 : f32
    %1355 = vector.broadcast %cst_579 : f32 to vector<2x128xf32>
    %1356 = arith.cmpf ogt, %1347, %1355 : vector<2x128xf32>
    %1357 = arith.extui %1356 : vector<2x128xi1> to vector<2x128xi32>
    %1358 = arith.sitofp %1357 : vector<2x128xi32> to vector<2x128xf32>
    %cst_580 = arith.constant 5.000000e-01 : f32
    %1359 = vector.broadcast %cst_580 : f32 to vector<2x128xf32>
    %1360 = arith.mulf %1359, %1347 : vector<2x128xf32>
    %1361 = arith.addf %1360, %1354 : vector<2x128xf32>
    %cst_581 = arith.constant 1.000000e+00 : f32
    %1362 = vector.broadcast %cst_581 : f32 to vector<2x128xf32>
    %1363 = arith.mulf %1358, %1362 : vector<2x128xf32>
    %1364 = arith.subf %1361, %1363 : vector<2x128xf32>
    %cst_582 = arith.constant 1.000000e+00 : f32
    %1365 = vector.broadcast %cst_582 : f32 to vector<2x128xf32>
    %1366 = arith.cmpf ogt, %1364, %1365 : vector<2x128xf32>
    %1367 = arith.extui %1366 : vector<2x128xi1> to vector<2x128xi32>
    %1368 = arith.sitofp %1367 : vector<2x128xi32> to vector<2x128xf32>
    %c28_583 = arith.constant 28 : index
    %c256_584 = arith.constant 256 : index
    %1369 = vector.load %arg6[%c28_583, %c256_584] : memref<128x512xf32, #tpu.memory_space<vmem>>, vector<2x128xf32>
    tpu.vector_store %arg6[%c28_583, %c256_584], %1368 {strides = array<i32>} : memref<128x512xf32, #tpu.memory_space<vmem>>, vector<2x128xf32>,
    %c28_585 = arith.constant 28 : index
    %c384_586 = arith.constant 384 : index
    %1370 = vector.load %arg6[%c28_585, %c384_586] : memref<128x512xf32, #tpu.memory_space<vmem>>, vector<2x128xf32>
    tpu.vector_store %arg6[%c28_585, %c384_586], %1364 {strides = array<i32>} : memref<128x512xf32, #tpu.memory_space<vmem>>, vector<2x128xf32>,
    %1371 = vector.extract_strided_slice %1114 {offsets = [30, 0], sizes = [2, 128], strides = [1, 1]} : vector<128x128xf32> to vector<2x128xf32>
    %cst_587 = arith.constant 1.000000e+00 : f32
    %1372 = vector.broadcast %cst_587 : f32 to vector<2x128xf32>
    %1373 = arith.cmpf ogt, %1364, %1372 : vector<2x128xf32>
    %1374 = arith.extui %1373 : vector<2x128xi1> to vector<2x128xi32>
    %1375 = arith.sitofp %1374 : vector<2x128xi32> to vector<2x128xf32>
    %cst_588 = arith.constant 5.000000e-01 : f32
    %1376 = vector.broadcast %cst_588 : f32 to vector<2x128xf32>
    %1377 = arith.mulf %1376, %1364 : vector<2x128xf32>
    %1378 = arith.addf %1377, %1371 : vector<2x128xf32>
    %cst_589 = arith.constant 1.000000e+00 : f32
    %1379 = vector.broadcast %cst_589 : f32 to vector<2x128xf32>
    %1380 = arith.mulf %1375, %1379 : vector<2x128xf32>
    %1381 = arith.subf %1378, %1380 : vector<2x128xf32>
    %cst_590 = arith.constant 1.000000e+00 : f32
    %1382 = vector.broadcast %cst_590 : f32 to vector<2x128xf32>
    %1383 = arith.cmpf ogt, %1381, %1382 : vector<2x128xf32>
    %1384 = arith.extui %1383 : vector<2x128xi1> to vector<2x128xi32>
    %1385 = arith.sitofp %1384 : vector<2x128xi32> to vector<2x128xf32>
    %c30_591 = arith.constant 30 : index
    %c256_592 = arith.constant 256 : index
    %1386 = vector.load %arg6[%c30_591, %c256_592] : memref<128x512xf32, #tpu.memory_space<vmem>>, vector<2x128xf32>
    tpu.vector_store %arg6[%c30_591, %c256_592], %1385 {strides = array<i32>} : memref<128x512xf32, #tpu.memory_space<vmem>>, vector<2x128xf32>,
    %c30_593 = arith.constant 30 : index
    %c384_594 = arith.constant 384 : index
    %1387 = vector.load %arg6[%c30_593, %c384_594] : memref<128x512xf32, #tpu.memory_space<vmem>>, vector<2x128xf32>
    tpu.vector_store %arg6[%c30_593, %c384_594], %1381 {strides = array<i32>} : memref<128x512xf32, #tpu.memory_space<vmem>>, vector<2x128xf32>,
    %1388 = vector.extract_strided_slice %1114 {offsets = [32, 0], sizes = [2, 128], strides = [1, 1]} : vector<128x128xf32> to vector<2x128xf32>
    %cst_595 = arith.constant 1.000000e+00 : f32
    %1389 = vector.broadcast %cst_595 : f32 to vector<2x128xf32>
    %1390 = arith.cmpf ogt, %1381, %1389 : vector<2x128xf32>
    %1391 = arith.extui %1390 : vector<2x128xi1> to vector<2x128xi32>
    %1392 = arith.sitofp %1391 : vector<2x128xi32> to vector<2x128xf32>
    %cst_596 = arith.constant 5.000000e-01 : f32
    %1393 = vector.broadcast %cst_596 : f32 to vector<2x128xf32>
    %1394 = arith.mulf %1393, %1381 : vector<2x128xf32>
    %1395 = arith.addf %1394, %1388 : vector<2x128xf32>
    %cst_597 = arith.constant 1.000000e+00 : f32
    %1396 = vector.broadcast %cst_597 : f32 to vector<2x128xf32>
    %1397 = arith.mulf %1392, %1396 : vector<2x128xf32>
    %1398 = arith.subf %1395, %1397 : vector<2x128xf32>
    %cst_598 = arith.constant 1.000000e+00 : f32
    %1399 = vector.broadcast %cst_598 : f32 to vector<2x128xf32>
    %1400 = arith.cmpf ogt, %1398, %1399 : vector<2x128xf32>
    %1401 = arith.extui %1400 : vector<2x128xi1> to vector<2x128xi32>
    %1402 = arith.sitofp %1401 : vector<2x128xi32> to vector<2x128xf32>
    %c32_599 = arith.constant 32 : index
    %c256_600 = arith.constant 256 : index
    %1403 = vector.load %arg6[%c32_599, %c256_600] : memref<128x512xf32, #tpu.memory_space<vmem>>, vector<2x128xf32>
    tpu.vector_store %arg6[%c32_599, %c256_600], %1402 {strides = array<i32>} : memref<128x512xf32, #tpu.memory_space<vmem>>, vector<2x128xf32>,
    %c32_601 = arith.constant 32 : index
    %c384_602 = arith.constant 384 : index
    %1404 = vector.load %arg6[%c32_601, %c384_602] : memref<128x512xf32, #tpu.memory_space<vmem>>, vector<2x128xf32>
    tpu.vector_store %arg6[%c32_601, %c384_602], %1398 {strides = array<i32>} : memref<128x512xf32, #tpu.memory_space<vmem>>, vector<2x128xf32>,
    %1405 = vector.extract_strided_slice %1114 {offsets = [34, 0], sizes = [2, 128], strides = [1, 1]} : vector<128x128xf32> to vector<2x128xf32>
    %cst_603 = arith.constant 1.000000e+00 : f32
    %1406 = vector.broadcast %cst_603 : f32 to vector<2x128xf32>
    %1407 = arith.cmpf ogt, %1398, %1406 : vector<2x128xf32>
    %1408 = arith.extui %1407 : vector<2x128xi1> to vector<2x128xi32>
    %1409 = arith.sitofp %1408 : vector<2x128xi32> to vector<2x128xf32>
    %cst_604 = arith.constant 5.000000e-01 : f32
    %1410 = vector.broadcast %cst_604 : f32 to vector<2x128xf32>
    %1411 = arith.mulf %1410, %1398 : vector<2x128xf32>
    %1412 = arith.addf %1411, %1405 : vector<2x128xf32>
    %cst_605 = arith.constant 1.000000e+00 : f32
    %1413 = vector.broadcast %cst_605 : f32 to vector<2x128xf32>
    %1414 = arith.mulf %1409, %1413 : vector<2x128xf32>
    %1415 = arith.subf %1412, %1414 : vector<2x128xf32>
    %cst_606 = arith.constant 1.000000e+00 : f32
    %1416 = vector.broadcast %cst_606 : f32 to vector<2x128xf32>
    %1417 = arith.cmpf ogt, %1415, %1416 : vector<2x128xf32>
    %1418 = arith.extui %1417 : vector<2x128xi1> to vector<2x128xi32>
    %1419 = arith.sitofp %1418 : vector<2x128xi32> to vector<2x128xf32>
    %c34_607 = arith.constant 34 : index
    %c256_608 = arith.constant 256 : index
    %1420 = vector.load %arg6[%c34_607, %c256_608] : memref<128x512xf32, #tpu.memory_space<vmem>>, vector<2x128xf32>
    tpu.vector_store %arg6[%c34_607, %c256_608], %1419 {strides = array<i32>} : memref<128x512xf32, #tpu.memory_space<vmem>>, vector<2x128xf32>,
    %c34_609 = arith.constant 34 : index
    %c384_610 = arith.constant 384 : index
    %1421 = vector.load %arg6[%c34_609, %c384_610] : memref<128x512xf32, #tpu.memory_space<vmem>>, vector<2x128xf32>
    tpu.vector_store %arg6[%c34_609, %c384_610], %1415 {strides = array<i32>} : memref<128x512xf32, #tpu.memory_space<vmem>>, vector<2x128xf32>,
    %1422 = vector.extract_strided_slice %1114 {offsets = [36, 0], sizes = [2, 128], strides = [1, 1]} : vector<128x128xf32> to vector<2x128xf32>
    %cst_611 = arith.constant 1.000000e+00 : f32
    %1423 = vector.broadcast %cst_611 : f32 to vector<2x128xf32>
    %1424 = arith.cmpf ogt, %1415, %1423 : vector<2x128xf32>
    %1425 = arith.extui %1424 : vector<2x128xi1> to vector<2x128xi32>
    %1426 = arith.sitofp %1425 : vector<2x128xi32> to vector<2x128xf32>
    %cst_612 = arith.constant 5.000000e-01 : f32
    %1427 = vector.broadcast %cst_612 : f32 to vector<2x128xf32>
    %1428 = arith.mulf %1427, %1415 : vector<2x128xf32>
    %1429 = arith.addf %1428, %1422 : vector<2x128xf32>
    %cst_613 = arith.constant 1.000000e+00 : f32
    %1430 = vector.broadcast %cst_613 : f32 to vector<2x128xf32>
    %1431 = arith.mulf %1426, %1430 : vector<2x128xf32>
    %1432 = arith.subf %1429, %1431 : vector<2x128xf32>
    %cst_614 = arith.constant 1.000000e+00 : f32
    %1433 = vector.broadcast %cst_614 : f32 to vector<2x128xf32>
    %1434 = arith.cmpf ogt, %1432, %1433 : vector<2x128xf32>
    %1435 = arith.extui %1434 : vector<2x128xi1> to vector<2x128xi32>
    %1436 = arith.sitofp %1435 : vector<2x128xi32> to vector<2x128xf32>
    %c36_615 = arith.constant 36 : index
    %c256_616 = arith.constant 256 : index
    %1437 = vector.load %arg6[%c36_615, %c256_616] : memref<128x512xf32, #tpu.memory_space<vmem>>, vector<2x128xf32>
    tpu.vector_store %arg6[%c36_615, %c256_616], %1436 {strides = array<i32>} : memref<128x512xf32, #tpu.memory_space<vmem>>, vector<2x128xf32>,
    %c36_617 = arith.constant 36 : index
    %c384_618 = arith.constant 384 : index
    %1438 = vector.load %arg6[%c36_617, %c384_618] : memref<128x512xf32, #tpu.memory_space<vmem>>, vector<2x128xf32>
    tpu.vector_store %arg6[%c36_617, %c384_618], %1432 {strides = array<i32>} : memref<128x512xf32, #tpu.memory_space<vmem>>, vector<2x128xf32>,
    %1439 = vector.extract_strided_slice %1114 {offsets = [38, 0], sizes = [2, 128], strides = [1, 1]} : vector<128x128xf32> to vector<2x128xf32>
    %cst_619 = arith.constant 1.000000e+00 : f32
    %1440 = vector.broadcast %cst_619 : f32 to vector<2x128xf32>
    %1441 = arith.cmpf ogt, %1432, %1440 : vector<2x128xf32>
    %1442 = arith.extui %1441 : vector<2x128xi1> to vector<2x128xi32>
    %1443 = arith.sitofp %1442 : vector<2x128xi32> to vector<2x128xf32>
    %cst_620 = arith.constant 5.000000e-01 : f32
    %1444 = vector.broadcast %cst_620 : f32 to vector<2x128xf32>
    %1445 = arith.mulf %1444, %1432 : vector<2x128xf32>
    %1446 = arith.addf %1445, %1439 : vector<2x128xf32>
    %cst_621 = arith.constant 1.000000e+00 : f32
    %1447 = vector.broadcast %cst_621 : f32 to vector<2x128xf32>
    %1448 = arith.mulf %1443, %1447 : vector<2x128xf32>
    %1449 = arith.subf %1446, %1448 : vector<2x128xf32>
    %cst_622 = arith.constant 1.000000e+00 : f32
    %1450 = vector.broadcast %cst_622 : f32 to vector<2x128xf32>
    %1451 = arith.cmpf ogt, %1449, %1450 : vector<2x128xf32>
    %1452 = arith.extui %1451 : vector<2x128xi1> to vector<2x128xi32>
    %1453 = arith.sitofp %1452 : vector<2x128xi32> to vector<2x128xf32>
    %c38_623 = arith.constant 38 : index
    %c256_624 = arith.constant 256 : index
    %1454 = vector.load %arg6[%c38_623, %c256_624] : memref<128x512xf32, #tpu.memory_space<vmem>>, vector<2x128xf32>
    tpu.vector_store %arg6[%c38_623, %c256_624], %1453 {strides = array<i32>} : memref<128x512xf32, #tpu.memory_space<vmem>>, vector<2x128xf32>,
    %c38_625 = arith.constant 38 : index
    %c384_626 = arith.constant 384 : index
    %1455 = vector.load %arg6[%c38_625, %c384_626] : memref<128x512xf32, #tpu.memory_space<vmem>>, vector<2x128xf32>
    tpu.vector_store %arg6[%c38_625, %c384_626], %1449 {strides = array<i32>} : memref<128x512xf32, #tpu.memory_space<vmem>>, vector<2x128xf32>,
    %1456 = vector.extract_strided_slice %1114 {offsets = [40, 0], sizes = [2, 128], strides = [1, 1]} : vector<128x128xf32> to vector<2x128xf32>
    %cst_627 = arith.constant 1.000000e+00 : f32
    %1457 = vector.broadcast %cst_627 : f32 to vector<2x128xf32>
    %1458 = arith.cmpf ogt, %1449, %1457 : vector<2x128xf32>
    %1459 = arith.extui %1458 : vector<2x128xi1> to vector<2x128xi32>
    %1460 = arith.sitofp %1459 : vector<2x128xi32> to vector<2x128xf32>
    %cst_628 = arith.constant 5.000000e-01 : f32
    %1461 = vector.broadcast %cst_628 : f32 to vector<2x128xf32>
    %1462 = arith.mulf %1461, %1449 : vector<2x128xf32>
    %1463 = arith.addf %1462, %1456 : vector<2x128xf32>
    %cst_629 = arith.constant 1.000000e+00 : f32
    %1464 = vector.broadcast %cst_629 : f32 to vector<2x128xf32>
    %1465 = arith.mulf %1460, %1464 : vector<2x128xf32>
    %1466 = arith.subf %1463, %1465 : vector<2x128xf32>
    %cst_630 = arith.constant 1.000000e+00 : f32
    %1467 = vector.broadcast %cst_630 : f32 to vector<2x128xf32>
    %1468 = arith.cmpf ogt, %1466, %1467 : vector<2x128xf32>
    %1469 = arith.extui %1468 : vector<2x128xi1> to vector<2x128xi32>
    %1470 = arith.sitofp %1469 : vector<2x128xi32> to vector<2x128xf32>
    %c40_631 = arith.constant 40 : index
    %c256_632 = arith.constant 256 : index
    %1471 = vector.load %arg6[%c40_631, %c256_632] : memref<128x512xf32, #tpu.memory_space<vmem>>, vector<2x128xf32>
    tpu.vector_store %arg6[%c40_631, %c256_632], %1470 {strides = array<i32>} : memref<128x512xf32, #tpu.memory_space<vmem>>, vector<2x128xf32>,
    %c40_633 = arith.constant 40 : index
    %c384_634 = arith.constant 384 : index
    %1472 = vector.load %arg6[%c40_633, %c384_634] : memref<128x512xf32, #tpu.memory_space<vmem>>, vector<2x128xf32>
    tpu.vector_store %arg6[%c40_633, %c384_634], %1466 {strides = array<i32>} : memref<128x512xf32, #tpu.memory_space<vmem>>, vector<2x128xf32>,
    %1473 = vector.extract_strided_slice %1114 {offsets = [42, 0], sizes = [2, 128], strides = [1, 1]} : vector<128x128xf32> to vector<2x128xf32>
    %cst_635 = arith.constant 1.000000e+00 : f32
    %1474 = vector.broadcast %cst_635 : f32 to vector<2x128xf32>
    %1475 = arith.cmpf ogt, %1466, %1474 : vector<2x128xf32>
    %1476 = arith.extui %1475 : vector<2x128xi1> to vector<2x128xi32>
    %1477 = arith.sitofp %1476 : vector<2x128xi32> to vector<2x128xf32>
    %cst_636 = arith.constant 5.000000e-01 : f32
    %1478 = vector.broadcast %cst_636 : f32 to vector<2x128xf32>
    %1479 = arith.mulf %1478, %1466 : vector<2x128xf32>
    %1480 = arith.addf %1479, %1473 : vector<2x128xf32>
    %cst_637 = arith.constant 1.000000e+00 : f32
    %1481 = vector.broadcast %cst_637 : f32 to vector<2x128xf32>
    %1482 = arith.mulf %1477, %1481 : vector<2x128xf32>
    %1483 = arith.subf %1480, %1482 : vector<2x128xf32>
    %cst_638 = arith.constant 1.000000e+00 : f32
    %1484 = vector.broadcast %cst_638 : f32 to vector<2x128xf32>
    %1485 = arith.cmpf ogt, %1483, %1484 : vector<2x128xf32>
    %1486 = arith.extui %1485 : vector<2x128xi1> to vector<2x128xi32>
    %1487 = arith.sitofp %1486 : vector<2x128xi32> to vector<2x128xf32>
    %c42_639 = arith.constant 42 : index
    %c256_640 = arith.constant 256 : index
    %1488 = vector.load %arg6[%c42_639, %c256_640] : memref<128x512xf32, #tpu.memory_space<vmem>>, vector<2x128xf32>
    tpu.vector_store %arg6[%c42_639, %c256_640], %1487 {strides = array<i32>} : memref<128x512xf32, #tpu.memory_space<vmem>>, vector<2x128xf32>,
    %c42_641 = arith.constant 42 : index
    %c384_642 = arith.constant 384 : index
    %1489 = vector.load %arg6[%c42_641, %c384_642] : memref<128x512xf32, #tpu.memory_space<vmem>>, vector<2x128xf32>
    tpu.vector_store %arg6[%c42_641, %c384_642], %1483 {strides = array<i32>} : memref<128x512xf32, #tpu.memory_space<vmem>>, vector<2x128xf32>,
    %1490 = vector.extract_strided_slice %1114 {offsets = [44, 0], sizes = [2, 128], strides = [1, 1]} : vector<128x128xf32> to vector<2x128xf32>
    %cst_643 = arith.constant 1.000000e+00 : f32
    %1491 = vector.broadcast %cst_643 : f32 to vector<2x128xf32>
    %1492 = arith.cmpf ogt, %1483, %1491 : vector<2x128xf32>
    %1493 = arith.extui %1492 : vector<2x128xi1> to vector<2x128xi32>
    %1494 = arith.sitofp %1493 : vector<2x128xi32> to vector<2x128xf32>
    %cst_644 = arith.constant 5.000000e-01 : f32
    %1495 = vector.broadcast %cst_644 : f32 to vector<2x128xf32>
    %1496 = arith.mulf %1495, %1483 : vector<2x128xf32>
    %1497 = arith.addf %1496, %1490 : vector<2x128xf32>
    %cst_645 = arith.constant 1.000000e+00 : f32
    %1498 = vector.broadcast %cst_645 : f32 to vector<2x128xf32>
    %1499 = arith.mulf %1494, %1498 : vector<2x128xf32>
    %1500 = arith.subf %1497, %1499 : vector<2x128xf32>
    %cst_646 = arith.constant 1.000000e+00 : f32
    %1501 = vector.broadcast %cst_646 : f32 to vector<2x128xf32>
    %1502 = arith.cmpf ogt, %1500, %1501 : vector<2x128xf32>
    %1503 = arith.extui %1502 : vector<2x128xi1> to vector<2x128xi32>
    %1504 = arith.sitofp %1503 : vector<2x128xi32> to vector<2x128xf32>
    %c44_647 = arith.constant 44 : index
    %c256_648 = arith.constant 256 : index
    %1505 = vector.load %arg6[%c44_647, %c256_648] : memref<128x512xf32, #tpu.memory_space<vmem>>, vector<2x128xf32>
    tpu.vector_store %arg6[%c44_647, %c256_648], %1504 {strides = array<i32>} : memref<128x512xf32, #tpu.memory_space<vmem>>, vector<2x128xf32>,
    %c44_649 = arith.constant 44 : index
    %c384_650 = arith.constant 384 : index
    %1506 = vector.load %arg6[%c44_649, %c384_650] : memref<128x512xf32, #tpu.memory_space<vmem>>, vector<2x128xf32>
    tpu.vector_store %arg6[%c44_649, %c384_650], %1500 {strides = array<i32>} : memref<128x512xf32, #tpu.memory_space<vmem>>, vector<2x128xf32>,
    %1507 = vector.extract_strided_slice %1114 {offsets = [46, 0], sizes = [2, 128], strides = [1, 1]} : vector<128x128xf32> to vector<2x128xf32>
    %cst_651 = arith.constant 1.000000e+00 : f32
    %1508 = vector.broadcast %cst_651 : f32 to vector<2x128xf32>
    %1509 = arith.cmpf ogt, %1500, %1508 : vector<2x128xf32>
    %1510 = arith.extui %1509 : vector<2x128xi1> to vector<2x128xi32>
    %1511 = arith.sitofp %1510 : vector<2x128xi32> to vector<2x128xf32>
    %cst_652 = arith.constant 5.000000e-01 : f32
    %1512 = vector.broadcast %cst_652 : f32 to vector<2x128xf32>
    %1513 = arith.mulf %1512, %1500 : vector<2x128xf32>
    %1514 = arith.addf %1513, %1507 : vector<2x128xf32>
    %cst_653 = arith.constant 1.000000e+00 : f32
    %1515 = vector.broadcast %cst_653 : f32 to vector<2x128xf32>
    %1516 = arith.mulf %1511, %1515 : vector<2x128xf32>
    %1517 = arith.subf %1514, %1516 : vector<2x128xf32>
    %cst_654 = arith.constant 1.000000e+00 : f32
    %1518 = vector.broadcast %cst_654 : f32 to vector<2x128xf32>
    %1519 = arith.cmpf ogt, %1517, %1518 : vector<2x128xf32>
    %1520 = arith.extui %1519 : vector<2x128xi1> to vector<2x128xi32>
    %1521 = arith.sitofp %1520 : vector<2x128xi32> to vector<2x128xf32>
    %c46_655 = arith.constant 46 : index
    %c256_656 = arith.constant 256 : index
    %1522 = vector.load %arg6[%c46_655, %c256_656] : memref<128x512xf32, #tpu.memory_space<vmem>>, vector<2x128xf32>
    tpu.vector_store %arg6[%c46_655, %c256_656], %1521 {strides = array<i32>} : memref<128x512xf32, #tpu.memory_space<vmem>>, vector<2x128xf32>,
    %c46_657 = arith.constant 46 : index
    %c384_658 = arith.constant 384 : index
    %1523 = vector.load %arg6[%c46_657, %c384_658] : memref<128x512xf32, #tpu.memory_space<vmem>>, vector<2x128xf32>
    tpu.vector_store %arg6[%c46_657, %c384_658], %1517 {strides = array<i32>} : memref<128x512xf32, #tpu.memory_space<vmem>>, vector<2x128xf32>,
    %1524 = vector.extract_strided_slice %1114 {offsets = [48, 0], sizes = [2, 128], strides = [1, 1]} : vector<128x128xf32> to vector<2x128xf32>
    %cst_659 = arith.constant 1.000000e+00 : f32
    %1525 = vector.broadcast %cst_659 : f32 to vector<2x128xf32>
    %1526 = arith.cmpf ogt, %1517, %1525 : vector<2x128xf32>
    %1527 = arith.extui %1526 : vector<2x128xi1> to vector<2x128xi32>
    %1528 = arith.sitofp %1527 : vector<2x128xi32> to vector<2x128xf32>
    %cst_660 = arith.constant 5.000000e-01 : f32
    %1529 = vector.broadcast %cst_660 : f32 to vector<2x128xf32>
    %1530 = arith.mulf %1529, %1517 : vector<2x128xf32>
    %1531 = arith.addf %1530, %1524 : vector<2x128xf32>
    %cst_661 = arith.constant 1.000000e+00 : f32
    %1532 = vector.broadcast %cst_661 : f32 to vector<2x128xf32>
    %1533 = arith.mulf %1528, %1532 : vector<2x128xf32>
    %1534 = arith.subf %1531, %1533 : vector<2x128xf32>
    %cst_662 = arith.constant 1.000000e+00 : f32
    %1535 = vector.broadcast %cst_662 : f32 to vector<2x128xf32>
    %1536 = arith.cmpf ogt, %1534, %1535 : vector<2x128xf32>
    %1537 = arith.extui %1536 : vector<2x128xi1> to vector<2x128xi32>
    %1538 = arith.sitofp %1537 : vector<2x128xi32> to vector<2x128xf32>
    %c48_663 = arith.constant 48 : index
    %c256_664 = arith.constant 256 : index
    %1539 = vector.load %arg6[%c48_663, %c256_664] : memref<128x512xf32, #tpu.memory_space<vmem>>, vector<2x128xf32>
    tpu.vector_store %arg6[%c48_663, %c256_664], %1538 {strides = array<i32>} : memref<128x512xf32, #tpu.memory_space<vmem>>, vector<2x128xf32>,
    %c48_665 = arith.constant 48 : index
    %c384_666 = arith.constant 384 : index
    %1540 = vector.load %arg6[%c48_665, %c384_666] : memref<128x512xf32, #tpu.memory_space<vmem>>, vector<2x128xf32>
    tpu.vector_store %arg6[%c48_665, %c384_666], %1534 {strides = array<i32>} : memref<128x512xf32, #tpu.memory_space<vmem>>, vector<2x128xf32>,
    %1541 = vector.extract_strided_slice %1114 {offsets = [50, 0], sizes = [2, 128], strides = [1, 1]} : vector<128x128xf32> to vector<2x128xf32>
    %cst_667 = arith.constant 1.000000e+00 : f32
    %1542 = vector.broadcast %cst_667 : f32 to vector<2x128xf32>
    %1543 = arith.cmpf ogt, %1534, %1542 : vector<2x128xf32>
    %1544 = arith.extui %1543 : vector<2x128xi1> to vector<2x128xi32>
    %1545 = arith.sitofp %1544 : vector<2x128xi32> to vector<2x128xf32>
    %cst_668 = arith.constant 5.000000e-01 : f32
    %1546 = vector.broadcast %cst_668 : f32 to vector<2x128xf32>
    %1547 = arith.mulf %1546, %1534 : vector<2x128xf32>
    %1548 = arith.addf %1547, %1541 : vector<2x128xf32>
    %cst_669 = arith.constant 1.000000e+00 : f32
    %1549 = vector.broadcast %cst_669 : f32 to vector<2x128xf32>
    %1550 = arith.mulf %1545, %1549 : vector<2x128xf32>
    %1551 = arith.subf %1548, %1550 : vector<2x128xf32>
    %cst_670 = arith.constant 1.000000e+00 : f32
    %1552 = vector.broadcast %cst_670 : f32 to vector<2x128xf32>
    %1553 = arith.cmpf ogt, %1551, %1552 : vector<2x128xf32>
    %1554 = arith.extui %1553 : vector<2x128xi1> to vector<2x128xi32>
    %1555 = arith.sitofp %1554 : vector<2x128xi32> to vector<2x128xf32>
    %c50_671 = arith.constant 50 : index
    %c256_672 = arith.constant 256 : index
    %1556 = vector.load %arg6[%c50_671, %c256_672] : memref<128x512xf32, #tpu.memory_space<vmem>>, vector<2x128xf32>
    tpu.vector_store %arg6[%c50_671, %c256_672], %1555 {strides = array<i32>} : memref<128x512xf32, #tpu.memory_space<vmem>>, vector<2x128xf32>,
    %c50_673 = arith.constant 50 : index
    %c384_674 = arith.constant 384 : index
    %1557 = vector.load %arg6[%c50_673, %c384_674] : memref<128x512xf32, #tpu.memory_space<vmem>>, vector<2x128xf32>
    tpu.vector_store %arg6[%c50_673, %c384_674], %1551 {strides = array<i32>} : memref<128x512xf32, #tpu.memory_space<vmem>>, vector<2x128xf32>,
    %1558 = vector.extract_strided_slice %1114 {offsets = [52, 0], sizes = [2, 128], strides = [1, 1]} : vector<128x128xf32> to vector<2x128xf32>
    %cst_675 = arith.constant 1.000000e+00 : f32
    %1559 = vector.broadcast %cst_675 : f32 to vector<2x128xf32>
    %1560 = arith.cmpf ogt, %1551, %1559 : vector<2x128xf32>
    %1561 = arith.extui %1560 : vector<2x128xi1> to vector<2x128xi32>
    %1562 = arith.sitofp %1561 : vector<2x128xi32> to vector<2x128xf32>
    %cst_676 = arith.constant 5.000000e-01 : f32
    %1563 = vector.broadcast %cst_676 : f32 to vector<2x128xf32>
    %1564 = arith.mulf %1563, %1551 : vector<2x128xf32>
    %1565 = arith.addf %1564, %1558 : vector<2x128xf32>
    %cst_677 = arith.constant 1.000000e+00 : f32
    %1566 = vector.broadcast %cst_677 : f32 to vector<2x128xf32>
    %1567 = arith.mulf %1562, %1566 : vector<2x128xf32>
    %1568 = arith.subf %1565, %1567 : vector<2x128xf32>
    %cst_678 = arith.constant 1.000000e+00 : f32
    %1569 = vector.broadcast %cst_678 : f32 to vector<2x128xf32>
    %1570 = arith.cmpf ogt, %1568, %1569 : vector<2x128xf32>
    %1571 = arith.extui %1570 : vector<2x128xi1> to vector<2x128xi32>
    %1572 = arith.sitofp %1571 : vector<2x128xi32> to vector<2x128xf32>
    %c52_679 = arith.constant 52 : index
    %c256_680 = arith.constant 256 : index
    %1573 = vector.load %arg6[%c52_679, %c256_680] : memref<128x512xf32, #tpu.memory_space<vmem>>, vector<2x128xf32>
    tpu.vector_store %arg6[%c52_679, %c256_680], %1572 {strides = array<i32>} : memref<128x512xf32, #tpu.memory_space<vmem>>, vector<2x128xf32>,
    %c52_681 = arith.constant 52 : index
    %c384_682 = arith.constant 384 : index
    %1574 = vector.load %arg6[%c52_681, %c384_682] : memref<128x512xf32, #tpu.memory_space<vmem>>, vector<2x128xf32>
    tpu.vector_store %arg6[%c52_681, %c384_682], %1568 {strides = array<i32>} : memref<128x512xf32, #tpu.memory_space<vmem>>, vector<2x128xf32>,
    %1575 = vector.extract_strided_slice %1114 {offsets = [54, 0], sizes = [2, 128], strides = [1, 1]} : vector<128x128xf32> to vector<2x128xf32>
    %cst_683 = arith.constant 1.000000e+00 : f32
    %1576 = vector.broadcast %cst_683 : f32 to vector<2x128xf32>
    %1577 = arith.cmpf ogt, %1568, %1576 : vector<2x128xf32>
    %1578 = arith.extui %1577 : vector<2x128xi1> to vector<2x128xi32>
    %1579 = arith.sitofp %1578 : vector<2x128xi32> to vector<2x128xf32>
    %cst_684 = arith.constant 5.000000e-01 : f32
    %1580 = vector.broadcast %cst_684 : f32 to vector<2x128xf32>
    %1581 = arith.mulf %1580, %1568 : vector<2x128xf32>
    %1582 = arith.addf %1581, %1575 : vector<2x128xf32>
    %cst_685 = arith.constant 1.000000e+00 : f32
    %1583 = vector.broadcast %cst_685 : f32 to vector<2x128xf32>
    %1584 = arith.mulf %1579, %1583 : vector<2x128xf32>
    %1585 = arith.subf %1582, %1584 : vector<2x128xf32>
    %cst_686 = arith.constant 1.000000e+00 : f32
    %1586 = vector.broadcast %cst_686 : f32 to vector<2x128xf32>
    %1587 = arith.cmpf ogt, %1585, %1586 : vector<2x128xf32>
    %1588 = arith.extui %1587 : vector<2x128xi1> to vector<2x128xi32>
    %1589 = arith.sitofp %1588 : vector<2x128xi32> to vector<2x128xf32>
    %c54_687 = arith.constant 54 : index
    %c256_688 = arith.constant 256 : index
    %1590 = vector.load %arg6[%c54_687, %c256_688] : memref<128x512xf32, #tpu.memory_space<vmem>>, vector<2x128xf32>
    tpu.vector_store %arg6[%c54_687, %c256_688], %1589 {strides = array<i32>} : memref<128x512xf32, #tpu.memory_space<vmem>>, vector<2x128xf32>,
    %c54_689 = arith.constant 54 : index
    %c384_690 = arith.constant 384 : index
    %1591 = vector.load %arg6[%c54_689, %c384_690] : memref<128x512xf32, #tpu.memory_space<vmem>>, vector<2x128xf32>
    tpu.vector_store %arg6[%c54_689, %c384_690], %1585 {strides = array<i32>} : memref<128x512xf32, #tpu.memory_space<vmem>>, vector<2x128xf32>,
    %1592 = vector.extract_strided_slice %1114 {offsets = [56, 0], sizes = [2, 128], strides = [1, 1]} : vector<128x128xf32> to vector<2x128xf32>
    %cst_691 = arith.constant 1.000000e+00 : f32
    %1593 = vector.broadcast %cst_691 : f32 to vector<2x128xf32>
    %1594 = arith.cmpf ogt, %1585, %1593 : vector<2x128xf32>
    %1595 = arith.extui %1594 : vector<2x128xi1> to vector<2x128xi32>
    %1596 = arith.sitofp %1595 : vector<2x128xi32> to vector<2x128xf32>
    %cst_692 = arith.constant 5.000000e-01 : f32
    %1597 = vector.broadcast %cst_692 : f32 to vector<2x128xf32>
    %1598 = arith.mulf %1597, %1585 : vector<2x128xf32>
    %1599 = arith.addf %1598, %1592 : vector<2x128xf32>
    %cst_693 = arith.constant 1.000000e+00 : f32
    %1600 = vector.broadcast %cst_693 : f32 to vector<2x128xf32>
    %1601 = arith.mulf %1596, %1600 : vector<2x128xf32>
    %1602 = arith.subf %1599, %1601 : vector<2x128xf32>
    %cst_694 = arith.constant 1.000000e+00 : f32
    %1603 = vector.broadcast %cst_694 : f32 to vector<2x128xf32>
    %1604 = arith.cmpf ogt, %1602, %1603 : vector<2x128xf32>
    %1605 = arith.extui %1604 : vector<2x128xi1> to vector<2x128xi32>
    %1606 = arith.sitofp %1605 : vector<2x128xi32> to vector<2x128xf32>
    %c56_695 = arith.constant 56 : index
    %c256_696 = arith.constant 256 : index
    %1607 = vector.load %arg6[%c56_695, %c256_696] : memref<128x512xf32, #tpu.memory_space<vmem>>, vector<2x128xf32>
    tpu.vector_store %arg6[%c56_695, %c256_696], %1606 {strides = array<i32>} : memref<128x512xf32, #tpu.memory_space<vmem>>, vector<2x128xf32>,
    %c56_697 = arith.constant 56 : index
    %c384_698 = arith.constant 384 : index
    %1608 = vector.load %arg6[%c56_697, %c384_698] : memref<128x512xf32, #tpu.memory_space<vmem>>, vector<2x128xf32>
    tpu.vector_store %arg6[%c56_697, %c384_698], %1602 {strides = array<i32>} : memref<128x512xf32, #tpu.memory_space<vmem>>, vector<2x128xf32>,
    %1609 = vector.extract_strided_slice %1114 {offsets = [58, 0], sizes = [2, 128], strides = [1, 1]} : vector<128x128xf32> to vector<2x128xf32>
    %cst_699 = arith.constant 1.000000e+00 : f32
    %1610 = vector.broadcast %cst_699 : f32 to vector<2x128xf32>
    %1611 = arith.cmpf ogt, %1602, %1610 : vector<2x128xf32>
    %1612 = arith.extui %1611 : vector<2x128xi1> to vector<2x128xi32>
    %1613 = arith.sitofp %1612 : vector<2x128xi32> to vector<2x128xf32>
    %cst_700 = arith.constant 5.000000e-01 : f32
    %1614 = vector.broadcast %cst_700 : f32 to vector<2x128xf32>
    %1615 = arith.mulf %1614, %1602 : vector<2x128xf32>
    %1616 = arith.addf %1615, %1609 : vector<2x128xf32>
    %cst_701 = arith.constant 1.000000e+00 : f32
    %1617 = vector.broadcast %cst_701 : f32 to vector<2x128xf32>
    %1618 = arith.mulf %1613, %1617 : vector<2x128xf32>
    %1619 = arith.subf %1616, %1618 : vector<2x128xf32>
    %cst_702 = arith.constant 1.000000e+00 : f32
    %1620 = vector.broadcast %cst_702 : f32 to vector<2x128xf32>
    %1621 = arith.cmpf ogt, %1619, %1620 : vector<2x128xf32>
    %1622 = arith.extui %1621 : vector<2x128xi1> to vector<2x128xi32>
    %1623 = arith.sitofp %1622 : vector<2x128xi32> to vector<2x128xf32>
    %c58_703 = arith.constant 58 : index
    %c256_704 = arith.constant 256 : index
    %1624 = vector.load %arg6[%c58_703, %c256_704] : memref<128x512xf32, #tpu.memory_space<vmem>>, vector<2x128xf32>
    tpu.vector_store %arg6[%c58_703, %c256_704], %1623 {strides = array<i32>} : memref<128x512xf32, #tpu.memory_space<vmem>>, vector<2x128xf32>,
    %c58_705 = arith.constant 58 : index
    %c384_706 = arith.constant 384 : index
    %1625 = vector.load %arg6[%c58_705, %c384_706] : memref<128x512xf32, #tpu.memory_space<vmem>>, vector<2x128xf32>
    tpu.vector_store %arg6[%c58_705, %c384_706], %1619 {strides = array<i32>} : memref<128x512xf32, #tpu.memory_space<vmem>>, vector<2x128xf32>,
    %1626 = vector.extract_strided_slice %1114 {offsets = [60, 0], sizes = [2, 128], strides = [1, 1]} : vector<128x128xf32> to vector<2x128xf32>
    %cst_707 = arith.constant 1.000000e+00 : f32
    %1627 = vector.broadcast %cst_707 : f32 to vector<2x128xf32>
    %1628 = arith.cmpf ogt, %1619, %1627 : vector<2x128xf32>
    %1629 = arith.extui %1628 : vector<2x128xi1> to vector<2x128xi32>
    %1630 = arith.sitofp %1629 : vector<2x128xi32> to vector<2x128xf32>
    %cst_708 = arith.constant 5.000000e-01 : f32
    %1631 = vector.broadcast %cst_708 : f32 to vector<2x128xf32>
    %1632 = arith.mulf %1631, %1619 : vector<2x128xf32>
    %1633 = arith.addf %1632, %1626 : vector<2x128xf32>
    %cst_709 = arith.constant 1.000000e+00 : f32
    %1634 = vector.broadcast %cst_709 : f32 to vector<2x128xf32>
    %1635 = arith.mulf %1630, %1634 : vector<2x128xf32>
    %1636 = arith.subf %1633, %1635 : vector<2x128xf32>
    %cst_710 = arith.constant 1.000000e+00 : f32
    %1637 = vector.broadcast %cst_710 : f32 to vector<2x128xf32>
    %1638 = arith.cmpf ogt, %1636, %1637 : vector<2x128xf32>
    %1639 = arith.extui %1638 : vector<2x128xi1> to vector<2x128xi32>
    %1640 = arith.sitofp %1639 : vector<2x128xi32> to vector<2x128xf32>
    %c60_711 = arith.constant 60 : index
    %c256_712 = arith.constant 256 : index
    %1641 = vector.load %arg6[%c60_711, %c256_712] : memref<128x512xf32, #tpu.memory_space<vmem>>, vector<2x128xf32>
    tpu.vector_store %arg6[%c60_711, %c256_712], %1640 {strides = array<i32>} : memref<128x512xf32, #tpu.memory_space<vmem>>, vector<2x128xf32>,
    %c60_713 = arith.constant 60 : index
    %c384_714 = arith.constant 384 : index
    %1642 = vector.load %arg6[%c60_713, %c384_714] : memref<128x512xf32, #tpu.memory_space<vmem>>, vector<2x128xf32>
    tpu.vector_store %arg6[%c60_713, %c384_714], %1636 {strides = array<i32>} : memref<128x512xf32, #tpu.memory_space<vmem>>, vector<2x128xf32>,
    %1643 = vector.extract_strided_slice %1114 {offsets = [62, 0], sizes = [2, 128], strides = [1, 1]} : vector<128x128xf32> to vector<2x128xf32>
    %cst_715 = arith.constant 1.000000e+00 : f32
    %1644 = vector.broadcast %cst_715 : f32 to vector<2x128xf32>
    %1645 = arith.cmpf ogt, %1636, %1644 : vector<2x128xf32>
    %1646 = arith.extui %1645 : vector<2x128xi1> to vector<2x128xi32>
    %1647 = arith.sitofp %1646 : vector<2x128xi32> to vector<2x128xf32>
    %cst_716 = arith.constant 5.000000e-01 : f32
    %1648 = vector.broadcast %cst_716 : f32 to vector<2x128xf32>
    %1649 = arith.mulf %1648, %1636 : vector<2x128xf32>
    %1650 = arith.addf %1649, %1643 : vector<2x128xf32>
    %cst_717 = arith.constant 1.000000e+00 : f32
    %1651 = vector.broadcast %cst_717 : f32 to vector<2x128xf32>
    %1652 = arith.mulf %1647, %1651 : vector<2x128xf32>
    %1653 = arith.subf %1650, %1652 : vector<2x128xf32>
    %cst_718 = arith.constant 1.000000e+00 : f32
    %1654 = vector.broadcast %cst_718 : f32 to vector<2x128xf32>
    %1655 = arith.cmpf ogt, %1653, %1654 : vector<2x128xf32>
    %1656 = arith.extui %1655 : vector<2x128xi1> to vector<2x128xi32>
    %1657 = arith.sitofp %1656 : vector<2x128xi32> to vector<2x128xf32>
    %c62_719 = arith.constant 62 : index
    %c256_720 = arith.constant 256 : index
    %1658 = vector.load %arg6[%c62_719, %c256_720] : memref<128x512xf32, #tpu.memory_space<vmem>>, vector<2x128xf32>
    tpu.vector_store %arg6[%c62_719, %c256_720], %1657 {strides = array<i32>} : memref<128x512xf32, #tpu.memory_space<vmem>>, vector<2x128xf32>,
    %c62_721 = arith.constant 62 : index
    %c384_722 = arith.constant 384 : index
    %1659 = vector.load %arg6[%c62_721, %c384_722] : memref<128x512xf32, #tpu.memory_space<vmem>>, vector<2x128xf32>
    tpu.vector_store %arg6[%c62_721, %c384_722], %1653 {strides = array<i32>} : memref<128x512xf32, #tpu.memory_space<vmem>>, vector<2x128xf32>,
    %1660 = vector.extract_strided_slice %1114 {offsets = [64, 0], sizes = [2, 128], strides = [1, 1]} : vector<128x128xf32> to vector<2x128xf32>
    %cst_723 = arith.constant 1.000000e+00 : f32
    %1661 = vector.broadcast %cst_723 : f32 to vector<2x128xf32>
    %1662 = arith.cmpf ogt, %1653, %1661 : vector<2x128xf32>
    %1663 = arith.extui %1662 : vector<2x128xi1> to vector<2x128xi32>
    %1664 = arith.sitofp %1663 : vector<2x128xi32> to vector<2x128xf32>
    %cst_724 = arith.constant 5.000000e-01 : f32
    %1665 = vector.broadcast %cst_724 : f32 to vector<2x128xf32>
    %1666 = arith.mulf %1665, %1653 : vector<2x128xf32>
    %1667 = arith.addf %1666, %1660 : vector<2x128xf32>
    %cst_725 = arith.constant 1.000000e+00 : f32
    %1668 = vector.broadcast %cst_725 : f32 to vector<2x128xf32>
    %1669 = arith.mulf %1664, %1668 : vector<2x128xf32>
    %1670 = arith.subf %1667, %1669 : vector<2x128xf32>
    %cst_726 = arith.constant 1.000000e+00 : f32
    %1671 = vector.broadcast %cst_726 : f32 to vector<2x128xf32>
    %1672 = arith.cmpf ogt, %1670, %1671 : vector<2x128xf32>
    %1673 = arith.extui %1672 : vector<2x128xi1> to vector<2x128xi32>
    %1674 = arith.sitofp %1673 : vector<2x128xi32> to vector<2x128xf32>
    %c64_727 = arith.constant 64 : index
    %c256_728 = arith.constant 256 : index
    %1675 = vector.load %arg6[%c64_727, %c256_728] : memref<128x512xf32, #tpu.memory_space<vmem>>, vector<2x128xf32>
    tpu.vector_store %arg6[%c64_727, %c256_728], %1674 {strides = array<i32>} : memref<128x512xf32, #tpu.memory_space<vmem>>, vector<2x128xf32>,
    %c64_729 = arith.constant 64 : index
    %c384_730 = arith.constant 384 : index
    %1676 = vector.load %arg6[%c64_729, %c384_730] : memref<128x512xf32, #tpu.memory_space<vmem>>, vector<2x128xf32>
    tpu.vector_store %arg6[%c64_729, %c384_730], %1670 {strides = array<i32>} : memref<128x512xf32, #tpu.memory_space<vmem>>, vector<2x128xf32>,
    %1677 = vector.extract_strided_slice %1114 {offsets = [66, 0], sizes = [2, 128], strides = [1, 1]} : vector<128x128xf32> to vector<2x128xf32>
    %cst_731 = arith.constant 1.000000e+00 : f32
    %1678 = vector.broadcast %cst_731 : f32 to vector<2x128xf32>
    %1679 = arith.cmpf ogt, %1670, %1678 : vector<2x128xf32>
    %1680 = arith.extui %1679 : vector<2x128xi1> to vector<2x128xi32>
    %1681 = arith.sitofp %1680 : vector<2x128xi32> to vector<2x128xf32>
    %cst_732 = arith.constant 5.000000e-01 : f32
    %1682 = vector.broadcast %cst_732 : f32 to vector<2x128xf32>
    %1683 = arith.mulf %1682, %1670 : vector<2x128xf32>
    %1684 = arith.addf %1683, %1677 : vector<2x128xf32>
    %cst_733 = arith.constant 1.000000e+00 : f32
    %1685 = vector.broadcast %cst_733 : f32 to vector<2x128xf32>
    %1686 = arith.mulf %1681, %1685 : vector<2x128xf32>
    %1687 = arith.subf %1684, %1686 : vector<2x128xf32>
    %cst_734 = arith.constant 1.000000e+00 : f32
    %1688 = vector.broadcast %cst_734 : f32 to vector<2x128xf32>
    %1689 = arith.cmpf ogt, %1687, %1688 : vector<2x128xf32>
    %1690 = arith.extui %1689 : vector<2x128xi1> to vector<2x128xi32>
    %1691 = arith.sitofp %1690 : vector<2x128xi32> to vector<2x128xf32>
    %c66_735 = arith.constant 66 : index
    %c256_736 = arith.constant 256 : index
    %1692 = vector.load %arg6[%c66_735, %c256_736] : memref<128x512xf32, #tpu.memory_space<vmem>>, vector<2x128xf32>
    tpu.vector_store %arg6[%c66_735, %c256_736], %1691 {strides = array<i32>} : memref<128x512xf32, #tpu.memory_space<vmem>>, vector<2x128xf32>,
    %c66_737 = arith.constant 66 : index
    %c384_738 = arith.constant 384 : index
    %1693 = vector.load %arg6[%c66_737, %c384_738] : memref<128x512xf32, #tpu.memory_space<vmem>>, vector<2x128xf32>
    tpu.vector_store %arg6[%c66_737, %c384_738], %1687 {strides = array<i32>} : memref<128x512xf32, #tpu.memory_space<vmem>>, vector<2x128xf32>,
    %1694 = vector.extract_strided_slice %1114 {offsets = [68, 0], sizes = [2, 128], strides = [1, 1]} : vector<128x128xf32> to vector<2x128xf32>
    %cst_739 = arith.constant 1.000000e+00 : f32
    %1695 = vector.broadcast %cst_739 : f32 to vector<2x128xf32>
    %1696 = arith.cmpf ogt, %1687, %1695 : vector<2x128xf32>
    %1697 = arith.extui %1696 : vector<2x128xi1> to vector<2x128xi32>
    %1698 = arith.sitofp %1697 : vector<2x128xi32> to vector<2x128xf32>
    %cst_740 = arith.constant 5.000000e-01 : f32
    %1699 = vector.broadcast %cst_740 : f32 to vector<2x128xf32>
    %1700 = arith.mulf %1699, %1687 : vector<2x128xf32>
    %1701 = arith.addf %1700, %1694 : vector<2x128xf32>
    %cst_741 = arith.constant 1.000000e+00 : f32
    %1702 = vector.broadcast %cst_741 : f32 to vector<2x128xf32>
    %1703 = arith.mulf %1698, %1702 : vector<2x128xf32>
    %1704 = arith.subf %1701, %1703 : vector<2x128xf32>
    %cst_742 = arith.constant 1.000000e+00 : f32
    %1705 = vector.broadcast %cst_742 : f32 to vector<2x128xf32>
    %1706 = arith.cmpf ogt, %1704, %1705 : vector<2x128xf32>
    %1707 = arith.extui %1706 : vector<2x128xi1> to vector<2x128xi32>
    %1708 = arith.sitofp %1707 : vector<2x128xi32> to vector<2x128xf32>
    %c68_743 = arith.constant 68 : index
    %c256_744 = arith.constant 256 : index
    %1709 = vector.load %arg6[%c68_743, %c256_744] : memref<128x512xf32, #tpu.memory_space<vmem>>, vector<2x128xf32>
    tpu.vector_store %arg6[%c68_743, %c256_744], %1708 {strides = array<i32>} : memref<128x512xf32, #tpu.memory_space<vmem>>, vector<2x128xf32>,
    %c68_745 = arith.constant 68 : index
    %c384_746 = arith.constant 384 : index
    %1710 = vector.load %arg6[%c68_745, %c384_746] : memref<128x512xf32, #tpu.memory_space<vmem>>, vector<2x128xf32>
    tpu.vector_store %arg6[%c68_745, %c384_746], %1704 {strides = array<i32>} : memref<128x512xf32, #tpu.memory_space<vmem>>, vector<2x128xf32>,
    %1711 = vector.extract_strided_slice %1114 {offsets = [70, 0], sizes = [2, 128], strides = [1, 1]} : vector<128x128xf32> to vector<2x128xf32>
    %cst_747 = arith.constant 1.000000e+00 : f32
    %1712 = vector.broadcast %cst_747 : f32 to vector<2x128xf32>
    %1713 = arith.cmpf ogt, %1704, %1712 : vector<2x128xf32>
    %1714 = arith.extui %1713 : vector<2x128xi1> to vector<2x128xi32>
    %1715 = arith.sitofp %1714 : vector<2x128xi32> to vector<2x128xf32>
    %cst_748 = arith.constant 5.000000e-01 : f32
    %1716 = vector.broadcast %cst_748 : f32 to vector<2x128xf32>
    %1717 = arith.mulf %1716, %1704 : vector<2x128xf32>
    %1718 = arith.addf %1717, %1711 : vector<2x128xf32>
    %cst_749 = arith.constant 1.000000e+00 : f32
    %1719 = vector.broadcast %cst_749 : f32 to vector<2x128xf32>
    %1720 = arith.mulf %1715, %1719 : vector<2x128xf32>
    %1721 = arith.subf %1718, %1720 : vector<2x128xf32>
    %cst_750 = arith.constant 1.000000e+00 : f32
    %1722 = vector.broadcast %cst_750 : f32 to vector<2x128xf32>
    %1723 = arith.cmpf ogt, %1721, %1722 : vector<2x128xf32>
    %1724 = arith.extui %1723 : vector<2x128xi1> to vector<2x128xi32>
    %1725 = arith.sitofp %1724 : vector<2x128xi32> to vector<2x128xf32>
    %c70_751 = arith.constant 70 : index
    %c256_752 = arith.constant 256 : index
    %1726 = vector.load %arg6[%c70_751, %c256_752] : memref<128x512xf32, #tpu.memory_space<vmem>>, vector<2x128xf32>
    tpu.vector_store %arg6[%c70_751, %c256_752], %1725 {strides = array<i32>} : memref<128x512xf32, #tpu.memory_space<vmem>>, vector<2x128xf32>,
    %c70_753 = arith.constant 70 : index
    %c384_754 = arith.constant 384 : index
    %1727 = vector.load %arg6[%c70_753, %c384_754] : memref<128x512xf32, #tpu.memory_space<vmem>>, vector<2x128xf32>
    tpu.vector_store %arg6[%c70_753, %c384_754], %1721 {strides = array<i32>} : memref<128x512xf32, #tpu.memory_space<vmem>>, vector<2x128xf32>,
    %1728 = vector.extract_strided_slice %1114 {offsets = [72, 0], sizes = [2, 128], strides = [1, 1]} : vector<128x128xf32> to vector<2x128xf32>
    %cst_755 = arith.constant 1.000000e+00 : f32
    %1729 = vector.broadcast %cst_755 : f32 to vector<2x128xf32>
    %1730 = arith.cmpf ogt, %1721, %1729 : vector<2x128xf32>
    %1731 = arith.extui %1730 : vector<2x128xi1> to vector<2x128xi32>
    %1732 = arith.sitofp %1731 : vector<2x128xi32> to vector<2x128xf32>
    %cst_756 = arith.constant 5.000000e-01 : f32
    %1733 = vector.broadcast %cst_756 : f32 to vector<2x128xf32>
    %1734 = arith.mulf %1733, %1721 : vector<2x128xf32>
    %1735 = arith.addf %1734, %1728 : vector<2x128xf32>
    %cst_757 = arith.constant 1.000000e+00 : f32
    %1736 = vector.broadcast %cst_757 : f32 to vector<2x128xf32>
    %1737 = arith.mulf %1732, %1736 : vector<2x128xf32>
    %1738 = arith.subf %1735, %1737 : vector<2x128xf32>
    %cst_758 = arith.constant 1.000000e+00 : f32
    %1739 = vector.broadcast %cst_758 : f32 to vector<2x128xf32>
    %1740 = arith.cmpf ogt, %1738, %1739 : vector<2x128xf32>
    %1741 = arith.extui %1740 : vector<2x128xi1> to vector<2x128xi32>
    %1742 = arith.sitofp %1741 : vector<2x128xi32> to vector<2x128xf32>
    %c72_759 = arith.constant 72 : index
    %c256_760 = arith.constant 256 : index
    %1743 = vector.load %arg6[%c72_759, %c256_760] : memref<128x512xf32, #tpu.memory_space<vmem>>, vector<2x128xf32>
    tpu.vector_store %arg6[%c72_759, %c256_760], %1742 {strides = array<i32>} : memref<128x512xf32, #tpu.memory_space<vmem>>, vector<2x128xf32>,
    %c72_761 = arith.constant 72 : index
    %c384_762 = arith.constant 384 : index
    %1744 = vector.load %arg6[%c72_761, %c384_762] : memref<128x512xf32, #tpu.memory_space<vmem>>, vector<2x128xf32>
    tpu.vector_store %arg6[%c72_761, %c384_762], %1738 {strides = array<i32>} : memref<128x512xf32, #tpu.memory_space<vmem>>, vector<2x128xf32>,
    %1745 = vector.extract_strided_slice %1114 {offsets = [74, 0], sizes = [2, 128], strides = [1, 1]} : vector<128x128xf32> to vector<2x128xf32>
    %cst_763 = arith.constant 1.000000e+00 : f32
    %1746 = vector.broadcast %cst_763 : f32 to vector<2x128xf32>
    %1747 = arith.cmpf ogt, %1738, %1746 : vector<2x128xf32>
    %1748 = arith.extui %1747 : vector<2x128xi1> to vector<2x128xi32>
    %1749 = arith.sitofp %1748 : vector<2x128xi32> to vector<2x128xf32>
    %cst_764 = arith.constant 5.000000e-01 : f32
    %1750 = vector.broadcast %cst_764 : f32 to vector<2x128xf32>
    %1751 = arith.mulf %1750, %1738 : vector<2x128xf32>
    %1752 = arith.addf %1751, %1745 : vector<2x128xf32>
    %cst_765 = arith.constant 1.000000e+00 : f32
    %1753 = vector.broadcast %cst_765 : f32 to vector<2x128xf32>
    %1754 = arith.mulf %1749, %1753 : vector<2x128xf32>
    %1755 = arith.subf %1752, %1754 : vector<2x128xf32>
    %cst_766 = arith.constant 1.000000e+00 : f32
    %1756 = vector.broadcast %cst_766 : f32 to vector<2x128xf32>
    %1757 = arith.cmpf ogt, %1755, %1756 : vector<2x128xf32>
    %1758 = arith.extui %1757 : vector<2x128xi1> to vector<2x128xi32>
    %1759 = arith.sitofp %1758 : vector<2x128xi32> to vector<2x128xf32>
    %c74_767 = arith.constant 74 : index
    %c256_768 = arith.constant 256 : index
    %1760 = vector.load %arg6[%c74_767, %c256_768] : memref<128x512xf32, #tpu.memory_space<vmem>>, vector<2x128xf32>
    tpu.vector_store %arg6[%c74_767, %c256_768], %1759 {strides = array<i32>} : memref<128x512xf32, #tpu.memory_space<vmem>>, vector<2x128xf32>,
    %c74_769 = arith.constant 74 : index
    %c384_770 = arith.constant 384 : index
    %1761 = vector.load %arg6[%c74_769, %c384_770] : memref<128x512xf32, #tpu.memory_space<vmem>>, vector<2x128xf32>
    tpu.vector_store %arg6[%c74_769, %c384_770], %1755 {strides = array<i32>} : memref<128x512xf32, #tpu.memory_space<vmem>>, vector<2x128xf32>,
    %1762 = vector.extract_strided_slice %1114 {offsets = [76, 0], sizes = [2, 128], strides = [1, 1]} : vector<128x128xf32> to vector<2x128xf32>
    %cst_771 = arith.constant 1.000000e+00 : f32
    %1763 = vector.broadcast %cst_771 : f32 to vector<2x128xf32>
    %1764 = arith.cmpf ogt, %1755, %1763 : vector<2x128xf32>
    %1765 = arith.extui %1764 : vector<2x128xi1> to vector<2x128xi32>
    %1766 = arith.sitofp %1765 : vector<2x128xi32> to vector<2x128xf32>
    %cst_772 = arith.constant 5.000000e-01 : f32
    %1767 = vector.broadcast %cst_772 : f32 to vector<2x128xf32>
    %1768 = arith.mulf %1767, %1755 : vector<2x128xf32>
    %1769 = arith.addf %1768, %1762 : vector<2x128xf32>
    %cst_773 = arith.constant 1.000000e+00 : f32
    %1770 = vector.broadcast %cst_773 : f32 to vector<2x128xf32>
    %1771 = arith.mulf %1766, %1770 : vector<2x128xf32>
    %1772 = arith.subf %1769, %1771 : vector<2x128xf32>
    %cst_774 = arith.constant 1.000000e+00 : f32
    %1773 = vector.broadcast %cst_774 : f32 to vector<2x128xf32>
    %1774 = arith.cmpf ogt, %1772, %1773 : vector<2x128xf32>
    %1775 = arith.extui %1774 : vector<2x128xi1> to vector<2x128xi32>
    %1776 = arith.sitofp %1775 : vector<2x128xi32> to vector<2x128xf32>
    %c76_775 = arith.constant 76 : index
    %c256_776 = arith.constant 256 : index
    %1777 = vector.load %arg6[%c76_775, %c256_776] : memref<128x512xf32, #tpu.memory_space<vmem>>, vector<2x128xf32>
    tpu.vector_store %arg6[%c76_775, %c256_776], %1776 {strides = array<i32>} : memref<128x512xf32, #tpu.memory_space<vmem>>, vector<2x128xf32>,
    %c76_777 = arith.constant 76 : index
    %c384_778 = arith.constant 384 : index
    %1778 = vector.load %arg6[%c76_777, %c384_778] : memref<128x512xf32, #tpu.memory_space<vmem>>, vector<2x128xf32>
    tpu.vector_store %arg6[%c76_777, %c384_778], %1772 {strides = array<i32>} : memref<128x512xf32, #tpu.memory_space<vmem>>, vector<2x128xf32>,
    %1779 = vector.extract_strided_slice %1114 {offsets = [78, 0], sizes = [2, 128], strides = [1, 1]} : vector<128x128xf32> to vector<2x128xf32>
    %cst_779 = arith.constant 1.000000e+00 : f32
    %1780 = vector.broadcast %cst_779 : f32 to vector<2x128xf32>
    %1781 = arith.cmpf ogt, %1772, %1780 : vector<2x128xf32>
    %1782 = arith.extui %1781 : vector<2x128xi1> to vector<2x128xi32>
    %1783 = arith.sitofp %1782 : vector<2x128xi32> to vector<2x128xf32>
    %cst_780 = arith.constant 5.000000e-01 : f32
    %1784 = vector.broadcast %cst_780 : f32 to vector<2x128xf32>
    %1785 = arith.mulf %1784, %1772 : vector<2x128xf32>
    %1786 = arith.addf %1785, %1779 : vector<2x128xf32>
    %cst_781 = arith.constant 1.000000e+00 : f32
    %1787 = vector.broadcast %cst_781 : f32 to vector<2x128xf32>
    %1788 = arith.mulf %1783, %1787 : vector<2x128xf32>
    %1789 = arith.subf %1786, %1788 : vector<2x128xf32>
    %cst_782 = arith.constant 1.000000e+00 : f32
    %1790 = vector.broadcast %cst_782 : f32 to vector<2x128xf32>
    %1791 = arith.cmpf ogt, %1789, %1790 : vector<2x128xf32>
    %1792 = arith.extui %1791 : vector<2x128xi1> to vector<2x128xi32>
    %1793 = arith.sitofp %1792 : vector<2x128xi32> to vector<2x128xf32>
    %c78_783 = arith.constant 78 : index
    %c256_784 = arith.constant 256 : index
    %1794 = vector.load %arg6[%c78_783, %c256_784] : memref<128x512xf32, #tpu.memory_space<vmem>>, vector<2x128xf32>
    tpu.vector_store %arg6[%c78_783, %c256_784], %1793 {strides = array<i32>} : memref<128x512xf32, #tpu.memory_space<vmem>>, vector<2x128xf32>,
    %c78_785 = arith.constant 78 : index
    %c384_786 = arith.constant 384 : index
    %1795 = vector.load %arg6[%c78_785, %c384_786] : memref<128x512xf32, #tpu.memory_space<vmem>>, vector<2x128xf32>
    tpu.vector_store %arg6[%c78_785, %c384_786], %1789 {strides = array<i32>} : memref<128x512xf32, #tpu.memory_space<vmem>>, vector<2x128xf32>,
    %1796 = vector.extract_strided_slice %1114 {offsets = [80, 0], sizes = [2, 128], strides = [1, 1]} : vector<128x128xf32> to vector<2x128xf32>
    %cst_787 = arith.constant 1.000000e+00 : f32
    %1797 = vector.broadcast %cst_787 : f32 to vector<2x128xf32>
    %1798 = arith.cmpf ogt, %1789, %1797 : vector<2x128xf32>
    %1799 = arith.extui %1798 : vector<2x128xi1> to vector<2x128xi32>
    %1800 = arith.sitofp %1799 : vector<2x128xi32> to vector<2x128xf32>
    %cst_788 = arith.constant 5.000000e-01 : f32
    %1801 = vector.broadcast %cst_788 : f32 to vector<2x128xf32>
    %1802 = arith.mulf %1801, %1789 : vector<2x128xf32>
    %1803 = arith.addf %1802, %1796 : vector<2x128xf32>
    %cst_789 = arith.constant 1.000000e+00 : f32
    %1804 = vector.broadcast %cst_789 : f32 to vector<2x128xf32>
    %1805 = arith.mulf %1800, %1804 : vector<2x128xf32>
    %1806 = arith.subf %1803, %1805 : vector<2x128xf32>
    %cst_790 = arith.constant 1.000000e+00 : f32
    %1807 = vector.broadcast %cst_790 : f32 to vector<2x128xf32>
    %1808 = arith.cmpf ogt, %1806, %1807 : vector<2x128xf32>
    %1809 = arith.extui %1808 : vector<2x128xi1> to vector<2x128xi32>
    %1810 = arith.sitofp %1809 : vector<2x128xi32> to vector<2x128xf32>
    %c80_791 = arith.constant 80 : index
    %c256_792 = arith.constant 256 : index
    %1811 = vector.load %arg6[%c80_791, %c256_792] : memref<128x512xf32, #tpu.memory_space<vmem>>, vector<2x128xf32>
    tpu.vector_store %arg6[%c80_791, %c256_792], %1810 {strides = array<i32>} : memref<128x512xf32, #tpu.memory_space<vmem>>, vector<2x128xf32>,
    %c80_793 = arith.constant 80 : index
    %c384_794 = arith.constant 384 : index
    %1812 = vector.load %arg6[%c80_793, %c384_794] : memref<128x512xf32, #tpu.memory_space<vmem>>, vector<2x128xf32>
    tpu.vector_store %arg6[%c80_793, %c384_794], %1806 {strides = array<i32>} : memref<128x512xf32, #tpu.memory_space<vmem>>, vector<2x128xf32>,
    %1813 = vector.extract_strided_slice %1114 {offsets = [82, 0], sizes = [2, 128], strides = [1, 1]} : vector<128x128xf32> to vector<2x128xf32>
    %cst_795 = arith.constant 1.000000e+00 : f32
    %1814 = vector.broadcast %cst_795 : f32 to vector<2x128xf32>
    %1815 = arith.cmpf ogt, %1806, %1814 : vector<2x128xf32>
    %1816 = arith.extui %1815 : vector<2x128xi1> to vector<2x128xi32>
    %1817 = arith.sitofp %1816 : vector<2x128xi32> to vector<2x128xf32>
    %cst_796 = arith.constant 5.000000e-01 : f32
    %1818 = vector.broadcast %cst_796 : f32 to vector<2x128xf32>
    %1819 = arith.mulf %1818, %1806 : vector<2x128xf32>
    %1820 = arith.addf %1819, %1813 : vector<2x128xf32>
    %cst_797 = arith.constant 1.000000e+00 : f32
    %1821 = vector.broadcast %cst_797 : f32 to vector<2x128xf32>
    %1822 = arith.mulf %1817, %1821 : vector<2x128xf32>
    %1823 = arith.subf %1820, %1822 : vector<2x128xf32>
    %cst_798 = arith.constant 1.000000e+00 : f32
    %1824 = vector.broadcast %cst_798 : f32 to vector<2x128xf32>
    %1825 = arith.cmpf ogt, %1823, %1824 : vector<2x128xf32>
    %1826 = arith.extui %1825 : vector<2x128xi1> to vector<2x128xi32>
    %1827 = arith.sitofp %1826 : vector<2x128xi32> to vector<2x128xf32>
    %c82_799 = arith.constant 82 : index
    %c256_800 = arith.constant 256 : index
    %1828 = vector.load %arg6[%c82_799, %c256_800] : memref<128x512xf32, #tpu.memory_space<vmem>>, vector<2x128xf32>
    tpu.vector_store %arg6[%c82_799, %c256_800], %1827 {strides = array<i32>} : memref<128x512xf32, #tpu.memory_space<vmem>>, vector<2x128xf32>,
    %c82_801 = arith.constant 82 : index
    %c384_802 = arith.constant 384 : index
    %1829 = vector.load %arg6[%c82_801, %c384_802] : memref<128x512xf32, #tpu.memory_space<vmem>>, vector<2x128xf32>
    tpu.vector_store %arg6[%c82_801, %c384_802], %1823 {strides = array<i32>} : memref<128x512xf32, #tpu.memory_space<vmem>>, vector<2x128xf32>,
    %1830 = vector.extract_strided_slice %1114 {offsets = [84, 0], sizes = [2, 128], strides = [1, 1]} : vector<128x128xf32> to vector<2x128xf32>
    %cst_803 = arith.constant 1.000000e+00 : f32
    %1831 = vector.broadcast %cst_803 : f32 to vector<2x128xf32>
    %1832 = arith.cmpf ogt, %1823, %1831 : vector<2x128xf32>
    %1833 = arith.extui %1832 : vector<2x128xi1> to vector<2x128xi32>
    %1834 = arith.sitofp %1833 : vector<2x128xi32> to vector<2x128xf32>
    %cst_804 = arith.constant 5.000000e-01 : f32
    %1835 = vector.broadcast %cst_804 : f32 to vector<2x128xf32>
    %1836 = arith.mulf %1835, %1823 : vector<2x128xf32>
    %1837 = arith.addf %1836, %1830 : vector<2x128xf32>
    %cst_805 = arith.constant 1.000000e+00 : f32
    %1838 = vector.broadcast %cst_805 : f32 to vector<2x128xf32>
    %1839 = arith.mulf %1834, %1838 : vector<2x128xf32>
    %1840 = arith.subf %1837, %1839 : vector<2x128xf32>
    %cst_806 = arith.constant 1.000000e+00 : f32
    %1841 = vector.broadcast %cst_806 : f32 to vector<2x128xf32>
    %1842 = arith.cmpf ogt, %1840, %1841 : vector<2x128xf32>
    %1843 = arith.extui %1842 : vector<2x128xi1> to vector<2x128xi32>
    %1844 = arith.sitofp %1843 : vector<2x128xi32> to vector<2x128xf32>
    %c84_807 = arith.constant 84 : index
    %c256_808 = arith.constant 256 : index
    %1845 = vector.load %arg6[%c84_807, %c256_808] : memref<128x512xf32, #tpu.memory_space<vmem>>, vector<2x128xf32>
    tpu.vector_store %arg6[%c84_807, %c256_808], %1844 {strides = array<i32>} : memref<128x512xf32, #tpu.memory_space<vmem>>, vector<2x128xf32>,
    %c84_809 = arith.constant 84 : index
    %c384_810 = arith.constant 384 : index
    %1846 = vector.load %arg6[%c84_809, %c384_810] : memref<128x512xf32, #tpu.memory_space<vmem>>, vector<2x128xf32>
    tpu.vector_store %arg6[%c84_809, %c384_810], %1840 {strides = array<i32>} : memref<128x512xf32, #tpu.memory_space<vmem>>, vector<2x128xf32>,
    %1847 = vector.extract_strided_slice %1114 {offsets = [86, 0], sizes = [2, 128], strides = [1, 1]} : vector<128x128xf32> to vector<2x128xf32>
    %cst_811 = arith.constant 1.000000e+00 : f32
    %1848 = vector.broadcast %cst_811 : f32 to vector<2x128xf32>
    %1849 = arith.cmpf ogt, %1840, %1848 : vector<2x128xf32>
    %1850 = arith.extui %1849 : vector<2x128xi1> to vector<2x128xi32>
    %1851 = arith.sitofp %1850 : vector<2x128xi32> to vector<2x128xf32>
    %cst_812 = arith.constant 5.000000e-01 : f32
    %1852 = vector.broadcast %cst_812 : f32 to vector<2x128xf32>
    %1853 = arith.mulf %1852, %1840 : vector<2x128xf32>
    %1854 = arith.addf %1853, %1847 : vector<2x128xf32>
    %cst_813 = arith.constant 1.000000e+00 : f32
    %1855 = vector.broadcast %cst_813 : f32 to vector<2x128xf32>
    %1856 = arith.mulf %1851, %1855 : vector<2x128xf32>
    %1857 = arith.subf %1854, %1856 : vector<2x128xf32>
    %cst_814 = arith.constant 1.000000e+00 : f32
    %1858 = vector.broadcast %cst_814 : f32 to vector<2x128xf32>
    %1859 = arith.cmpf ogt, %1857, %1858 : vector<2x128xf32>
    %1860 = arith.extui %1859 : vector<2x128xi1> to vector<2x128xi32>
    %1861 = arith.sitofp %1860 : vector<2x128xi32> to vector<2x128xf32>
    %c86_815 = arith.constant 86 : index
    %c256_816 = arith.constant 256 : index
    %1862 = vector.load %arg6[%c86_815, %c256_816] : memref<128x512xf32, #tpu.memory_space<vmem>>, vector<2x128xf32>
    tpu.vector_store %arg6[%c86_815, %c256_816], %1861 {strides = array<i32>} : memref<128x512xf32, #tpu.memory_space<vmem>>, vector<2x128xf32>,
    %c86_817 = arith.constant 86 : index
    %c384_818 = arith.constant 384 : index
    %1863 = vector.load %arg6[%c86_817, %c384_818] : memref<128x512xf32, #tpu.memory_space<vmem>>, vector<2x128xf32>
    tpu.vector_store %arg6[%c86_817, %c384_818], %1857 {strides = array<i32>} : memref<128x512xf32, #tpu.memory_space<vmem>>, vector<2x128xf32>,
    %1864 = vector.extract_strided_slice %1114 {offsets = [88, 0], sizes = [2, 128], strides = [1, 1]} : vector<128x128xf32> to vector<2x128xf32>
    %cst_819 = arith.constant 1.000000e+00 : f32
    %1865 = vector.broadcast %cst_819 : f32 to vector<2x128xf32>
    %1866 = arith.cmpf ogt, %1857, %1865 : vector<2x128xf32>
    %1867 = arith.extui %1866 : vector<2x128xi1> to vector<2x128xi32>
    %1868 = arith.sitofp %1867 : vector<2x128xi32> to vector<2x128xf32>
    %cst_820 = arith.constant 5.000000e-01 : f32
    %1869 = vector.broadcast %cst_820 : f32 to vector<2x128xf32>
    %1870 = arith.mulf %1869, %1857 : vector<2x128xf32>
    %1871 = arith.addf %1870, %1864 : vector<2x128xf32>
    %cst_821 = arith.constant 1.000000e+00 : f32
    %1872 = vector.broadcast %cst_821 : f32 to vector<2x128xf32>
    %1873 = arith.mulf %1868, %1872 : vector<2x128xf32>
    %1874 = arith.subf %1871, %1873 : vector<2x128xf32>
    %cst_822 = arith.constant 1.000000e+00 : f32
    %1875 = vector.broadcast %cst_822 : f32 to vector<2x128xf32>
    %1876 = arith.cmpf ogt, %1874, %1875 : vector<2x128xf32>
    %1877 = arith.extui %1876 : vector<2x128xi1> to vector<2x128xi32>
    %1878 = arith.sitofp %1877 : vector<2x128xi32> to vector<2x128xf32>
    %c88_823 = arith.constant 88 : index
    %c256_824 = arith.constant 256 : index
    %1879 = vector.load %arg6[%c88_823, %c256_824] : memref<128x512xf32, #tpu.memory_space<vmem>>, vector<2x128xf32>
    tpu.vector_store %arg6[%c88_823, %c256_824], %1878 {strides = array<i32>} : memref<128x512xf32, #tpu.memory_space<vmem>>, vector<2x128xf32>,
    %c88_825 = arith.constant 88 : index
    %c384_826 = arith.constant 384 : index
    %1880 = vector.load %arg6[%c88_825, %c384_826] : memref<128x512xf32, #tpu.memory_space<vmem>>, vector<2x128xf32>
    tpu.vector_store %arg6[%c88_825, %c384_826], %1874 {strides = array<i32>} : memref<128x512xf32, #tpu.memory_space<vmem>>, vector<2x128xf32>,
    %1881 = vector.extract_strided_slice %1114 {offsets = [90, 0], sizes = [2, 128], strides = [1, 1]} : vector<128x128xf32> to vector<2x128xf32>
    %cst_827 = arith.constant 1.000000e+00 : f32
    %1882 = vector.broadcast %cst_827 : f32 to vector<2x128xf32>
    %1883 = arith.cmpf ogt, %1874, %1882 : vector<2x128xf32>
    %1884 = arith.extui %1883 : vector<2x128xi1> to vector<2x128xi32>
    %1885 = arith.sitofp %1884 : vector<2x128xi32> to vector<2x128xf32>
    %cst_828 = arith.constant 5.000000e-01 : f32
    %1886 = vector.broadcast %cst_828 : f32 to vector<2x128xf32>
    %1887 = arith.mulf %1886, %1874 : vector<2x128xf32>
    %1888 = arith.addf %1887, %1881 : vector<2x128xf32>
    %cst_829 = arith.constant 1.000000e+00 : f32
    %1889 = vector.broadcast %cst_829 : f32 to vector<2x128xf32>
    %1890 = arith.mulf %1885, %1889 : vector<2x128xf32>
    %1891 = arith.subf %1888, %1890 : vector<2x128xf32>
    %cst_830 = arith.constant 1.000000e+00 : f32
    %1892 = vector.broadcast %cst_830 : f32 to vector<2x128xf32>
    %1893 = arith.cmpf ogt, %1891, %1892 : vector<2x128xf32>
    %1894 = arith.extui %1893 : vector<2x128xi1> to vector<2x128xi32>
    %1895 = arith.sitofp %1894 : vector<2x128xi32> to vector<2x128xf32>
    %c90_831 = arith.constant 90 : index
    %c256_832 = arith.constant 256 : index
    %1896 = vector.load %arg6[%c90_831, %c256_832] : memref<128x512xf32, #tpu.memory_space<vmem>>, vector<2x128xf32>
    tpu.vector_store %arg6[%c90_831, %c256_832], %1895 {strides = array<i32>} : memref<128x512xf32, #tpu.memory_space<vmem>>, vector<2x128xf32>,
    %c90_833 = arith.constant 90 : index
    %c384_834 = arith.constant 384 : index
    %1897 = vector.load %arg6[%c90_833, %c384_834] : memref<128x512xf32, #tpu.memory_space<vmem>>, vector<2x128xf32>
    tpu.vector_store %arg6[%c90_833, %c384_834], %1891 {strides = array<i32>} : memref<128x512xf32, #tpu.memory_space<vmem>>, vector<2x128xf32>,
    %1898 = vector.extract_strided_slice %1114 {offsets = [92, 0], sizes = [2, 128], strides = [1, 1]} : vector<128x128xf32> to vector<2x128xf32>
    %cst_835 = arith.constant 1.000000e+00 : f32
    %1899 = vector.broadcast %cst_835 : f32 to vector<2x128xf32>
    %1900 = arith.cmpf ogt, %1891, %1899 : vector<2x128xf32>
    %1901 = arith.extui %1900 : vector<2x128xi1> to vector<2x128xi32>
    %1902 = arith.sitofp %1901 : vector<2x128xi32> to vector<2x128xf32>
    %cst_836 = arith.constant 5.000000e-01 : f32
    %1903 = vector.broadcast %cst_836 : f32 to vector<2x128xf32>
    %1904 = arith.mulf %1903, %1891 : vector<2x128xf32>
    %1905 = arith.addf %1904, %1898 : vector<2x128xf32>
    %cst_837 = arith.constant 1.000000e+00 : f32
    %1906 = vector.broadcast %cst_837 : f32 to vector<2x128xf32>
    %1907 = arith.mulf %1902, %1906 : vector<2x128xf32>
    %1908 = arith.subf %1905, %1907 : vector<2x128xf32>
    %cst_838 = arith.constant 1.000000e+00 : f32
    %1909 = vector.broadcast %cst_838 : f32 to vector<2x128xf32>
    %1910 = arith.cmpf ogt, %1908, %1909 : vector<2x128xf32>
    %1911 = arith.extui %1910 : vector<2x128xi1> to vector<2x128xi32>
    %1912 = arith.sitofp %1911 : vector<2x128xi32> to vector<2x128xf32>
    %c92_839 = arith.constant 92 : index
    %c256_840 = arith.constant 256 : index
    %1913 = vector.load %arg6[%c92_839, %c256_840] : memref<128x512xf32, #tpu.memory_space<vmem>>, vector<2x128xf32>
    tpu.vector_store %arg6[%c92_839, %c256_840], %1912 {strides = array<i32>} : memref<128x512xf32, #tpu.memory_space<vmem>>, vector<2x128xf32>,
    %c92_841 = arith.constant 92 : index
    %c384_842 = arith.constant 384 : index
    %1914 = vector.load %arg6[%c92_841, %c384_842] : memref<128x512xf32, #tpu.memory_space<vmem>>, vector<2x128xf32>
    tpu.vector_store %arg6[%c92_841, %c384_842], %1908 {strides = array<i32>} : memref<128x512xf32, #tpu.memory_space<vmem>>, vector<2x128xf32>,
    %1915 = vector.extract_strided_slice %1114 {offsets = [94, 0], sizes = [2, 128], strides = [1, 1]} : vector<128x128xf32> to vector<2x128xf32>
    %cst_843 = arith.constant 1.000000e+00 : f32
    %1916 = vector.broadcast %cst_843 : f32 to vector<2x128xf32>
    %1917 = arith.cmpf ogt, %1908, %1916 : vector<2x128xf32>
    %1918 = arith.extui %1917 : vector<2x128xi1> to vector<2x128xi32>
    %1919 = arith.sitofp %1918 : vector<2x128xi32> to vector<2x128xf32>
    %cst_844 = arith.constant 5.000000e-01 : f32
    %1920 = vector.broadcast %cst_844 : f32 to vector<2x128xf32>
    %1921 = arith.mulf %1920, %1908 : vector<2x128xf32>
    %1922 = arith.addf %1921, %1915 : vector<2x128xf32>
    %cst_845 = arith.constant 1.000000e+00 : f32
    %1923 = vector.broadcast %cst_845 : f32 to vector<2x128xf32>
    %1924 = arith.mulf %1919, %1923 : vector<2x128xf32>
    %1925 = arith.subf %1922, %1924 : vector<2x128xf32>
    %cst_846 = arith.constant 1.000000e+00 : f32
    %1926 = vector.broadcast %cst_846 : f32 to vector<2x128xf32>
    %1927 = arith.cmpf ogt, %1925, %1926 : vector<2x128xf32>
    %1928 = arith.extui %1927 : vector<2x128xi1> to vector<2x128xi32>
    %1929 = arith.sitofp %1928 : vector<2x128xi32> to vector<2x128xf32>
    %c94_847 = arith.constant 94 : index
    %c256_848 = arith.constant 256 : index
    %1930 = vector.load %arg6[%c94_847, %c256_848] : memref<128x512xf32, #tpu.memory_space<vmem>>, vector<2x128xf32>
    tpu.vector_store %arg6[%c94_847, %c256_848], %1929 {strides = array<i32>} : memref<128x512xf32, #tpu.memory_space<vmem>>, vector<2x128xf32>,
    %c94_849 = arith.constant 94 : index
    %c384_850 = arith.constant 384 : index
    %1931 = vector.load %arg6[%c94_849, %c384_850] : memref<128x512xf32, #tpu.memory_space<vmem>>, vector<2x128xf32>
    tpu.vector_store %arg6[%c94_849, %c384_850], %1925 {strides = array<i32>} : memref<128x512xf32, #tpu.memory_space<vmem>>, vector<2x128xf32>,
    %1932 = vector.extract_strided_slice %1114 {offsets = [96, 0], sizes = [2, 128], strides = [1, 1]} : vector<128x128xf32> to vector<2x128xf32>
    %cst_851 = arith.constant 1.000000e+00 : f32
    %1933 = vector.broadcast %cst_851 : f32 to vector<2x128xf32>
    %1934 = arith.cmpf ogt, %1925, %1933 : vector<2x128xf32>
    %1935 = arith.extui %1934 : vector<2x128xi1> to vector<2x128xi32>
    %1936 = arith.sitofp %1935 : vector<2x128xi32> to vector<2x128xf32>
    %cst_852 = arith.constant 5.000000e-01 : f32
    %1937 = vector.broadcast %cst_852 : f32 to vector<2x128xf32>
    %1938 = arith.mulf %1937, %1925 : vector<2x128xf32>
    %1939 = arith.addf %1938, %1932 : vector<2x128xf32>
    %cst_853 = arith.constant 1.000000e+00 : f32
    %1940 = vector.broadcast %cst_853 : f32 to vector<2x128xf32>
    %1941 = arith.mulf %1936, %1940 : vector<2x128xf32>
    %1942 = arith.subf %1939, %1941 : vector<2x128xf32>
    %cst_854 = arith.constant 1.000000e+00 : f32
    %1943 = vector.broadcast %cst_854 : f32 to vector<2x128xf32>
    %1944 = arith.cmpf ogt, %1942, %1943 : vector<2x128xf32>
    %1945 = arith.extui %1944 : vector<2x128xi1> to vector<2x128xi32>
    %1946 = arith.sitofp %1945 : vector<2x128xi32> to vector<2x128xf32>
    %c96_855 = arith.constant 96 : index
    %c256_856 = arith.constant 256 : index
    %1947 = vector.load %arg6[%c96_855, %c256_856] : memref<128x512xf32, #tpu.memory_space<vmem>>, vector<2x128xf32>
    tpu.vector_store %arg6[%c96_855, %c256_856], %1946 {strides = array<i32>} : memref<128x512xf32, #tpu.memory_space<vmem>>, vector<2x128xf32>,
    %c96_857 = arith.constant 96 : index
    %c384_858 = arith.constant 384 : index
    %1948 = vector.load %arg6[%c96_857, %c384_858] : memref<128x512xf32, #tpu.memory_space<vmem>>, vector<2x128xf32>
    tpu.vector_store %arg6[%c96_857, %c384_858], %1942 {strides = array<i32>} : memref<128x512xf32, #tpu.memory_space<vmem>>, vector<2x128xf32>,
    %1949 = vector.extract_strided_slice %1114 {offsets = [98, 0], sizes = [2, 128], strides = [1, 1]} : vector<128x128xf32> to vector<2x128xf32>
    %cst_859 = arith.constant 1.000000e+00 : f32
    %1950 = vector.broadcast %cst_859 : f32 to vector<2x128xf32>
    %1951 = arith.cmpf ogt, %1942, %1950 : vector<2x128xf32>
    %1952 = arith.extui %1951 : vector<2x128xi1> to vector<2x128xi32>
    %1953 = arith.sitofp %1952 : vector<2x128xi32> to vector<2x128xf32>
    %cst_860 = arith.constant 5.000000e-01 : f32
    %1954 = vector.broadcast %cst_860 : f32 to vector<2x128xf32>
    %1955 = arith.mulf %1954, %1942 : vector<2x128xf32>
    %1956 = arith.addf %1955, %1949 : vector<2x128xf32>
    %cst_861 = arith.constant 1.000000e+00 : f32
    %1957 = vector.broadcast %cst_861 : f32 to vector<2x128xf32>
    %1958 = arith.mulf %1953, %1957 : vector<2x128xf32>
    %1959 = arith.subf %1956, %1958 : vector<2x128xf32>
    %cst_862 = arith.constant 1.000000e+00 : f32
    %1960 = vector.broadcast %cst_862 : f32 to vector<2x128xf32>
    %1961 = arith.cmpf ogt, %1959, %1960 : vector<2x128xf32>
    %1962 = arith.extui %1961 : vector<2x128xi1> to vector<2x128xi32>
    %1963 = arith.sitofp %1962 : vector<2x128xi32> to vector<2x128xf32>
    %c98_863 = arith.constant 98 : index
    %c256_864 = arith.constant 256 : index
    %1964 = vector.load %arg6[%c98_863, %c256_864] : memref<128x512xf32, #tpu.memory_space<vmem>>, vector<2x128xf32>
    tpu.vector_store %arg6[%c98_863, %c256_864], %1963 {strides = array<i32>} : memref<128x512xf32, #tpu.memory_space<vmem>>, vector<2x128xf32>,
    %c98_865 = arith.constant 98 : index
    %c384_866 = arith.constant 384 : index
    %1965 = vector.load %arg6[%c98_865, %c384_866] : memref<128x512xf32, #tpu.memory_space<vmem>>, vector<2x128xf32>
    tpu.vector_store %arg6[%c98_865, %c384_866], %1959 {strides = array<i32>} : memref<128x512xf32, #tpu.memory_space<vmem>>, vector<2x128xf32>,
    %1966 = vector.extract_strided_slice %1114 {offsets = [100, 0], sizes = [2, 128], strides = [1, 1]} : vector<128x128xf32> to vector<2x128xf32>
    %cst_867 = arith.constant 1.000000e+00 : f32
    %1967 = vector.broadcast %cst_867 : f32 to vector<2x128xf32>
    %1968 = arith.cmpf ogt, %1959, %1967 : vector<2x128xf32>
    %1969 = arith.extui %1968 : vector<2x128xi1> to vector<2x128xi32>
    %1970 = arith.sitofp %1969 : vector<2x128xi32> to vector<2x128xf32>
    %cst_868 = arith.constant 5.000000e-01 : f32
    %1971 = vector.broadcast %cst_868 : f32 to vector<2x128xf32>
    %1972 = arith.mulf %1971, %1959 : vector<2x128xf32>
    %1973 = arith.addf %1972, %1966 : vector<2x128xf32>
    %cst_869 = arith.constant 1.000000e+00 : f32
    %1974 = vector.broadcast %cst_869 : f32 to vector<2x128xf32>
    %1975 = arith.mulf %1970, %1974 : vector<2x128xf32>
    %1976 = arith.subf %1973, %1975 : vector<2x128xf32>
    %cst_870 = arith.constant 1.000000e+00 : f32
    %1977 = vector.broadcast %cst_870 : f32 to vector<2x128xf32>
    %1978 = arith.cmpf ogt, %1976, %1977 : vector<2x128xf32>
    %1979 = arith.extui %1978 : vector<2x128xi1> to vector<2x128xi32>
    %1980 = arith.sitofp %1979 : vector<2x128xi32> to vector<2x128xf32>
    %c100_871 = arith.constant 100 : index
    %c256_872 = arith.constant 256 : index
    %1981 = vector.load %arg6[%c100_871, %c256_872] : memref<128x512xf32, #tpu.memory_space<vmem>>, vector<2x128xf32>
    tpu.vector_store %arg6[%c100_871, %c256_872], %1980 {strides = array<i32>} : memref<128x512xf32, #tpu.memory_space<vmem>>, vector<2x128xf32>,
    %c100_873 = arith.constant 100 : index
    %c384_874 = arith.constant 384 : index
    %1982 = vector.load %arg6[%c100_873, %c384_874] : memref<128x512xf32, #tpu.memory_space<vmem>>, vector<2x128xf32>
    tpu.vector_store %arg6[%c100_873, %c384_874], %1976 {strides = array<i32>} : memref<128x512xf32, #tpu.memory_space<vmem>>, vector<2x128xf32>,
    %1983 = vector.extract_strided_slice %1114 {offsets = [102, 0], sizes = [2, 128], strides = [1, 1]} : vector<128x128xf32> to vector<2x128xf32>
    %cst_875 = arith.constant 1.000000e+00 : f32
    %1984 = vector.broadcast %cst_875 : f32 to vector<2x128xf32>
    %1985 = arith.cmpf ogt, %1976, %1984 : vector<2x128xf32>
    %1986 = arith.extui %1985 : vector<2x128xi1> to vector<2x128xi32>
    %1987 = arith.sitofp %1986 : vector<2x128xi32> to vector<2x128xf32>
    %cst_876 = arith.constant 5.000000e-01 : f32
    %1988 = vector.broadcast %cst_876 : f32 to vector<2x128xf32>
    %1989 = arith.mulf %1988, %1976 : vector<2x128xf32>
    %1990 = arith.addf %1989, %1983 : vector<2x128xf32>
    %cst_877 = arith.constant 1.000000e+00 : f32
    %1991 = vector.broadcast %cst_877 : f32 to vector<2x128xf32>
    %1992 = arith.mulf %1987, %1991 : vector<2x128xf32>
    %1993 = arith.subf %1990, %1992 : vector<2x128xf32>
    %cst_878 = arith.constant 1.000000e+00 : f32
    %1994 = vector.broadcast %cst_878 : f32 to vector<2x128xf32>
    %1995 = arith.cmpf ogt, %1993, %1994 : vector<2x128xf32>
    %1996 = arith.extui %1995 : vector<2x128xi1> to vector<2x128xi32>
    %1997 = arith.sitofp %1996 : vector<2x128xi32> to vector<2x128xf32>
    %c102_879 = arith.constant 102 : index
    %c256_880 = arith.constant 256 : index
    %1998 = vector.load %arg6[%c102_879, %c256_880] : memref<128x512xf32, #tpu.memory_space<vmem>>, vector<2x128xf32>
    tpu.vector_store %arg6[%c102_879, %c256_880], %1997 {strides = array<i32>} : memref<128x512xf32, #tpu.memory_space<vmem>>, vector<2x128xf32>,
    %c102_881 = arith.constant 102 : index
    %c384_882 = arith.constant 384 : index
    %1999 = vector.load %arg6[%c102_881, %c384_882] : memref<128x512xf32, #tpu.memory_space<vmem>>, vector<2x128xf32>
    tpu.vector_store %arg6[%c102_881, %c384_882], %1993 {strides = array<i32>} : memref<128x512xf32, #tpu.memory_space<vmem>>, vector<2x128xf32>,
    %2000 = vector.extract_strided_slice %1114 {offsets = [104, 0], sizes = [2, 128], strides = [1, 1]} : vector<128x128xf32> to vector<2x128xf32>
    %cst_883 = arith.constant 1.000000e+00 : f32
    %2001 = vector.broadcast %cst_883 : f32 to vector<2x128xf32>
    %2002 = arith.cmpf ogt, %1993, %2001 : vector<2x128xf32>
    %2003 = arith.extui %2002 : vector<2x128xi1> to vector<2x128xi32>
    %2004 = arith.sitofp %2003 : vector<2x128xi32> to vector<2x128xf32>
    %cst_884 = arith.constant 5.000000e-01 : f32
    %2005 = vector.broadcast %cst_884 : f32 to vector<2x128xf32>
    %2006 = arith.mulf %2005, %1993 : vector<2x128xf32>
    %2007 = arith.addf %2006, %2000 : vector<2x128xf32>
    %cst_885 = arith.constant 1.000000e+00 : f32
    %2008 = vector.broadcast %cst_885 : f32 to vector<2x128xf32>
    %2009 = arith.mulf %2004, %2008 : vector<2x128xf32>
    %2010 = arith.subf %2007, %2009 : vector<2x128xf32>
    %cst_886 = arith.constant 1.000000e+00 : f32
    %2011 = vector.broadcast %cst_886 : f32 to vector<2x128xf32>
    %2012 = arith.cmpf ogt, %2010, %2011 : vector<2x128xf32>
    %2013 = arith.extui %2012 : vector<2x128xi1> to vector<2x128xi32>
    %2014 = arith.sitofp %2013 : vector<2x128xi32> to vector<2x128xf32>
    %c104_887 = arith.constant 104 : index
    %c256_888 = arith.constant 256 : index
    %2015 = vector.load %arg6[%c104_887, %c256_888] : memref<128x512xf32, #tpu.memory_space<vmem>>, vector<2x128xf32>
    tpu.vector_store %arg6[%c104_887, %c256_888], %2014 {strides = array<i32>} : memref<128x512xf32, #tpu.memory_space<vmem>>, vector<2x128xf32>,
    %c104_889 = arith.constant 104 : index
    %c384_890 = arith.constant 384 : index
    %2016 = vector.load %arg6[%c104_889, %c384_890] : memref<128x512xf32, #tpu.memory_space<vmem>>, vector<2x128xf32>
    tpu.vector_store %arg6[%c104_889, %c384_890], %2010 {strides = array<i32>} : memref<128x512xf32, #tpu.memory_space<vmem>>, vector<2x128xf32>,
    %2017 = vector.extract_strided_slice %1114 {offsets = [106, 0], sizes = [2, 128], strides = [1, 1]} : vector<128x128xf32> to vector<2x128xf32>
    %cst_891 = arith.constant 1.000000e+00 : f32
    %2018 = vector.broadcast %cst_891 : f32 to vector<2x128xf32>
    %2019 = arith.cmpf ogt, %2010, %2018 : vector<2x128xf32>
    %2020 = arith.extui %2019 : vector<2x128xi1> to vector<2x128xi32>
    %2021 = arith.sitofp %2020 : vector<2x128xi32> to vector<2x128xf32>
    %cst_892 = arith.constant 5.000000e-01 : f32
    %2022 = vector.broadcast %cst_892 : f32 to vector<2x128xf32>
    %2023 = arith.mulf %2022, %2010 : vector<2x128xf32>
    %2024 = arith.addf %2023, %2017 : vector<2x128xf32>
    %cst_893 = arith.constant 1.000000e+00 : f32
    %2025 = vector.broadcast %cst_893 : f32 to vector<2x128xf32>
    %2026 = arith.mulf %2021, %2025 : vector<2x128xf32>
    %2027 = arith.subf %2024, %2026 : vector<2x128xf32>
    %cst_894 = arith.constant 1.000000e+00 : f32
    %2028 = vector.broadcast %cst_894 : f32 to vector<2x128xf32>
    %2029 = arith.cmpf ogt, %2027, %2028 : vector<2x128xf32>
    %2030 = arith.extui %2029 : vector<2x128xi1> to vector<2x128xi32>
    %2031 = arith.sitofp %2030 : vector<2x128xi32> to vector<2x128xf32>
    %c106_895 = arith.constant 106 : index
    %c256_896 = arith.constant 256 : index
    %2032 = vector.load %arg6[%c106_895, %c256_896] : memref<128x512xf32, #tpu.memory_space<vmem>>, vector<2x128xf32>
    tpu.vector_store %arg6[%c106_895, %c256_896], %2031 {strides = array<i32>} : memref<128x512xf32, #tpu.memory_space<vmem>>, vector<2x128xf32>,
    %c106_897 = arith.constant 106 : index
    %c384_898 = arith.constant 384 : index
    %2033 = vector.load %arg6[%c106_897, %c384_898] : memref<128x512xf32, #tpu.memory_space<vmem>>, vector<2x128xf32>
    tpu.vector_store %arg6[%c106_897, %c384_898], %2027 {strides = array<i32>} : memref<128x512xf32, #tpu.memory_space<vmem>>, vector<2x128xf32>,
    %2034 = vector.extract_strided_slice %1114 {offsets = [108, 0], sizes = [2, 128], strides = [1, 1]} : vector<128x128xf32> to vector<2x128xf32>
    %cst_899 = arith.constant 1.000000e+00 : f32
    %2035 = vector.broadcast %cst_899 : f32 to vector<2x128xf32>
    %2036 = arith.cmpf ogt, %2027, %2035 : vector<2x128xf32>
    %2037 = arith.extui %2036 : vector<2x128xi1> to vector<2x128xi32>
    %2038 = arith.sitofp %2037 : vector<2x128xi32> to vector<2x128xf32>
    %cst_900 = arith.constant 5.000000e-01 : f32
    %2039 = vector.broadcast %cst_900 : f32 to vector<2x128xf32>
    %2040 = arith.mulf %2039, %2027 : vector<2x128xf32>
    %2041 = arith.addf %2040, %2034 : vector<2x128xf32>
    %cst_901 = arith.constant 1.000000e+00 : f32
    %2042 = vector.broadcast %cst_901 : f32 to vector<2x128xf32>
    %2043 = arith.mulf %2038, %2042 : vector<2x128xf32>
    %2044 = arith.subf %2041, %2043 : vector<2x128xf32>
    %cst_902 = arith.constant 1.000000e+00 : f32
    %2045 = vector.broadcast %cst_902 : f32 to vector<2x128xf32>
    %2046 = arith.cmpf ogt, %2044, %2045 : vector<2x128xf32>
    %2047 = arith.extui %2046 : vector<2x128xi1> to vector<2x128xi32>
    %2048 = arith.sitofp %2047 : vector<2x128xi32> to vector<2x128xf32>
    %c108_903 = arith.constant 108 : index
    %c256_904 = arith.constant 256 : index
    %2049 = vector.load %arg6[%c108_903, %c256_904] : memref<128x512xf32, #tpu.memory_space<vmem>>, vector<2x128xf32>
    tpu.vector_store %arg6[%c108_903, %c256_904], %2048 {strides = array<i32>} : memref<128x512xf32, #tpu.memory_space<vmem>>, vector<2x128xf32>,
    %c108_905 = arith.constant 108 : index
    %c384_906 = arith.constant 384 : index
    %2050 = vector.load %arg6[%c108_905, %c384_906] : memref<128x512xf32, #tpu.memory_space<vmem>>, vector<2x128xf32>
    tpu.vector_store %arg6[%c108_905, %c384_906], %2044 {strides = array<i32>} : memref<128x512xf32, #tpu.memory_space<vmem>>, vector<2x128xf32>,
    %2051 = vector.extract_strided_slice %1114 {offsets = [110, 0], sizes = [2, 128], strides = [1, 1]} : vector<128x128xf32> to vector<2x128xf32>
    %cst_907 = arith.constant 1.000000e+00 : f32
    %2052 = vector.broadcast %cst_907 : f32 to vector<2x128xf32>
    %2053 = arith.cmpf ogt, %2044, %2052 : vector<2x128xf32>
    %2054 = arith.extui %2053 : vector<2x128xi1> to vector<2x128xi32>
    %2055 = arith.sitofp %2054 : vector<2x128xi32> to vector<2x128xf32>
    %cst_908 = arith.constant 5.000000e-01 : f32
    %2056 = vector.broadcast %cst_908 : f32 to vector<2x128xf32>
    %2057 = arith.mulf %2056, %2044 : vector<2x128xf32>
    %2058 = arith.addf %2057, %2051 : vector<2x128xf32>
    %cst_909 = arith.constant 1.000000e+00 : f32
    %2059 = vector.broadcast %cst_909 : f32 to vector<2x128xf32>
    %2060 = arith.mulf %2055, %2059 : vector<2x128xf32>
    %2061 = arith.subf %2058, %2060 : vector<2x128xf32>
    %cst_910 = arith.constant 1.000000e+00 : f32
    %2062 = vector.broadcast %cst_910 : f32 to vector<2x128xf32>
    %2063 = arith.cmpf ogt, %2061, %2062 : vector<2x128xf32>
    %2064 = arith.extui %2063 : vector<2x128xi1> to vector<2x128xi32>
    %2065 = arith.sitofp %2064 : vector<2x128xi32> to vector<2x128xf32>
    %c110_911 = arith.constant 110 : index
    %c256_912 = arith.constant 256 : index
    %2066 = vector.load %arg6[%c110_911, %c256_912] : memref<128x512xf32, #tpu.memory_space<vmem>>, vector<2x128xf32>
    tpu.vector_store %arg6[%c110_911, %c256_912], %2065 {strides = array<i32>} : memref<128x512xf32, #tpu.memory_space<vmem>>, vector<2x128xf32>,
    %c110_913 = arith.constant 110 : index
    %c384_914 = arith.constant 384 : index
    %2067 = vector.load %arg6[%c110_913, %c384_914] : memref<128x512xf32, #tpu.memory_space<vmem>>, vector<2x128xf32>
    tpu.vector_store %arg6[%c110_913, %c384_914], %2061 {strides = array<i32>} : memref<128x512xf32, #tpu.memory_space<vmem>>, vector<2x128xf32>,
    %2068 = vector.extract_strided_slice %1114 {offsets = [112, 0], sizes = [2, 128], strides = [1, 1]} : vector<128x128xf32> to vector<2x128xf32>
    %cst_915 = arith.constant 1.000000e+00 : f32
    %2069 = vector.broadcast %cst_915 : f32 to vector<2x128xf32>
    %2070 = arith.cmpf ogt, %2061, %2069 : vector<2x128xf32>
    %2071 = arith.extui %2070 : vector<2x128xi1> to vector<2x128xi32>
    %2072 = arith.sitofp %2071 : vector<2x128xi32> to vector<2x128xf32>
    %cst_916 = arith.constant 5.000000e-01 : f32
    %2073 = vector.broadcast %cst_916 : f32 to vector<2x128xf32>
    %2074 = arith.mulf %2073, %2061 : vector<2x128xf32>
    %2075 = arith.addf %2074, %2068 : vector<2x128xf32>
    %cst_917 = arith.constant 1.000000e+00 : f32
    %2076 = vector.broadcast %cst_917 : f32 to vector<2x128xf32>
    %2077 = arith.mulf %2072, %2076 : vector<2x128xf32>
    %2078 = arith.subf %2075, %2077 : vector<2x128xf32>
    %cst_918 = arith.constant 1.000000e+00 : f32
    %2079 = vector.broadcast %cst_918 : f32 to vector<2x128xf32>
    %2080 = arith.cmpf ogt, %2078, %2079 : vector<2x128xf32>
    %2081 = arith.extui %2080 : vector<2x128xi1> to vector<2x128xi32>
    %2082 = arith.sitofp %2081 : vector<2x128xi32> to vector<2x128xf32>
    %c112_919 = arith.constant 112 : index
    %c256_920 = arith.constant 256 : index
    %2083 = vector.load %arg6[%c112_919, %c256_920] : memref<128x512xf32, #tpu.memory_space<vmem>>, vector<2x128xf32>
    tpu.vector_store %arg6[%c112_919, %c256_920], %2082 {strides = array<i32>} : memref<128x512xf32, #tpu.memory_space<vmem>>, vector<2x128xf32>,
    %c112_921 = arith.constant 112 : index
    %c384_922 = arith.constant 384 : index
    %2084 = vector.load %arg6[%c112_921, %c384_922] : memref<128x512xf32, #tpu.memory_space<vmem>>, vector<2x128xf32>
    tpu.vector_store %arg6[%c112_921, %c384_922], %2078 {strides = array<i32>} : memref<128x512xf32, #tpu.memory_space<vmem>>, vector<2x128xf32>,
    %2085 = vector.extract_strided_slice %1114 {offsets = [114, 0], sizes = [2, 128], strides = [1, 1]} : vector<128x128xf32> to vector<2x128xf32>
    %cst_923 = arith.constant 1.000000e+00 : f32
    %2086 = vector.broadcast %cst_923 : f32 to vector<2x128xf32>
    %2087 = arith.cmpf ogt, %2078, %2086 : vector<2x128xf32>
    %2088 = arith.extui %2087 : vector<2x128xi1> to vector<2x128xi32>
    %2089 = arith.sitofp %2088 : vector<2x128xi32> to vector<2x128xf32>
    %cst_924 = arith.constant 5.000000e-01 : f32
    %2090 = vector.broadcast %cst_924 : f32 to vector<2x128xf32>
    %2091 = arith.mulf %2090, %2078 : vector<2x128xf32>
    %2092 = arith.addf %2091, %2085 : vector<2x128xf32>
    %cst_925 = arith.constant 1.000000e+00 : f32
    %2093 = vector.broadcast %cst_925 : f32 to vector<2x128xf32>
    %2094 = arith.mulf %2089, %2093 : vector<2x128xf32>
    %2095 = arith.subf %2092, %2094 : vector<2x128xf32>
    %cst_926 = arith.constant 1.000000e+00 : f32
    %2096 = vector.broadcast %cst_926 : f32 to vector<2x128xf32>
    %2097 = arith.cmpf ogt, %2095, %2096 : vector<2x128xf32>
    %2098 = arith.extui %2097 : vector<2x128xi1> to vector<2x128xi32>
    %2099 = arith.sitofp %2098 : vector<2x128xi32> to vector<2x128xf32>
    %c114_927 = arith.constant 114 : index
    %c256_928 = arith.constant 256 : index
    %2100 = vector.load %arg6[%c114_927, %c256_928] : memref<128x512xf32, #tpu.memory_space<vmem>>, vector<2x128xf32>
    tpu.vector_store %arg6[%c114_927, %c256_928], %2099 {strides = array<i32>} : memref<128x512xf32, #tpu.memory_space<vmem>>, vector<2x128xf32>,
    %c114_929 = arith.constant 114 : index
    %c384_930 = arith.constant 384 : index
    %2101 = vector.load %arg6[%c114_929, %c384_930] : memref<128x512xf32, #tpu.memory_space<vmem>>, vector<2x128xf32>
    tpu.vector_store %arg6[%c114_929, %c384_930], %2095 {strides = array<i32>} : memref<128x512xf32, #tpu.memory_space<vmem>>, vector<2x128xf32>,
    %2102 = vector.extract_strided_slice %1114 {offsets = [116, 0], sizes = [2, 128], strides = [1, 1]} : vector<128x128xf32> to vector<2x128xf32>
    %cst_931 = arith.constant 1.000000e+00 : f32
    %2103 = vector.broadcast %cst_931 : f32 to vector<2x128xf32>
    %2104 = arith.cmpf ogt, %2095, %2103 : vector<2x128xf32>
    %2105 = arith.extui %2104 : vector<2x128xi1> to vector<2x128xi32>
    %2106 = arith.sitofp %2105 : vector<2x128xi32> to vector<2x128xf32>
    %cst_932 = arith.constant 5.000000e-01 : f32
    %2107 = vector.broadcast %cst_932 : f32 to vector<2x128xf32>
    %2108 = arith.mulf %2107, %2095 : vector<2x128xf32>
    %2109 = arith.addf %2108, %2102 : vector<2x128xf32>
    %cst_933 = arith.constant 1.000000e+00 : f32
    %2110 = vector.broadcast %cst_933 : f32 to vector<2x128xf32>
    %2111 = arith.mulf %2106, %2110 : vector<2x128xf32>
    %2112 = arith.subf %2109, %2111 : vector<2x128xf32>
    %cst_934 = arith.constant 1.000000e+00 : f32
    %2113 = vector.broadcast %cst_934 : f32 to vector<2x128xf32>
    %2114 = arith.cmpf ogt, %2112, %2113 : vector<2x128xf32>
    %2115 = arith.extui %2114 : vector<2x128xi1> to vector<2x128xi32>
    %2116 = arith.sitofp %2115 : vector<2x128xi32> to vector<2x128xf32>
    %c116_935 = arith.constant 116 : index
    %c256_936 = arith.constant 256 : index
    %2117 = vector.load %arg6[%c116_935, %c256_936] : memref<128x512xf32, #tpu.memory_space<vmem>>, vector<2x128xf32>
    tpu.vector_store %arg6[%c116_935, %c256_936], %2116 {strides = array<i32>} : memref<128x512xf32, #tpu.memory_space<vmem>>, vector<2x128xf32>,
    %c116_937 = arith.constant 116 : index
    %c384_938 = arith.constant 384 : index
    %2118 = vector.load %arg6[%c116_937, %c384_938] : memref<128x512xf32, #tpu.memory_space<vmem>>, vector<2x128xf32>
    tpu.vector_store %arg6[%c116_937, %c384_938], %2112 {strides = array<i32>} : memref<128x512xf32, #tpu.memory_space<vmem>>, vector<2x128xf32>,
    %2119 = vector.extract_strided_slice %1114 {offsets = [118, 0], sizes = [2, 128], strides = [1, 1]} : vector<128x128xf32> to vector<2x128xf32>
    %cst_939 = arith.constant 1.000000e+00 : f32
    %2120 = vector.broadcast %cst_939 : f32 to vector<2x128xf32>
    %2121 = arith.cmpf ogt, %2112, %2120 : vector<2x128xf32>
    %2122 = arith.extui %2121 : vector<2x128xi1> to vector<2x128xi32>
    %2123 = arith.sitofp %2122 : vector<2x128xi32> to vector<2x128xf32>
    %cst_940 = arith.constant 5.000000e-01 : f32
    %2124 = vector.broadcast %cst_940 : f32 to vector<2x128xf32>
    %2125 = arith.mulf %2124, %2112 : vector<2x128xf32>
    %2126 = arith.addf %2125, %2119 : vector<2x128xf32>
    %cst_941 = arith.constant 1.000000e+00 : f32
    %2127 = vector.broadcast %cst_941 : f32 to vector<2x128xf32>
    %2128 = arith.mulf %2123, %2127 : vector<2x128xf32>
    %2129 = arith.subf %2126, %2128 : vector<2x128xf32>
    %cst_942 = arith.constant 1.000000e+00 : f32
    %2130 = vector.broadcast %cst_942 : f32 to vector<2x128xf32>
    %2131 = arith.cmpf ogt, %2129, %2130 : vector<2x128xf32>
    %2132 = arith.extui %2131 : vector<2x128xi1> to vector<2x128xi32>
    %2133 = arith.sitofp %2132 : vector<2x128xi32> to vector<2x128xf32>
    %c118_943 = arith.constant 118 : index
    %c256_944 = arith.constant 256 : index
    %2134 = vector.load %arg6[%c118_943, %c256_944] : memref<128x512xf32, #tpu.memory_space<vmem>>, vector<2x128xf32>
    tpu.vector_store %arg6[%c118_943, %c256_944], %2133 {strides = array<i32>} : memref<128x512xf32, #tpu.memory_space<vmem>>, vector<2x128xf32>,
    %c118_945 = arith.constant 118 : index
    %c384_946 = arith.constant 384 : index
    %2135 = vector.load %arg6[%c118_945, %c384_946] : memref<128x512xf32, #tpu.memory_space<vmem>>, vector<2x128xf32>
    tpu.vector_store %arg6[%c118_945, %c384_946], %2129 {strides = array<i32>} : memref<128x512xf32, #tpu.memory_space<vmem>>, vector<2x128xf32>,
    %2136 = vector.extract_strided_slice %1114 {offsets = [120, 0], sizes = [2, 128], strides = [1, 1]} : vector<128x128xf32> to vector<2x128xf32>
    %cst_947 = arith.constant 1.000000e+00 : f32
    %2137 = vector.broadcast %cst_947 : f32 to vector<2x128xf32>
    %2138 = arith.cmpf ogt, %2129, %2137 : vector<2x128xf32>
    %2139 = arith.extui %2138 : vector<2x128xi1> to vector<2x128xi32>
    %2140 = arith.sitofp %2139 : vector<2x128xi32> to vector<2x128xf32>
    %cst_948 = arith.constant 5.000000e-01 : f32
    %2141 = vector.broadcast %cst_948 : f32 to vector<2x128xf32>
    %2142 = arith.mulf %2141, %2129 : vector<2x128xf32>
    %2143 = arith.addf %2142, %2136 : vector<2x128xf32>
    %cst_949 = arith.constant 1.000000e+00 : f32
    %2144 = vector.broadcast %cst_949 : f32 to vector<2x128xf32>
    %2145 = arith.mulf %2140, %2144 : vector<2x128xf32>
    %2146 = arith.subf %2143, %2145 : vector<2x128xf32>
    %cst_950 = arith.constant 1.000000e+00 : f32
    %2147 = vector.broadcast %cst_950 : f32 to vector<2x128xf32>
    %2148 = arith.cmpf ogt, %2146, %2147 : vector<2x128xf32>
    %2149 = arith.extui %2148 : vector<2x128xi1> to vector<2x128xi32>
    %2150 = arith.sitofp %2149 : vector<2x128xi32> to vector<2x128xf32>
    %c120_951 = arith.constant 120 : index
    %c256_952 = arith.constant 256 : index
    %2151 = vector.load %arg6[%c120_951, %c256_952] : memref<128x512xf32, #tpu.memory_space<vmem>>, vector<2x128xf32>
    tpu.vector_store %arg6[%c120_951, %c256_952], %2150 {strides = array<i32>} : memref<128x512xf32, #tpu.memory_space<vmem>>, vector<2x128xf32>,
    %c120_953 = arith.constant 120 : index
    %c384_954 = arith.constant 384 : index
    %2152 = vector.load %arg6[%c120_953, %c384_954] : memref<128x512xf32, #tpu.memory_space<vmem>>, vector<2x128xf32>
    tpu.vector_store %arg6[%c120_953, %c384_954], %2146 {strides = array<i32>} : memref<128x512xf32, #tpu.memory_space<vmem>>, vector<2x128xf32>,
    %2153 = vector.extract_strided_slice %1114 {offsets = [122, 0], sizes = [2, 128], strides = [1, 1]} : vector<128x128xf32> to vector<2x128xf32>
    %cst_955 = arith.constant 1.000000e+00 : f32
    %2154 = vector.broadcast %cst_955 : f32 to vector<2x128xf32>
    %2155 = arith.cmpf ogt, %2146, %2154 : vector<2x128xf32>
    %2156 = arith.extui %2155 : vector<2x128xi1> to vector<2x128xi32>
    %2157 = arith.sitofp %2156 : vector<2x128xi32> to vector<2x128xf32>
    %cst_956 = arith.constant 5.000000e-01 : f32
    %2158 = vector.broadcast %cst_956 : f32 to vector<2x128xf32>
    %2159 = arith.mulf %2158, %2146 : vector<2x128xf32>
    %2160 = arith.addf %2159, %2153 : vector<2x128xf32>
    %cst_957 = arith.constant 1.000000e+00 : f32
    %2161 = vector.broadcast %cst_957 : f32 to vector<2x128xf32>
    %2162 = arith.mulf %2157, %2161 : vector<2x128xf32>
    %2163 = arith.subf %2160, %2162 : vector<2x128xf32>
    %cst_958 = arith.constant 1.000000e+00 : f32
    %2164 = vector.broadcast %cst_958 : f32 to vector<2x128xf32>
    %2165 = arith.cmpf ogt, %2163, %2164 : vector<2x128xf32>
    %2166 = arith.extui %2165 : vector<2x128xi1> to vector<2x128xi32>
    %2167 = arith.sitofp %2166 : vector<2x128xi32> to vector<2x128xf32>
    %c122_959 = arith.constant 122 : index
    %c256_960 = arith.constant 256 : index
    %2168 = vector.load %arg6[%c122_959, %c256_960] : memref<128x512xf32, #tpu.memory_space<vmem>>, vector<2x128xf32>
    tpu.vector_store %arg6[%c122_959, %c256_960], %2167 {strides = array<i32>} : memref<128x512xf32, #tpu.memory_space<vmem>>, vector<2x128xf32>,
    %c122_961 = arith.constant 122 : index
    %c384_962 = arith.constant 384 : index
    %2169 = vector.load %arg6[%c122_961, %c384_962] : memref<128x512xf32, #tpu.memory_space<vmem>>, vector<2x128xf32>
    tpu.vector_store %arg6[%c122_961, %c384_962], %2163 {strides = array<i32>} : memref<128x512xf32, #tpu.memory_space<vmem>>, vector<2x128xf32>,
    %2170 = vector.extract_strided_slice %1114 {offsets = [124, 0], sizes = [2, 128], strides = [1, 1]} : vector<128x128xf32> to vector<2x128xf32>
    %cst_963 = arith.constant 1.000000e+00 : f32
    %2171 = vector.broadcast %cst_963 : f32 to vector<2x128xf32>
    %2172 = arith.cmpf ogt, %2163, %2171 : vector<2x128xf32>
    %2173 = arith.extui %2172 : vector<2x128xi1> to vector<2x128xi32>
    %2174 = arith.sitofp %2173 : vector<2x128xi32> to vector<2x128xf32>
    %cst_964 = arith.constant 5.000000e-01 : f32
    %2175 = vector.broadcast %cst_964 : f32 to vector<2x128xf32>
    %2176 = arith.mulf %2175, %2163 : vector<2x128xf32>
    %2177 = arith.addf %2176, %2170 : vector<2x128xf32>
    %cst_965 = arith.constant 1.000000e+00 : f32
    %2178 = vector.broadcast %cst_965 : f32 to vector<2x128xf32>
    %2179 = arith.mulf %2174, %2178 : vector<2x128xf32>
    %2180 = arith.subf %2177, %2179 : vector<2x128xf32>
    %cst_966 = arith.constant 1.000000e+00 : f32
    %2181 = vector.broadcast %cst_966 : f32 to vector<2x128xf32>
    %2182 = arith.cmpf ogt, %2180, %2181 : vector<2x128xf32>
    %2183 = arith.extui %2182 : vector<2x128xi1> to vector<2x128xi32>
    %2184 = arith.sitofp %2183 : vector<2x128xi32> to vector<2x128xf32>
    %c124_967 = arith.constant 124 : index
    %c256_968 = arith.constant 256 : index
    %2185 = vector.load %arg6[%c124_967, %c256_968] : memref<128x512xf32, #tpu.memory_space<vmem>>, vector<2x128xf32>
    tpu.vector_store %arg6[%c124_967, %c256_968], %2184 {strides = array<i32>} : memref<128x512xf32, #tpu.memory_space<vmem>>, vector<2x128xf32>,
    %c124_969 = arith.constant 124 : index
    %c384_970 = arith.constant 384 : index
    %2186 = vector.load %arg6[%c124_969, %c384_970] : memref<128x512xf32, #tpu.memory_space<vmem>>, vector<2x128xf32>
    tpu.vector_store %arg6[%c124_969, %c384_970], %2180 {strides = array<i32>} : memref<128x512xf32, #tpu.memory_space<vmem>>, vector<2x128xf32>,
    %2187 = vector.extract_strided_slice %1114 {offsets = [126, 0], sizes = [2, 128], strides = [1, 1]} : vector<128x128xf32> to vector<2x128xf32>
    %cst_971 = arith.constant 1.000000e+00 : f32
    %2188 = vector.broadcast %cst_971 : f32 to vector<2x128xf32>
    %2189 = arith.cmpf ogt, %2180, %2188 : vector<2x128xf32>
    %2190 = arith.extui %2189 : vector<2x128xi1> to vector<2x128xi32>
    %2191 = arith.sitofp %2190 : vector<2x128xi32> to vector<2x128xf32>
    %cst_972 = arith.constant 5.000000e-01 : f32
    %2192 = vector.broadcast %cst_972 : f32 to vector<2x128xf32>
    %2193 = arith.mulf %2192, %2180 : vector<2x128xf32>
    %2194 = arith.addf %2193, %2187 : vector<2x128xf32>
    %cst_973 = arith.constant 1.000000e+00 : f32
    %2195 = vector.broadcast %cst_973 : f32 to vector<2x128xf32>
    %2196 = arith.mulf %2191, %2195 : vector<2x128xf32>
    %2197 = arith.subf %2194, %2196 : vector<2x128xf32>
    %cst_974 = arith.constant 1.000000e+00 : f32
    %2198 = vector.broadcast %cst_974 : f32 to vector<2x128xf32>
    %2199 = arith.cmpf ogt, %2197, %2198 : vector<2x128xf32>
    %2200 = arith.extui %2199 : vector<2x128xi1> to vector<2x128xi32>
    %2201 = arith.sitofp %2200 : vector<2x128xi32> to vector<2x128xf32>
    %c126_975 = arith.constant 126 : index
    %c256_976 = arith.constant 256 : index
    %2202 = vector.load %arg6[%c126_975, %c256_976] : memref<128x512xf32, #tpu.memory_space<vmem>>, vector<2x128xf32>
    tpu.vector_store %arg6[%c126_975, %c256_976], %2201 {strides = array<i32>} : memref<128x512xf32, #tpu.memory_space<vmem>>, vector<2x128xf32>,
    %c126_977 = arith.constant 126 : index
    %c384_978 = arith.constant 384 : index
    %2203 = vector.load %arg6[%c126_977, %c384_978] : memref<128x512xf32, #tpu.memory_space<vmem>>, vector<2x128xf32>
    tpu.vector_store %arg6[%c126_977, %c384_978], %2197 {strides = array<i32>} : memref<128x512xf32, #tpu.memory_space<vmem>>, vector<2x128xf32>,
    %c0_979 = arith.constant 0 : index
    %c0_980 = arith.constant 0 : index
    %2204 = vector.load %arg8[%c0_979, %c0_980] : memref<2x128xf32, #tpu.memory_space<vmem>>, vector<2x128xf32>
    tpu.vector_store %arg8[%c0_979, %c0_980], %2197 {strides = array<i32>} : memref<2x128xf32, #tpu.memory_space<vmem>>, vector<2x128xf32>,
    return
  }
  func.func @transform_0(%arg0: i32) -> (i32, i32) {
    %c0_i32 = arith.constant 0 : i32
    %c0_i32_0 = arith.constant 0 : i32
    return %arg0, %c0_i32 : i32, i32
  }
  func.func @transform_1(%arg0: i32) -> (i32, i32) {
    %c0_i32 = arith.constant 0 : i32
    %c0_i32_0 = arith.constant 0 : i32
    %c0_i32_1 = arith.constant 0 : i32
    return %c0_i32, %c0_i32_0 : i32, i32
  }
  func.func @transform_2(%arg0: i32) -> (i32, i32) {
    %c0_i32 = arith.constant 0 : i32
    %c0_i32_0 = arith.constant 0 : i32
    %c0_i32_1 = arith.constant 0 : i32
    return %c0_i32, %c0_i32_0 : i32, i32
  }
  func.func @transform_3(%arg0: i32) -> (i32, i32) {
    %c0_i32 = arith.constant 0 : i32
    %c0_i32_0 = arith.constant 0 : i32
    %c0_i32_1 = arith.constant 0 : i32
    return %c0_i32, %c0_i32_0 : i32, i32
  }
  func.func @transform_4(%arg0: i32) -> (i32, i32) {
    %c0_i32 = arith.constant 0 : i32
    %c0_i32_0 = arith.constant 0 : i32
    %c0_i32_1 = arith.constant 0 : i32
    return %c0_i32, %c0_i32_0 : i32, i32
  }
  func.func @transform_5(%arg0: i32) -> (i32, i32) {
    %c0_i32 = arith.constant 0 : i32
    %c0_i32_0 = arith.constant 0 : i32
    return %arg0, %c0_i32 : i32, i32
  }
}

</mosaic_0001>

<bundles_post_ra>
// kernel: snn_forward.1
= control target key start
LH: loop header
LB: loop body
LE: loop exit
PB: predicated region body
PF: predicated region fallthrough
CT: control target
= control target key end

     0   :  { %v2281_v0 = vmov 0   ;;  %v2282_v4 = vmov 1   ;;  %v2283_v8 = vmov 0.0   ;;  %s3401_s0 = inlined_call_operand.vmem [shape: f32[128,2], index: 0, kind: input, shape index: {}]   ;;  %s3402_s1 = inlined_call_operand.vmem [shape: f32[2,128], index: 1, kind: input, shape index: {}]   ;;  %s3403_s2 = inlined_call_operand.vmem [shape: f32[1,128], index: 2, kind: input, shape index: {}]   ;;  %s3404_s3 = inlined_call_operand.vmem [shape: f32[128,128], index: 3, kind: input, shape index: {}]   ;;  %s3405_s5 = inlined_call_operand.vmem [shape: f32[128,512], index: 5, kind: output, shape index: {}]   ;;  %s3406_s4 = inlined_call_operand.vmem [shape: f32[1,128], index: 4, kind: input, shape index: {}]  }
   0x1   :  { %2250 = vset.pattern.permute.xlu0 %v2281_v0  ;;  %v26_v1 = vld [vmem:[%s3401_s0] sm:$0xff]  ;;  %2252 = vset.pattern.permute.xlu1 %v2281_v0  ;;  %v27_v2 = vld [vmem:[%s3401_s0 + $0x8] sm:$0xff]  ;;  %v28_v3 = vld [vmem:[%s3401_s0 + $0x10] sm:$0xff]  ;;  %24 = vst [vmem:[#allocation2] sm:$0x3] %v2283_v8 }
   0x2   :  { %45 = vperm.xlu0 %2250, %v26_v1   ;;  %50 = vperm.xlu1 %2252, %v27_v2   ;;  %v29_v5 = vld [vmem:[%s3401_s0 + $0x18] sm:$0xff]  ;;  %v30_v6 = vld [vmem:[%s3401_s0 + $0x20] sm:$0xff]  ;;  %v31_v7 = vld [vmem:[%s3401_s0 + $0x28] sm:$0xff]  ;;  %25 = vst [vmem:[#allocation3] sm:$0x3] %v2283_v8 }
   0x3   :  { %2254 = vset.pattern.permute.xlu2 %v2281_v0  ;;  %v1078_v9 = vld [vmem:[%s3404_s3 + $0x78] sm:$0xff]  ;;  %v32_v10 = vld [vmem:[%s3401_s0 + $0x30] sm:$0xff]  ;;  %v1076_v12 = vld [vmem:[%s3404_s3 + $0x68] sm:$0xff] }
   0x4   :  { %55 = vperm.xlu2 %2254, %v28_v3   ;;  %1083 = vmatpush.msra.mxu0 %v1078_v9  ;;  %v1077_v11 = vld [vmem:[%s3404_s3 + $0x70] sm:$0xff]  ;;  %v1075_v13 = vld [vmem:[%s3404_s3 + $0x60] sm:$0xff]  ;;  %v1074_v14 = vld [vmem:[%s3404_s3 + $0x58] sm:$0xff] }
   0x5   :  { %2199 = vmatpush.msra.mxu1 %v1078_v9  ;;  %2200 = vmatpush.msra.mxu2 %v1078_v9  ;;  %v1073_v15 = vld [vmem:[%s3404_s3 + $0x50] sm:$0xff]  ;;  %v1072_v16 = vld [vmem:[%s3404_s3 + $0x48] sm:$0xff]  ;;  %v1071_v17 = vld [vmem:[%s3404_s3 + $0x40] sm:$0xff] }
   0x6   :  { %1084 = vmatpush.msra.mxu0 %v1077_v11  ;;  %2201 = vmatpush.msra.mxu3 %v1078_v9  ;;  %v1070_v18 = vld [vmem:[%s3404_s3 + $0x38] sm:$0xff]  ;;  %v1069_v20 = vld [vmem:[%s3404_s3 + $0x30] sm:$0xff]  ;;  %v2384_v21 = vld [vmem:[%s3402_s1] ss:$0 sm:$0xff] }
   0x7   :  { %2202 = vmatpush.msra.mxu1 %v1077_v11  ;;  %2203 = vmatpush.msra.mxu2 %v1077_v11  ;;  %v1068_v22 = vld [vmem:[%s3404_s3 + $0x28] sm:$0xff]  ;;  %v1067_v23 = vld [vmem:[%s3404_s3 + $0x20] sm:$0xff]  ;;  %v1066_v28 = vld [vmem:[%s3404_s3 + $0x18] sm:$0xff] }
   0x8   :  { %1085 = vmatpush.msra.mxu0 %v1076_v12  ;;  %2204 = vmatpush.msra.mxu3 %v1077_v11  ;;  %v2395_v24 = vld [vmem:[%s3403_s2] ss:$0 sm:$0xff]  ;;  %v2401_v26 = vld [vmem:[%s3402_s1 + $0x1] ss:$0 sm:$0xff]  ;;  %v1065_v30 = vld [vmem:[%s3404_s3 + $0x10] sm:$0xff] }
   0x9   :  { %2205 = vmatpush.msra.mxu1 %v1076_v12  ;;  %2206 = vmatpush.msra.mxu2 %v1076_v12  ;;  %v258_v27 = vld [vmem:[#allocation2] sm:$0x3]  ;;  %v1064_v34 = vld [vmem:[%s3404_s3 + $0x8] sm:$0xff]  ;;  %v33_v45 = vld [vmem:[%s3401_s0 + $0x38] sm:$0xff] }
   0xa   :  { %2251 = vset.pattern.permute.xlu0 %v2282_v4  ;;  %2253 = vset.pattern.permute.xlu1 %v2282_v4  ;;  %vm259_vm0 = vcmp.gt.f32.partialorder %v258_v27, 1.0  ;;  %v262_v32 = vmul.f32 0.5, %v258_v27  ;;  %v1063_v37 = vld [vmem:[%s3404_s3] sm:$0xff] }
   0xb   :  { %162 = vperm.xlu0 %2251, %v26_v1   ;;  %166 = vperm.xlu1 %2253, %v27_v2   ;;  %v2069_v36 = vsel %vm259_vm0, 1.0, %v2283_v8  ;;  %v34_v55 = vld [vmem:[%s3401_s0 + $0x40] sm:$0xff] }
   0xc   :  { %2255 = vset.pattern.permute.xlu2 %v2282_v4  ;;  %1086 = vmatpush.msra.mxu0 %v1075_v13 }
   0xd   :  { %170 = vperm.xlu2 %2255, %v28_v3   ;;  %2208 = vmatpush.msra.mxu1 %v1075_v13 }
   0xe   :  { %2207 = vmatpush.msra.mxu3 %v1076_v12  ;;  %1087 = vmatpush.msra.mxu0 %v1074_v14 }
   0xf   :  { %2211 = vmatpush.msra.mxu1 %v1074_v14  ;;  %2209 = vmatpush.msra.mxu2 %v1075_v13 }
  0x10   :  { %1088 = vmatpush.msra.mxu0 %v1073_v15  ;;  %2210 = vmatpush.msra.mxu3 %v1075_v13 }
  0x11   :  { %2214 = vmatpush.msra.mxu1 %v1073_v15  ;;  %2212 = vmatpush.msra.mxu2 %v1074_v14 }
  0x12   :  { %1089 = vmatpush.msra.mxu0 %v1072_v16  ;;  %2213 = vmatpush.msra.mxu3 %v1074_v14 }
  0x13   :  { %2256 = vset.pattern.permute.xlu1 %v2281_v0  ;;  %2257 = vset.pattern.permute.xlu0 %v2281_v0 }
  0x14   :  { %60 = vperm.xlu1 %2256, %v29_v5   ;;  %65 = vperm.xlu0 %2257, %v30_v6  }
  0x15   :  { %174 = vperm.xlu2 %2255, %v29_v5   ;;  %2217 = vmatpush.msra.mxu1 %v1072_v16 }
  0x16   :  { %1090 = vmatpush.msra.mxu0 %v1071_v17  ;;  %2215 = vmatpush.msra.mxu2 %v1073_v15 }
  0x17   :  { %2220 = vmatpush.msra.mxu1 %v1071_v17  ;;  %2216 = vmatpush.msra.mxu3 %v1073_v15 }
  0x18   :  { %1091 = vmatpush.msra.mxu0 %v1070_v18  ;;  %2218 = vmatpush.msra.mxu2 %v1072_v16 }
  0x19   :  { %2223 = vmatpush.msra.mxu1 %v1070_v18  ;;  %2219 = vmatpush.msra.mxu3 %v1072_v16 }
  0x1a   :  { %1092 = vmatpush.msra.mxu0 %v1069_v20  ;;  %2221 = vmatpush.msra.mxu2 %v1071_v17 }
  0x1b   :  { %2226 = vmatpush.msra.mxu1 %v1069_v20  ;;  %2222 = vmatpush.msra.mxu3 %v1071_v17 }
  0x1c   :  { %2258 = vset.pattern.permute.xlu1 %v2282_v4  ;;  %2260 = vset.pattern.permute.xlu0 %v2282_v4 }
  0x1d   :  { %178 = vperm.xlu1 %2258, %v30_v6   ;;  %2259 = vset.pattern.permute.xlu2 %v2281_v0 }
  0x1e   :  { %70 = vperm.xlu2 %2259, %v31_v7   ;;  %186 = vperm.xlu0 %2260, %v32_v10  }
  0x1f   :  { %1093 = vmatpush.msra.mxu0 %v1068_v22  ;;  %2224 = vmatpush.msra.mxu2 %v1070_v18 }
  0x20   :  { %2229 = vmatpush.msra.mxu1 %v1068_v22  ;;  %2225 = vmatpush.msra.mxu3 %v1070_v18 }
  0x21   :  { %1094 = vmatpush.msra.mxu0 %v1067_v23  ;;  %2227 = vmatpush.msra.mxu2 %v1069_v20 }
  0x22   :  { %2232 = vmatpush.msra.mxu1 %v1067_v23  ;;  %2228 = vmatpush.msra.mxu3 %v1069_v20 }
  0x23   :  { %1095 = vmatpush.msra.mxu0 %v1066_v28  ;;  %2230 = vmatpush.msra.mxu2 %v1068_v22 }
  0x24   :  { %2235 = vmatpush.msra.mxu1 %v1066_v28  ;;  %2231 = vmatpush.msra.mxu3 %v1068_v22 }
  0x25   :  { %182 = vperm.xlu1 %2258, %v31_v7   ;;  %1096 = vmatpush.msra.mxu0 %v1065_v30 }
  0x26   :  { %75 = vperm.xlu2 %2259, %v32_v10   ;;  %2263 = vset.pattern.permute.xlu0 %v2281_v0 }
  0x27   :  { %2233 = vmatpush.msra.mxu2 %v1067_v23  ;;  %2238 = vmatpush.msra.mxu1 %v1065_v30 }
  0x28   :  { %2234 = vmatpush.msra.mxu3 %v1067_v23  ;;  %1097 = vmatpush.msra.mxu0 %v1064_v34 }
  0x29   :  { %2236 = vmatpush.msra.mxu2 %v1066_v28  ;;  %2241 = vmatpush.msra.mxu1 %v1064_v34 }
  0x2a   :  { %2237 = vmatpush.msra.mxu3 %v1066_v28  ;;  %1098 = vmatpush.msra.mxu0 %v1063_v37 }
  0x2b   :  { %2239 = vmatpush.msra.mxu2 %v1065_v30  ;;  %2244 = vmatpush.msra.mxu1 %v1063_v37 }
  0x2c   :  { %2240 = vmatpush.msra.mxu3 %v1065_v30 }
  0x2d   :  { %2261 = vset.pattern.permute.xlu1 %v2281_v0  ;;  %2242 = vmatpush.msra.mxu2 %v1064_v34 }
  0x2e   :  { %2262 = vset.pattern.permute.xlu2 %v2282_v4  ;;  %2243 = vmatpush.msra.mxu3 %v1064_v34 }
  0x2f   :  { %2245 = vmatpush.msra.mxu2 %v1063_v37  ;;  %80 = vperm.xlu1 %2261, %v33_v45  }
  0x30   :  { %2246 = vmatpush.msra.mxu3 %v1063_v37  ;;  %190 = vperm.xlu2 %2262, %v33_v45  }
  0x37   :  { %85 = vperm.xlu1 %2261, %v34_v55  }
  0x38   :  { %194 = vperm.xlu2 %2262, %v34_v55  }
  0x3f   :  { %2264 = vset.pattern.permute.xlu1 %v2282_v4 }
  0x40   :  { %2265 = vset.pattern.permute.xlu2 %v2281_v0 }
  0x5e   :  { %v56_v12 = vpop.permute.xlu2 %55 }
  0x5f   :  { %v126_v23 = vmul.f32 %v2384_v21, %v56_v12 }
  0x74   :  { %v46_v19 = vpop.permute.xlu0 %45  ;;  %v51_v43 = vpop.permute.xlu1 %50 }
  0x75   :  { %v124_v25 = vmul.f32 %v2384_v21, %v46_v19  ;;  %v125_v53 = vmul.f32 %v2384_v21, %v51_v43 }
  0x77   :  { %v144_v31 = vadd.f32 %v2395_v24, %v124_v25  ;;  %v145_v61 = vadd.f32 %v2395_v24, %v125_v53  ;;  %v171_v25 = vpop.permute.xlu2 %170 }
  0x7d   :  { %v163_v29 = vpop.permute.xlu0 %162  ;;  %v167_v54 = vpop.permute.xlu1 %166 }
  0x7e   :  { %v226_v33 = vmul.f32 %v2401_v26, %v163_v29  ;;  %v227_v62 = vmul.f32 %v2401_v26, %v167_v54 }
  0x80   :  { %v242_v35 = vadd.f32 %v226_v33, %v144_v31  ;;  %v243_v2 = vadd.f32 %v227_v62, %v145_v61  ;;  %v228_v33 = vmul.f32 %v2401_v26, %v171_v25  ;;  %v36_v61 = vld [vmem:[%s3401_s0 + $0x50] sm:$0xff] }
  0x81   :  { %95 = vperm.xlu2 %2265, %v36_v61  }
  0x82   :  { %v263_v38 = vadd.f32 %v262_v32, %v242_v35  ;;  %v272_v41 = vrot.slane %v242_v35, 2  ;;  %v285_v49 = vrot.slane %v242_v35, 4  ;;  %v298_v58 = vrot.slane %v242_v35, 6 }
  0x83   :  { %v320_v10 = vrot.slane %v243_v2, 2  ;;  %v333_v18 = vrot.slane %v243_v2, 4  ;;  %v346_v29 = vrot.slane %v243_v2, 6  ;;  %v146_v32 = vadd.f32 %v2395_v24, %v126_v23 }
  0x84   :  { %v264_v39 = vsub.f32 %v263_v38, %v2069_v36 }
  0x85   :  { %v244_v36 = vadd.f32 %v228_v33, %v146_v32 }
  0x86   :  { %vm265_vm1 = vcmp.gt.f32.partialorder %v264_v39, 1.0  ;;  %269 = vst [vmem:[%s3405_s5 + $0x8] sm:$0x3] %v264_v39  ;;  %v270_v40 = vmul.f32 0.5, %v264_v39 }
  0x87   :  { %v2070_v42 = vsel %vm265_vm1, 1.0, %v2283_v8 }
  0x88   :  { %268 = vst [vmem:[#allocation4] sm:$0x3] %v2070_v42  ;;  %v274_v44 = vadd.f32 %v272_v41, %v270_v40 }
  0x8a   :  { %v275_v46 = vsub.f32 %v274_v44, %v2070_v42  ;;  %v368_v42 = vrot.slane %v244_v36, 2 }
  0x8c   :  { %vm276_vm2 = vcmp.gt.f32.partialorder %v275_v46, 1.0  ;;  %v281_v47 = vrot.slane %v275_v46, 6  ;;  %v284_v48 = vmul.f32 0.5, %v275_v46 }
  0x8d   :  { %v2071_v50 = vsel %vm276_vm2, 1.0, %v2283_v8 }
  0x8e   :  { %279 = vst [vmem:[#allocation4 + $0x2] sm:$0x3] %v2071_v50  ;;  %v287_v51 = vadd.f32 %v285_v49, %v284_v48 }
  0x8f   :  { %283 = vst [vmem:[%s3405_s5 + $0x8] sm:$0xc] %v281_v47  ;;  %v35_v47 = vld [vmem:[%s3401_s0 + $0x48] sm:$0xff] }
  0x90   :  { %v288_v52 = vsub.f32 %v287_v51, %v2071_v50  ;;  %v381_v50 = vrot.slane %v244_v36, 4  ;;  %198 = vperm.xlu1 %2264, %v35_v47   ;;  %90 = vperm.xlu0 %2263, %v35_v47  }
  0x92   :  { %vm289_vm3 = vcmp.gt.f32.partialorder %v288_v52, 1.0  ;;  %v294_v56 = vrot.slane %v288_v52, 4  ;;  %v297_v57 = vmul.f32 0.5, %v288_v52  ;;  %v61_v52 = vpop.permute.xlu1 %60 }
  0x93   :  { %v2072_v59 = vsel %vm289_vm3, 1.0, %v2283_v8  ;;  %v127_v55 = vmul.f32 %v2384_v21, %v61_v52 }
  0x94   :  { %292 = vst [vmem:[#allocation4 + $0x4] sm:$0x3] %v2072_v59  ;;  %v300_v60 = vadd.f32 %v298_v58, %v297_v57 }
  0x95   :  { %296 = vst [vmem:[%s3405_s5 + $0x8] sm:$0x30] %v294_v56  ;;  %v175_v56 = vpop.permute.xlu2 %174 }
  0x96   :  { %v301_v63 = vsub.f32 %v300_v60, %v2072_v59  ;;  %v394_v59 = vrot.slane %v244_v36, 6 }
  0x98   :  { %v307_v1 = vrot.slane %v301_v63, 2  ;;  %vm302_vm4 = vcmp.gt.f32.partialorder %v301_v63, 1.0  ;;  %v310_v3 = vmul.f32 0.5, %v301_v63  ;;  %v147_v63 = vadd.f32 %v2395_v24, %v127_v55  ;;  %202 = vperm.xlu1 %2264, %v36_v61   ;;  %2266 = vset.pattern.permute.xlu0 %v2282_v4 }
  0x99   :  { %v2073_v5 = vsel %vm302_vm4, 1.0, %v2283_v8 }
  0x9a   :  { %309 = vst [vmem:[%s3405_s5 + $0x8] sm:$0xc0] %v307_v1  ;;  %v311_v6 = vadd.f32 %v310_v3, %v243_v2  ;;  %v229_v1 = vmul.f32 %v2401_v26, %v175_v56 }
  0x9b   :  { %305 = vst [vmem:[#allocation4 + $0x6] sm:$0x3] %v2073_v5 }
  0x9c   :  { %v312_v7 = vsub.f32 %v311_v6, %v2073_v5  ;;  %v245_v5 = vadd.f32 %v229_v1, %v147_v63 }
  0x9e   :  { %vm313_vm5 = vcmp.gt.f32.partialorder %v312_v7, 1.0  ;;  %317 = vst [vmem:[%s3405_s5 + $0x28] sm:$0x3] %v312_v7  ;;  %v318_v9 = vmul.f32 0.5, %v312_v7  ;;  %v416_v12 = vrot.slane %v245_v5, 2 }
  0x9f   :  { %v2074_v11 = vsel %vm313_vm5, 1.0, %v2283_v8 }
  0xa0   :  { %316 = vst [vmem:[#allocation4 + $0x8] sm:$0x3] %v2074_v11  ;;  %v322_v13 = vadd.f32 %v320_v10, %v318_v9  ;;  %2267 = vset.pattern.permute.xlu1 %v2281_v0 }
  0xa2   :  { %v323_v14 = vsub.f32 %v322_v13, %v2074_v11  ;;  %v1031_v15 = vld [vmem:[#allocation4] sm:$0xff] }
  0xa3   :  { %1047 = vst [vmem:[%s3405_s5] sm:$0xff] %v1031_v15  ;;  %1099 = vmatmul.f32.vlgmr.msra.gmra.mxu0 %v1031_v15 }
  0xa4   :  { %vm324_vm6 = vcmp.gt.f32.partialorder %v323_v14, 1.0  ;;  %v329_v16 = vrot.slane %v323_v14, 6  ;;  %v332_v17 = vmul.f32 0.5, %v323_v14 }
  0xa5   :  { %v2075_v19 = vsel %vm324_vm6, 1.0, %v2283_v8 }
  0xa6   :  { %327 = vst [vmem:[#allocation4 + $0xa] sm:$0x3] %v2075_v19  ;;  %v335_v20 = vadd.f32 %v333_v18, %v332_v17  ;;  %v66_v17 = vpop.permute.xlu0 %65 }
  0xa7   :  { %331 = vst [vmem:[%s3405_s5 + $0x28] sm:$0xc] %v329_v16  ;;  %v128_v25 = vmul.f32 %v2384_v21, %v66_v17 }
  0xa8   :  { %v336_v22 = vsub.f32 %v335_v20, %v2075_v19  ;;  %v429_v20 = vrot.slane %v245_v5, 4 }
  0xa9   :  { %v148_v33 = vadd.f32 %v2395_v24, %v128_v25 }
  0xaa   :  { %vm337_vm7 = vcmp.gt.f32.partialorder %v336_v22, 1.0  ;;  %v342_v27 = vrot.slane %v336_v22, 4  ;;  %v345_v28 = vmul.f32 0.5, %v336_v22 }
  0xab   :  { %v2076_v30 = vsel %vm337_vm7, 1.0, %v2283_v8 }
  0xac   :  { %340 = vst [vmem:[#allocation4 + $0xc] sm:$0x3] %v2076_v30  ;;  %v348_v31 = vadd.f32 %v346_v29, %v345_v28  ;;  %v179_v28 = vpop.permute.xlu1 %178  ;;  %v442_v29 = vrot.slane %v245_v5, 6 }
  0xad   :  { %344 = vst [vmem:[%s3405_s5 + $0x28] sm:$0x30] %v342_v27 }
  0xae   :  { %v349_v34 = vsub.f32 %v348_v31, %v2076_v30  ;;  %v230_v30 = vmul.f32 %v2401_v26, %v179_v28 }
  0xb0   :  { %v355_v35 = vrot.slane %v349_v34, 2  ;;  %vm350_vm8 = vcmp.gt.f32.partialorder %v349_v34, 1.0  ;;  %v358_v37 = vmul.f32 0.5, %v349_v34 }
  0xb1   :  { %v2077_v38 = vsel %vm350_vm8, 1.0, %v2283_v8 }
  0xb2   :  { %357 = vst [vmem:[%s3405_s5 + $0x28] sm:$0xc0] %v355_v35  ;;  %v359_v39 = vadd.f32 %v358_v37, %v244_v36  ;;  %v37_v35 = vld [vmem:[%s3401_s0 + $0x58] sm:$0xff] }
  0xb3   :  { %353 = vst [vmem:[#allocation4 + $0xe] sm:$0x3] %v2077_v38  ;;  %206 = vperm.xlu0 %2266, %v37_v35   ;;  %100 = vperm.xlu2 %2265, %v37_v35  }
  0xb4   :  { %v360_v40 = vsub.f32 %v359_v39, %v2077_v38  ;;  %v246_v38 = vadd.f32 %v230_v30, %v148_v33  ;;  %v187_v30 = vpop.permute.xlu0 %186 }
  0xb6   :  { %vm361_vm9 = vcmp.gt.f32.partialorder %v360_v40, 1.0  ;;  %365 = vst [vmem:[%s3405_s5 + $0x48] sm:$0x3] %v360_v40  ;;  %v366_v41 = vmul.f32 0.5, %v360_v40  ;;  %v477_v52 = vrot.slane %v246_v38, 4  ;;  %v490_v61 = vrot.slane %v246_v38, 6 }
  0xb7   :  { %v2078_v43 = vsel %vm361_vm9, 1.0, %v2283_v8 }
  0xb8   :  { %364 = vst [vmem:[#allocation4 + $0x10] sm:$0x3] %v2078_v43  ;;  %v370_v44 = vadd.f32 %v368_v42, %v366_v41 }
  0xba   :  { %v371_v45 = vsub.f32 %v370_v44, %v2078_v43  ;;  %v1032_v46 = vld [vmem:[#allocation4 + $0x8] sm:$0xff] }
  0xbb   :  { %1048 = vst [vmem:[%s3405_s5 + $0x20] sm:$0xff] %v1032_v46  ;;  %1102 = vmatmul.f32.gmra.mxu0 %v1032_v46  ;;  %2268 = vset.pattern.permute.xlu2 %v2282_v4 }
  0xbc   :  { %vm372_vm10 = vcmp.gt.f32.partialorder %v371_v45, 1.0  ;;  %v377_v48 = vrot.slane %v371_v45, 6  ;;  %v380_v49 = vmul.f32 0.5, %v371_v45  ;;  %2269 = vset.pattern.permute.xlu0 %v2281_v0  ;;  %v464_v45 = vrot.slane %v246_v38, 2 }
  0xbd   :  { %v2079_v51 = vsel %vm372_vm10, 1.0, %v2283_v8 }
  0xbe   :  { %375 = vst [vmem:[#allocation4 + $0x12] sm:$0x3] %v2079_v51  ;;  %v383_v53 = vadd.f32 %v381_v50, %v380_v49 }
  0xbf   :  { %379 = vst [vmem:[%s3405_s5 + $0x48] sm:$0xc] %v377_v48 }
  0xc0   :  { %v384_v54 = vsub.f32 %v383_v53, %v2079_v51  ;;  %v71_v53 = vpop.permute.xlu2 %70 }
  0xc1   :  { %v129_v56 = vmul.f32 %v2384_v21, %v71_v53 }
  0xc2   :  { %vm385_vm11 = vcmp.gt.f32.partialorder %v384_v54, 1.0  ;;  %v390_v57 = vrot.slane %v384_v54, 4  ;;  %v393_v58 = vmul.f32 0.5, %v384_v54 }
  0xc3   :  { %v2080_v60 = vsel %vm385_vm11, 1.0, %v2283_v8  ;;  %v149_v63 = vadd.f32 %v2395_v24, %v129_v56 }
  0xc4   :  { %388 = vst [vmem:[#allocation4 + $0x14] sm:$0x3] %v2080_v60  ;;  %v396_v62 = vadd.f32 %v394_v59, %v393_v58  ;;  %v183_v58 = vpop.permute.xlu1 %182 }
  0xc5   :  { %392 = vst [vmem:[%s3405_s5 + $0x48] sm:$0x30] %v390_v57 }
  0xc6   :  { %v397_v2 = vsub.f32 %v396_v62, %v2080_v60 }
  0xc8   :  { %v403_v3 = vrot.slane %v397_v2, 2  ;;  %vm398_vm12 = vcmp.gt.f32.partialorder %v397_v2, 1.0  ;;  %v406_v6 = vmul.f32 0.5, %v397_v2  ;;  %v231_v2 = vmul.f32 %v2401_v26, %v183_v58  ;;  %v76_v25 = vpop.permute.xlu2 %75  ;;  %v2588_v58 = vld [vmem:[%s3406_s4] ss:$0 sm:$0xff] }
  0xc9   :  { %v2081_v7 = vsel %vm398_vm12, 1.0, %v2283_v8 }
  0xca   :  { %405 = vst [vmem:[%s3405_s5 + $0x48] sm:$0xc0] %v403_v3  ;;  %v407_v9 = vadd.f32 %v406_v6, %v245_v5  ;;  %v247_v6 = vadd.f32 %v231_v2, %v149_v63 }
  0xcb   :  { %401 = vst [vmem:[#allocation4 + $0x16] sm:$0x3] %v2081_v7 }
  0xcc   :  { %v408_v10 = vsub.f32 %v407_v9, %v2081_v7  ;;  %v538_v33 = vrot.slane %v247_v6, 6 }
  0xce   :  { %vm409_vm13 = vcmp.gt.f32.partialorder %v408_v10, 1.0  ;;  %413 = vst [vmem:[%s3405_s5 + $0x68] sm:$0x3] %v408_v10  ;;  %v414_v11 = vmul.f32 0.5, %v408_v10 }
  0xcf   :  { %v2082_v13 = vsel %vm409_vm13, 1.0, %v2283_v8 }
  0xd0   :  { %412 = vst [vmem:[#allocation4 + $0x18] sm:$0x3] %v2082_v13  ;;  %v418_v14 = vadd.f32 %v416_v12, %v414_v11  ;;  %v191_v2 = vpop.permute.xlu2 %190 }
  0xd2   :  { %v419_v15 = vsub.f32 %v418_v14, %v2082_v13  ;;  %v1033_v16 = vld [vmem:[#allocation4 + $0x10] sm:$0xff]  ;;  %v512_v13 = vrot.slane %v247_v6, 2 }
  0xd3   :  { %1049 = vst [vmem:[%s3405_s5 + $0x40] sm:$0xff] %v1033_v16  ;;  %1105 = vmatmul.f32.gmra.mxu0 %v1033_v16 }
  0xd4   :  { %vm420_vm14 = vcmp.gt.f32.partialorder %v419_v15, 1.0  ;;  %v425_v18 = vrot.slane %v419_v15, 6  ;;  %v428_v19 = vmul.f32 0.5, %v419_v15 }
  0xd5   :  { %v2083_v22 = vsel %vm420_vm14, 1.0, %v2283_v8 }
  0xd6   :  { %423 = vst [vmem:[#allocation4 + $0x1a] sm:$0x3] %v2083_v22  ;;  %v431_v23 = vadd.f32 %v429_v20, %v428_v19 }
  0xd7   :  { %427 = vst [vmem:[%s3405_s5 + $0x68] sm:$0xc] %v425_v18  ;;  %v38_v18 = vld [vmem:[%s3401_s0 + $0x60] sm:$0xff] }
  0xd8   :  { %v432_v27 = vsub.f32 %v431_v23, %v2083_v22  ;;  %105 = vperm.xlu1 %2267, %v38_v18   ;;  %v525_v22 = vrot.slane %v247_v6, 4  ;;  %210 = vperm.xlu2 %2268, %v38_v18  }
  0xda   :  { %vm433_vm15 = vcmp.gt.f32.partialorder %v432_v27, 1.0  ;;  %v438_v31 = vrot.slane %v432_v27, 4  ;;  %v441_v32 = vmul.f32 0.5, %v432_v27 }
  0xdb   :  { %v2084_v34 = vsel %vm433_vm15, 1.0, %v2283_v8 }
  0xdc   :  { %436 = vst [vmem:[#allocation4 + $0x1c] sm:$0x3] %v2084_v34  ;;  %v444_v36 = vadd.f32 %v442_v29, %v441_v32  ;;  %v130_v29 = vmul.f32 %v2384_v21, %v76_v25 }
  0xdd   :  { %440 = vst [vmem:[%s3405_s5 + $0x68] sm:$0x30] %v438_v31 }
  0xde   :  { %v445_v37 = vsub.f32 %v444_v36, %v2084_v34  ;;  %v39_v34 = vld [vmem:[%s3401_s0 + $0x68] sm:$0xff] }
  0xe0   :  { %v451_v39 = vrot.slane %v445_v37, 2  ;;  %vm446_vm0 = vcmp.gt.f32.partialorder %v445_v37, 1.0  ;;  %v454_v40 = vmul.f32 0.5, %v445_v37  ;;  %110 = vperm.xlu1 %2267, %v39_v34   ;;  %v150_v37 = vadd.f32 %v2395_v24, %v130_v29  ;;  %214 = vperm.xlu2 %2268, %v39_v34  }
  0xe1   :  { %v2085_v41 = vsel %vm446_vm0, 1.0, %v2283_v8 }
  0xe2   :  { %453 = vst [vmem:[%s3405_s5 + $0x68] sm:$0xc0] %v451_v39  ;;  %v455_v42 = vadd.f32 %v454_v40, %v246_v38  ;;  %v232_v38 = vmul.f32 %v2401_v26, %v187_v30 }
  0xe3   :  { %449 = vst [vmem:[#allocation4 + $0x1e] sm:$0x3] %v2085_v41 }
  0xe4   :  { %v456_v43 = vsub.f32 %v455_v42, %v2085_v41  ;;  %v248_v42 = vadd.f32 %v232_v38, %v150_v37 }
  0xe6   :  { %vm457_vm1 = vcmp.gt.f32.partialorder %v456_v43, 1.0  ;;  %461 = vst [vmem:[%s3405_s5 + $0x88] sm:$0x3] %v456_v43  ;;  %v462_v44 = vmul.f32 0.5, %v456_v43  ;;  %v573_v53 = vrot.slane %v248_v42, 4  ;;  %v586_v63 = vrot.slane %v248_v42, 6 }
  0xe7   :  { %v2086_v46 = vsel %vm457_vm1, 1.0, %v2283_v8 }
  0xe8   :  { %460 = vst [vmem:[#allocation4 + $0x20] sm:$0x3] %v2086_v46  ;;  %v466_v47 = vadd.f32 %v464_v45, %v462_v44  ;;  %2270 = vset.pattern.permute.xlu1 %v2282_v4  ;;  %2271 = vset.pattern.permute.xlu2 %v2281_v0 }
  0xea   :  { %v467_v48 = vsub.f32 %v466_v47, %v2086_v46  ;;  %v1034_v49 = vld [vmem:[#allocation4 + $0x18] sm:$0xff]  ;;  %v560_v47 = vrot.slane %v248_v42, 2 }
  0xeb   :  { %1050 = vst [vmem:[%s3405_s5 + $0x60] sm:$0xff] %v1034_v49  ;;  %1108 = vmatmul.f32.gmra.mxu0 %v1034_v49 }
  0xec   :  { %vm468_vm2 = vcmp.gt.f32.partialorder %v467_v48, 1.0  ;;  %v473_v50 = vrot.slane %v467_v48, 6  ;;  %v476_v51 = vmul.f32 0.5, %v467_v48 }
  0xed   :  { %v2087_v54 = vsel %vm468_vm2, 1.0, %v2283_v8 }
  0xee   :  { %471 = vst [vmem:[#allocation4 + $0x22] sm:$0x3] %v2087_v54  ;;  %v479_v55 = vadd.f32 %v477_v52, %v476_v51 }
  0xef   :  { %475 = vst [vmem:[%s3405_s5 + $0x88] sm:$0xc] %v473_v50 }
  0xf0   :  { %v480_v57 = vsub.f32 %v479_v55, %v2087_v54  ;;  %v81_v54 = vpop.permute.xlu1 %80  ;;  %v1148_v55 = vld [vmem:[#allocation3] sm:$0x3] }
  0xf1   :  { %vm1149_vm11 = vcmp.gt.f32.partialorder %v1148_v55, 1.0 }
  0xf2   :  { %vm481_vm3 = vcmp.gt.f32.partialorder %v480_v57, 1.0  ;;  %v486_v59 = vrot.slane %v480_v57, 4  ;;  %v489_v60 = vmul.f32 0.5, %v480_v57  ;;  %v131_v57 = vmul.f32 %v2384_v21, %v81_v54 }
  0xf3   :  { %v2088_v62 = vsel %vm481_vm3, 1.0, %v2283_v8 }
  0xf4   :  { %484 = vst [vmem:[#allocation4 + $0x24] sm:$0x3] %v2088_v62  ;;  %v492_v1 = vadd.f32 %v490_v61, %v489_v60  ;;  %v1152_v60 = vmul.f32 0.5, %v1148_v55 }
  0xf5   :  { %488 = vst [vmem:[%s3405_s5 + $0x88] sm:$0x30] %v486_v59 }
  0xf6   :  { %v493_v3 = vsub.f32 %v492_v1, %v2088_v62  ;;  %v151_v1 = vadd.f32 %v2395_v24, %v131_v57 }
  0xf8   :  { %v499_v5 = vrot.slane %v493_v3, 2  ;;  %vm494_vm4 = vcmp.gt.f32.partialorder %v493_v3, 1.0  ;;  %v502_v7 = vmul.f32 0.5, %v493_v3  ;;  %v86_v38 = vpop.permute.xlu1 %85 }
  0xf9   :  { %v2089_v9 = vsel %vm494_vm4, 1.0, %v2283_v8 }
  0xfa   :  { %501 = vst [vmem:[%s3405_s5 + $0x88] sm:$0xc0] %v499_v5  ;;  %v503_v10 = vadd.f32 %v502_v7, %v247_v6  ;;  %v2134_v5 = vsel %vm1149_vm11, 1.0, %v2283_v8 }
  0xfb   :  { %497 = vst [vmem:[#allocation4 + $0x26] sm:$0x3] %v2089_v9 }
  0xfc   :  { %v504_v11 = vsub.f32 %v503_v10, %v2089_v9  ;;  %v233_v9 = vmul.f32 %v2401_v26, %v191_v2 }
  0xfe   :  { %vm505_vm5 = vcmp.gt.f32.partialorder %v504_v11, 1.0  ;;  %509 = vst [vmem:[%s3405_s5 + $0xa8] sm:$0x3] %v504_v11  ;;  %v510_v12 = vmul.f32 0.5, %v504_v11 }
  0xff   :  { %v2090_v14 = vsel %vm505_vm5, 1.0, %v2283_v8 }
 0x100   :  { %508 = vst [vmem:[#allocation4 + $0x28] sm:$0x3] %v2090_v14  ;;  %v514_v15 = vadd.f32 %v512_v13, %v510_v12 }
 0x102   :  { %v515_v16 = vsub.f32 %v514_v15, %v2090_v14  ;;  %v1035_v17 = vld [vmem:[#allocation4 + $0x20] sm:$0xff]  ;;  %v2604_v15 = vadd.f32 %v233_v9, %v151_v1 }
 0x103   :  { %1051 = vst [vmem:[%s3405_s5 + $0x80] sm:$0xff] %v1035_v17  ;;  %1111 = vmatmul.f32.vlgmr.msra.gmra.mxu1 %v1035_v17 }
 0x104   :  { %vm516_vm6 = vcmp.gt.f32.partialorder %v515_v16, 1.0  ;;  %v521_v19 = vrot.slane %v515_v16, 6  ;;  %v524_v20 = vmul.f32 0.5, %v515_v16  ;;  %v634_v57 = vrot.slane %v2604_v15, 6 }
 0x105   :  { %v2091_v23 = vsel %vm516_vm6, 1.0, %v2283_v8 }
 0x106   :  { %519 = vst [vmem:[#allocation4 + $0x2a] sm:$0x3] %v2091_v23  ;;  %v527_v27 = vadd.f32 %v525_v22, %v524_v20 }
 0x107   :  { %523 = vst [vmem:[%s3405_s5 + $0xa8] sm:$0xc] %v521_v19 }
 0x108   :  { %v528_v28 = vsub.f32 %v527_v27, %v2091_v23 }
 0x10a   :  { %vm529_vm7 = vcmp.gt.f32.partialorder %v528_v28, 1.0  ;;  %v534_v31 = vrot.slane %v528_v28, 4  ;;  %v537_v32 = vmul.f32 0.5, %v528_v28 }
 0x10b   :  { %v2092_v35 = vsel %vm529_vm7, 1.0, %v2283_v8 }
 0x10c   :  { %532 = vst [vmem:[#allocation4 + $0x2c] sm:$0x3] %v2092_v35  ;;  %v540_v36 = vadd.f32 %v538_v33, %v537_v32  ;;  %v608_v33 = vrot.slane %v2604_v15, 2 }
 0x10d   :  { %536 = vst [vmem:[%s3405_s5 + $0xa8] sm:$0x30] %v534_v31 }
 0x10e   :  { %v541_v39 = vsub.f32 %v540_v36, %v2092_v35 }
 0x110   :  { %v547_v40 = vrot.slane %v541_v39, 2  ;;  %vm542_vm8 = vcmp.gt.f32.partialorder %v541_v39, 1.0  ;;  %v550_v41 = vmul.f32 0.5, %v541_v39 }
 0x111   :  { %v2093_v43 = vsel %vm542_vm8, 1.0, %v2283_v8 }
 0x112   :  { %549 = vst [vmem:[%s3405_s5 + $0xa8] sm:$0xc0] %v547_v40  ;;  %v551_v44 = vadd.f32 %v550_v41, %v248_v42  ;;  %v621_v42 = vrot.slane %v2604_v15, 4 }
 0x113   :  { %545 = vst [vmem:[#allocation4 + $0x2e] sm:$0x3] %v2093_v43 }
 0x114   :  { %v552_v45 = vsub.f32 %v551_v44, %v2093_v43  ;;  %v132_v43 = vmul.f32 %v2384_v21, %v86_v38 }
 0x116   :  { %vm553_vm9 = vcmp.gt.f32.partialorder %v552_v45, 1.0  ;;  %557 = vst [vmem:[%s3405_s5 + $0xc8] sm:$0x3] %v552_v45  ;;  %v558_v46 = vmul.f32 0.5, %v552_v45 }
 0x117   :  { %v2094_v48 = vsel %vm553_vm9, 1.0, %v2283_v8 }
 0x118   :  { %556 = vst [vmem:[#allocation4 + $0x30] sm:$0x3] %v2094_v48  ;;  %v562_v49 = vadd.f32 %v560_v47, %v558_v46 }
 0x11a   :  { %v563_v50 = vsub.f32 %v562_v49, %v2094_v48  ;;  %v1036_v51 = vld [vmem:[#allocation4 + $0x28] sm:$0xff] }
 0x11b   :  { %1052 = vst [vmem:[%s3405_s5 + $0xa0] sm:$0xff] %v1036_v51  ;;  %1114 = vmatmul.f32.gmra.mxu1 %v1036_v51  ;;  %v40_v51 = vld [vmem:[%s3401_s0 + $0x70] sm:$0xff] }
 0x11c   :  { %vm564_vm10 = vcmp.gt.f32.partialorder %v563_v50, 1.0  ;;  %v569_v0 = vrot.slane %v563_v50, 6  ;;  %v572_v52 = vmul.f32 0.5, %v563_v50  ;;  %218 = vperm.xlu1 %2270, %v40_v51   ;;  %115 = vperm.xlu0 %2269, %v40_v51  }
 0x11d   :  { %v2095_v56 = vsel %vm564_vm10, 1.0, %v2283_v8 }
 0x11e   :  { %567 = vst [vmem:[#allocation4 + $0x32] sm:$0x3] %v2095_v56  ;;  %v575_v59 = vadd.f32 %v573_v53, %v572_v52 }
 0x11f   :  { %571 = vst [vmem:[%s3405_s5 + $0xc8] sm:$0xc] %v569_v0 }
 0x120   :  { %v576_v61 = vsub.f32 %v575_v59, %v2095_v56  ;;  %v1100_v62 = vpop.f32.mrf.mxu0  ;;  %v152_v59 = vadd.f32 %v2395_v24, %v132_v43 }
 0x121   :  { %v2595_v3 = vadd.f32 %v2588_v58, %v1100_v62 }
 0x122   :  { %vm577_vm12 = vcmp.gt.f32.partialorder %v576_v61, 1.0  ;;  %v582_v6 = vrot.slane %v576_v61, 4  ;;  %v585_v7 = vmul.f32 0.5, %v576_v61 }
 0x123   :  { %v2096_v10 = vsel %vm577_vm12, 1.0, %v2283_v8  ;;  %v1153_v11 = vadd.f32 %v1152_v60, %v2595_v3  ;;  %v1162_v17 = vrot.slane %v2595_v3, 2  ;;  %v1178_v31 = vrot.slane %v2595_v3, 4  ;;  %v195_v60 = vpop.permute.xlu2 %194 }
 0x124   :  { %580 = vst [vmem:[#allocation4 + $0x34] sm:$0x3] %v2096_v10  ;;  %v588_v12 = vadd.f32 %v586_v63, %v585_v7  ;;  %v1194_v47 = vrot.slane %v2595_v3, 6  ;;  %v234_v7 = vmul.f32 %v2401_v26, %v195_v60  ;;  %2272 = vset.pattern.permute.xlu0 %v2282_v4 }
 0x125   :  { %584 = vst [vmem:[%s3405_s5 + $0xc8] sm:$0x30] %v582_v6  ;;  %v1154_v13 = vsub.f32 %v1153_v11, %v2134_v5  ;;  %v41_v11 = vld [vmem:[%s3401_s0 + $0x78] sm:$0xff] }
 0x126   :  { %v589_v14 = vsub.f32 %v588_v12, %v2096_v10  ;;  %222 = vperm.xlu1 %2270, %v41_v11   ;;  %120 = vperm.xlu2 %2271, %v41_v11   ;;  %v2674_v26 = vadd.f32 %v234_v7, %v152_v59 }
 0x127   :  { %vm1155_vm13 = vcmp.gt.f32.partialorder %v1154_v13, 1.0  ;;  %1159 = vst [vmem:[%s3405_s5 + $0x18] sm:$0x3] %v1154_v13  ;;  %v1160_v16 = vmul.f32 0.5, %v1154_v13 }
 0x128   :  { %v595_v18 = vrot.slane %v589_v14, 2  ;;  %vm590_vm14 = vcmp.gt.f32.partialorder %v589_v14, 1.0  ;;  %v598_v19 = vmul.f32 0.5, %v589_v14  ;;  %v2135_v20 = vsel %vm1155_vm13, 1.0, %v2283_v8 }
 0x129   :  { %v2097_v22 = vsel %vm590_vm14, 1.0, %v2283_v8  ;;  %1158 = vst [vmem:[%s3405_s5 + $0x10] sm:$0x3] %v2135_v20  ;;  %v1164_v23 = vadd.f32 %v1162_v17, %v1160_v16 }
 0x12a   :  { %597 = vst [vmem:[%s3405_s5 + $0xc8] sm:$0xc0] %v595_v18  ;;  %v599_v25 = vadd.f32 %v598_v19, %v2604_v15 }
 0x12b   :  { %593 = vst [vmem:[#allocation4 + $0x36] sm:$0x3] %v2097_v22  ;;  %v1165_v27 = vsub.f32 %v1164_v23, %v2135_v20 }
 0x12c   :  { %v600_v28 = vsub.f32 %v599_v25, %v2097_v22 }
 0x12d   :  { %vm1166_vm15 = vcmp.gt.f32.partialorder %v1165_v27, 1.0  ;;  %v1174_v29 = vrot.slane %v1165_v27, 6  ;;  %v1177_v30 = vmul.f32 0.5, %v1165_v27 }
 0x12e   :  { %vm601_vm0 = vcmp.gt.f32.partialorder %v600_v28, 1.0  ;;  %605 = vst [vmem:[%s3405_s5 + $0xe8] sm:$0x3] %v600_v28  ;;  %v606_v32 = vmul.f32 0.5, %v600_v28  ;;  %v2136_v34 = vsel %vm1166_vm15, 1.0, %v2283_v8 }
 0x12f   :  { %v2098_v35 = vsel %vm601_vm0, 1.0, %v2283_v8  ;;  %v1170_v36 = vrot.slane %v2136_v34, 6  ;;  %1176 = vst [vmem:[%s3405_s5 + $0x18] sm:$0xc] %v1174_v29  ;;  %v1180_v37 = vadd.f32 %v1178_v31, %v1177_v30  ;;  %v656_v30 = vrot.slane %v2674_v26, 2 }
 0x130   :  { %604 = vst [vmem:[#allocation4 + $0x38] sm:$0x3] %v2098_v35  ;;  %v610_v39 = vadd.f32 %v608_v33, %v606_v32 }
 0x131   :  { %1172 = vst [vmem:[%s3405_s5 + $0x10] sm:$0xc] %v1170_v36  ;;  %v1181_v40 = vsub.f32 %v1180_v37, %v2136_v34 }
 0x132   :  { %v611_v41 = vsub.f32 %v610_v39, %v2098_v35  ;;  %v1037_v44 = vld [vmem:[#allocation4 + $0x30] sm:$0xff]  ;;  %v91_v35 = vpop.permute.xlu0 %90  ;;  %v669_v39 = vrot.slane %v2674_v26, 4 }
 0x133   :  { %vm1182_vm1 = vcmp.gt.f32.partialorder %v1181_v40, 1.0  ;;  %v1190_v45 = vrot.slane %v1181_v40, 4  ;;  %v1193_v46 = vmul.f32 0.5, %v1181_v40  ;;  %1053 = vst [vmem:[%s3405_s5 + $0xc0] sm:$0xff] %v1037_v44  ;;  %1117 = vmatmul.f32.gmra.mxu1 %v1037_v44 }
 0x134   :  { %vm612_vm2 = vcmp.gt.f32.partialorder %v611_v41, 1.0  ;;  %v617_v48 = vrot.slane %v611_v41, 6  ;;  %v620_v49 = vmul.f32 0.5, %v611_v41  ;;  %v2137_v50 = vsel %vm1182_vm1, 1.0, %v2283_v8 }
 0x135   :  { %v2099_v0 = vsel %vm612_vm2, 1.0, %v2283_v8  ;;  %1192 = vst [vmem:[%s3405_s5 + $0x18] sm:$0x30] %v1190_v45  ;;  %v1196_v52 = vadd.f32 %v1194_v47, %v1193_v46  ;;  %v1186_v53 = vrot.slane %v2137_v50, 4  ;;  %v133_v41 = vmul.f32 %v2384_v21, %v91_v35 }
 0x136   :  { %615 = vst [vmem:[#allocation4 + $0x3a] sm:$0x3] %v2099_v0  ;;  %v623_v54 = vadd.f32 %v621_v42, %v620_v49 }
 0x137   :  { %619 = vst [vmem:[%s3405_s5 + $0xe8] sm:$0xc] %v617_v48  ;;  %v1197_v55 = vsub.f32 %v1196_v52, %v2137_v50 }
 0x138   :  { %v624_v56 = vsub.f32 %v623_v54, %v2099_v0  ;;  %v1103_v61 = vpop.f32.mrf.mxu0  ;;  %1188 = vst [vmem:[%s3405_s5 + $0x10] sm:$0x30] %v1186_v53  ;;  %v199_v0 = vpop.permute.xlu1 %198  ;;  %v682_v53 = vrot.slane %v2674_v26, 6  ;;  %v2723_v54 = vld [vmem:[%s3402_s1 + $0x1] ss:$0 sm:$0xff] }
 0x139   :  { %vm1198_vm3 = vcmp.gt.f32.partialorder %v1197_v55, 1.0  ;;  %v1206_v62 = vrot.slane %v1197_v55, 2  ;;  %v2655_v63 = vadd.f32 %v2588_v58, %v1103_v61  ;;  %v1209_v1 = vmul.f32 0.5, %v1197_v55 }
 0x13a   :  { %vm625_vm4 = vcmp.gt.f32.partialorder %v624_v56, 1.0  ;;  %v630_v2 = vrot.slane %v624_v56, 4  ;;  %v633_v3 = vmul.f32 0.5, %v624_v56  ;;  %v2138_v5 = vsel %vm1198_vm3, 1.0, %v2283_v8 }
 0x13b   :  { %v2100_v6 = vsel %vm625_vm4, 1.0, %v2283_v8  ;;  %v1202_v24 = vrot.slane %v2138_v5, 2  ;;  %1208 = vst [vmem:[%s3405_s5 + $0x18] sm:$0xc0] %v1206_v62  ;;  %v1210_v9 = vadd.f32 %v1209_v1, %v2655_v63  ;;  %v1219_v15 = vrot.slane %v2655_v63, 2 }
 0x13c   :  { %628 = vst [vmem:[#allocation4 + $0x3c] sm:$0x3] %v2100_v6  ;;  %v636_v10 = vadd.f32 %v634_v57, %v633_v3  ;;  %v1235_v28 = vrot.slane %v2655_v63, 4  ;;  %v1251_v44 = vrot.slane %v2655_v63, 6  ;;  %v235_v55 = vmul.f32 %v2723_v54, %v199_v0  ;;  %v2729_v57 = vld [vmem:[%s3403_s2] ss:$0 sm:$0xff] }
 0x13d   :  { %632 = vst [vmem:[%s3405_s5 + $0xe8] sm:$0x30] %v630_v2  ;;  %v1211_v12 = vsub.f32 %v1210_v9, %v2138_v5  ;;  %v153_v59 = vadd.f32 %v2729_v57, %v133_v41 }
 0x13e   :  { %v637_v13 = vsub.f32 %v636_v10, %v2100_v6  ;;  %1204 = vst [vmem:[%s3405_s5 + $0x10] sm:$0xc0] %v1202_v24 }
 0x13f   :  { %vm1212_vm5 = vcmp.gt.f32.partialorder %v1211_v12, 1.0  ;;  %1216 = vst [vmem:[%s3405_s5 + $0x38] sm:$0x3] %v1211_v12  ;;  %v1217_v14 = vmul.f32 0.5, %v1211_v12  ;;  %v2747_v10 = vadd.f32 %v235_v55, %v153_v59 }
 0x140   :  { %v643_v16 = vrot.slane %v637_v13, 2  ;;  %vm638_vm6 = vcmp.gt.f32.partialorder %v637_v13, 1.0  ;;  %v646_v17 = vmul.f32 0.5, %v637_v13  ;;  %v2139_v18 = vsel %vm1212_vm5, 1.0, %v2283_v8  ;;  %v203_v0 = vpop.permute.xlu1 %202 }
 0x141   :  { %v2101_v19 = vsel %vm638_vm6, 1.0, %v2283_v8  ;;  %1215 = vst [vmem:[%s3405_s5 + $0x30] sm:$0x3] %v2139_v18  ;;  %v1221_v4 = vadd.f32 %v1219_v15, %v1217_v14 }
 0x142   :  { %645 = vst [vmem:[%s3405_s5 + $0xe8] sm:$0xc0] %v643_v16  ;;  %v647_v20 = vadd.f32 %v646_v17, %v2674_v26 }
 0x143   :  { %641 = vst [vmem:[#allocation4 + $0x3e] sm:$0x3] %v2101_v19  ;;  %v1222_v22 = vsub.f32 %v1221_v4, %v2139_v18 }
 0x144   :  { %v648_v23 = vsub.f32 %v647_v20, %v2101_v19 }
 0x145   :  { %vm1223_vm7 = vcmp.gt.f32.partialorder %v1222_v22, 1.0  ;;  %v1231_v25 = vrot.slane %v1222_v22, 6  ;;  %v1234_v27 = vmul.f32 0.5, %v1222_v22 }
 0x146   :  { %vm649_vm8 = vcmp.gt.f32.partialorder %v648_v23, 1.0  ;;  %653 = vst [vmem:[%s3405_s5 + $0x108] sm:$0x3] %v648_v23  ;;  %v654_v29 = vmul.f32 0.5, %v648_v23  ;;  %v2140_v31 = vsel %vm1223_vm7, 1.0, %v2283_v8 }
 0x147   :  { %v2102_v32 = vsel %vm649_vm8, 1.0, %v2283_v8  ;;  %v1227_v33 = vrot.slane %v2140_v31, 6  ;;  %1233 = vst [vmem:[%s3405_s5 + $0x38] sm:$0xc] %v1231_v25  ;;  %v1237_v34 = vadd.f32 %v1235_v28, %v1234_v27  ;;  %v704_v27 = vrot.slane %v2747_v10, 2 }
 0x148   :  { %652 = vst [vmem:[#allocation4 + $0x40] sm:$0x3] %v2102_v32  ;;  %v658_v36 = vadd.f32 %v656_v30, %v654_v29  ;;  %v96_v30 = vpop.permute.xlu2 %95 }
 0x149   :  { %1229 = vst [vmem:[%s3405_s5 + $0x30] sm:$0xc] %v1227_v33  ;;  %v1238_v37 = vsub.f32 %v1237_v34, %v2140_v31  ;;  %v2778_v34 = vld [vmem:[%s3402_s1] ss:$0 sm:$0xff] }
 0x14a   :  { %v659_v38 = vsub.f32 %v658_v36, %v2102_v32  ;;  %v1038_v40 = vld [vmem:[#allocation4 + $0x38] sm:$0xff]  ;;  %v134_v35 = vmul.f32 %v2778_v34, %v96_v30 }
 0x14b   :  { %vm1239_vm9 = vcmp.gt.f32.partialorder %v1238_v37, 1.0  ;;  %v1247_v42 = vrot.slane %v1238_v37, 4  ;;  %v1250_v43 = vmul.f32 0.5, %v1238_v37  ;;  %1054 = vst [vmem:[%s3405_s5 + $0xe0] sm:$0xff] %v1038_v40  ;;  %1120 = vmatmul.f32.gmra.mxu1 %v1038_v40  ;;  %v717_v37 = vrot.slane %v2747_v10, 4 }
 0x14c   :  { %vm660_vm10 = vcmp.gt.f32.partialorder %v659_v38, 1.0  ;;  %v665_v45 = vrot.slane %v659_v38, 6  ;;  %v668_v46 = vmul.f32 0.5, %v659_v38  ;;  %v2141_v47 = vsel %vm1239_vm9, 1.0, %v2283_v8 }
 0x14d   :  { %v2103_v48 = vsel %vm660_vm10, 1.0, %v2283_v8  ;;  %v1243_v49 = vrot.slane %v2141_v47, 4  ;;  %1249 = vst [vmem:[%s3405_s5 + $0x38] sm:$0x30] %v1247_v42  ;;  %v1253_v21 = vadd.f32 %v1251_v44, %v1250_v43 }
 0x14e   :  { %663 = vst [vmem:[#allocation4 + $0x42] sm:$0x3] %v2103_v48  ;;  %v671_v50 = vadd.f32 %v669_v39, %v668_v46 }
 0x14f   :  { %667 = vst [vmem:[%s3405_s5 + $0x108] sm:$0xc] %v665_v45  ;;  %v1254_v51 = vsub.f32 %v1253_v21, %v2141_v47  ;;  %v154_v21 = vadd.f32 %v2729_v57, %v134_v35 }
 0x150   :  { %v672_v52 = vsub.f32 %v671_v50, %v2103_v48  ;;  %1245 = vst [vmem:[%s3405_s5 + $0x30] sm:$0x30] %v1243_v49  ;;  %v1106_v56 = vpop.f32.mrf.mxu0 }
 0x151   :  { %vm1255_vm11 = vcmp.gt.f32.partialorder %v1254_v51, 1.0  ;;  %v1263_v60 = vrot.slane %v1254_v51, 2  ;;  %v2733_v61 = vadd.f32 %v2588_v58, %v1106_v56  ;;  %v1266_v62 = vmul.f32 0.5, %v1254_v51 }
 0x152   :  { %vm673_vm12 = vcmp.gt.f32.partialorder %v672_v52, 1.0  ;;  %v678_v63 = vrot.slane %v672_v52, 4  ;;  %v681_v1 = vmul.f32 0.5, %v672_v52  ;;  %v2142_v2 = vsel %vm1255_vm11, 1.0, %v2283_v8 }
 0x153   :  { %v2104_v3 = vsel %vm673_vm12, 1.0, %v2283_v8  ;;  %v1259_v5 = vrot.slane %v2142_v2, 2  ;;  %1265 = vst [vmem:[%s3405_s5 + $0x38] sm:$0xc0] %v1263_v60  ;;  %v1267_v6 = vadd.f32 %v1266_v62, %v2733_v61  ;;  %v1276_v12 = vrot.slane %v2733_v61, 2 }
 0x154   :  { %676 = vst [vmem:[#allocation4 + $0x44] sm:$0x3] %v2104_v3  ;;  %v684_v24 = vadd.f32 %v682_v53, %v681_v1  ;;  %v1292_v22 = vrot.slane %v2733_v61, 4  ;;  %v1308_v41 = vrot.slane %v2733_v61, 6  ;;  %v730_v51 = vrot.slane %v2747_v10, 6 }
 0x155   :  { %680 = vst [vmem:[%s3405_s5 + $0x108] sm:$0x30] %v678_v63  ;;  %v1268_v7 = vsub.f32 %v1267_v6, %v2142_v2  ;;  %v236_v63 = vmul.f32 %v2723_v54, %v203_v0 }
 0x156   :  { %v685_v9 = vsub.f32 %v684_v24, %v2104_v3  ;;  %1261 = vst [vmem:[%s3405_s5 + $0x30] sm:$0xc0] %v1259_v5 }
 0x157   :  { %vm1269_vm13 = vcmp.gt.f32.partialorder %v1268_v7, 1.0  ;;  %1273 = vst [vmem:[%s3405_s5 + $0x58] sm:$0x3] %v1268_v7  ;;  %v1274_v11 = vmul.f32 0.5, %v1268_v7  ;;  %v2815_v24 = vadd.f32 %v236_v63, %v154_v21  ;;  %v207_v21 = vpop.permute.xlu0 %206 }
 0x158   :  { %v691_v13 = vrot.slane %v685_v9, 2  ;;  %v2143_v26 = vsel %vm1269_vm13, 1.0, %v2283_v8  ;;  %vm686_vm14 = vcmp.gt.f32.partialorder %v685_v9, 1.0  ;;  %v694_v14 = vmul.f32 0.5, %v685_v9 }
 0x159   :  { %1272 = vst [vmem:[%s3405_s5 + $0x50] sm:$0x3] %v2143_v26  ;;  %v1278_v15 = vadd.f32 %v1276_v12, %v1274_v11  ;;  %v2105_v16 = vsel %vm686_vm14, 1.0, %v2283_v8 }
 0x15a   :  { %693 = vst [vmem:[%s3405_s5 + $0x108] sm:$0xc0] %v691_v13  ;;  %v695_v17 = vadd.f32 %v694_v14, %v2747_v10 }
 0x15b   :  { %v1279_v18 = vsub.f32 %v1278_v15, %v2143_v26  ;;  %689 = vst [vmem:[#allocation4 + $0x46] sm:$0x3] %v2105_v16 }
 0x15c   :  { %v696_v19 = vsub.f32 %v695_v17, %v2105_v16 }
 0x15d   :  { %vm1280_vm15 = vcmp.gt.f32.partialorder %v1279_v18, 1.0  ;;  %v1288_v4 = vrot.slane %v1279_v18, 6  ;;  %v1291_v20 = vmul.f32 0.5, %v1279_v18 }
 0x15e   :  { %v2144_v23 = vsel %vm1280_vm15, 1.0, %v2283_v8  ;;  %vm697_vm0 = vcmp.gt.f32.partialorder %v696_v19, 1.0  ;;  %701 = vst [vmem:[%s3405_s5 + $0x128] sm:$0x3] %v696_v19  ;;  %v702_v25 = vmul.f32 0.5, %v696_v19 }
 0x15f   :  { %v1284_v28 = vrot.slane %v2144_v23, 6  ;;  %1290 = vst [vmem:[%s3405_s5 + $0x58] sm:$0xc] %v1288_v4  ;;  %v1294_v29 = vadd.f32 %v1292_v22, %v1291_v20  ;;  %v2106_v31 = vsel %vm697_vm0, 1.0, %v2283_v8  ;;  %v752_v20 = vrot.slane %v2815_v24, 2 }
 0x160   :  { %700 = vst [vmem:[#allocation4 + $0x48] sm:$0x3] %v2106_v31  ;;  %v706_v32 = vadd.f32 %v704_v27, %v702_v25 }
 0x161   :  { %1286 = vst [vmem:[%s3405_s5 + $0x50] sm:$0xc] %v1284_v28  ;;  %v1295_v33 = vsub.f32 %v1294_v29, %v2144_v23  ;;  %v101_v28 = vpop.permute.xlu2 %100 }
 0x162   :  { %v707_v36 = vsub.f32 %v706_v32, %v2106_v31  ;;  %v1039_v38 = vld [vmem:[#allocation4 + $0x40] sm:$0xff]  ;;  %v765_v32 = vrot.slane %v2815_v24, 4 }
 0x163   :  { %vm1296_vm1 = vcmp.gt.f32.partialorder %v1295_v33, 1.0  ;;  %v1304_v39 = vrot.slane %v1295_v33, 4  ;;  %v1307_v40 = vmul.f32 0.5, %v1295_v33  ;;  %1055 = vst [vmem:[%s3405_s5 + $0x100] sm:$0xff] %v1039_v38  ;;  %1123 = vmatmul.f32.vlgmr.msra.gmra.mxu2 %v1039_v38  ;;  %v135_v33 = vmul.f32 %v2778_v34, %v101_v28 }
 0x164   :  { %v2145_v42 = vsel %vm1296_vm1, 1.0, %v2283_v8  ;;  %vm708_vm2 = vcmp.gt.f32.partialorder %v707_v36, 1.0  ;;  %v713_v43 = vrot.slane %v707_v36, 6  ;;  %v716_v44 = vmul.f32 0.5, %v707_v36 }
 0x165   :  { %v1300_v45 = vrot.slane %v2145_v42, 4  ;;  %1306 = vst [vmem:[%s3405_s5 + $0x58] sm:$0x30] %v1304_v39  ;;  %v1310_v46 = vadd.f32 %v1308_v41, %v1307_v40  ;;  %v2107_v47 = vsel %vm708_vm2, 1.0, %v2283_v8 }
 0x166   :  { %711 = vst [vmem:[#allocation4 + $0x4a] sm:$0x3] %v2107_v47  ;;  %v719_v48 = vadd.f32 %v717_v37, %v716_v44 }
 0x167   :  { %1302 = vst [vmem:[%s3405_s5 + $0x50] sm:$0x30] %v1300_v45  ;;  %v1311_v49 = vsub.f32 %v1310_v46, %v2145_v42 }
 0x168   :  { %715 = vst [vmem:[%s3405_s5 + $0x128] sm:$0xc] %v713_v43  ;;  %v720_v50 = vsub.f32 %v719_v48, %v2107_v47  ;;  %v1109_v52 = vpop.f32.mrf.mxu0  ;;  %v778_v48 = vrot.slane %v2815_v24, 6 }
 0x169   :  { %v1320_v53 = vrot.slane %v1311_v49, 2  ;;  %v2800_v55 = vadd.f32 %v2588_v58, %v1109_v52  ;;  %vm1312_vm3 = vcmp.gt.f32.partialorder %v1311_v49, 1.0  ;;  %v1323_v56 = vmul.f32 0.5, %v1311_v49 }
 0x16a   :  { %vm721_vm4 = vcmp.gt.f32.partialorder %v720_v50, 1.0  ;;  %v726_v59 = vrot.slane %v720_v50, 4  ;;  %v729_v60 = vmul.f32 0.5, %v720_v50  ;;  %v2146_v61 = vsel %vm1312_vm3, 1.0, %v2283_v8 }
 0x16b   :  { %1322 = vst [vmem:[%s3405_s5 + $0x58] sm:$0xc0] %v1320_v53  ;;  %v2108_v62 = vsel %vm721_vm4, 1.0, %v2283_v8  ;;  %v1316_v1 = vrot.slane %v2146_v61, 2  ;;  %v1324_v2 = vadd.f32 %v1323_v56, %v2800_v55  ;;  %v1333_v9 = vrot.slane %v2800_v55, 2 }
 0x16c   :  { %724 = vst [vmem:[#allocation4 + $0x4c] sm:$0x3] %v2108_v62  ;;  %v732_v3 = vadd.f32 %v730_v51, %v729_v60  ;;  %v1349_v19 = vrot.slane %v2800_v55, 4  ;;  %v1365_v38 = vrot.slane %v2800_v55, 6  ;;  %v155_v49 = vadd.f32 %v2729_v57, %v135_v33 }
 0x16d   :  { %728 = vst [vmem:[%s3405_s5 + $0x128] sm:$0x30] %v726_v59  ;;  %v1325_v5 = vsub.f32 %v1324_v2, %v2146_v61  ;;  %v237_v60 = vmul.f32 %v2723_v54, %v207_v21 }
 0x16e   :  { %v733_v6 = vsub.f32 %v732_v3, %v2108_v62  ;;  %1318 = vst [vmem:[%s3405_s5 + $0x50] sm:$0xc0] %v1316_v1 }
 0x16f   :  { %vm1326_vm5 = vcmp.gt.f32.partialorder %v1325_v5, 1.0  ;;  %1330 = vst [vmem:[%s3405_s5 + $0x78] sm:$0x3] %v1325_v5  ;;  %v1331_v7 = vmul.f32 0.5, %v1325_v5  ;;  %v2878_v3 = vadd.f32 %v237_v60, %v155_v49 }
 0x170   :  { %v739_v10 = vrot.slane %v733_v6, 2  ;;  %vm734_vm6 = vcmp.gt.f32.partialorder %v733_v6, 1.0  ;;  %v742_v11 = vmul.f32 0.5, %v733_v6  ;;  %v2147_v12 = vsel %vm1326_vm5, 1.0, %v2283_v8 }
 0x171   :  { %v2109_v13 = vsel %vm734_vm6, 1.0, %v2283_v8  ;;  %1329 = vst [vmem:[%s3405_s5 + $0x70] sm:$0x3] %v2147_v12  ;;  %v1335_v26 = vadd.f32 %v1333_v9, %v1331_v7 }
 0x172   :  { %741 = vst [vmem:[%s3405_s5 + $0x128] sm:$0xc0] %v739_v10  ;;  %v743_v14 = vadd.f32 %v742_v11, %v2815_v24 }
 0x173   :  { %737 = vst [vmem:[#allocation4 + $0x4e] sm:$0x3] %v2109_v13  ;;  %v1336_v15 = vsub.f32 %v1335_v26, %v2147_v12 }
 0x174   :  { %v744_v16 = vsub.f32 %v743_v14, %v2109_v13 }
 0x175   :  { %vm1337_vm7 = vcmp.gt.f32.partialorder %v1336_v15, 1.0  ;;  %v1345_v17 = vrot.slane %v1336_v15, 6  ;;  %v1348_v18 = vmul.f32 0.5, %v1336_v15 }
 0x176   :  { %vm745_vm8 = vcmp.gt.f32.partialorder %v744_v16, 1.0  ;;  %749 = vst [vmem:[%s3405_s5 + $0x148] sm:$0x3] %v744_v16  ;;  %v750_v4 = vmul.f32 0.5, %v744_v16  ;;  %v2148_v22 = vsel %vm1337_vm7, 1.0, %v2283_v8 }
 0x177   :  { %v2110_v23 = vsel %vm745_vm8, 1.0, %v2283_v8  ;;  %v1341_v25 = vrot.slane %v2148_v22, 6  ;;  %1347 = vst [vmem:[%s3405_s5 + $0x78] sm:$0xc] %v1345_v17  ;;  %v1351_v27 = vadd.f32 %v1349_v19, %v1348_v18  ;;  %v800_v18 = vrot.slane %v2878_v3, 2 }
 0x178   :  { %748 = vst [vmem:[#allocation4 + $0x50] sm:$0x3] %v2110_v23  ;;  %v754_v29 = vadd.f32 %v752_v20, %v750_v4 }
 0x179   :  { %1343 = vst [vmem:[%s3405_s5 + $0x70] sm:$0xc] %v1341_v25  ;;  %v1352_v30 = vsub.f32 %v1351_v27, %v2148_v22  ;;  %v106_v27 = vpop.permute.xlu1 %105 }
 0x17a   :  { %v755_v31 = vsub.f32 %v754_v29, %v2110_v23  ;;  %v1040_v35 = vld [vmem:[#allocation4 + $0x48] sm:$0xff]  ;;  %v813_v29 = vrot.slane %v2878_v3, 4 }
 0x17b   :  { %vm1353_vm9 = vcmp.gt.f32.partialorder %v1352_v30, 1.0  ;;  %v1361_v36 = vrot.slane %v1352_v30, 4  ;;  %v1364_v37 = vmul.f32 0.5, %v1352_v30  ;;  %1056 = vst [vmem:[%s3405_s5 + $0x120] sm:$0xff] %v1040_v35  ;;  %1126 = vmatmul.f32.gmra.mxu2 %v1040_v35 }
 0x17c   :  { %vm756_vm10 = vcmp.gt.f32.partialorder %v755_v31, 1.0  ;;  %v761_v39 = vrot.slane %v755_v31, 6  ;;  %v764_v40 = vmul.f32 0.5, %v755_v31  ;;  %v2149_v41 = vsel %vm1353_vm9, 1.0, %v2283_v8 }
 0x17d   :  { %v2111_v42 = vsel %vm756_vm10, 1.0, %v2283_v8  ;;  %v1357_v43 = vrot.slane %v2149_v41, 4  ;;  %1363 = vst [vmem:[%s3405_s5 + $0x78] sm:$0x30] %v1361_v36  ;;  %v1367_v44 = vadd.f32 %v1365_v38, %v1364_v37  ;;  %v136_v31 = vmul.f32 %v2778_v34, %v106_v27 }
 0x17e   :  { %759 = vst [vmem:[#allocation4 + $0x52] sm:$0x3] %v2111_v42  ;;  %v767_v45 = vadd.f32 %v765_v32, %v764_v40 }
 0x17f   :  { %763 = vst [vmem:[%s3405_s5 + $0x148] sm:$0xc] %v761_v39  ;;  %v1368_v46 = vsub.f32 %v1367_v44, %v2149_v41  ;;  %v211_v44 = vpop.permute.xlu2 %210 }
 0x180   :  { %v768_v47 = vsub.f32 %v767_v45, %v2111_v42  ;;  %1359 = vst [vmem:[%s3405_s5 + $0x70] sm:$0x30] %v1357_v43  ;;  %v1112_v50 = vpop.f32.mrf.mxu1 }
 0x181   :  { %v1377_v51 = vrot.slane %v1368_v46, 2  ;;  %v2863_v0 = vadd.f32 %v2588_v58, %v1112_v50  ;;  %vm1369_vm11 = vcmp.gt.f32.partialorder %v1368_v46, 1.0  ;;  %v1380_v52 = vmul.f32 0.5, %v1368_v46 }
 0x182   :  { %vm769_vm12 = vcmp.gt.f32.partialorder %v768_v47, 1.0  ;;  %v774_v53 = vrot.slane %v768_v47, 4  ;;  %v777_v55 = vmul.f32 0.5, %v768_v47  ;;  %v2150_v56 = vsel %vm1369_vm11, 1.0, %v2283_v8 }
 0x183   :  { %v2112_v59 = vsel %vm769_vm12, 1.0, %v2283_v8  ;;  %1379 = vst [vmem:[%s3405_s5 + $0x78] sm:$0xc0] %v1377_v51  ;;  %v1373_v61 = vrot.slane %v2150_v56, 2  ;;  %v1381_v62 = vadd.f32 %v1380_v52, %v2863_v0  ;;  %v1390_v6 = vrot.slane %v2863_v0, 2 }
 0x184   :  { %772 = vst [vmem:[#allocation4 + $0x54] sm:$0x3] %v2112_v59  ;;  %v780_v63 = vadd.f32 %v778_v48, %v777_v55  ;;  %v1406_v16 = vrot.slane %v2863_v0, 4  ;;  %v1422_v35 = vrot.slane %v2863_v0, 6  ;;  %v826_v46 = vrot.slane %v2878_v3, 6 }
 0x185   :  { %776 = vst [vmem:[%s3405_s5 + $0x148] sm:$0x30] %v774_v53  ;;  %v1382_v1 = vsub.f32 %v1381_v62, %v2150_v56  ;;  %v156_v47 = vadd.f32 %v2729_v57, %v136_v31  ;;  %v238_v48 = vmul.f32 %v2723_v54, %v211_v44 }
 0x186   :  { %v781_v2 = vsub.f32 %v780_v63, %v2112_v59  ;;  %1375 = vst [vmem:[%s3405_s5 + $0x70] sm:$0xc0] %v1373_v61 }
 0x187   :  { %vm1383_vm13 = vcmp.gt.f32.partialorder %v1382_v1, 1.0  ;;  %1387 = vst [vmem:[%s3405_s5 + $0x98] sm:$0x3] %v1382_v1  ;;  %v1388_v5 = vmul.f32 0.5, %v1382_v1  ;;  %v2938_v63 = vadd.f32 %v238_v48, %v156_v47  ;;  %v215_v44 = vpop.permute.xlu2 %214 }
 0x188   :  { %v787_v24 = vrot.slane %v781_v2, 2  ;;  %vm782_vm14 = vcmp.gt.f32.partialorder %v781_v2, 1.0  ;;  %v790_v7 = vmul.f32 0.5, %v781_v2  ;;  %v2151_v9 = vsel %vm1383_vm13, 1.0, %v2283_v8 }
 0x189   :  { %v2113_v10 = vsel %vm782_vm14, 1.0, %v2283_v8  ;;  %1386 = vst [vmem:[%s3405_s5 + $0x90] sm:$0x3] %v2151_v9  ;;  %v1392_v11 = vadd.f32 %v1390_v6, %v1388_v5 }
 0x18a   :  { %789 = vst [vmem:[%s3405_s5 + $0x148] sm:$0xc0] %v787_v24  ;;  %v791_v12 = vadd.f32 %v790_v7, %v2878_v3 }
 0x18b   :  { %785 = vst [vmem:[#allocation4 + $0x56] sm:$0x3] %v2113_v10  ;;  %v1393_v13 = vsub.f32 %v1392_v11, %v2151_v9 }
 0x18c   :  { %v792_v26 = vsub.f32 %v791_v12, %v2113_v10 }
 0x18d   :  { %vm1394_vm15 = vcmp.gt.f32.partialorder %v1393_v13, 1.0  ;;  %v1402_v14 = vrot.slane %v1393_v13, 6  ;;  %v1405_v15 = vmul.f32 0.5, %v1393_v13 }
 0x18e   :  { %vm793_vm0 = vcmp.gt.f32.partialorder %v792_v26, 1.0  ;;  %797 = vst [vmem:[%s3405_s5 + $0x168] sm:$0x3] %v792_v26  ;;  %v798_v17 = vmul.f32 0.5, %v792_v26  ;;  %v2152_v19 = vsel %vm1394_vm15, 1.0, %v2283_v8 }
 0x18f   :  { %v2114_v4 = vsel %vm793_vm0, 1.0, %v2283_v8  ;;  %v1398_v20 = vrot.slane %v2152_v19, 6  ;;  %1404 = vst [vmem:[%s3405_s5 + $0x98] sm:$0xc] %v1402_v14  ;;  %v1408_v22 = vadd.f32 %v1406_v16, %v1405_v15  ;;  %v848_v15 = vrot.slane %v2938_v63, 2 }
 0x190   :  { %796 = vst [vmem:[#allocation4 + $0x58] sm:$0x3] %v2114_v4  ;;  %v802_v23 = vadd.f32 %v800_v18, %v798_v17 }
 0x191   :  { %1400 = vst [vmem:[%s3405_s5 + $0x90] sm:$0xc] %v1398_v20  ;;  %v1409_v25 = vsub.f32 %v1408_v22, %v2152_v19 }
 0x192   :  { %v803_v28 = vsub.f32 %v802_v23, %v2114_v4  ;;  %v1041_v30 = vld [vmem:[#allocation4 + $0x50] sm:$0xff]  ;;  %v111_v4 = vpop.permute.xlu1 %110 }
 0x193   :  { %vm1410_vm1 = vcmp.gt.f32.partialorder %v1409_v25, 1.0  ;;  %v1418_v32 = vrot.slane %v1409_v25, 4  ;;  %v1421_v33 = vmul.f32 0.5, %v1409_v25  ;;  %1057 = vst [vmem:[%s3405_s5 + $0x140] sm:$0xff] %v1041_v30  ;;  %1129 = vmatmul.f32.gmra.mxu2 %v1041_v30  ;;  %v861_v25 = vrot.slane %v2938_v63, 4 }
 0x194   :  { %vm804_vm2 = vcmp.gt.f32.partialorder %v803_v28, 1.0  ;;  %v809_v36 = vrot.slane %v803_v28, 6  ;;  %v812_v37 = vmul.f32 0.5, %v803_v28  ;;  %v2153_v38 = vsel %vm1410_vm1, 1.0, %v2283_v8 }
 0x195   :  { %v2115_v39 = vsel %vm804_vm2, 1.0, %v2283_v8  ;;  %v1414_v40 = vrot.slane %v2153_v38, 4  ;;  %1420 = vst [vmem:[%s3405_s5 + $0x98] sm:$0x30] %v1418_v32  ;;  %v1424_v41 = vadd.f32 %v1422_v35, %v1421_v33  ;;  %v137_v27 = vmul.f32 %v2778_v34, %v111_v4 }
 0x196   :  { %807 = vst [vmem:[#allocation4 + $0x5a] sm:$0x3] %v2115_v39  ;;  %v815_v42 = vadd.f32 %v813_v29, %v812_v37 }
 0x197   :  { %811 = vst [vmem:[%s3405_s5 + $0x168] sm:$0xc] %v809_v36  ;;  %v1425_v43 = vsub.f32 %v1424_v41, %v2153_v38 }
 0x198   :  { %v816_v45 = vsub.f32 %v815_v42, %v2115_v39  ;;  %1416 = vst [vmem:[%s3405_s5 + $0x90] sm:$0x30] %v1414_v40  ;;  %v1115_v49 = vpop.f32.mrf.mxu1  ;;  %v874_v42 = vrot.slane %v2938_v63, 6 }
 0x199   :  { %v1434_v21 = vrot.slane %v1425_v43, 2  ;;  %v2927_v50 = vadd.f32 %v2588_v58, %v1115_v49  ;;  %vm1426_vm3 = vcmp.gt.f32.partialorder %v1425_v43, 1.0  ;;  %v1437_v51 = vmul.f32 0.5, %v1425_v43 }
 0x19a   :  { %vm817_vm4 = vcmp.gt.f32.partialorder %v816_v45, 1.0  ;;  %v822_v0 = vrot.slane %v816_v45, 4  ;;  %v825_v52 = vmul.f32 0.5, %v816_v45  ;;  %v2154_v53 = vsel %vm1426_vm3, 1.0, %v2283_v8 }
 0x19b   :  { %v2116_v55 = vsel %vm817_vm4, 1.0, %v2283_v8  ;;  %1436 = vst [vmem:[%s3405_s5 + $0x98] sm:$0xc0] %v1434_v21  ;;  %v1430_v56 = vrot.slane %v2154_v53, 2  ;;  %v1438_v59 = vadd.f32 %v1437_v51, %v2927_v50  ;;  %v1447_v2 = vrot.slane %v2927_v50, 2 }
 0x19c   :  { %820 = vst [vmem:[#allocation4 + $0x5c] sm:$0x3] %v2116_v55  ;;  %v828_v60 = vadd.f32 %v826_v46, %v825_v52  ;;  %v1463_v26 = vrot.slane %v2927_v50, 4  ;;  %v1479_v31 = vrot.slane %v2927_v50, 6  ;;  %v157_v43 = vadd.f32 %v2729_v57, %v137_v27 }
 0x19d   :  { %824 = vst [vmem:[%s3405_s5 + $0x168] sm:$0x30] %v822_v0  ;;  %v1439_v61 = vsub.f32 %v1438_v59, %v2154_v53  ;;  %v239_v0 = vmul.f32 %v2723_v54, %v215_v44  ;;  %v3055_v44 = vld [vmem:[%s3406_s4] ss:$0 sm:$0xff] }
 0x19e   :  { %v829_v62 = vsub.f32 %v828_v60, %v2116_v55  ;;  %1432 = vst [vmem:[%s3405_s5 + $0x90] sm:$0xc0] %v1430_v56 }
 0x19f   :  { %vm1440_vm5 = vcmp.gt.f32.partialorder %v1439_v61, 1.0  ;;  %1444 = vst [vmem:[%s3405_s5 + $0xb8] sm:$0x3] %v1439_v61  ;;  %v1445_v1 = vmul.f32 0.5, %v1439_v61  ;;  %v3004_v59 = vadd.f32 %v239_v0, %v157_v43 }
 0x1a0   :  { %v835_v3 = vrot.slane %v829_v62, 2  ;;  %vm830_vm6 = vcmp.gt.f32.partialorder %v829_v62, 1.0  ;;  %v838_v5 = vmul.f32 0.5, %v829_v62  ;;  %v2155_v6 = vsel %vm1440_vm5, 1.0, %v2283_v8 }
 0x1a1   :  { %v2117_v24 = vsel %vm830_vm6, 1.0, %v2283_v8  ;;  %1443 = vst [vmem:[%s3405_s5 + $0xb0] sm:$0x3] %v2155_v6  ;;  %v1449_v7 = vadd.f32 %v1447_v2, %v1445_v1  ;;  %v909_v4 = vrot.slane %v3004_v59, 4 }
 0x1a2   :  { %837 = vst [vmem:[%s3405_s5 + $0x168] sm:$0xc0] %v835_v3  ;;  %v839_v9 = vadd.f32 %v838_v5, %v2938_v63 }
 0x1a3   :  { %833 = vst [vmem:[#allocation4 + $0x5e] sm:$0x3] %v2117_v24  ;;  %v1450_v10 = vsub.f32 %v1449_v7, %v2155_v6 }
 0x1a4   :  { %v840_v11 = vsub.f32 %v839_v9, %v2117_v24 }
 0x1a5   :  { %vm1451_vm7 = vcmp.gt.f32.partialorder %v1450_v10, 1.0  ;;  %v1459_v12 = vrot.slane %v1450_v10, 6  ;;  %v1462_v13 = vmul.f32 0.5, %v1450_v10 }
 0x1a6   :  { %vm841_vm8 = vcmp.gt.f32.partialorder %v840_v11, 1.0  ;;  %845 = vst [vmem:[%s3405_s5 + $0x188] sm:$0x3] %v840_v11  ;;  %v846_v14 = vmul.f32 0.5, %v840_v11  ;;  %v2156_v16 = vsel %vm1451_vm7, 1.0, %v2283_v8 }
 0x1a7   :  { %v2118_v17 = vsel %vm841_vm8, 1.0, %v2283_v8  ;;  %v1455_v18 = vrot.slane %v2156_v16, 6  ;;  %1461 = vst [vmem:[%s3405_s5 + $0xb8] sm:$0xc] %v1459_v12  ;;  %v1465_v19 = vadd.f32 %v1463_v26, %v1462_v13  ;;  %v896_v12 = vrot.slane %v3004_v59, 2 }
 0x1a8   :  { %844 = vst [vmem:[#allocation4 + $0x60] sm:$0x3] %v2118_v17  ;;  %v850_v20 = vadd.f32 %v848_v15, %v846_v14 }
 0x1a9   :  { %1457 = vst [vmem:[%s3405_s5 + $0xb0] sm:$0xc] %v1455_v18  ;;  %v1466_v22 = vsub.f32 %v1465_v19, %v2156_v16  ;;  %v116_v16 = vpop.permute.xlu0 %115 }
 0x1aa   :  { %v851_v23 = vsub.f32 %v850_v20, %v2118_v17  ;;  %v1042_v28 = vld [vmem:[#allocation4 + $0x58] sm:$0xff] }
 0x1ab   :  { %vm1467_vm9 = vcmp.gt.f32.partialorder %v1466_v22, 1.0  ;;  %v1475_v29 = vrot.slane %v1466_v22, 4  ;;  %v1478_v30 = vmul.f32 0.5, %v1466_v22  ;;  %1058 = vst [vmem:[%s3405_s5 + $0x160] sm:$0xff] %v1042_v28  ;;  %1132 = vmatmul.f32.gmra.mxu2 %v1042_v28  ;;  %v138_v22 = vmul.f32 %v2778_v34, %v116_v16 }
 0x1ac   :  { %vm852_vm10 = vcmp.gt.f32.partialorder %v851_v23, 1.0  ;;  %v857_v32 = vrot.slane %v851_v23, 6  ;;  %v860_v33 = vmul.f32 0.5, %v851_v23  ;;  %v2157_v35 = vsel %vm1467_vm9, 1.0, %v2283_v8 }
 0x1ad   :  { %v2119_v36 = vsel %vm852_vm10, 1.0, %v2283_v8  ;;  %v1471_v37 = vrot.slane %v2157_v35, 4  ;;  %1477 = vst [vmem:[%s3405_s5 + $0xb8] sm:$0x30] %v1475_v29  ;;  %v1481_v38 = vadd.f32 %v1479_v31, %v1478_v30 }
 0x1ae   :  { %855 = vst [vmem:[#allocation4 + $0x62] sm:$0x3] %v2119_v36  ;;  %v863_v39 = vadd.f32 %v861_v25, %v860_v33 }
 0x1af   :  { %859 = vst [vmem:[%s3405_s5 + $0x188] sm:$0xc] %v857_v32  ;;  %v1482_v40 = vsub.f32 %v1481_v38, %v2157_v35 }
 0x1b0   :  { %v864_v41 = vsub.f32 %v863_v39, %v2119_v36  ;;  %1473 = vst [vmem:[%s3405_s5 + $0xb0] sm:$0x30] %v1471_v37  ;;  %v1118_v45 = vpop.f32.mrf.mxu1  ;;  %v219_v37 = vpop.permute.xlu1 %218  ;;  %v922_v39 = vrot.slane %v3004_v59, 6 }
 0x1b1   :  { %v1491_v46 = vrot.slane %v1482_v40, 2  ;;  %v2989_v47 = vadd.f32 %v2588_v58, %v1118_v45  ;;  %vm1483_vm11 = vcmp.gt.f32.partialorder %v1482_v40, 1.0  ;;  %v1494_v48 = vmul.f32 0.5, %v1482_v40 }
 0x1b2   :  { %vm865_vm12 = vcmp.gt.f32.partialorder %v864_v41, 1.0  ;;  %v870_v49 = vrot.slane %v864_v41, 4  ;;  %v873_v21 = vmul.f32 0.5, %v864_v41  ;;  %v2158_v50 = vsel %vm1483_vm11, 1.0, %v2283_v8 }
 0x1b3   :  { %v2120_v51 = vsel %vm865_vm12, 1.0, %v2283_v8  ;;  %1493 = vst [vmem:[%s3405_s5 + $0xb8] sm:$0xc0] %v1491_v46  ;;  %v1487_v52 = vrot.slane %v2158_v50, 2  ;;  %v1495_v53 = vadd.f32 %v1494_v48, %v2989_v47  ;;  %v1504_v61 = vrot.slane %v2989_v47, 2 }
 0x1b4   :  { %868 = vst [vmem:[#allocation4 + $0x64] sm:$0x3] %v2120_v51  ;;  %v876_v58 = vadd.f32 %v874_v42, %v873_v21  ;;  %v1520_v10 = vrot.slane %v2989_v47, 4  ;;  %v1536_v27 = vrot.slane %v2989_v47, 6  ;;  %v240_v40 = vmul.f32 %v2723_v54, %v219_v37 }
 0x1b5   :  { %872 = vst [vmem:[%s3405_s5 + $0x188] sm:$0x30] %v870_v49  ;;  %v1496_v55 = vsub.f32 %v1495_v53, %v2158_v50  ;;  %v158_v42 = vadd.f32 %v2729_v57, %v138_v22 }
 0x1b6   :  { %v877_v56 = vsub.f32 %v876_v58, %v2120_v51  ;;  %1489 = vst [vmem:[%s3405_s5 + $0xb0] sm:$0xc0] %v1487_v52 }
 0x1b7   :  { %vm1497_vm13 = vcmp.gt.f32.partialorder %v1496_v55, 1.0  ;;  %1501 = vst [vmem:[%s3405_s5 + $0xd8] sm:$0x3] %v1496_v55  ;;  %v1502_v60 = vmul.f32 0.5, %v1496_v55  ;;  %v3072_v58 = vadd.f32 %v240_v40, %v158_v42 }
 0x1b8   :  { %v883_v62 = vrot.slane %v877_v56, 2  ;;  %vm878_vm14 = vcmp.gt.f32.partialorder %v877_v56, 1.0  ;;  %v886_v63 = vmul.f32 0.5, %v877_v56  ;;  %v2159_v1 = vsel %vm1497_vm13, 1.0, %v2283_v8  ;;  %v223_v37 = vpop.permute.xlu1 %222 }
 0x1b9   :  { %v2121_v2 = vsel %vm878_vm14, 1.0, %v2283_v8  ;;  %1500 = vst [vmem:[%s3405_s5 + $0xd0] sm:$0x3] %v2159_v1  ;;  %v1506_v3 = vadd.f32 %v1504_v61, %v1502_v60  ;;  %v957_v16 = vrot.slane %v3072_v58, 4 }
 0x1ba   :  { %885 = vst [vmem:[%s3405_s5 + $0x188] sm:$0xc0] %v883_v62  ;;  %v887_v5 = vadd.f32 %v886_v63, %v3004_v59 }
 0x1bb   :  { %881 = vst [vmem:[#allocation4 + $0x66] sm:$0x3] %v2121_v2  ;;  %v1507_v6 = vsub.f32 %v1506_v3, %v2159_v1 }
 0x1bc   :  { %v888_v24 = vsub.f32 %v887_v5, %v2121_v2 }
 0x1bd   :  { %vm1508_vm15 = vcmp.gt.f32.partialorder %v1507_v6, 1.0  ;;  %v1516_v7 = vrot.slane %v1507_v6, 6  ;;  %v1519_v9 = vmul.f32 0.5, %v1507_v6 }
 0x1be   :  { %vm889_vm0 = vcmp.gt.f32.partialorder %v888_v24, 1.0  ;;  %893 = vst [vmem:[%s3405_s5 + $0x1a8] sm:$0x3] %v888_v24  ;;  %v894_v11 = vmul.f32 0.5, %v888_v24  ;;  %v2160_v13 = vsel %vm1508_vm15, 1.0, %v2283_v8 }
 0x1bf   :  { %v2122_v26 = vsel %vm889_vm0, 1.0, %v2283_v8  ;;  %v1512_v14 = vrot.slane %v2160_v13, 6  ;;  %1518 = vst [vmem:[%s3405_s5 + $0xd8] sm:$0xc] %v1516_v7  ;;  %v1522_v15 = vadd.f32 %v1520_v10, %v1519_v9  ;;  %v944_v10 = vrot.slane %v3072_v58, 2 }
 0x1c0   :  { %892 = vst [vmem:[#allocation4 + $0x68] sm:$0x3] %v2122_v26  ;;  %v898_v17 = vadd.f32 %v896_v12, %v894_v11 }
 0x1c1   :  { %1514 = vst [vmem:[%s3405_s5 + $0xd0] sm:$0xc] %v1512_v14  ;;  %v1523_v18 = vsub.f32 %v1522_v15, %v2160_v13 }
 0x1c2   :  { %v899_v19 = vsub.f32 %v898_v17, %v2122_v26  ;;  %v1043_v20 = vld [vmem:[#allocation4 + $0x60] sm:$0xff] }
 0x1c3   :  { %vm1524_vm1 = vcmp.gt.f32.partialorder %v1523_v18, 1.0  ;;  %v1532_v23 = vrot.slane %v1523_v18, 4  ;;  %v1535_v25 = vmul.f32 0.5, %v1523_v18  ;;  %1059 = vst [vmem:[%s3405_s5 + $0x180] sm:$0xff] %v1043_v20  ;;  %1135 = vmatmul.f32.vlgmr.msra.gmra.mxu3 %v1043_v20 }
 0x1c4   :  { %vm900_vm2 = vcmp.gt.f32.partialorder %v899_v19, 1.0  ;;  %v905_v28 = vrot.slane %v899_v19, 6  ;;  %v908_v29 = vmul.f32 0.5, %v899_v19  ;;  %v2161_v30 = vsel %vm1524_vm1, 1.0, %v2283_v8 }
 0x1c5   :  { %v2123_v31 = vsel %vm900_vm2, 1.0, %v2283_v8  ;;  %v1528_v32 = vrot.slane %v2161_v30, 4  ;;  %1534 = vst [vmem:[%s3405_s5 + $0xd8] sm:$0x30] %v1532_v23  ;;  %v1538_v33 = vadd.f32 %v1536_v27, %v1535_v25 }
 0x1c6   :  { %903 = vst [vmem:[#allocation4 + $0x6a] sm:$0x3] %v2123_v31  ;;  %v911_v35 = vadd.f32 %v909_v4, %v908_v29 }
 0x1c7   :  { %907 = vst [vmem:[%s3405_s5 + $0x1a8] sm:$0xc] %v905_v28  ;;  %v1539_v36 = vsub.f32 %v1538_v33, %v2161_v30  ;;  %v121_v28 = vpop.permute.xlu2 %120 }
 0x1c8   :  { %v912_v38 = vsub.f32 %v911_v35, %v2123_v31  ;;  %1530 = vst [vmem:[%s3405_s5 + $0xd0] sm:$0x30] %v1528_v32  ;;  %v1121_v41 = vpop.f32.mrf.mxu1  ;;  %v139_v32 = vmul.f32 %v2778_v34, %v121_v28 }
 0x1c9   :  { %v1548_v43 = vrot.slane %v1539_v36, 2  ;;  %v3058_v45 = vadd.f32 %v3055_v44, %v1121_v41  ;;  %vm1540_vm3 = vcmp.gt.f32.partialorder %v1539_v36, 1.0  ;;  %v1551_v46 = vmul.f32 0.5, %v1539_v36 }
 0x1ca   :  { %vm913_vm4 = vcmp.gt.f32.partialorder %v912_v38, 1.0  ;;  %v918_v47 = vrot.slane %v912_v38, 4  ;;  %v921_v48 = vmul.f32 0.5, %v912_v38  ;;  %v2162_v49 = vsel %vm1540_vm3, 1.0, %v2283_v8 }
 0x1cb   :  { %v2124_v21 = vsel %vm913_vm4, 1.0, %v2283_v8  ;;  %1550 = vst [vmem:[%s3405_s5 + $0xd8] sm:$0xc0] %v1548_v43  ;;  %v1544_v50 = vrot.slane %v2162_v49, 2  ;;  %v1552_v51 = vadd.f32 %v1551_v46, %v3058_v45  ;;  %v1561_v56 = vrot.slane %v3058_v45, 2 }
 0x1cc   :  { %916 = vst [vmem:[#allocation4 + $0x6c] sm:$0x3] %v2124_v21  ;;  %v924_v0 = vadd.f32 %v922_v39, %v921_v48  ;;  %v1577_v24 = vrot.slane %v3058_v45, 4  ;;  %v1593_v4 = vrot.slane %v3058_v45, 6  ;;  %v970_v36 = vrot.slane %v3072_v58, 6 }
 0x1cd   :  { %920 = vst [vmem:[%s3405_s5 + $0x1a8] sm:$0x30] %v918_v47  ;;  %v1553_v52 = vsub.f32 %v1552_v51, %v2162_v49  ;;  %v159_v42 = vadd.f32 %v2729_v57, %v139_v32  ;;  %v241_v45 = vmul.f32 %v2723_v54, %v223_v37 }
 0x1ce   :  { %v925_v53 = vsub.f32 %v924_v0, %v2124_v21  ;;  %1546 = vst [vmem:[%s3405_s5 + $0xd0] sm:$0xc0] %v1544_v50 }
 0x1cf   :  { %vm1554_vm5 = vcmp.gt.f32.partialorder %v1553_v52, 1.0  ;;  %1558 = vst [vmem:[%s3405_s5 + $0xf8] sm:$0x3] %v1553_v52  ;;  %v1559_v55 = vmul.f32 0.5, %v1553_v52  ;;  %v3134_v57 = vadd.f32 %v241_v45, %v159_v42 }
 0x1d0   :  { %v931_v59 = vrot.slane %v925_v53, 2  ;;  %v2163_v60 = vsel %vm1554_vm5, 1.0, %v2283_v8  ;;  %vm926_vm6 = vcmp.gt.f32.partialorder %v925_v53, 1.0  ;;  %v934_v61 = vmul.f32 0.5, %v925_v53 }
 0x1d1   :  { %1557 = vst [vmem:[%s3405_s5 + $0xf0] sm:$0x3] %v2163_v60  ;;  %v1563_v62 = vadd.f32 %v1561_v56, %v1559_v55  ;;  %v2125_v63 = vsel %vm926_vm6, 1.0, %v2283_v8 }
 0x1d2   :  { %933 = vst [vmem:[%s3405_s5 + $0x1a8] sm:$0xc0] %v931_v59  ;;  %v935_v1 = vadd.f32 %v934_v61, %v3072_v58  ;;  %v992_v59 = vrot.slane %v3134_v57, 2 }
 0x1d3   :  { %v1564_v2 = vsub.f32 %v1563_v62, %v2163_v60  ;;  %929 = vst [vmem:[#allocation4 + $0x6e] sm:$0x3] %v2125_v63 }
 0x1d4   :  { %v936_v3 = vsub.f32 %v935_v1, %v2125_v63 }
 0x1d5   :  { %vm1565_vm7 = vcmp.gt.f32.partialorder %v1564_v2, 1.0  ;;  %v1573_v5 = vrot.slane %v1564_v2, 6  ;;  %v1576_v6 = vmul.f32 0.5, %v1564_v2 }
 0x1d6   :  { %v2164_v7 = vsel %vm1565_vm7, 1.0, %v2283_v8  ;;  %vm937_vm8 = vcmp.gt.f32.partialorder %v936_v3, 1.0  ;;  %941 = vst [vmem:[%s3405_s5 + $0x1c8] sm:$0x3] %v936_v3  ;;  %v942_v9 = vmul.f32 0.5, %v936_v3  ;;  %v1005_v3 = vrot.slane %v3134_v57, 4 }
 0x1d7   :  { %v1569_v11 = vrot.slane %v2164_v7, 6  ;;  %1575 = vst [vmem:[%s3405_s5 + $0xf8] sm:$0xc] %v1573_v5  ;;  %v1579_v12 = vadd.f32 %v1577_v24, %v1576_v6  ;;  %v2126_v13 = vsel %vm937_vm8, 1.0, %v2283_v8 }
 0x1d8   :  { %940 = vst [vmem:[#allocation4 + $0x70] sm:$0x3] %v2126_v13  ;;  %v946_v26 = vadd.f32 %v944_v10, %v942_v9 }
 0x1d9   :  { %1571 = vst [vmem:[%s3405_s5 + $0xf0] sm:$0xc] %v1569_v11  ;;  %v1580_v14 = vsub.f32 %v1579_v12, %v2164_v7 }
 0x1da   :  { %v947_v15 = vsub.f32 %v946_v26, %v2126_v13  ;;  %v1044_v17 = vld [vmem:[#allocation4 + $0x68] sm:$0xff] }
 0x1db   :  { %vm1581_vm9 = vcmp.gt.f32.partialorder %v1580_v14, 1.0  ;;  %v1589_v18 = vrot.slane %v1580_v14, 4  ;;  %v1592_v19 = vmul.f32 0.5, %v1580_v14  ;;  %1060 = vst [vmem:[%s3405_s5 + $0x1a0] sm:$0xff] %v1044_v17  ;;  %1138 = vmatmul.f32.gmra.mxu3 %v1044_v17  ;;  %v1018_v17 = vrot.slane %v3134_v57, 6 }
 0x1dc   :  { %v2165_v20 = vsel %vm1581_vm9, 1.0, %v2283_v8  ;;  %vm948_vm10 = vcmp.gt.f32.partialorder %v947_v15, 1.0  ;;  %v953_v22 = vrot.slane %v947_v15, 6  ;;  %v956_v23 = vmul.f32 0.5, %v947_v15 }
 0x1dd   :  { %v1585_v25 = vrot.slane %v2165_v20, 4  ;;  %1591 = vst [vmem:[%s3405_s5 + $0xf8] sm:$0x30] %v1589_v18  ;;  %v1595_v27 = vadd.f32 %v1593_v4, %v1592_v19  ;;  %v2127_v29 = vsel %vm948_vm10, 1.0, %v2283_v8 }
 0x1de   :  { %951 = vst [vmem:[#allocation4 + $0x72] sm:$0x3] %v2127_v29  ;;  %v959_v30 = vadd.f32 %v957_v16, %v956_v23 }
 0x1df   :  { %1587 = vst [vmem:[%s3405_s5 + $0xf0] sm:$0x30] %v1585_v25  ;;  %v1596_v31 = vsub.f32 %v1595_v27, %v2165_v20 }
 0x1e0   :  { %955 = vst [vmem:[%s3405_s5 + $0x1c8] sm:$0xc] %v953_v22  ;;  %v960_v33 = vsub.f32 %v959_v30, %v2127_v29 }
 0x1e1   :  { %v1605_v35 = vrot.slane %v1596_v31, 2  ;;  %vm1597_vm11 = vcmp.gt.f32.partialorder %v1596_v31, 1.0  ;;  %v1608_v49 = vmul.f32 0.5, %v1596_v31 }
 0x1e2   :  { %vm961_vm12 = vcmp.gt.f32.partialorder %v960_v33, 1.0  ;;  %v966_v38 = vrot.slane %v960_v33, 4  ;;  %v969_v39 = vmul.f32 0.5, %v960_v33  ;;  %v2166_v40 = vsel %vm1597_vm11, 1.0, %v2283_v8 }
 0x1e3   :  { %1607 = vst [vmem:[%s3405_s5 + $0xf8] sm:$0xc0] %v1605_v35  ;;  %v2128_v34 = vsel %vm961_vm12, 1.0, %v2283_v8  ;;  %v1601_v41 = vrot.slane %v2166_v40, 2 }
 0x1e4   :  { %964 = vst [vmem:[#allocation4 + $0x74] sm:$0x3] %v2128_v34  ;;  %v972_v43 = vadd.f32 %v970_v36, %v969_v39 }
 0x1e5   :  { %968 = vst [vmem:[%s3405_s5 + $0x1c8] sm:$0x30] %v966_v38 }
 0x1e6   :  { %v973_v46 = vsub.f32 %v972_v43, %v2128_v34  ;;  %v1124_v47 = vpop.f32.mrf.mxu2  ;;  %1603 = vst [vmem:[%s3405_s5 + $0xf0] sm:$0xc0] %v1601_v41 }
 0x1e7   :  { %v3132_v48 = vadd.f32 %v3055_v44, %v1124_v47 }
 0x1e8   :  { %v979_v21 = vrot.slane %v973_v46, 2  ;;  %vm974_vm13 = vcmp.gt.f32.partialorder %v973_v46, 1.0  ;;  %v982_v50 = vmul.f32 0.5, %v973_v46 }
 0x1e9   :  { %v2129_v54 = vsel %vm974_vm13, 1.0, %v2283_v8  ;;  %v1609_v51 = vadd.f32 %v1608_v49, %v3132_v48  ;;  %v1618_v55 = vrot.slane %v3132_v48, 2  ;;  %v1634_v7 = vrot.slane %v3132_v48, 4 }
 0x1ea   :  { %981 = vst [vmem:[%s3405_s5 + $0x1c8] sm:$0xc0] %v979_v21  ;;  %v983_v0 = vadd.f32 %v982_v50, %v3134_v57  ;;  %v1650_v4 = vrot.slane %v3132_v48, 6 }
 0x1eb   :  { %977 = vst [vmem:[#allocation4 + $0x76] sm:$0x3] %v2129_v54  ;;  %v1610_v52 = vsub.f32 %v1609_v51, %v2166_v40 }
 0x1ec   :  { %v984_v53 = vsub.f32 %v983_v0, %v2129_v54 }
 0x1ed   :  { %vm1611_vm14 = vcmp.gt.f32.partialorder %v1610_v52, 1.0  ;;  %1615 = vst [vmem:[%s3405_s5 + $0x118] sm:$0x3] %v1610_v52  ;;  %v1616_v58 = vmul.f32 0.5, %v1610_v52 }
 0x1ee   :  { %vm985_vm15 = vcmp.gt.f32.partialorder %v984_v53, 1.0  ;;  %989 = vst [vmem:[%s3405_s5 + $0x1e8] sm:$0x3] %v984_v53  ;;  %v990_v56 = vmul.f32 0.5, %v984_v53  ;;  %v2167_v60 = vsel %vm1611_vm14, 1.0, %v2283_v8 }
 0x1ef   :  { %v2130_v61 = vsel %vm985_vm15, 1.0, %v2283_v8  ;;  %1614 = vst [vmem:[%s3405_s5 + $0x110] sm:$0x3] %v2167_v60  ;;  %v1620_v62 = vadd.f32 %v1618_v55, %v1616_v58 }
 0x1f0   :  { %988 = vst [vmem:[#allocation4 + $0x78] sm:$0x3] %v2130_v61  ;;  %v994_v63 = vadd.f32 %v992_v59, %v990_v56 }
 0x1f1   :  { %v1621_v1 = vsub.f32 %v1620_v62, %v2167_v60 }
 0x1f2   :  { %v995_v2 = vsub.f32 %v994_v63, %v2130_v61  ;;  %v1045_v5 = vld [vmem:[#allocation4 + $0x70] sm:$0xff] }
 0x1f3   :  { %vm1622_vm0 = vcmp.gt.f32.partialorder %v1621_v1, 1.0  ;;  %v1630_v6 = vrot.slane %v1621_v1, 6  ;;  %v1633_v24 = vmul.f32 0.5, %v1621_v1  ;;  %1061 = vst [vmem:[%s3405_s5 + $0x1c0] sm:$0xff] %v1045_v5  ;;  %1141 = vmatmul.f32.gmra.mxu3 %v1045_v5 }
 0x1f4   :  { %vm996_vm1 = vcmp.gt.f32.partialorder %v995_v2, 1.0  ;;  %v1001_v9 = vrot.slane %v995_v2, 6  ;;  %v1004_v10 = vmul.f32 0.5, %v995_v2  ;;  %v2168_v11 = vsel %vm1622_vm0, 1.0, %v2283_v8 }
 0x1f5   :  { %v2131_v12 = vsel %vm996_vm1, 1.0, %v2283_v8  ;;  %v1626_v13 = vrot.slane %v2168_v11, 6  ;;  %1632 = vst [vmem:[%s3405_s5 + $0x118] sm:$0xc] %v1630_v6  ;;  %v1636_v26 = vadd.f32 %v1634_v7, %v1633_v24 }
 0x1f6   :  { %999 = vst [vmem:[#allocation4 + $0x7a] sm:$0x3] %v2131_v12  ;;  %v1007_v14 = vadd.f32 %v1005_v3, %v1004_v10 }
 0x1f7   :  { %1003 = vst [vmem:[%s3405_s5 + $0x1e8] sm:$0xc] %v1001_v9  ;;  %v1637_v15 = vsub.f32 %v1636_v26, %v2168_v11 }
 0x1f8   :  { %v1008_v16 = vsub.f32 %v1007_v14, %v2131_v12  ;;  %1628 = vst [vmem:[%s3405_s5 + $0x110] sm:$0xc] %v1626_v13 }
 0x1f9   :  { %vm1638_vm2 = vcmp.gt.f32.partialorder %v1637_v15, 1.0  ;;  %v1646_v18 = vrot.slane %v1637_v15, 4  ;;  %v1649_v19 = vmul.f32 0.5, %v1637_v15 }
 0x1fa   :  { %vm1009_vm3 = vcmp.gt.f32.partialorder %v1008_v16, 1.0  ;;  %v1014_v20 = vrot.slane %v1008_v16, 4  ;;  %v1017_v22 = vmul.f32 0.5, %v1008_v16  ;;  %v2169_v23 = vsel %vm1638_vm2, 1.0, %v2283_v8 }
 0x1fb   :  { %v2132_v25 = vsel %vm1009_vm3, 1.0, %v2283_v8  ;;  %v1642_v27 = vrot.slane %v2169_v23, 4  ;;  %1648 = vst [vmem:[%s3405_s5 + $0x118] sm:$0x30] %v1646_v18  ;;  %v1652_v28 = vadd.f32 %v1650_v4, %v1649_v19 }
 0x1fc   :  { %1012 = vst [vmem:[#allocation4 + $0x7c] sm:$0x3] %v2132_v25  ;;  %v1020_v29 = vadd.f32 %v1018_v17, %v1017_v22 }
 0x1fd   :  { %1016 = vst [vmem:[%s3405_s5 + $0x1e8] sm:$0x30] %v1014_v20  ;;  %v1653_v30 = vsub.f32 %v1652_v28, %v2169_v23 }
 0x1fe   :  { %v1021_v31 = vsub.f32 %v1020_v29, %v2132_v25  ;;  %1644 = vst [vmem:[%s3405_s5 + $0x110] sm:$0x30] %v1642_v27  ;;  %v1127_v32 = vpop.f32.mrf.mxu2 }
 0x1ff   :  { %v1662_v33 = vrot.slane %v1653_v30, 2  ;;  %v1128_v35 = vadd.f32 %v3055_v44, %v1127_v32  ;;  %vm1654_vm4 = vcmp.gt.f32.partialorder %v1653_v30, 1.0  ;;  %v1665_v36 = vmul.f32 0.5, %v1653_v30 }
 0x200   :  { %vm1022_vm5 = vcmp.gt.f32.partialorder %v1021_v31, 1.0  ;;  %v1027_v37 = vrot.slane %v1021_v31, 2  ;;  %1030 = vst [vmem:[#allocation2] sm:$0x3] %v1021_v31  ;;  %v2170_v38 = vsel %vm1654_vm4, 1.0, %v2283_v8 }
 0x201   :  { %v2133_v39 = vsel %vm1022_vm5, 1.0, %v2283_v8  ;;  %1664 = vst [vmem:[%s3405_s5 + $0x118] sm:$0xc0] %v1662_v33  ;;  %v1658_v40 = vrot.slane %v2170_v38, 2  ;;  %v1666_v34 = vadd.f32 %v1665_v36, %v1128_v35  ;;  %v1675_v43 = vrot.slane %v1128_v35, 2 }
 0x202   :  { %1025 = vst [vmem:[#allocation4 + $0x7e] sm:$0x3] %v2133_v39  ;;  %v1691_v57 = vrot.slane %v1128_v35, 4  ;;  %v1707_v58 = vrot.slane %v1128_v35, 6 }
 0x203   :  { %1029 = vst [vmem:[%s3405_s5 + $0x1e8] sm:$0xc0] %v1027_v37  ;;  %v1667_v41 = vsub.f32 %v1666_v34, %v2170_v38 }
 0x204   :  { %1660 = vst [vmem:[%s3405_s5 + $0x110] sm:$0xc0] %v1658_v40 }
 0x205   :  { %vm1668_vm6 = vcmp.gt.f32.partialorder %v1667_v41, 1.0  ;;  %1672 = vst [vmem:[%s3405_s5 + $0x138] sm:$0x3] %v1667_v41  ;;  %v1673_v42 = vmul.f32 0.5, %v1667_v41 }
 0x206   :  { %v2171_v45 = vsel %vm1668_vm6, 1.0, %v2283_v8 }
 0x207   :  { %1671 = vst [vmem:[%s3405_s5 + $0x130] sm:$0x3] %v2171_v45  ;;  %v1677_v46 = vadd.f32 %v1675_v43, %v1673_v42 }
 0x209   :  { %v1678_v47 = vsub.f32 %v1677_v46, %v2171_v45  ;;  %v1046_v48 = vld [vmem:[#allocation4 + $0x78] sm:$0xff] }
 0x20a   :  { %1062 = vst [vmem:[%s3405_s5 + $0x1e0] sm:$0xff] %v1046_v48  ;;  %1144 = vmatmul.f32.gmra.mxu3 %v1046_v48 }
 0x20b   :  { %vm1679_vm7 = vcmp.gt.f32.partialorder %v1678_v47, 1.0  ;;  %v1687_v49 = vrot.slane %v1678_v47, 6  ;;  %v1690_v21 = vmul.f32 0.5, %v1678_v47 }
 0x20c   :  { %v2172_v50 = vsel %vm1679_vm7, 1.0, %v2283_v8 }
 0x20d   :  { %v1683_v54 = vrot.slane %v2172_v50, 6  ;;  %1689 = vst [vmem:[%s3405_s5 + $0x138] sm:$0xc] %v1687_v49  ;;  %v1693_v51 = vadd.f32 %v1691_v57, %v1690_v21 }
 0x20f   :  { %1685 = vst [vmem:[%s3405_s5 + $0x130] sm:$0xc] %v1683_v54  ;;  %v1694_v0 = vsub.f32 %v1693_v51, %v2172_v50 }
 0x211   :  { %vm1695_vm8 = vcmp.gt.f32.partialorder %v1694_v0, 1.0  ;;  %v1703_v52 = vrot.slane %v1694_v0, 4  ;;  %v1706_v53 = vmul.f32 0.5, %v1694_v0 }
 0x212   :  { %v2173_v55 = vsel %vm1695_vm8, 1.0, %v2283_v8 }
 0x213   :  { %v1699_v56 = vrot.slane %v2173_v55, 4  ;;  %1705 = vst [vmem:[%s3405_s5 + $0x138] sm:$0x30] %v1703_v52  ;;  %v1709_v59 = vadd.f32 %v1707_v58, %v1706_v53 }
 0x215   :  { %1701 = vst [vmem:[%s3405_s5 + $0x130] sm:$0x30] %v1699_v56  ;;  %v1710_v60 = vsub.f32 %v1709_v59, %v2173_v55 }
 0x216   :  { %v1130_v61 = vpop.f32.mrf.mxu2 }
 0x217   :  { %v1719_v62 = vrot.slane %v1710_v60, 2  ;;  %v1131_v63 = vadd.f32 %v3055_v44, %v1130_v61  ;;  %vm1711_vm9 = vcmp.gt.f32.partialorder %v1710_v60, 1.0  ;;  %v1722_v1 = vmul.f32 0.5, %v1710_v60 }
 0x218   :  { %v2174_v2 = vsel %vm1711_vm9, 1.0, %v2283_v8 }
 0x219   :  { %1721 = vst [vmem:[%s3405_s5 + $0x138] sm:$0xc0] %v1719_v62  ;;  %v1715_v3 = vrot.slane %v2174_v2, 2  ;;  %v1723_v5 = vadd.f32 %v1722_v1, %v1131_v63  ;;  %v1732_v7 = vrot.slane %v1131_v63, 2  ;;  %v1748_v26 = vrot.slane %v1131_v63, 4 }
 0x21a   :  { %v1764_v4 = vrot.slane %v1131_v63, 6 }
 0x21b   :  { %1717 = vst [vmem:[%s3405_s5 + $0x130] sm:$0xc0] %v1715_v3  ;;  %v1724_v6 = vsub.f32 %v1723_v5, %v2174_v2 }
 0x21d   :  { %vm1725_vm10 = vcmp.gt.f32.partialorder %v1724_v6, 1.0  ;;  %1729 = vst [vmem:[%s3405_s5 + $0x158] sm:$0x3] %v1724_v6  ;;  %v1730_v24 = vmul.f32 0.5, %v1724_v6 }
 0x21e   :  { %v2175_v9 = vsel %vm1725_vm10, 1.0, %v2283_v8 }
 0x21f   :  { %1728 = vst [vmem:[%s3405_s5 + $0x150] sm:$0x3] %v2175_v9  ;;  %v1734_v10 = vadd.f32 %v1732_v7, %v1730_v24 }
 0x221   :  { %v1735_v11 = vsub.f32 %v1734_v10, %v2175_v9 }
 0x223   :  { %vm1736_vm11 = vcmp.gt.f32.partialorder %v1735_v11, 1.0  ;;  %v1744_v12 = vrot.slane %v1735_v11, 6  ;;  %v1747_v13 = vmul.f32 0.5, %v1735_v11 }
 0x224   :  { %v2176_v14 = vsel %vm1736_vm11, 1.0, %v2283_v8 }
 0x225   :  { %v1740_v15 = vrot.slane %v2176_v14, 6  ;;  %1746 = vst [vmem:[%s3405_s5 + $0x158] sm:$0xc] %v1744_v12  ;;  %v1750_v16 = vadd.f32 %v1748_v26, %v1747_v13 }
 0x227   :  { %1742 = vst [vmem:[%s3405_s5 + $0x150] sm:$0xc] %v1740_v15  ;;  %v1751_v17 = vsub.f32 %v1750_v16, %v2176_v14 }
 0x229   :  { %vm1752_vm12 = vcmp.gt.f32.partialorder %v1751_v17, 1.0  ;;  %v1760_v18 = vrot.slane %v1751_v17, 4  ;;  %v1763_v19 = vmul.f32 0.5, %v1751_v17 }
 0x22a   :  { %v2177_v20 = vsel %vm1752_vm12, 1.0, %v2283_v8 }
 0x22b   :  { %v1756_v22 = vrot.slane %v2177_v20, 4  ;;  %1762 = vst [vmem:[%s3405_s5 + $0x158] sm:$0x30] %v1760_v18  ;;  %v1766_v23 = vadd.f32 %v1764_v4, %v1763_v19 }
 0x22d   :  { %1758 = vst [vmem:[%s3405_s5 + $0x150] sm:$0x30] %v1756_v22  ;;  %v1767_v25 = vsub.f32 %v1766_v23, %v2177_v20 }
 0x22e   :  { %v1133_v27 = vpop.f32.mrf.mxu2 }
 0x22f   :  { %v1776_v28 = vrot.slane %v1767_v25, 2  ;;  %v1134_v29 = vadd.f32 %v3055_v44, %v1133_v27  ;;  %vm1768_vm13 = vcmp.gt.f32.partialorder %v1767_v25, 1.0  ;;  %v1779_v30 = vmul.f32 0.5, %v1767_v25 }
 0x230   :  { %v2178_v31 = vsel %vm1768_vm13, 1.0, %v2283_v8 }
 0x231   :  { %1778 = vst [vmem:[%s3405_s5 + $0x158] sm:$0xc0] %v1776_v28  ;;  %v1772_v32 = vrot.slane %v2178_v31, 2  ;;  %v1780_v33 = vadd.f32 %v1779_v30, %v1134_v29  ;;  %v1789_v37 = vrot.slane %v1134_v29, 2  ;;  %v1805_v42 = vrot.slane %v1134_v29, 4 }
 0x232   :  { %v1821_v21 = vrot.slane %v1134_v29, 6 }
 0x233   :  { %1774 = vst [vmem:[%s3405_s5 + $0x150] sm:$0xc0] %v1772_v32  ;;  %v1781_v35 = vsub.f32 %v1780_v33, %v2178_v31 }
 0x235   :  { %vm1782_vm14 = vcmp.gt.f32.partialorder %v1781_v35, 1.0  ;;  %1786 = vst [vmem:[%s3405_s5 + $0x178] sm:$0x3] %v1781_v35  ;;  %v1787_v36 = vmul.f32 0.5, %v1781_v35 }
 0x236   :  { %v2179_v38 = vsel %vm1782_vm14, 1.0, %v2283_v8 }
 0x237   :  { %1785 = vst [vmem:[%s3405_s5 + $0x170] sm:$0x3] %v2179_v38  ;;  %v1791_v39 = vadd.f32 %v1789_v37, %v1787_v36 }
 0x239   :  { %v1792_v40 = vsub.f32 %v1791_v39, %v2179_v38 }
 0x23b   :  { %vm1793_vm15 = vcmp.gt.f32.partialorder %v1792_v40, 1.0  ;;  %v1801_v34 = vrot.slane %v1792_v40, 6  ;;  %v1804_v41 = vmul.f32 0.5, %v1792_v40 }
 0x23c   :  { %v2180_v43 = vsel %vm1793_vm15, 1.0, %v2283_v8 }
 0x23d   :  { %v1797_v45 = vrot.slane %v2180_v43, 6  ;;  %1803 = vst [vmem:[%s3405_s5 + $0x178] sm:$0xc] %v1801_v34  ;;  %v1807_v46 = vadd.f32 %v1805_v42, %v1804_v41 }
 0x23f   :  { %1799 = vst [vmem:[%s3405_s5 + $0x170] sm:$0xc] %v1797_v45  ;;  %v1808_v47 = vsub.f32 %v1807_v46, %v2180_v43 }
 0x241   :  { %vm1809_vm0 = vcmp.gt.f32.partialorder %v1808_v47, 1.0  ;;  %v1817_v48 = vrot.slane %v1808_v47, 4  ;;  %v1820_v49 = vmul.f32 0.5, %v1808_v47 }
 0x242   :  { %v2181_v57 = vsel %vm1809_vm0, 1.0, %v2283_v8 }
 0x243   :  { %v1813_v50 = vrot.slane %v2181_v57, 4  ;;  %1819 = vst [vmem:[%s3405_s5 + $0x178] sm:$0x30] %v1817_v48  ;;  %v1823_v54 = vadd.f32 %v1821_v21, %v1820_v49 }
 0x245   :  { %1815 = vst [vmem:[%s3405_s5 + $0x170] sm:$0x30] %v1813_v50  ;;  %v1824_v51 = vsub.f32 %v1823_v54, %v2181_v57 }
 0x246   :  { %v1136_v0 = vpop.f32.mrf.mxu3 }
 0x247   :  { %v1833_v52 = vrot.slane %v1824_v51, 2  ;;  %v1137_v53 = vadd.f32 %v3055_v44, %v1136_v0  ;;  %vm1825_vm1 = vcmp.gt.f32.partialorder %v1824_v51, 1.0  ;;  %v1836_v58 = vmul.f32 0.5, %v1824_v51 }
 0x248   :  { %v2182_v55 = vsel %vm1825_vm1, 1.0, %v2283_v8 }
 0x249   :  { %1835 = vst [vmem:[%s3405_s5 + $0x178] sm:$0xc0] %v1833_v52  ;;  %v1829_v56 = vrot.slane %v2182_v55, 2  ;;  %v1837_v59 = vadd.f32 %v1836_v58, %v1137_v53  ;;  %v1846_v62 = vrot.slane %v1137_v53, 2  ;;  %v1862_v6 = vrot.slane %v1137_v53, 4 }
 0x24a   :  { %v1878_v13 = vrot.slane %v1137_v53, 6 }
 0x24b   :  { %1831 = vst [vmem:[%s3405_s5 + $0x170] sm:$0xc0] %v1829_v56  ;;  %v1838_v60 = vsub.f32 %v1837_v59, %v2182_v55 }
 0x24d   :  { %vm1839_vm2 = vcmp.gt.f32.partialorder %v1838_v60, 1.0  ;;  %1843 = vst [vmem:[%s3405_s5 + $0x198] sm:$0x3] %v1838_v60  ;;  %v1844_v61 = vmul.f32 0.5, %v1838_v60 }
 0x24e   :  { %v2183_v63 = vsel %vm1839_vm2, 1.0, %v2283_v8 }
 0x24f   :  { %1842 = vst [vmem:[%s3405_s5 + $0x190] sm:$0x3] %v2183_v63  ;;  %v1848_v1 = vadd.f32 %v1846_v62, %v1844_v61 }
 0x251   :  { %v1849_v2 = vsub.f32 %v1848_v1, %v2183_v63 }
 0x253   :  { %vm1850_vm3 = vcmp.gt.f32.partialorder %v1849_v2, 1.0  ;;  %v1858_v3 = vrot.slane %v1849_v2, 6  ;;  %v1861_v5 = vmul.f32 0.5, %v1849_v2 }
 0x254   :  { %v2184_v24 = vsel %vm1850_vm3, 1.0, %v2283_v8 }
 0x255   :  { %v1854_v7 = vrot.slane %v2184_v24, 6  ;;  %1860 = vst [vmem:[%s3405_s5 + $0x198] sm:$0xc] %v1858_v3  ;;  %v1864_v9 = vadd.f32 %v1862_v6, %v1861_v5 }
 0x257   :  { %1856 = vst [vmem:[%s3405_s5 + $0x190] sm:$0xc] %v1854_v7  ;;  %v1865_v10 = vsub.f32 %v1864_v9, %v2184_v24 }
 0x259   :  { %vm1866_vm4 = vcmp.gt.f32.partialorder %v1865_v10, 1.0  ;;  %v1874_v11 = vrot.slane %v1865_v10, 4  ;;  %v1877_v12 = vmul.f32 0.5, %v1865_v10 }
 0x25a   :  { %v2185_v26 = vsel %vm1866_vm4, 1.0, %v2283_v8 }
 0x25b   :  { %v1870_v14 = vrot.slane %v2185_v26, 4  ;;  %1876 = vst [vmem:[%s3405_s5 + $0x198] sm:$0x30] %v1874_v11  ;;  %v1880_v15 = vadd.f32 %v1878_v13, %v1877_v12 }
 0x25d   :  { %1872 = vst [vmem:[%s3405_s5 + $0x190] sm:$0x30] %v1870_v14  ;;  %v1881_v16 = vsub.f32 %v1880_v15, %v2185_v26 }
 0x25e   :  { %v1139_v17 = vpop.f32.mrf.mxu3 }
 0x25f   :  { %v1890_v18 = vrot.slane %v1881_v16, 2  ;;  %v1140_v19 = vadd.f32 %v3055_v44, %v1139_v17  ;;  %vm1882_vm5 = vcmp.gt.f32.partialorder %v1881_v16, 1.0  ;;  %v1893_v4 = vmul.f32 0.5, %v1881_v16 }
 0x260   :  { %v2186_v20 = vsel %vm1882_vm5, 1.0, %v2283_v8 }
 0x261   :  { %1892 = vst [vmem:[%s3405_s5 + $0x198] sm:$0xc0] %v1890_v18  ;;  %v1886_v22 = vrot.slane %v2186_v20, 2  ;;  %v1894_v23 = vadd.f32 %v1893_v4, %v1140_v19  ;;  %v1903_v28 = vrot.slane %v1140_v19, 2  ;;  %v1919_v35 = vrot.slane %v1140_v19, 4 }
 0x262   :  { %v1935_v41 = vrot.slane %v1140_v19, 6 }
 0x263   :  { %1888 = vst [vmem:[%s3405_s5 + $0x190] sm:$0xc0] %v1886_v22  ;;  %v1895_v25 = vsub.f32 %v1894_v23, %v2186_v20 }
 0x265   :  { %vm1896_vm6 = vcmp.gt.f32.partialorder %v1895_v25, 1.0  ;;  %1900 = vst [vmem:[%s3405_s5 + $0x1b8] sm:$0x3] %v1895_v25  ;;  %v1901_v27 = vmul.f32 0.5, %v1895_v25 }
 0x266   :  { %v2187_v29 = vsel %vm1896_vm6, 1.0, %v2283_v8 }
 0x267   :  { %1899 = vst [vmem:[%s3405_s5 + $0x1b0] sm:$0x3] %v2187_v29  ;;  %v1905_v30 = vadd.f32 %v1903_v28, %v1901_v27 }
 0x269   :  { %v1906_v31 = vsub.f32 %v1905_v30, %v2187_v29 }
 0x26b   :  { %vm1907_vm7 = vcmp.gt.f32.partialorder %v1906_v31, 1.0  ;;  %v1915_v32 = vrot.slane %v1906_v31, 6  ;;  %v1918_v33 = vmul.f32 0.5, %v1906_v31 }
 0x26c   :  { %v2188_v36 = vsel %vm1907_vm7, 1.0, %v2283_v8 }
 0x26d   :  { %v1911_v37 = vrot.slane %v2188_v36, 6  ;;  %1917 = vst [vmem:[%s3405_s5 + $0x1b8] sm:$0xc] %v1915_v32  ;;  %v1921_v38 = vadd.f32 %v1919_v35, %v1918_v33 }
 0x26f   :  { %1913 = vst [vmem:[%s3405_s5 + $0x1b0] sm:$0xc] %v1911_v37  ;;  %v1922_v39 = vsub.f32 %v1921_v38, %v2188_v36 }
 0x271   :  { %vm1923_vm8 = vcmp.gt.f32.partialorder %v1922_v39, 1.0  ;;  %v1931_v40 = vrot.slane %v1922_v39, 4  ;;  %v1934_v34 = vmul.f32 0.5, %v1922_v39 }
 0x272   :  { %v2189_v42 = vsel %vm1923_vm8, 1.0, %v2283_v8 }
 0x273   :  { %v1927_v43 = vrot.slane %v2189_v42, 4  ;;  %1933 = vst [vmem:[%s3405_s5 + $0x1b8] sm:$0x30] %v1931_v40  ;;  %v1937_v45 = vadd.f32 %v1935_v41, %v1934_v34 }
 0x275   :  { %1929 = vst [vmem:[%s3405_s5 + $0x1b0] sm:$0x30] %v1927_v43  ;;  %v1938_v46 = vsub.f32 %v1937_v45, %v2189_v42 }
 0x276   :  { %v1142_v47 = vpop.f32.mrf.mxu3 }
 0x277   :  { %v1947_v48 = vrot.slane %v1938_v46, 2  ;;  %v1143_v49 = vadd.f32 %v3055_v44, %v1142_v47  ;;  %vm1939_vm9 = vcmp.gt.f32.partialorder %v1938_v46, 1.0  ;;  %v1950_v21 = vmul.f32 0.5, %v1938_v46 }
 0x278   :  { %v2190_v57 = vsel %vm1939_vm9, 1.0, %v2283_v8 }
 0x279   :  { %1949 = vst [vmem:[%s3405_s5 + $0x1b8] sm:$0xc0] %v1947_v48  ;;  %v1943_v50 = vrot.slane %v2190_v57, 2  ;;  %v1951_v54 = vadd.f32 %v1950_v21, %v1143_v49  ;;  %v1960_v52 = vrot.slane %v1143_v49, 2  ;;  %v1976_v60 = vrot.slane %v1143_v49, 4 }
 0x27a   :  { %v1992_v5 = vrot.slane %v1143_v49, 6 }
 0x27b   :  { %1945 = vst [vmem:[%s3405_s5 + $0x1b0] sm:$0xc0] %v1943_v50  ;;  %v1952_v51 = vsub.f32 %v1951_v54, %v2190_v57 }
 0x27d   :  { %vm1953_vm10 = vcmp.gt.f32.partialorder %v1952_v51, 1.0  ;;  %1957 = vst [vmem:[%s3405_s5 + $0x1d8] sm:$0x3] %v1952_v51  ;;  %v1958_v0 = vmul.f32 0.5, %v1952_v51 }
 0x27e   :  { %v2191_v53 = vsel %vm1953_vm10, 1.0, %v2283_v8 }
 0x27f   :  { %1956 = vst [vmem:[%s3405_s5 + $0x1d0] sm:$0x3] %v2191_v53  ;;  %v1962_v58 = vadd.f32 %v1960_v52, %v1958_v0 }
 0x281   :  { %v1963_v55 = vsub.f32 %v1962_v58, %v2191_v53 }
 0x283   :  { %vm1964_vm11 = vcmp.gt.f32.partialorder %v1963_v55, 1.0  ;;  %v1972_v56 = vrot.slane %v1963_v55, 6  ;;  %v1975_v59 = vmul.f32 0.5, %v1963_v55 }
 0x284   :  { %v2192_v61 = vsel %vm1964_vm11, 1.0, %v2283_v8 }
 0x285   :  { %v1968_v62 = vrot.slane %v2192_v61, 6  ;;  %1974 = vst [vmem:[%s3405_s5 + $0x1d8] sm:$0xc] %v1972_v56  ;;  %v1978_v63 = vadd.f32 %v1976_v60, %v1975_v59 }
 0x287   :  { %1970 = vst [vmem:[%s3405_s5 + $0x1d0] sm:$0xc] %v1968_v62  ;;  %v1979_v1 = vsub.f32 %v1978_v63, %v2192_v61 }
 0x289   :  { %vm1980_vm12 = vcmp.gt.f32.partialorder %v1979_v1, 1.0  ;;  %v1988_v2 = vrot.slane %v1979_v1, 4  ;;  %v1991_v3 = vmul.f32 0.5, %v1979_v1 }
 0x28a   :  { %v2193_v6 = vsel %vm1980_vm12, 1.0, %v2283_v8 }
 0x28b   :  { %v1984_v24 = vrot.slane %v2193_v6, 4  ;;  %1990 = vst [vmem:[%s3405_s5 + $0x1d8] sm:$0x30] %v1988_v2  ;;  %v1994_v7 = vadd.f32 %v1992_v5, %v1991_v3 }
 0x28d   :  { %1986 = vst [vmem:[%s3405_s5 + $0x1d0] sm:$0x30] %v1984_v24  ;;  %v1995_v9 = vsub.f32 %v1994_v7, %v2193_v6  ;;  %v1145_v10 = vpop.f32.mrf.mxu3 }
 0x28e   :  { %v1146_v11 = vadd.f32 %v3055_v44, %v1145_v10 }
 0x28f   :  { %v2004_v12 = vrot.slane %v1995_v9, 2  ;;  %vm1996_vm13 = vcmp.gt.f32.partialorder %v1995_v9, 1.0  ;;  %v2007_v13 = vmul.f32 0.5, %v1995_v9 }
 0x290   :  { %v2194_v26 = vsel %vm1996_vm13, 1.0, %v2283_v8  ;;  %v2017_v17 = vrot.slane %v1146_v11, 2  ;;  %v2033_v23 = vrot.slane %v1146_v11, 4  ;;  %v2049_v32 = vrot.slane %v1146_v11, 6 }
 0x291   :  { %2006 = vst [vmem:[%s3405_s5 + $0x1d8] sm:$0xc0] %v2004_v12  ;;  %v2000_v14 = vrot.slane %v2194_v26, 2  ;;  %v2008_v15 = vadd.f32 %v2007_v13, %v1146_v11 }
 0x293   :  { %2002 = vst [vmem:[%s3405_s5 + $0x1d0] sm:$0xc0] %v2000_v14  ;;  %v2009_v16 = vsub.f32 %v2008_v15, %v2194_v26 }
 0x295   :  { %vm2010_vm14 = vcmp.gt.f32.partialorder %v2009_v16, 1.0  ;;  %2014 = vst [vmem:[%s3405_s5 + $0x1f8] sm:$0x3] %v2009_v16  ;;  %v2015_v44 = vmul.f32 0.5, %v2009_v16 }
 0x296   :  { %v2195_v18 = vsel %vm2010_vm14, 1.0, %v2283_v8 }
 0x297   :  { %2013 = vst [vmem:[%s3405_s5 + $0x1f0] sm:$0x3] %v2195_v18  ;;  %v2019_v19 = vadd.f32 %v2017_v17, %v2015_v44 }
 0x299   :  { %v2020_v4 = vsub.f32 %v2019_v19, %v2195_v18 }
 0x29b   :  { %vm2021_vm15 = vcmp.gt.f32.partialorder %v2020_v4, 1.0  ;;  %v2029_v20 = vrot.slane %v2020_v4, 6  ;;  %v2032_v22 = vmul.f32 0.5, %v2020_v4 }
 0x29c   :  { %v2196_v25 = vsel %vm2021_vm15, 1.0, %v2283_v8 }
 0x29d   :  { %v2025_v27 = vrot.slane %v2196_v25, 6  ;;  %2031 = vst [vmem:[%s3405_s5 + $0x1f8] sm:$0xc] %v2029_v20  ;;  %v2035_v28 = vadd.f32 %v2033_v23, %v2032_v22 }
 0x29f   :  { %2027 = vst [vmem:[%s3405_s5 + $0x1f0] sm:$0xc] %v2025_v27  ;;  %v2036_v29 = vsub.f32 %v2035_v28, %v2196_v25 }
 0x2a1   :  { %vm2037_vm0 = vcmp.gt.f32.partialorder %v2036_v29, 1.0  ;;  %v2045_v30 = vrot.slane %v2036_v29, 4  ;;  %v2048_v31 = vmul.f32 0.5, %v2036_v29 }
 0x2a2   :  { %v2197_v33 = vsel %vm2037_vm0, 1.0, %v2283_v8 }
 0x2a3   :  { %v2041_v35 = vrot.slane %v2197_v33, 4  ;;  %2047 = vst [vmem:[%s3405_s5 + $0x1f8] sm:$0x30] %v2045_v30  ;;  %v2051_v36 = vadd.f32 %v2049_v32, %v2048_v31 }
 0x2a5   :  { %2043 = vst [vmem:[%s3405_s5 + $0x1f0] sm:$0x30] %v2041_v35  ;;  %v2052_v37 = vsub.f32 %v2051_v36, %v2197_v33 }
 0x2a7   :  { %vm2053_vm1 = vcmp.gt.f32.partialorder %v2052_v37, 1.0  ;;  %v2061_v38 = vrot.slane %v2052_v37, 2  ;;  %2064 = vst [vmem:[#allocation3] sm:$0x3] %v2052_v37 }
 0x2a8   :  { %v2198_v39 = vsel %vm2053_vm1, 1.0, %v2283_v8 }
 0x2a9   :  { %v2057_v40 = vrot.slane %v2198_v39, 2  ;;  %2063 = vst [vmem:[%s3405_s5 + $0x1f8] sm:$0xc0] %v2061_v38 }
 0x2ab   :  { %2059 = vst [vmem:[%s3405_s5 + $0x1f0] sm:$0xc0] %v2057_v40 }

</bundles_post_ra>
